<compile_context>
chip_gen: v7x
topology: tpu7x:2x2x1
jax: 0.10.0
libtpu: 0.0.40
codegen_flags: <defaults>
</compile_context>

<pallas_src>
import functools

import jax
import jax.numpy as jnp
from jax.experimental import pallas as pl
from jax.experimental.pallas import tpu as pltpu

LRELU_SLOPE = 0.2
BN_EPS = 1e-5
LANE = 128
# Scoped-VMEM budget valid on v5e / v6e (128 MiB phys) and v7x (64 MiB phys).
VMEM_LIMIT_BYTES = 32 * 1024 * 1024
# Soft budget used when choosing the row tile (leaves headroom for the
# compiler / double buffering on v7x).
VMEM_SOFT_BUDGET_BYTES = 20 * 1024 * 1024
# Target number of matmul rows (TR * W) per grid step.
DEFAULT_TARGET_ROWS = 2048


def _round_up(x, m):
    return (x + m - 1) // m * m


def _pick_row_tile(h, w_img, cin_p, cout_p, target_rows=DEFAULT_TARGET_ROWS):
    """Largest divisor of H whose row tile fits the VMEM soft budget.

    Worst case is TR = 1 (bounded footprint); never the whole problem."""
    best = 1
    for tr in range(1, h + 1):
        if h % tr:
            continue
        rows = tr * w_img
        # double-buffered IO tiles + resident weights
        io = (2 * rows * (cin_p * 2 + cout_p * 2)
              + 2 * 9 * cin_p * cout_p * 2)
        # in-kernel temporaries: f32 haloed input + bf16 copy + f32 accumulator
        tmp = (tr + 2) * (w_img + 2) * cin_p * 6 + rows * cout_p * 4
        if rows <= target_rows and io + tmp <= VMEM_SOFT_BUDGET_BYTES:
            best = tr
    return best


# ----------------------------------------------------------------------------
# Kernel: direct 3x3 conv (+ fused input affine / LeakyReLU, optional partial
# BN stats, optional sigmoid epilogue)
# ----------------------------------------------------------------------------
def _conv3x3_kernel(prev_ref, main_ref, next_ref, w_ref, b_ref, scale_ref,
                    shift_ref, y_ref, *stats_refs, tr, h_img, w_img,
                    input_lrelu, sigmoid, with_stats):
    """One (batch image, row tile) grid cell.

    prev_ref : (1, 1,  W, Cp)  bf16  row above the tile (index-clamped)
    main_ref : (1, TR, W, Cp)  bf16  the TR rows of this tile
    next_ref : (1, 1,  W, Cp)  bf16  row below the tile (index-clamped)
    w_ref    : (9, Cp, CoutP)  bf16  weights, tap index = dh*3 + dw
    b_ref    : (1, CoutP)      f32   bias
    scale_ref/shift_ref : (1, Cp) f32  previous layer's BN affine (fused here)
    y_ref    : (1, TR, W, CoutP)      raw conv output (bf16 or f32)
    stats    : (1, 1, 2, CoutP) f32   per-tile partial [sum, sum-of-squares]
    """
    t = pl.program_id(1)
    cin_p = main_ref.shape[-1]
    cout_p = y_ref.shape[-1]

    # ---- assemble the (TR+2, W, Cp) haloed input rows -----------------------
    rows = jnp.concatenate([prev_ref[0], main_ref[0], next_ref[0]], axis=0)
    a = rows.astype(jnp.float32)

    # Fused input transform: previous layer's BatchNorm affine and this
    # ConvBlock's LeakyReLU, applied once per element (pre-taps).
    a = (a * scale_ref[...].reshape(1, 1, cin_p)
         + shift_ref[...].reshape(1, 1, cin_p))
    if input_lrelu:
        a = jnp.where(a >= 0.0, a, LRELU_SLOPE * a)

    # Re-create the conv's zero padding: rows falling outside [0, H) are
    # zeroed (the halo rows were index-clamped, so their contents are ignored
    # here), and a zero column is concatenated on each side.
    rr = t * tr - 1 + jax.lax.broadcasted_iota(jnp.int32, (tr + 2, 1, 1), 0)
    a = jnp.where((rr >= 0) & (rr < h_img), a, 0.0)
    zcol = jnp.zeros((tr + 2, 1, cin_p), jnp.float32)
    a = jnp.concatenate([zcol, a, zcol], axis=1).astype(jnp.bfloat16)

    # ---- direct conv: 9 shifted MXU matmuls into an f32 accumulator ---------
    acc = jnp.zeros((tr * w_img, cout_p), jnp.float32)
    for dh in range(3):
        for dw in range(3):
            slab = a[dh:dh + tr, dw:dw + w_img, :].reshape(tr * w_img, cin_p)
            acc = acc + jnp.dot(slab, w_ref[dh * 3 + dw],
                                preferred_element_type=jnp.float32)
    y = acc + b_ref[...]

    if with_stats:
        # Per-tile partial BN statistics from the f32 values (reduced outside;
        # no cross-tile accumulation -> safe with "parallel" semantics).
        s1 = jnp.sum(y, axis=0, keepdims=True)
        s2 = jnp.sum(y * y, axis=0, keepdims=True)
        stats_refs[0][0, 0] = jnp.concatenate([s1, s2], axis=0)

    if sigmoid:
        # TODO(synk): could route the divide through pl.reciprocal(approx=True)
        # (EUP slot); exact divide kept so the output stays strictly in [0, 1].
        y = 1.0 / (1.0 + jnp.exp(-y))

    y_ref[...] = y.reshape(1, tr, w_img, cout_p).astype(y_ref.dtype)


# ----------------------------------------------------------------------------
# pallas_call wrapper for one conv layer
# ----------------------------------------------------------------------------
def _conv3x3_layer(act, w9, b, scale, shift, *, tr, input_lrelu, sigmoid,
                   with_stats, out_dtype):
    n, h, w_img, cin_p = act.shape
    cout_p = w9.shape[-1]
    nt = h // tr
    m = n * h * w_img

    def prev_map(ni, ti):
        return (ni, jnp.maximum(ti * tr - 1, 0), 0, 0)

    def main_map(ni, ti):
        return (ni, ti, 0, 0)

    def next_map(ni, ti):
        return (ni, jnp.minimum((ti + 1) * tr, h - 1), 0, 0)

    in_specs = [
        pl.BlockSpec((1, 1, w_img, cin_p), prev_map),
        pl.BlockSpec((1, tr, w_img, cin_p), main_map),
        pl.BlockSpec((1, 1, w_img, cin_p), next_map),
        pl.BlockSpec((9, cin_p, cout_p), lambda ni, ti: (0, 0, 0)),
        pl.BlockSpec((1, cout_p), lambda ni, ti: (0, 0)),
        pl.BlockSpec((1, cin_p), lambda ni, ti: (0, 0)),
        pl.BlockSpec((1, cin_p), lambda ni, ti: (0, 0)),
    ]
    y_spec = pl.BlockSpec((1, tr, w_img, cout_p), lambda ni, ti: (ni, ti, 0, 0))

    out_itemsize = jnp.dtype(out_dtype).itemsize
    cost = pl.CostEstimate(
        flops=2 * m * 9 * cin_p * cout_p,
        transcendentals=(m * cout_p if sigmoid else 0),
        bytes_accessed=(act.size * act.dtype.itemsize
                        + 2 * n * nt * w_img * cin_p * act.dtype.itemsize
                        + w9.size * w9.dtype.itemsize
                        + (b.size + scale.size + shift.size) * 4
                        + m * cout_p * out_itemsize
                        + (n * nt * 2 * cout_p * 4 if with_stats else 0)))

    kernel = functools.partial(
        _conv3x3_kernel, tr=tr, h_img=h, w_img=w_img,
        input_lrelu=input_lrelu, sigmoid=sigmoid, with_stats=with_stats)

    if with_stats:
        out_shape = (jax.ShapeDtypeStruct((n, h, w_img, cout_p), out_dtype),
                     jax.ShapeDtypeStruct((n, nt, 2, cout_p), jnp.float32))
        out_specs = (y_spec,
                     pl.BlockSpec((1, 1, 2, cout_p),
                                  lambda ni, ti: (ni, ti, 0, 0)))
    else:
        out_shape = jax.ShapeDtypeStruct((n, h, w_img, cout_p), out_dtype)
        out_specs = y_spec

    return pl.pallas_call(
        kernel,
        grid=(n, nt),
        in_specs=in_specs,
        out_specs=out_specs,
        out_shape=out_shape,
        compiler_params=pltpu.CompilerParams(
            dimension_semantics=("parallel", "parallel"),
            vmem_limit_bytes=VMEM_LIMIT_BYTES),
        cost_estimate=cost,
    )(act, act, act, w9, b, scale, shift)


# ----------------------------------------------------------------------------
# Parameters (deterministic synthetic, normal_weight_init: N(0, 0.02))
# ----------------------------------------------------------------------------
def init_params(key, input_dim, num_filter, output_dim):
    chans = ([(input_dim, num_filter),
              (num_filter, num_filter * 2),
              (num_filter * 2, num_filter * 4),
              (num_filter * 4, num_filter * 8)]
             + [(num_filter * 8, num_filter * 8)] * 5
             + [(num_filter * 8, output_dim)])
    bn_flags = [False] + [True] * 8 + [False]
    act_flags = [False] + [True] * 9
    params = []
    for (cin, cout), has_bn, has_act in zip(chans, bn_flags, act_flags):
        key, kw, kb = jax.random.split(key, 3)
        # HWIO weight; tap order (dh, dw) matches the kernel's dh*3 + dw.
        w = jax.random.normal(kw, (3, 3, cin, cout), jnp.float32) * 0.02
        b = jax.random.normal(kb, (cout,), jnp.float32) * 0.02
        cin_p, cout_p = _round_up(cin, LANE), _round_up(cout, LANE)
        w_pad = (jnp.zeros((9, cin_p, cout_p), jnp.float32)
                 .at[:, :cin, :cout].set(w.reshape(9, cin, cout))
                 .astype(jnp.bfloat16))
        b_pad = jnp.zeros((1, cout_p), jnp.float32).at[0, :cout].set(b)
        # torch BatchNorm2d defaults: gamma=1, beta=0 (padded lanes -> 0).
        gamma = jnp.zeros((1, cout_p), jnp.float32).at[0, :cout].set(1.0)
        beta = jnp.zeros((1, cout_p), jnp.float32)
        params.append(dict(w=w_pad, b=b_pad, gamma=gamma, beta=beta,
                           cout=cout, bn=has_bn, act=has_act))
    return params


# ----------------------------------------------------------------------------
# Full forward pass (matches torch Discriminator.forward semantics, train-mode
# BatchNorm: batch statistics, biased variance, eps=1e-5)
# ----------------------------------------------------------------------------
def discriminator_forward(x_nchw, label_nchw, params, *,
                          target_rows=DEFAULT_TARGET_ROWS):
    x = jnp.concatenate([x_nchw, label_nchw], axis=1)       # torch.cat dim=1
    act = jnp.transpose(x, (0, 2, 3, 1))                    # NCHW -> NHWC
    n, h, w_img, c = act.shape
    cin_p0 = params[0]["w"].shape[1]
    act = jnp.pad(act, ((0, 0), (0, 0), (0, 0), (0, cin_p0 - c)))
    act = act.astype(jnp.bfloat16)
    m = n * h * w_img
    n_layers = len(params)

    # Input-side affine of the *current* layer = BN of the previous layer
    # (identity for layer 1 / after non-BN layers), fused into the conv kernel.
    scale = jnp.ones((1, cin_p0), jnp.float32)
    shift = jnp.zeros((1, cin_p0), jnp.float32)

    for li, p in enumerate(params):
        cin_p, cout_p = p["w"].shape[1], p["w"].shape[2]
        tr = _pick_row_tile(h, w_img, cin_p, cout_p, target_rows)
        last = li == n_layers - 1

        if p["bn"]:
            # conv2..conv9: conv + bias, bf16 output, per-tile partial stats.
            y, stats = _conv3x3_layer(
                act, p["w"], p["b"], scale, shift, tr=tr,
                input_lrelu=p["act"], sigmoid=False, with_stats=True,
                out_dtype=jnp.bfloat16)
            tot = jnp.sum(stats, axis=(0, 1))                   # (2, CoutP)
            mean = tot[0] / m
            var = jnp.maximum(tot[1] / m - mean * mean, 0.0)    # biased var
            s = p["gamma"][0] * jax.lax.rsqrt(var + BN_EPS)
            scale = s[None, :]
            shift = (p["beta"][0] - mean * s)[None, :]
            act = y                                             # raw conv out
        else:
            # conv1 (no act/BN) and conv10 (fused final Sigmoid, no BN).
            y = _conv3x3_layer(
                act, p["w"], p["b"], scale, shift, tr=tr,
                input_lrelu=p["act"], sigmoid=last, with_stats=False,
                out_dtype=jnp.float32 if last else jnp.bfloat16)
            if last:
                out = y[..., :p["cout"]]                        # drop pad lanes
                return jnp.transpose(out, (0, 3, 1, 2))         # NHWC -> NCHW
            act = y
            scale = jnp.ones((1, cout_p), jnp.float32)
            shift = jnp.zeros((1, cout_p), jnp.float32)


if __name__ == "__main__":
    key = jax.random.PRNGKey(0)
    kx, kl, kp = jax.random.split(key, 3)

    # small shapes: batch=2, x has 2 channels, label has 2 channels -> input_dim=4
    N, Cx, Cl, H, W = 2, 2, 2, 16, 16
    input_dim, num_filter, output_dim = Cx + Cl, 8, 1

    x = jax.random.normal(kx, (N, Cx, H, W), jnp.float32)
    label = jax.random.normal(kl, (N, Cl, H, W), jnp.float32)
    params = init_params(kp, input_dim, num_filter, output_dim)

    fwd = jax.jit(lambda a, b: discriminator_forward(a, b, params))
    out = fwd(x, label)
    jax.block_until_ready(out)

    assert out.shape == (N, output_dim, H, W), out.shape
    assert bool(jnp.all((out >= 0.0) & (out <= 1.0)))           # sigmoid range
    assert bool(jnp.all(jnp.isfinite(out)))
    print("KERNEL_OK")
</pallas_src>

<mosaic_0001>
module attributes {stable_mosaic.version = 11 : i64} {
  func.func @_conv3x3_kernel(%arg0: i32, %arg1: i32, %arg2: memref<1x1x16x128xbf16, #tpu.memory_space<vmem>>, %arg3: memref<1x16x16x128xbf16, #tpu.memory_space<vmem>>, %arg4: memref<1x1x16x128xbf16, #tpu.memory_space<vmem>>, %arg5: memref<9x128x128xbf16, #tpu.memory_space<vmem>>, %arg6: memref<1x128xf32, #tpu.memory_space<vmem>>, %arg7: memref<1x128xf32, #tpu.memory_space<vmem>>, %arg8: memref<1x128xf32, #tpu.memory_space<vmem>>, %arg9: memref<1x16x16x128xbf16, #tpu.memory_space<vmem>>) attributes {dimension_semantics = [#tpu.dimension_semantics<parallel>, #tpu.dimension_semantics<parallel>], iteration_bounds = array<i64: 2, 1>, scalar_prefetch = 0 : i64, scratch_operands = 0 : i64, tpu.core_type = #tpu.core_type<tc>, window_params = [{transform_indices = @transform_0, window_bounds = array<i64: 1, 1, 16, 128>}, {transform_indices = @transform_1, window_bounds = array<i64: 1, 16, 16, 128>}, {transform_indices = @transform_2, window_bounds = array<i64: 1, 1, 16, 128>}, {pipeline_mode = #tpu.pipeline_mode<synchronous>, transform_indices = @transform_3, window_bounds = array<i64: 9, 128, 128>}, {pipeline_mode = #tpu.pipeline_mode<synchronous>, transform_indices = @transform_4, window_bounds = array<i64: 1, 128>}, {pipeline_mode = #tpu.pipeline_mode<synchronous>, transform_indices = @transform_5, window_bounds = array<i64: 1, 128>}, {pipeline_mode = #tpu.pipeline_mode<synchronous>, transform_indices = @transform_6, window_bounds = array<i64: 1, 128>}, {transform_indices = @transform_7, window_bounds = array<i64: 1, 16, 16, 128>}]} {
    %c0 = arith.constant 0 : index
    %c0_0 = arith.constant 0 : index
    %c0_1 = arith.constant 0 : index
    %c0_2 = arith.constant 0 : index
    %0 = vector.load %arg2[%c0, %c0_0, %c0_1, %c0_2] : memref<1x1x16x128xbf16, #tpu.memory_space<vmem>>, vector<1x1x16x128xbf16>
    %1 = vector.shape_cast %0 : vector<1x1x16x128xbf16> to vector<1x16x128xbf16>
    %c0_3 = arith.constant 0 : index
    %c0_4 = arith.constant 0 : index
    %c0_5 = arith.constant 0 : index
    %c0_6 = arith.constant 0 : index
    %2 = vector.load %arg3[%c0_3, %c0_4, %c0_5, %c0_6] : memref<1x16x16x128xbf16, #tpu.memory_space<vmem>>, vector<1x16x16x128xbf16>
    %3 = vector.shape_cast %2 : vector<1x16x16x128xbf16> to vector<16x16x128xbf16>
    %c0_7 = arith.constant 0 : index
    %c0_8 = arith.constant 0 : index
    %c0_9 = arith.constant 0 : index
    %c0_10 = arith.constant 0 : index
    %4 = vector.load %arg4[%c0_7, %c0_8, %c0_9, %c0_10] : memref<1x1x16x128xbf16, #tpu.memory_space<vmem>>, vector<1x1x16x128xbf16>
    %5 = vector.shape_cast %4 : vector<1x1x16x128xbf16> to vector<1x16x128xbf16>
    %6 = tpu.concatenate %1, %3, %5 in 0 : vector<1x16x128xbf16>, vector<16x16x128xbf16>, vector<1x16x128xbf16> -> vector<18x16x128xbf16>
    %7 = arith.extf %6 : vector<18x16x128xbf16> to vector<18x16x128xf32>
    %c0_11 = arith.constant 0 : index
    %c0_12 = arith.constant 0 : index
    %8 = vector.load %arg7[%c0_11, %c0_12] : memref<1x128xf32, #tpu.memory_space<vmem>>, vector<1x128xf32>
    %9 = vector.shape_cast %8 : vector<1x128xf32> to vector<1x1x128xf32>
    %10 = vector.broadcast %9 : vector<1x1x128xf32> to vector<18x16x128xf32>
    %11 = arith.mulf %7, %10 : vector<18x16x128xf32>
    %c0_13 = arith.constant 0 : index
    %c0_14 = arith.constant 0 : index
    %12 = vector.load %arg8[%c0_13, %c0_14] : memref<1x128xf32, #tpu.memory_space<vmem>>, vector<1x128xf32>
    %13 = vector.shape_cast %12 : vector<1x128xf32> to vector<1x1x128xf32>
    %14 = vector.broadcast %13 : vector<1x1x128xf32> to vector<18x16x128xf32>
    %15 = arith.addf %11, %14 : vector<18x16x128xf32>
    %c16_i32 = arith.constant 16 : i32
    %16 = arith.muli %arg1, %c16_i32 : i32
    %c1_i32 = arith.constant 1 : i32
    %17 = arith.subi %16, %c1_i32 : i32
    %18 = tpu.iota {dimensions = array<i32: 0>} : vector<18x1x1xi32>
    %19 = vector.broadcast %17 : i32 to vector<18x1x1xi32>
    %20 = arith.addi %19, %18 : vector<18x1x1xi32>
    %c0_i32 = arith.constant 0 : i32
    %21 = vector.broadcast %c0_i32 : i32 to vector<18x1x1xi32>
    %22 = arith.cmpi sge, %20, %21 : vector<18x1x1xi32>
    %c16_i32_15 = arith.constant 16 : i32
    %23 = vector.broadcast %c16_i32_15 : i32 to vector<18x1x1xi32>
    %24 = arith.cmpi slt, %20, %23 : vector<18x1x1xi32>
    %25 = arith.andi %22, %24 : vector<18x1x1xi1>
    %cst = arith.constant 0.000000e+00 : f32
    %26 = vector.shape_cast %25 : vector<18x1x1xi1> to vector<18x1x1xi1>
    %27 = vector.broadcast %26 : vector<18x1x1xi1> to vector<18x16x128xi1>
    %28 = vector.broadcast %cst : f32 to vector<18x16x128xf32>
    %29 = arith.select %27, %15, %28 : vector<18x16x128xi1>, vector<18x16x128xf32>
    %cst_16 = arith.constant 0.000000e+00 : f32
    %30 = vector.broadcast %cst_16 : f32 to vector<18x1x128xf32>
    %31 = tpu.concatenate %30, %29, %30 in 1 : vector<18x1x128xf32>, vector<18x16x128xf32>, vector<18x1x128xf32> -> vector<18x18x128xf32>
    %32 = arith.truncf %31 : vector<18x18x128xf32> to vector<18x18x128xbf16>
    %cst_17 = arith.constant 0.000000e+00 : f32
    %33 = vector.broadcast %cst_17 : f32 to vector<256x128xf32>
    %34 = vector.extract_strided_slice %32 {offsets = [0, 0, 0], sizes = [16, 16, 128], strides = [1, 1, 1]} : vector<18x18x128xbf16> to vector<16x16x128xbf16>
    %35 = vector.shape_cast %34 : vector<16x16x128xbf16> to vector<256x128xbf16>
    %c0_18 = arith.constant 0 : index
    %c0_19 = arith.constant 0 : index
    %c0_20 = arith.constant 0 : index
    %36 = vector.load %arg5[%c0_18, %c0_19, %c0_20] : memref<9x128x128xbf16, #tpu.memory_space<vmem>>, vector<1x128x128xbf16>
    %37 = vector.shape_cast %36 : vector<1x128x128xbf16> to vector<128x128xbf16>
    %cst_21 = arith.constant dense<0.000000e+00> : vector<256x128xf32>
    %38 = tpu.matmul %35, %37, %cst_21 {dimension_numbers = #tpu.dot_dimension_numbers<[1], [0], [0], [1], [0, 0, 1, 1], [], []>} : vector<256x128xbf16>, vector<128x128xbf16>, vector<256x128xf32> -> vector<256x128xf32>
    %39 = arith.addf %33, %38 : vector<256x128xf32>
    %40 = vector.extract_strided_slice %32 {offsets = [0, 1, 0], sizes = [16, 16, 128], strides = [1, 1, 1]} : vector<18x18x128xbf16> to vector<16x16x128xbf16>
    %41 = vector.shape_cast %40 : vector<16x16x128xbf16> to vector<256x128xbf16>
    %c1 = arith.constant 1 : index
    %c0_22 = arith.constant 0 : index
    %c0_23 = arith.constant 0 : index
    %42 = vector.load %arg5[%c1, %c0_22, %c0_23] : memref<9x128x128xbf16, #tpu.memory_space<vmem>>, vector<1x128x128xbf16>
    %43 = vector.shape_cast %42 : vector<1x128x128xbf16> to vector<128x128xbf16>
    %cst_24 = arith.constant dense<0.000000e+00> : vector<256x128xf32>
    %44 = tpu.matmul %41, %43, %cst_24 {dimension_numbers = #tpu.dot_dimension_numbers<[1], [0], [0], [1], [0, 0, 1, 1], [], []>} : vector<256x128xbf16>, vector<128x128xbf16>, vector<256x128xf32> -> vector<256x128xf32>
    %45 = arith.addf %39, %44 : vector<256x128xf32>
    %46 = vector.extract_strided_slice %32 {offsets = [0, 2, 0], sizes = [16, 16, 128], strides = [1, 1, 1]} : vector<18x18x128xbf16> to vector<16x16x128xbf16>
    %47 = vector.shape_cast %46 : vector<16x16x128xbf16> to vector<256x128xbf16>
    %c2 = arith.constant 2 : index
    %c0_25 = arith.constant 0 : index
    %c0_26 = arith.constant 0 : index
    %48 = vector.load %arg5[%c2, %c0_25, %c0_26] : memref<9x128x128xbf16, #tpu.memory_space<vmem>>, vector<1x128x128xbf16>
    %49 = vector.shape_cast %48 : vector<1x128x128xbf16> to vector<128x128xbf16>
    %cst_27 = arith.constant dense<0.000000e+00> : vector<256x128xf32>
    %50 = tpu.matmul %47, %49, %cst_27 {dimension_numbers = #tpu.dot_dimension_numbers<[1], [0], [0], [1], [0, 0, 1, 1], [], []>} : vector<256x128xbf16>, vector<128x128xbf16>, vector<256x128xf32> -> vector<256x128xf32>
    %51 = arith.addf %45, %50 : vector<256x128xf32>
    %52 = vector.extract_strided_slice %32 {offsets = [1, 0, 0], sizes = [16, 16, 128], strides = [1, 1, 1]} : vector<18x18x128xbf16> to vector<16x16x128xbf16>
    %53 = vector.shape_cast %52 : vector<16x16x128xbf16> to vector<256x128xbf16>
    %c3 = arith.constant 3 : index
    %c0_28 = arith.constant 0 : index
    %c0_29 = arith.constant 0 : index
    %54 = vector.load %arg5[%c3, %c0_28, %c0_29] : memref<9x128x128xbf16, #tpu.memory_space<vmem>>, vector<1x128x128xbf16>
    %55 = vector.shape_cast %54 : vector<1x128x128xbf16> to vector<128x128xbf16>
    %cst_30 = arith.constant dense<0.000000e+00> : vector<256x128xf32>
    %56 = tpu.matmul %53, %55, %cst_30 {dimension_numbers = #tpu.dot_dimension_numbers<[1], [0], [0], [1], [0, 0, 1, 1], [], []>} : vector<256x128xbf16>, vector<128x128xbf16>, vector<256x128xf32> -> vector<256x128xf32>
    %57 = arith.addf %51, %56 : vector<256x128xf32>
    %58 = vector.extract_strided_slice %32 {offsets = [1, 1, 0], sizes = [16, 16, 128], strides = [1, 1, 1]} : vector<18x18x128xbf16> to vector<16x16x128xbf16>
    %59 = vector.shape_cast %58 : vector<16x16x128xbf16> to vector<256x128xbf16>
    %c4 = arith.constant 4 : index
    %c0_31 = arith.constant 0 : index
    %c0_32 = arith.constant 0 : index
    %60 = vector.load %arg5[%c4, %c0_31, %c0_32] : memref<9x128x128xbf16, #tpu.memory_space<vmem>>, vector<1x128x128xbf16>
    %61 = vector.shape_cast %60 : vector<1x128x128xbf16> to vector<128x128xbf16>
    %cst_33 = arith.constant dense<0.000000e+00> : vector<256x128xf32>
    %62 = tpu.matmul %59, %61, %cst_33 {dimension_numbers = #tpu.dot_dimension_numbers<[1], [0], [0], [1], [0, 0, 1, 1], [], []>} : vector<256x128xbf16>, vector<128x128xbf16>, vector<256x128xf32> -> vector<256x128xf32>
    %63 = arith.addf %57, %62 : vector<256x128xf32>
    %64 = vector.extract_strided_slice %32 {offsets = [1, 2, 0], sizes = [16, 16, 128], strides = [1, 1, 1]} : vector<18x18x128xbf16> to vector<16x16x128xbf16>
    %65 = vector.shape_cast %64 : vector<16x16x128xbf16> to vector<256x128xbf16>
    %c5 = arith.constant 5 : index
    %c0_34 = arith.constant 0 : index
    %c0_35 = arith.constant 0 : index
    %66 = vector.load %arg5[%c5, %c0_34, %c0_35] : memref<9x128x128xbf16, #tpu.memory_space<vmem>>, vector<1x128x128xbf16>
    %67 = vector.shape_cast %66 : vector<1x128x128xbf16> to vector<128x128xbf16>
    %cst_36 = arith.constant dense<0.000000e+00> : vector<256x128xf32>
    %68 = tpu.matmul %65, %67, %cst_36 {dimension_numbers = #tpu.dot_dimension_numbers<[1], [0], [0], [1], [0, 0, 1, 1], [], []>} : vector<256x128xbf16>, vector<128x128xbf16>, vector<256x128xf32> -> vector<256x128xf32>
    %69 = arith.addf %63, %68 : vector<256x128xf32>
    %70 = vector.extract_strided_slice %32 {offsets = [2, 0, 0], sizes = [16, 16, 128], strides = [1, 1, 1]} : vector<18x18x128xbf16> to vector<16x16x128xbf16>
    %71 = vector.shape_cast %70 : vector<16x16x128xbf16> to vector<256x128xbf16>
    %c6 = arith.constant 6 : index
    %c0_37 = arith.constant 0 : index
    %c0_38 = arith.constant 0 : index
    %72 = vector.load %arg5[%c6, %c0_37, %c0_38] : memref<9x128x128xbf16, #tpu.memory_space<vmem>>, vector<1x128x128xbf16>
    %73 = vector.shape_cast %72 : vector<1x128x128xbf16> to vector<128x128xbf16>
    %cst_39 = arith.constant dense<0.000000e+00> : vector<256x128xf32>
    %74 = tpu.matmul %71, %73, %cst_39 {dimension_numbers = #tpu.dot_dimension_numbers<[1], [0], [0], [1], [0, 0, 1, 1], [], []>} : vector<256x128xbf16>, vector<128x128xbf16>, vector<256x128xf32> -> vector<256x128xf32>
    %75 = arith.addf %69, %74 : vector<256x128xf32>
    %76 = vector.extract_strided_slice %32 {offsets = [2, 1, 0], sizes = [16, 16, 128], strides = [1, 1, 1]} : vector<18x18x128xbf16> to vector<16x16x128xbf16>
    %77 = vector.shape_cast %76 : vector<16x16x128xbf16> to vector<256x128xbf16>
    %c7 = arith.constant 7 : index
    %c0_40 = arith.constant 0 : index
    %c0_41 = arith.constant 0 : index
    %78 = vector.load %arg5[%c7, %c0_40, %c0_41] : memref<9x128x128xbf16, #tpu.memory_space<vmem>>, vector<1x128x128xbf16>
    %79 = vector.shape_cast %78 : vector<1x128x128xbf16> to vector<128x128xbf16>
    %cst_42 = arith.constant dense<0.000000e+00> : vector<256x128xf32>
    %80 = tpu.matmul %77, %79, %cst_42 {dimension_numbers = #tpu.dot_dimension_numbers<[1], [0], [0], [1], [0, 0, 1, 1], [], []>} : vector<256x128xbf16>, vector<128x128xbf16>, vector<256x128xf32> -> vector<256x128xf32>
    %81 = arith.addf %75, %80 : vector<256x128xf32>
    %82 = vector.extract_strided_slice %32 {offsets = [2, 2, 0], sizes = [16, 16, 128], strides = [1, 1, 1]} : vector<18x18x128xbf16> to vector<16x16x128xbf16>
    %83 = vector.shape_cast %82 : vector<16x16x128xbf16> to vector<256x128xbf16>
    %c8 = arith.constant 8 : index
    %c0_43 = arith.constant 0 : index
    %c0_44 = arith.constant 0 : index
    %84 = vector.load %arg5[%c8, %c0_43, %c0_44] : memref<9x128x128xbf16, #tpu.memory_space<vmem>>, vector<1x128x128xbf16>
    %85 = vector.shape_cast %84 : vector<1x128x128xbf16> to vector<128x128xbf16>
    %cst_45 = arith.constant dense<0.000000e+00> : vector<256x128xf32>
    %86 = tpu.matmul %83, %85, %cst_45 {dimension_numbers = #tpu.dot_dimension_numbers<[1], [0], [0], [1], [0, 0, 1, 1], [], []>} : vector<256x128xbf16>, vector<128x128xbf16>, vector<256x128xf32> -> vector<256x128xf32>
    %87 = arith.addf %81, %86 : vector<256x128xf32>
    %c0_46 = arith.constant 0 : index
    %c0_47 = arith.constant 0 : index
    %88 = vector.load %arg6[%c0_46, %c0_47] : memref<1x128xf32, #tpu.memory_space<vmem>>, vector<1x128xf32>
    %89 = vector.broadcast %88 : vector<1x128xf32> to vector<256x128xf32>
    %90 = arith.addf %87, %89 : vector<256x128xf32>
    %91 = vector.shape_cast %90 : vector<256x128xf32> to vector<1x16x16x128xf32>
    %92 = arith.truncf %91 : vector<1x16x16x128xf32> to vector<1x16x16x128xbf16>
    %c0_48 = arith.constant 0 : index
    %c0_49 = arith.constant 0 : index
    %c0_50 = arith.constant 0 : index
    %c0_51 = arith.constant 0 : index
    %93 = vector.load %arg9[%c0_48, %c0_49, %c0_50, %c0_51] : memref<1x16x16x128xbf16, #tpu.memory_space<vmem>>, vector<1x16x16x128xbf16>
    tpu.vector_store %arg9[%c0_48, %c0_49, %c0_50, %c0_51], %92 {strides = array<i32>} : memref<1x16x16x128xbf16, #tpu.memory_space<vmem>>, vector<1x16x16x128xbf16>,
    return
  }
  func.func @transform_0(%arg0: i32, %arg1: i32) -> (i32, i32, i32, i32) {
    %c16_i32 = arith.constant 16 : i32
    %0 = arith.muli %arg1, %c16_i32 : i32
    %c1_i32 = arith.constant 1 : i32
    %1 = arith.subi %0, %c1_i32 : i32
    %c0_i32 = arith.constant 0 : i32
    %2 = arith.maxsi %1, %c0_i32 : i32
    %c0_i32_0 = arith.constant 0 : i32
    %c0_i32_1 = arith.constant 0 : i32
    %c0_i32_2 = arith.constant 0 : i32
    return %arg0, %2, %c0_i32_0, %c0_i32_1 : i32, i32, i32, i32
  }
  func.func @transform_1(%arg0: i32, %arg1: i32) -> (i32, i32, i32, i32) {
    %c0_i32 = arith.constant 0 : i32
    %c0_i32_0 = arith.constant 0 : i32
    %c0_i32_1 = arith.constant 0 : i32
    return %arg0, %arg1, %c0_i32, %c0_i32_0 : i32, i32, i32, i32
  }
  func.func @transform_2(%arg0: i32, %arg1: i32) -> (i32, i32, i32, i32) {
    %c1_i32 = arith.constant 1 : i32
    %0 = arith.addi %arg1, %c1_i32 : i32
    %c16_i32 = arith.constant 16 : i32
    %1 = arith.muli %0, %c16_i32 : i32
    %c15_i32 = arith.constant 15 : i32
    %2 = arith.minsi %1, %c15_i32 : i32
    %c0_i32 = arith.constant 0 : i32
    %c0_i32_0 = arith.constant 0 : i32
    %c0_i32_1 = arith.constant 0 : i32
    return %arg0, %2, %c0_i32, %c0_i32_0 : i32, i32, i32, i32
  }
  func.func @transform_3(%arg0: i32, %arg1: i32) -> (i32, i32, i32) {
    %c0_i32 = arith.constant 0 : i32
    %c0_i32_0 = arith.constant 0 : i32
    %c0_i32_1 = arith.constant 0 : i32
    %c0_i32_2 = arith.constant 0 : i32
    return %c0_i32, %c0_i32_0, %c0_i32_1 : i32, i32, i32
  }
  func.func @transform_4(%arg0: i32, %arg1: i32) -> (i32, i32) {
    %c0_i32 = arith.constant 0 : i32
    %c0_i32_0 = arith.constant 0 : i32
    %c0_i32_1 = arith.constant 0 : i32
    return %c0_i32, %c0_i32_0 : i32, i32
  }
  func.func @transform_5(%arg0: i32, %arg1: i32) -> (i32, i32) {
    %c0_i32 = arith.constant 0 : i32
    %c0_i32_0 = arith.constant 0 : i32
    %c0_i32_1 = arith.constant 0 : i32
    return %c0_i32, %c0_i32_0 : i32, i32
  }
  func.func @transform_6(%arg0: i32, %arg1: i32) -> (i32, i32) {
    %c0_i32 = arith.constant 0 : i32
    %c0_i32_0 = arith.constant 0 : i32
    %c0_i32_1 = arith.constant 0 : i32
    return %c0_i32, %c0_i32_0 : i32, i32
  }
  func.func @transform_7(%arg0: i32, %arg1: i32) -> (i32, i32, i32, i32) {
    %c0_i32 = arith.constant 0 : i32
    %c0_i32_0 = arith.constant 0 : i32
    %c0_i32_1 = arith.constant 0 : i32
    return %arg0, %arg1, %c0_i32, %c0_i32_0 : i32, i32, i32, i32
  }
}

module attributes {stable_mosaic.version = 11 : i64} {
  func.func @_conv3x3_kernel(%arg0: i32, %arg1: i32, %arg2: memref<1x1x16x128xbf16, #tpu.memory_space<vmem>>, %arg3: memref<1x16x16x128xbf16, #tpu.memory_space<vmem>>, %arg4: memref<1x1x16x128xbf16, #tpu.memory_space<vmem>>, %arg5: memref<9x128x128xbf16, #tpu.memory_space<vmem>>, %arg6: memref<1x128xf32, #tpu.memory_space<vmem>>, %arg7: memref<1x128xf32, #tpu.memory_space<vmem>>, %arg8: memref<1x128xf32, #tpu.memory_space<vmem>>, %arg9: memref<1x16x16x128xbf16, #tpu.memory_space<vmem>>, %arg10: memref<1x1x2x128xf32, #tpu.memory_space<vmem>>) attributes {dimension_semantics = [#tpu.dimension_semantics<parallel>, #tpu.dimension_semantics<parallel>], iteration_bounds = array<i64: 2, 1>, scalar_prefetch = 0 : i64, scratch_operands = 0 : i64, tpu.core_type = #tpu.core_type<tc>, window_params = [{transform_indices = @transform_0, window_bounds = array<i64: 1, 1, 16, 128>}, {transform_indices = @transform_1, window_bounds = array<i64: 1, 16, 16, 128>}, {transform_indices = @transform_2, window_bounds = array<i64: 1, 1, 16, 128>}, {pipeline_mode = #tpu.pipeline_mode<synchronous>, transform_indices = @transform_3, window_bounds = array<i64: 9, 128, 128>}, {pipeline_mode = #tpu.pipeline_mode<synchronous>, transform_indices = @transform_4, window_bounds = array<i64: 1, 128>}, {pipeline_mode = #tpu.pipeline_mode<synchronous>, transform_indices = @transform_5, window_bounds = array<i64: 1, 128>}, {pipeline_mode = #tpu.pipeline_mode<synchronous>, transform_indices = @transform_6, window_bounds = array<i64: 1, 128>}, {transform_indices = @transform_7, window_bounds = array<i64: 1, 16, 16, 128>}, {transform_indices = @transform_8, window_bounds = array<i64: 1, 1, 2, 128>}]} {
    %c0 = arith.constant 0 : index
    %c0_0 = arith.constant 0 : index
    %c0_1 = arith.constant 0 : index
    %c0_2 = arith.constant 0 : index
    %0 = vector.load %arg2[%c0, %c0_0, %c0_1, %c0_2] : memref<1x1x16x128xbf16, #tpu.memory_space<vmem>>, vector<1x1x16x128xbf16>
    %1 = vector.shape_cast %0 : vector<1x1x16x128xbf16> to vector<1x16x128xbf16>
    %c0_3 = arith.constant 0 : index
    %c0_4 = arith.constant 0 : index
    %c0_5 = arith.constant 0 : index
    %c0_6 = arith.constant 0 : index
    %2 = vector.load %arg3[%c0_3, %c0_4, %c0_5, %c0_6] : memref<1x16x16x128xbf16, #tpu.memory_space<vmem>>, vector<1x16x16x128xbf16>
    %3 = vector.shape_cast %2 : vector<1x16x16x128xbf16> to vector<16x16x128xbf16>
    %c0_7 = arith.constant 0 : index
    %c0_8 = arith.constant 0 : index
    %c0_9 = arith.constant 0 : index
    %c0_10 = arith.constant 0 : index
    %4 = vector.load %arg4[%c0_7, %c0_8, %c0_9, %c0_10] : memref<1x1x16x128xbf16, #tpu.memory_space<vmem>>, vector<1x1x16x128xbf16>
    %5 = vector.shape_cast %4 : vector<1x1x16x128xbf16> to vector<1x16x128xbf16>
    %6 = tpu.concatenate %1, %3, %5 in 0 : vector<1x16x128xbf16>, vector<16x16x128xbf16>, vector<1x16x128xbf16> -> vector<18x16x128xbf16>
    %7 = arith.extf %6 : vector<18x16x128xbf16> to vector<18x16x128xf32>
    %c0_11 = arith.constant 0 : index
    %c0_12 = arith.constant 0 : index
    %8 = vector.load %arg7[%c0_11, %c0_12] : memref<1x128xf32, #tpu.memory_space<vmem>>, vector<1x128xf32>
    %9 = vector.shape_cast %8 : vector<1x128xf32> to vector<1x1x128xf32>
    %10 = vector.broadcast %9 : vector<1x1x128xf32> to vector<18x16x128xf32>
    %11 = arith.mulf %7, %10 : vector<18x16x128xf32>
    %c0_13 = arith.constant 0 : index
    %c0_14 = arith.constant 0 : index
    %12 = vector.load %arg8[%c0_13, %c0_14] : memref<1x128xf32, #tpu.memory_space<vmem>>, vector<1x128xf32>
    %13 = vector.shape_cast %12 : vector<1x128xf32> to vector<1x1x128xf32>
    %14 = vector.broadcast %13 : vector<1x1x128xf32> to vector<18x16x128xf32>
    %15 = arith.addf %11, %14 : vector<18x16x128xf32>
    %cst = arith.constant 0.000000e+00 : f32
    %16 = vector.broadcast %cst : f32 to vector<18x16x128xf32>
    %17 = arith.cmpf oge, %15, %16 : vector<18x16x128xf32>
    %cst_15 = arith.constant 2.000000e-01 : f32
    %18 = vector.broadcast %cst_15 : f32 to vector<18x16x128xf32>
    %19 = arith.mulf %18, %15 : vector<18x16x128xf32>
    %20 = arith.select %17, %15, %19 : vector<18x16x128xi1>, vector<18x16x128xf32>
    %c16_i32 = arith.constant 16 : i32
    %21 = arith.muli %arg1, %c16_i32 : i32
    %c1_i32 = arith.constant 1 : i32
    %22 = arith.subi %21, %c1_i32 : i32
    %23 = tpu.iota {dimensions = array<i32: 0>} : vector<18x1x1xi32>
    %24 = vector.broadcast %22 : i32 to vector<18x1x1xi32>
    %25 = arith.addi %24, %23 : vector<18x1x1xi32>
    %c0_i32 = arith.constant 0 : i32
    %26 = vector.broadcast %c0_i32 : i32 to vector<18x1x1xi32>
    %27 = arith.cmpi sge, %25, %26 : vector<18x1x1xi32>
    %c16_i32_16 = arith.constant 16 : i32
    %28 = vector.broadcast %c16_i32_16 : i32 to vector<18x1x1xi32>
    %29 = arith.cmpi slt, %25, %28 : vector<18x1x1xi32>
    %30 = arith.andi %27, %29 : vector<18x1x1xi1>
    %cst_17 = arith.constant 0.000000e+00 : f32
    %31 = vector.shape_cast %30 : vector<18x1x1xi1> to vector<18x1x1xi1>
    %32 = vector.broadcast %31 : vector<18x1x1xi1> to vector<18x16x128xi1>
    %33 = vector.broadcast %cst_17 : f32 to vector<18x16x128xf32>
    %34 = arith.select %32, %20, %33 : vector<18x16x128xi1>, vector<18x16x128xf32>
    %cst_18 = arith.constant 0.000000e+00 : f32
    %35 = vector.broadcast %cst_18 : f32 to vector<18x1x128xf32>
    %36 = tpu.concatenate %35, %34, %35 in 1 : vector<18x1x128xf32>, vector<18x16x128xf32>, vector<18x1x128xf32> -> vector<18x18x128xf32>
    %37 = arith.truncf %36 : vector<18x18x128xf32> to vector<18x18x128xbf16>
    %cst_19 = arith.constant 0.000000e+00 : f32
    %38 = vector.broadcast %cst_19 : f32 to vector<256x128xf32>
    %39 = vector.extract_strided_slice %37 {offsets = [0, 0, 0], sizes = [16, 16, 128], strides = [1, 1, 1]} : vector<18x18x128xbf16> to vector<16x16x128xbf16>
    %40 = vector.shape_cast %39 : vector<16x16x128xbf16> to vector<256x128xbf16>
    %c0_20 = arith.constant 0 : index
    %c0_21 = arith.constant 0 : index
    %c0_22 = arith.constant 0 : index
    %41 = vector.load %arg5[%c0_20, %c0_21, %c0_22] : memref<9x128x128xbf16, #tpu.memory_space<vmem>>, vector<1x128x128xbf16>
    %42 = vector.shape_cast %41 : vector<1x128x128xbf16> to vector<128x128xbf16>
    %cst_23 = arith.constant dense<0.000000e+00> : vector<256x128xf32>
    %43 = tpu.matmul %40, %42, %cst_23 {dimension_numbers = #tpu.dot_dimension_numbers<[1], [0], [0], [1], [0, 0, 1, 1], [], []>} : vector<256x128xbf16>, vector<128x128xbf16>, vector<256x128xf32> -> vector<256x128xf32>
    %44 = arith.addf %38, %43 : vector<256x128xf32>
    %45 = vector.extract_strided_slice %37 {offsets = [0, 1, 0], sizes = [16, 16, 128], strides = [1, 1, 1]} : vector<18x18x128xbf16> to vector<16x16x128xbf16>
    %46 = vector.shape_cast %45 : vector<16x16x128xbf16> to vector<256x128xbf16>
    %c1 = arith.constant 1 : index
    %c0_24 = arith.constant 0 : index
    %c0_25 = arith.constant 0 : index
    %47 = vector.load %arg5[%c1, %c0_24, %c0_25] : memref<9x128x128xbf16, #tpu.memory_space<vmem>>, vector<1x128x128xbf16>
    %48 = vector.shape_cast %47 : vector<1x128x128xbf16> to vector<128x128xbf16>
    %cst_26 = arith.constant dense<0.000000e+00> : vector<256x128xf32>
    %49 = tpu.matmul %46, %48, %cst_26 {dimension_numbers = #tpu.dot_dimension_numbers<[1], [0], [0], [1], [0, 0, 1, 1], [], []>} : vector<256x128xbf16>, vector<128x128xbf16>, vector<256x128xf32> -> vector<256x128xf32>
    %50 = arith.addf %44, %49 : vector<256x128xf32>
    %51 = vector.extract_strided_slice %37 {offsets = [0, 2, 0], sizes = [16, 16, 128], strides = [1, 1, 1]} : vector<18x18x128xbf16> to vector<16x16x128xbf16>
    %52 = vector.shape_cast %51 : vector<16x16x128xbf16> to vector<256x128xbf16>
    %c2 = arith.constant 2 : index
    %c0_27 = arith.constant 0 : index
    %c0_28 = arith.constant 0 : index
    %53 = vector.load %arg5[%c2, %c0_27, %c0_28] : memref<9x128x128xbf16, #tpu.memory_space<vmem>>, vector<1x128x128xbf16>
    %54 = vector.shape_cast %53 : vector<1x128x128xbf16> to vector<128x128xbf16>
    %cst_29 = arith.constant dense<0.000000e+00> : vector<256x128xf32>
    %55 = tpu.matmul %52, %54, %cst_29 {dimension_numbers = #tpu.dot_dimension_numbers<[1], [0], [0], [1], [0, 0, 1, 1], [], []>} : vector<256x128xbf16>, vector<128x128xbf16>, vector<256x128xf32> -> vector<256x128xf32>
    %56 = arith.addf %50, %55 : vector<256x128xf32>
    %57 = vector.extract_strided_slice %37 {offsets = [1, 0, 0], sizes = [16, 16, 128], strides = [1, 1, 1]} : vector<18x18x128xbf16> to vector<16x16x128xbf16>
    %58 = vector.shape_cast %57 : vector<16x16x128xbf16> to vector<256x128xbf16>
    %c3 = arith.constant 3 : index
    %c0_30 = arith.constant 0 : index
    %c0_31 = arith.constant 0 : index
    %59 = vector.load %arg5[%c3, %c0_30, %c0_31] : memref<9x128x128xbf16, #tpu.memory_space<vmem>>, vector<1x128x128xbf16>
    %60 = vector.shape_cast %59 : vector<1x128x128xbf16> to vector<128x128xbf16>
    %cst_32 = arith.constant dense<0.000000e+00> : vector<256x128xf32>
    %61 = tpu.matmul %58, %60, %cst_32 {dimension_numbers = #tpu.dot_dimension_numbers<[1], [0], [0], [1], [0, 0, 1, 1], [], []>} : vector<256x128xbf16>, vector<128x128xbf16>, vector<256x128xf32> -> vector<256x128xf32>
    %62 = arith.addf %56, %61 : vector<256x128xf32>
    %63 = vector.extract_strided_slice %37 {offsets = [1, 1, 0], sizes = [16, 16, 128], strides = [1, 1, 1]} : vector<18x18x128xbf16> to vector<16x16x128xbf16>
    %64 = vector.shape_cast %63 : vector<16x16x128xbf16> to vector<256x128xbf16>
    %c4 = arith.constant 4 : index
    %c0_33 = arith.constant 0 : index
    %c0_34 = arith.constant 0 : index
    %65 = vector.load %arg5[%c4, %c0_33, %c0_34] : memref<9x128x128xbf16, #tpu.memory_space<vmem>>, vector<1x128x128xbf16>
    %66 = vector.shape_cast %65 : vector<1x128x128xbf16> to vector<128x128xbf16>
    %cst_35 = arith.constant dense<0.000000e+00> : vector<256x128xf32>
    %67 = tpu.matmul %64, %66, %cst_35 {dimension_numbers = #tpu.dot_dimension_numbers<[1], [0], [0], [1], [0, 0, 1, 1], [], []>} : vector<256x128xbf16>, vector<128x128xbf16>, vector<256x128xf32> -> vector<256x128xf32>
    %68 = arith.addf %62, %67 : vector<256x128xf32>
    %69 = vector.extract_strided_slice %37 {offsets = [1, 2, 0], sizes = [16, 16, 128], strides = [1, 1, 1]} : vector<18x18x128xbf16> to vector<16x16x128xbf16>
    %70 = vector.shape_cast %69 : vector<16x16x128xbf16> to vector<256x128xbf16>
    %c5 = arith.constant 5 : index
    %c0_36 = arith.constant 0 : index
    %c0_37 = arith.constant 0 : index
    %71 = vector.load %arg5[%c5, %c0_36, %c0_37] : memref<9x128x128xbf16, #tpu.memory_space<vmem>>, vector<1x128x128xbf16>
    %72 = vector.shape_cast %71 : vector<1x128x128xbf16> to vector<128x128xbf16>
    %cst_38 = arith.constant dense<0.000000e+00> : vector<256x128xf32>
    %73 = tpu.matmul %70, %72, %cst_38 {dimension_numbers = #tpu.dot_dimension_numbers<[1], [0], [0], [1], [0, 0, 1, 1], [], []>} : vector<256x128xbf16>, vector<128x128xbf16>, vector<256x128xf32> -> vector<256x128xf32>
    %74 = arith.addf %68, %73 : vector<256x128xf32>
    %75 = vector.extract_strided_slice %37 {offsets = [2, 0, 0], sizes = [16, 16, 128], strides = [1, 1, 1]} : vector<18x18x128xbf16> to vector<16x16x128xbf16>
    %76 = vector.shape_cast %75 : vector<16x16x128xbf16> to vector<256x128xbf16>
    %c6 = arith.constant 6 : index
    %c0_39 = arith.constant 0 : index
    %c0_40 = arith.constant 0 : index
    %77 = vector.load %arg5[%c6, %c0_39, %c0_40] : memref<9x128x128xbf16, #tpu.memory_space<vmem>>, vector<1x128x128xbf16>
    %78 = vector.shape_cast %77 : vector<1x128x128xbf16> to vector<128x128xbf16>
    %cst_41 = arith.constant dense<0.000000e+00> : vector<256x128xf32>
    %79 = tpu.matmul %76, %78, %cst_41 {dimension_numbers = #tpu.dot_dimension_numbers<[1], [0], [0], [1], [0, 0, 1, 1], [], []>} : vector<256x128xbf16>, vector<128x128xbf16>, vector<256x128xf32> -> vector<256x128xf32>
    %80 = arith.addf %74, %79 : vector<256x128xf32>
    %81 = vector.extract_strided_slice %37 {offsets = [2, 1, 0], sizes = [16, 16, 128], strides = [1, 1, 1]} : vector<18x18x128xbf16> to vector<16x16x128xbf16>
    %82 = vector.shape_cast %81 : vector<16x16x128xbf16> to vector<256x128xbf16>
    %c7 = arith.constant 7 : index
    %c0_42 = arith.constant 0 : index
    %c0_43 = arith.constant 0 : index
    %83 = vector.load %arg5[%c7, %c0_42, %c0_43] : memref<9x128x128xbf16, #tpu.memory_space<vmem>>, vector<1x128x128xbf16>
    %84 = vector.shape_cast %83 : vector<1x128x128xbf16> to vector<128x128xbf16>
    %cst_44 = arith.constant dense<0.000000e+00> : vector<256x128xf32>
    %85 = tpu.matmul %82, %84, %cst_44 {dimension_numbers = #tpu.dot_dimension_numbers<[1], [0], [0], [1], [0, 0, 1, 1], [], []>} : vector<256x128xbf16>, vector<128x128xbf16>, vector<256x128xf32> -> vector<256x128xf32>
    %86 = arith.addf %80, %85 : vector<256x128xf32>
    %87 = vector.extract_strided_slice %37 {offsets = [2, 2, 0], sizes = [16, 16, 128], strides = [1, 1, 1]} : vector<18x18x128xbf16> to vector<16x16x128xbf16>
    %88 = vector.shape_cast %87 : vector<16x16x128xbf16> to vector<256x128xbf16>
    %c8 = arith.constant 8 : index
    %c0_45 = arith.constant 0 : index
    %c0_46 = arith.constant 0 : index
    %89 = vector.load %arg5[%c8, %c0_45, %c0_46] : memref<9x128x128xbf16, #tpu.memory_space<vmem>>, vector<1x128x128xbf16>
    %90 = vector.shape_cast %89 : vector<1x128x128xbf16> to vector<128x128xbf16>
    %cst_47 = arith.constant dense<0.000000e+00> : vector<256x128xf32>
    %91 = tpu.matmul %88, %90, %cst_47 {dimension_numbers = #tpu.dot_dimension_numbers<[1], [0], [0], [1], [0, 0, 1, 1], [], []>} : vector<256x128xbf16>, vector<128x128xbf16>, vector<256x128xf32> -> vector<256x128xf32>
    %92 = arith.addf %86, %91 : vector<256x128xf32>
    %c0_48 = arith.constant 0 : index
    %c0_49 = arith.constant 0 : index
    %93 = vector.load %arg6[%c0_48, %c0_49] : memref<1x128xf32, #tpu.memory_space<vmem>>, vector<1x128xf32>
    %94 = vector.broadcast %93 : vector<1x128xf32> to vector<256x128xf32>
    %95 = arith.addf %92, %94 : vector<256x128xf32>
    %cst_50 = arith.constant dense<0.000000e+00> : vector<128xf32>
    %96 = vector.multi_reduction <add>, %95, %cst_50 [0] : vector<256x128xf32> to vector<128xf32>
    %97 = vector.shape_cast %96 : vector<128xf32> to vector<1x128xf32>
    %98 = arith.mulf %95, %95 : vector<256x128xf32>
    %cst_51 = arith.constant dense<0.000000e+00> : vector<128xf32>
    %99 = vector.multi_reduction <add>, %98, %cst_51 [0] : vector<256x128xf32> to vector<128xf32>
    %100 = vector.shape_cast %99 : vector<128xf32> to vector<1x128xf32>
    %101 = tpu.concatenate %97, %100 in 0 : vector<1x128xf32>, vector<1x128xf32> -> vector<2x128xf32>
    %c0_52 = arith.constant 0 : index
    %c0_53 = arith.constant 0 : index
    %c0_54 = arith.constant 0 : index
    %c0_55 = arith.constant 0 : index
    %102 = vector.load %arg10[%c0_52, %c0_53, %c0_54, %c0_55] : memref<1x1x2x128xf32, #tpu.memory_space<vmem>>, vector<1x1x2x128xf32>
    %103 = vector.shape_cast %102 : vector<1x1x2x128xf32> to vector<2x128xf32>
    %104 = vector.shape_cast %101 : vector<2x128xf32> to vector<1x1x2x128xf32>
    tpu.vector_store %arg10[%c0_52, %c0_53, %c0_54, %c0_55], %104 {strides = array<i32>} : memref<1x1x2x128xf32, #tpu.memory_space<vmem>>, vector<1x1x2x128xf32>,
    %105 = vector.shape_cast %95 : vector<256x128xf32> to vector<1x16x16x128xf32>
    %106 = arith.truncf %105 : vector<1x16x16x128xf32> to vector<1x16x16x128xbf16>
    %c0_56 = arith.constant 0 : index
    %c0_57 = arith.constant 0 : index
    %c0_58 = arith.constant 0 : index
    %c0_59 = arith.constant 0 : index
    %107 = vector.load %arg9[%c0_56, %c0_57, %c0_58, %c0_59] : memref<1x16x16x128xbf16, #tpu.memory_space<vmem>>, vector<1x16x16x128xbf16>
    tpu.vector_store %arg9[%c0_56, %c0_57, %c0_58, %c0_59], %106 {strides = array<i32>} : memref<1x16x16x128xbf16, #tpu.memory_space<vmem>>, vector<1x16x16x128xbf16>,
    return
  }
  func.func @transform_0(%arg0: i32, %arg1: i32) -> (i32, i32, i32, i32) {
    %c16_i32 = arith.constant 16 : i32
    %0 = arith.muli %arg1, %c16_i32 : i32
    %c1_i32 = arith.constant 1 : i32
    %1 = arith.subi %0, %c1_i32 : i32
    %c0_i32 = arith.constant 0 : i32
    %2 = arith.maxsi %1, %c0_i32 : i32
    %c0_i32_0 = arith.constant 0 : i32
    %c0_i32_1 = arith.constant 0 : i32
    %c0_i32_2 = arith.constant 0 : i32
    return %arg0, %2, %c0_i32_0, %c0_i32_1 : i32, i32, i32, i32
  }
  func.func @transform_1(%arg0: i32, %arg1: i32) -> (i32, i32, i32, i32) {
    %c0_i32 = arith.constant 0 : i32
    %c0_i32_0 = arith.constant 0 : i32
    %c0_i32_1 = arith.constant 0 : i32
    return %arg0, %arg1, %c0_i32, %c0_i32_0 : i32, i32, i32, i32
  }
  func.func @transform_2(%arg0: i32, %arg1: i32) -> (i32, i32, i32, i32) {
    %c1_i32 = arith.constant 1 : i32
    %0 = arith.addi %arg1, %c1_i32 : i32
    %c16_i32 = arith.constant 16 : i32
    %1 = arith.muli %0, %c16_i32 : i32
    %c15_i32 = arith.constant 15 : i32
    %2 = arith.minsi %1, %c15_i32 : i32
    %c0_i32 = arith.constant 0 : i32
    %c0_i32_0 = arith.constant 0 : i32
    %c0_i32_1 = arith.constant 0 : i32
    return %arg0, %2, %c0_i32, %c0_i32_0 : i32, i32, i32, i32
  }
  func.func @transform_3(%arg0: i32, %arg1: i32) -> (i32, i32, i32) {
    %c0_i32 = arith.constant 0 : i32
    %c0_i32_0 = arith.constant 0 : i32
    %c0_i32_1 = arith.constant 0 : i32
    %c0_i32_2 = arith.constant 0 : i32
    return %c0_i32, %c0_i32_0, %c0_i32_1 : i32, i32, i32
  }
  func.func @transform_4(%arg0: i32, %arg1: i32) -> (i32, i32) {
    %c0_i32 = arith.constant 0 : i32
    %c0_i32_0 = arith.constant 0 : i32
    %c0_i32_1 = arith.constant 0 : i32
    return %c0_i32, %c0_i32_0 : i32, i32
  }
  func.func @transform_5(%arg0: i32, %arg1: i32) -> (i32, i32) {
    %c0_i32 = arith.constant 0 : i32
    %c0_i32_0 = arith.constant 0 : i32
    %c0_i32_1 = arith.constant 0 : i32
    return %c0_i32, %c0_i32_0 : i32, i32
  }
  func.func @transform_6(%arg0: i32, %arg1: i32) -> (i32, i32) {
    %c0_i32 = arith.constant 0 : i32
    %c0_i32_0 = arith.constant 0 : i32
    %c0_i32_1 = arith.constant 0 : i32
    return %c0_i32, %c0_i32_0 : i32, i32
  }
  func.func @transform_7(%arg0: i32, %arg1: i32) -> (i32, i32, i32, i32) {
    %c0_i32 = arith.constant 0 : i32
    %c0_i32_0 = arith.constant 0 : i32
    %c0_i32_1 = arith.constant 0 : i32
    return %arg0, %arg1, %c0_i32, %c0_i32_0 : i32, i32, i32, i32
  }
  func.func @transform_8(%arg0: i32, %arg1: i32) -> (i32, i32, i32, i32) {
    %c0_i32 = arith.constant 0 : i32
    %c0_i32_0 = arith.constant 0 : i32
    %c0_i32_1 = arith.constant 0 : i32
    return %arg0, %arg1, %c0_i32, %c0_i32_0 : i32, i32, i32, i32
  }
}

module attributes {stable_mosaic.version = 11 : i64} {
  func.func @_conv3x3_kernel(%arg0: i32, %arg1: i32, %arg2: memref<1x1x16x128xbf16, #tpu.memory_space<vmem>>, %arg3: memref<1x16x16x128xbf16, #tpu.memory_space<vmem>>, %arg4: memref<1x1x16x128xbf16, #tpu.memory_space<vmem>>, %arg5: memref<9x128x128xbf16, #tpu.memory_space<vmem>>, %arg6: memref<1x128xf32, #tpu.memory_space<vmem>>, %arg7: memref<1x128xf32, #tpu.memory_space<vmem>>, %arg8: memref<1x128xf32, #tpu.memory_space<vmem>>, %arg9: memref<1x16x16x128xf32, #tpu.memory_space<vmem>>) attributes {dimension_semantics = [#tpu.dimension_semantics<parallel>, #tpu.dimension_semantics<parallel>], iteration_bounds = array<i64: 2, 1>, scalar_prefetch = 0 : i64, scratch_operands = 0 : i64, tpu.core_type = #tpu.core_type<tc>, window_params = [{transform_indices = @transform_0, window_bounds = array<i64: 1, 1, 16, 128>}, {transform_indices = @transform_1, window_bounds = array<i64: 1, 16, 16, 128>}, {transform_indices = @transform_2, window_bounds = array<i64: 1, 1, 16, 128>}, {pipeline_mode = #tpu.pipeline_mode<synchronous>, transform_indices = @transform_3, window_bounds = array<i64: 9, 128, 128>}, {pipeline_mode = #tpu.pipeline_mode<synchronous>, transform_indices = @transform_4, window_bounds = array<i64: 1, 128>}, {pipeline_mode = #tpu.pipeline_mode<synchronous>, transform_indices = @transform_5, window_bounds = array<i64: 1, 128>}, {pipeline_mode = #tpu.pipeline_mode<synchronous>, transform_indices = @transform_6, window_bounds = array<i64: 1, 128>}, {transform_indices = @transform_7, window_bounds = array<i64: 1, 16, 16, 128>}]} {
    %c0 = arith.constant 0 : index
    %c0_0 = arith.constant 0 : index
    %c0_1 = arith.constant 0 : index
    %c0_2 = arith.constant 0 : index
    %0 = vector.load %arg2[%c0, %c0_0, %c0_1, %c0_2] : memref<1x1x16x128xbf16, #tpu.memory_space<vmem>>, vector<1x1x16x128xbf16>
    %1 = vector.shape_cast %0 : vector<1x1x16x128xbf16> to vector<1x16x128xbf16>
    %c0_3 = arith.constant 0 : index
    %c0_4 = arith.constant 0 : index
    %c0_5 = arith.constant 0 : index
    %c0_6 = arith.constant 0 : index
    %2 = vector.load %arg3[%c0_3, %c0_4, %c0_5, %c0_6] : memref<1x16x16x128xbf16, #tpu.memory_space<vmem>>, vector<1x16x16x128xbf16>
    %3 = vector.shape_cast %2 : vector<1x16x16x128xbf16> to vector<16x16x128xbf16>
    %c0_7 = arith.constant 0 : index
    %c0_8 = arith.constant 0 : index
    %c0_9 = arith.constant 0 : index
    %c0_10 = arith.constant 0 : index
    %4 = vector.load %arg4[%c0_7, %c0_8, %c0_9, %c0_10] : memref<1x1x16x128xbf16, #tpu.memory_space<vmem>>, vector<1x1x16x128xbf16>
    %5 = vector.shape_cast %4 : vector<1x1x16x128xbf16> to vector<1x16x128xbf16>
    %6 = tpu.concatenate %1, %3, %5 in 0 : vector<1x16x128xbf16>, vector<16x16x128xbf16>, vector<1x16x128xbf16> -> vector<18x16x128xbf16>
    %7 = arith.extf %6 : vector<18x16x128xbf16> to vector<18x16x128xf32>
    %c0_11 = arith.constant 0 : index
    %c0_12 = arith.constant 0 : index
    %8 = vector.load %arg7[%c0_11, %c0_12] : memref<1x128xf32, #tpu.memory_space<vmem>>, vector<1x128xf32>
    %9 = vector.shape_cast %8 : vector<1x128xf32> to vector<1x1x128xf32>
    %10 = vector.broadcast %9 : vector<1x1x128xf32> to vector<18x16x128xf32>
    %11 = arith.mulf %7, %10 : vector<18x16x128xf32>
    %c0_13 = arith.constant 0 : index
    %c0_14 = arith.constant 0 : index
    %12 = vector.load %arg8[%c0_13, %c0_14] : memref<1x128xf32, #tpu.memory_space<vmem>>, vector<1x128xf32>
    %13 = vector.shape_cast %12 : vector<1x128xf32> to vector<1x1x128xf32>
    %14 = vector.broadcast %13 : vector<1x1x128xf32> to vector<18x16x128xf32>
    %15 = arith.addf %11, %14 : vector<18x16x128xf32>
    %cst = arith.constant 0.000000e+00 : f32
    %16 = vector.broadcast %cst : f32 to vector<18x16x128xf32>
    %17 = arith.cmpf oge, %15, %16 : vector<18x16x128xf32>
    %cst_15 = arith.constant 2.000000e-01 : f32
    %18 = vector.broadcast %cst_15 : f32 to vector<18x16x128xf32>
    %19 = arith.mulf %18, %15 : vector<18x16x128xf32>
    %20 = arith.select %17, %15, %19 : vector<18x16x128xi1>, vector<18x16x128xf32>
    %c16_i32 = arith.constant 16 : i32
    %21 = arith.muli %arg1, %c16_i32 : i32
    %c1_i32 = arith.constant 1 : i32
    %22 = arith.subi %21, %c1_i32 : i32
    %23 = tpu.iota {dimensions = array<i32: 0>} : vector<18x1x1xi32>
    %24 = vector.broadcast %22 : i32 to vector<18x1x1xi32>
    %25 = arith.addi %24, %23 : vector<18x1x1xi32>
    %c0_i32 = arith.constant 0 : i32
    %26 = vector.broadcast %c0_i32 : i32 to vector<18x1x1xi32>
    %27 = arith.cmpi sge, %25, %26 : vector<18x1x1xi32>
    %c16_i32_16 = arith.constant 16 : i32
    %28 = vector.broadcast %c16_i32_16 : i32 to vector<18x1x1xi32>
    %29 = arith.cmpi slt, %25, %28 : vector<18x1x1xi32>
    %30 = arith.andi %27, %29 : vector<18x1x1xi1>
    %cst_17 = arith.constant 0.000000e+00 : f32
    %31 = vector.shape_cast %30 : vector<18x1x1xi1> to vector<18x1x1xi1>
    %32 = vector.broadcast %31 : vector<18x1x1xi1> to vector<18x16x128xi1>
    %33 = vector.broadcast %cst_17 : f32 to vector<18x16x128xf32>
    %34 = arith.select %32, %20, %33 : vector<18x16x128xi1>, vector<18x16x128xf32>
    %cst_18 = arith.constant 0.000000e+00 : f32
    %35 = vector.broadcast %cst_18 : f32 to vector<18x1x128xf32>
    %36 = tpu.concatenate %35, %34, %35 in 1 : vector<18x1x128xf32>, vector<18x16x128xf32>, vector<18x1x128xf32> -> vector<18x18x128xf32>
    %37 = arith.truncf %36 : vector<18x18x128xf32> to vector<18x18x128xbf16>
    %cst_19 = arith.constant 0.000000e+00 : f32
    %38 = vector.broadcast %cst_19 : f32 to vector<256x128xf32>
    %39 = vector.extract_strided_slice %37 {offsets = [0, 0, 0], sizes = [16, 16, 128], strides = [1, 1, 1]} : vector<18x18x128xbf16> to vector<16x16x128xbf16>
    %40 = vector.shape_cast %39 : vector<16x16x128xbf16> to vector<256x128xbf16>
    %c0_20 = arith.constant 0 : index
    %c0_21 = arith.constant 0 : index
    %c0_22 = arith.constant 0 : index
    %41 = vector.load %arg5[%c0_20, %c0_21, %c0_22] : memref<9x128x128xbf16, #tpu.memory_space<vmem>>, vector<1x128x128xbf16>
    %42 = vector.shape_cast %41 : vector<1x128x128xbf16> to vector<128x128xbf16>
    %cst_23 = arith.constant dense<0.000000e+00> : vector<256x128xf32>
    %43 = tpu.matmul %40, %42, %cst_23 {dimension_numbers = #tpu.dot_dimension_numbers<[1], [0], [0], [1], [0, 0, 1, 1], [], []>} : vector<256x128xbf16>, vector<128x128xbf16>, vector<256x128xf32> -> vector<256x128xf32>
    %44 = arith.addf %38, %43 : vector<256x128xf32>
    %45 = vector.extract_strided_slice %37 {offsets = [0, 1, 0], sizes = [16, 16, 128], strides = [1, 1, 1]} : vector<18x18x128xbf16> to vector<16x16x128xbf16>
    %46 = vector.shape_cast %45 : vector<16x16x128xbf16> to vector<256x128xbf16>
    %c1 = arith.constant 1 : index
    %c0_24 = arith.constant 0 : index
    %c0_25 = arith.constant 0 : index
    %47 = vector.load %arg5[%c1, %c0_24, %c0_25] : memref<9x128x128xbf16, #tpu.memory_space<vmem>>, vector<1x128x128xbf16>
    %48 = vector.shape_cast %47 : vector<1x128x128xbf16> to vector<128x128xbf16>
    %cst_26 = arith.constant dense<0.000000e+00> : vector<256x128xf32>
    %49 = tpu.matmul %46, %48, %cst_26 {dimension_numbers = #tpu.dot_dimension_numbers<[1], [0], [0], [1], [0, 0, 1, 1], [], []>} : vector<256x128xbf16>, vector<128x128xbf16>, vector<256x128xf32> -> vector<256x128xf32>
    %50 = arith.addf %44, %49 : vector<256x128xf32>
    %51 = vector.extract_strided_slice %37 {offsets = [0, 2, 0], sizes = [16, 16, 128], strides = [1, 1, 1]} : vector<18x18x128xbf16> to vector<16x16x128xbf16>
    %52 = vector.shape_cast %51 : vector<16x16x128xbf16> to vector<256x128xbf16>
    %c2 = arith.constant 2 : index
    %c0_27 = arith.constant 0 : index
    %c0_28 = arith.constant 0 : index
    %53 = vector.load %arg5[%c2, %c0_27, %c0_28] : memref<9x128x128xbf16, #tpu.memory_space<vmem>>, vector<1x128x128xbf16>
    %54 = vector.shape_cast %53 : vector<1x128x128xbf16> to vector<128x128xbf16>
    %cst_29 = arith.constant dense<0.000000e+00> : vector<256x128xf32>
    %55 = tpu.matmul %52, %54, %cst_29 {dimension_numbers = #tpu.dot_dimension_numbers<[1], [0], [0], [1], [0, 0, 1, 1], [], []>} : vector<256x128xbf16>, vector<128x128xbf16>, vector<256x128xf32> -> vector<256x128xf32>
    %56 = arith.addf %50, %55 : vector<256x128xf32>
    %57 = vector.extract_strided_slice %37 {offsets = [1, 0, 0], sizes = [16, 16, 128], strides = [1, 1, 1]} : vector<18x18x128xbf16> to vector<16x16x128xbf16>
    %58 = vector.shape_cast %57 : vector<16x16x128xbf16> to vector<256x128xbf16>
    %c3 = arith.constant 3 : index
    %c0_30 = arith.constant 0 : index
    %c0_31 = arith.constant 0 : index
    %59 = vector.load %arg5[%c3, %c0_30, %c0_31] : memref<9x128x128xbf16, #tpu.memory_space<vmem>>, vector<1x128x128xbf16>
    %60 = vector.shape_cast %59 : vector<1x128x128xbf16> to vector<128x128xbf16>
    %cst_32 = arith.constant dense<0.000000e+00> : vector<256x128xf32>
    %61 = tpu.matmul %58, %60, %cst_32 {dimension_numbers = #tpu.dot_dimension_numbers<[1], [0], [0], [1], [0, 0, 1, 1], [], []>} : vector<256x128xbf16>, vector<128x128xbf16>, vector<256x128xf32> -> vector<256x128xf32>
    %62 = arith.addf %56, %61 : vector<256x128xf32>
    %63 = vector.extract_strided_slice %37 {offsets = [1, 1, 0], sizes = [16, 16, 128], strides = [1, 1, 1]} : vector<18x18x128xbf16> to vector<16x16x128xbf16>
    %64 = vector.shape_cast %63 : vector<16x16x128xbf16> to vector<256x128xbf16>
    %c4 = arith.constant 4 : index
    %c0_33 = arith.constant 0 : index
    %c0_34 = arith.constant 0 : index
    %65 = vector.load %arg5[%c4, %c0_33, %c0_34] : memref<9x128x128xbf16, #tpu.memory_space<vmem>>, vector<1x128x128xbf16>
    %66 = vector.shape_cast %65 : vector<1x128x128xbf16> to vector<128x128xbf16>
    %cst_35 = arith.constant dense<0.000000e+00> : vector<256x128xf32>
    %67 = tpu.matmul %64, %66, %cst_35 {dimension_numbers = #tpu.dot_dimension_numbers<[1], [0], [0], [1], [0, 0, 1, 1], [], []>} : vector<256x128xbf16>, vector<128x128xbf16>, vector<256x128xf32> -> vector<256x128xf32>
    %68 = arith.addf %62, %67 : vector<256x128xf32>
    %69 = vector.extract_strided_slice %37 {offsets = [1, 2, 0], sizes = [16, 16, 128], strides = [1, 1, 1]} : vector<18x18x128xbf16> to vector<16x16x128xbf16>
    %70 = vector.shape_cast %69 : vector<16x16x128xbf16> to vector<256x128xbf16>
    %c5 = arith.constant 5 : index
    %c0_36 = arith.constant 0 : index
    %c0_37 = arith.constant 0 : index
    %71 = vector.load %arg5[%c5, %c0_36, %c0_37] : memref<9x128x128xbf16, #tpu.memory_space<vmem>>, vector<1x128x128xbf16>
    %72 = vector.shape_cast %71 : vector<1x128x128xbf16> to vector<128x128xbf16>
    %cst_38 = arith.constant dense<0.000000e+00> : vector<256x128xf32>
    %73 = tpu.matmul %70, %72, %cst_38 {dimension_numbers = #tpu.dot_dimension_numbers<[1], [0], [0], [1], [0, 0, 1, 1], [], []>} : vector<256x128xbf16>, vector<128x128xbf16>, vector<256x128xf32> -> vector<256x128xf32>
    %74 = arith.addf %68, %73 : vector<256x128xf32>
    %75 = vector.extract_strided_slice %37 {offsets = [2, 0, 0], sizes = [16, 16, 128], strides = [1, 1, 1]} : vector<18x18x128xbf16> to vector<16x16x128xbf16>
    %76 = vector.shape_cast %75 : vector<16x16x128xbf16> to vector<256x128xbf16>
    %c6 = arith.constant 6 : index
    %c0_39 = arith.constant 0 : index
    %c0_40 = arith.constant 0 : index
    %77 = vector.load %arg5[%c6, %c0_39, %c0_40] : memref<9x128x128xbf16, #tpu.memory_space<vmem>>, vector<1x128x128xbf16>
    %78 = vector.shape_cast %77 : vector<1x128x128xbf16> to vector<128x128xbf16>
    %cst_41 = arith.constant dense<0.000000e+00> : vector<256x128xf32>
    %79 = tpu.matmul %76, %78, %cst_41 {dimension_numbers = #tpu.dot_dimension_numbers<[1], [0], [0], [1], [0, 0, 1, 1], [], []>} : vector<256x128xbf16>, vector<128x128xbf16>, vector<256x128xf32> -> vector<256x128xf32>
    %80 = arith.addf %74, %79 : vector<256x128xf32>
    %81 = vector.extract_strided_slice %37 {offsets = [2, 1, 0], sizes = [16, 16, 128], strides = [1, 1, 1]} : vector<18x18x128xbf16> to vector<16x16x128xbf16>
    %82 = vector.shape_cast %81 : vector<16x16x128xbf16> to vector<256x128xbf16>
    %c7 = arith.constant 7 : index
    %c0_42 = arith.constant 0 : index
    %c0_43 = arith.constant 0 : index
    %83 = vector.load %arg5[%c7, %c0_42, %c0_43] : memref<9x128x128xbf16, #tpu.memory_space<vmem>>, vector<1x128x128xbf16>
    %84 = vector.shape_cast %83 : vector<1x128x128xbf16> to vector<128x128xbf16>
    %cst_44 = arith.constant dense<0.000000e+00> : vector<256x128xf32>
    %85 = tpu.matmul %82, %84, %cst_44 {dimension_numbers = #tpu.dot_dimension_numbers<[1], [0], [0], [1], [0, 0, 1, 1], [], []>} : vector<256x128xbf16>, vector<128x128xbf16>, vector<256x128xf32> -> vector<256x128xf32>
    %86 = arith.addf %80, %85 : vector<256x128xf32>
    %87 = vector.extract_strided_slice %37 {offsets = [2, 2, 0], sizes = [16, 16, 128], strides = [1, 1, 1]} : vector<18x18x128xbf16> to vector<16x16x128xbf16>
    %88 = vector.shape_cast %87 : vector<16x16x128xbf16> to vector<256x128xbf16>
    %c8 = arith.constant 8 : index
    %c0_45 = arith.constant 0 : index
    %c0_46 = arith.constant 0 : index
    %89 = vector.load %arg5[%c8, %c0_45, %c0_46] : memref<9x128x128xbf16, #tpu.memory_space<vmem>>, vector<1x128x128xbf16>
    %90 = vector.shape_cast %89 : vector<1x128x128xbf16> to vector<128x128xbf16>
    %cst_47 = arith.constant dense<0.000000e+00> : vector<256x128xf32>
    %91 = tpu.matmul %88, %90, %cst_47 {dimension_numbers = #tpu.dot_dimension_numbers<[1], [0], [0], [1], [0, 0, 1, 1], [], []>} : vector<256x128xbf16>, vector<128x128xbf16>, vector<256x128xf32> -> vector<256x128xf32>
    %92 = arith.addf %86, %91 : vector<256x128xf32>
    %c0_48 = arith.constant 0 : index
    %c0_49 = arith.constant 0 : index
    %93 = vector.load %arg6[%c0_48, %c0_49] : memref<1x128xf32, #tpu.memory_space<vmem>>, vector<1x128xf32>
    %94 = vector.broadcast %93 : vector<1x128xf32> to vector<256x128xf32>
    %95 = arith.addf %92, %94 : vector<256x128xf32>
    %cst_50 = arith.constant 0.000000e+00 : f32
    %96 = vector.broadcast %cst_50 : f32 to vector<256x128xf32>
    %97 = arith.subf %96, %95 : vector<256x128xf32>
    %98 = math.exp %97 : vector<256x128xf32>
    %cst_51 = arith.constant 1.000000e+00 : f32
    %99 = vector.broadcast %cst_51 : f32 to vector<256x128xf32>
    %100 = arith.addf %99, %98 : vector<256x128xf32>
    %cst_52 = arith.constant 1.000000e+00 : f32
    %101 = vector.broadcast %cst_52 : f32 to vector<256x128xf32>
    %102 = arith.divf %101, %100 : vector<256x128xf32>
    %103 = vector.shape_cast %102 : vector<256x128xf32> to vector<1x16x16x128xf32>
    %c0_53 = arith.constant 0 : index
    %c0_54 = arith.constant 0 : index
    %c0_55 = arith.constant 0 : index
    %c0_56 = arith.constant 0 : index
    %104 = vector.load %arg9[%c0_53, %c0_54, %c0_55, %c0_56] : memref<1x16x16x128xf32, #tpu.memory_space<vmem>>, vector<1x16x16x128xf32>
    tpu.vector_store %arg9[%c0_53, %c0_54, %c0_55, %c0_56], %103 {strides = array<i32>} : memref<1x16x16x128xf32, #tpu.memory_space<vmem>>, vector<1x16x16x128xf32>,
    return
  }
  func.func @transform_0(%arg0: i32, %arg1: i32) -> (i32, i32, i32, i32) {
    %c16_i32 = arith.constant 16 : i32
    %0 = arith.muli %arg1, %c16_i32 : i32
    %c1_i32 = arith.constant 1 : i32
    %1 = arith.subi %0, %c1_i32 : i32
    %c0_i32 = arith.constant 0 : i32
    %2 = arith.maxsi %1, %c0_i32 : i32
    %c0_i32_0 = arith.constant 0 : i32
    %c0_i32_1 = arith.constant 0 : i32
    %c0_i32_2 = arith.constant 0 : i32
    return %arg0, %2, %c0_i32_0, %c0_i32_1 : i32, i32, i32, i32
  }
  func.func @transform_1(%arg0: i32, %arg1: i32) -> (i32, i32, i32, i32) {
    %c0_i32 = arith.constant 0 : i32
    %c0_i32_0 = arith.constant 0 : i32
    %c0_i32_1 = arith.constant 0 : i32
    return %arg0, %arg1, %c0_i32, %c0_i32_0 : i32, i32, i32, i32
  }
  func.func @transform_2(%arg0: i32, %arg1: i32) -> (i32, i32, i32, i32) {
    %c1_i32 = arith.constant 1 : i32
    %0 = arith.addi %arg1, %c1_i32 : i32
    %c16_i32 = arith.constant 16 : i32
    %1 = arith.muli %0, %c16_i32 : i32
    %c15_i32 = arith.constant 15 : i32
    %2 = arith.minsi %1, %c15_i32 : i32
    %c0_i32 = arith.constant 0 : i32
    %c0_i32_0 = arith.constant 0 : i32
    %c0_i32_1 = arith.constant 0 : i32
    return %arg0, %2, %c0_i32, %c0_i32_0 : i32, i32, i32, i32
  }
  func.func @transform_3(%arg0: i32, %arg1: i32) -> (i32, i32, i32) {
    %c0_i32 = arith.constant 0 : i32
    %c0_i32_0 = arith.constant 0 : i32
    %c0_i32_1 = arith.constant 0 : i32
    %c0_i32_2 = arith.constant 0 : i32
    return %c0_i32, %c0_i32_0, %c0_i32_1 : i32, i32, i32
  }
  func.func @transform_4(%arg0: i32, %arg1: i32) -> (i32, i32) {
    %c0_i32 = arith.constant 0 : i32
    %c0_i32_0 = arith.constant 0 : i32
    %c0_i32_1 = arith.constant 0 : i32
    return %c0_i32, %c0_i32_0 : i32, i32
  }
  func.func @transform_5(%arg0: i32, %arg1: i32) -> (i32, i32) {
    %c0_i32 = arith.constant 0 : i32
    %c0_i32_0 = arith.constant 0 : i32
    %c0_i32_1 = arith.constant 0 : i32
    return %c0_i32, %c0_i32_0 : i32, i32
  }
  func.func @transform_6(%arg0: i32, %arg1: i32) -> (i32, i32) {
    %c0_i32 = arith.constant 0 : i32
    %c0_i32_0 = arith.constant 0 : i32
    %c0_i32_1 = arith.constant 0 : i32
    return %c0_i32, %c0_i32_0 : i32, i32
  }
  func.func @transform_7(%arg0: i32, %arg1: i32) -> (i32, i32, i32, i32) {
    %c0_i32 = arith.constant 0 : i32
    %c0_i32_0 = arith.constant 0 : i32
    %c0_i32_1 = arith.constant 0 : i32
    return %arg0, %arg1, %c0_i32, %c0_i32_0 : i32, i32, i32, i32
  }
}

</mosaic_0001>

<bundles_post_ra>
// kernel: _lambda_.19
= control target key start
LH: loop header
LB: loop body
LE: loop exit
PB: predicated region body
PF: predicated region fallthrough
CT: control target
= control target key end

     0   :  { %s5795_s23 = smov 0   ;;  %s5797_s24 = smov 0   ;;  %s7023_s0 = inlined_call_operand.vmem [shape: bf16[2,16,16,128], index: 0, kind: input, shape index: {}, may-alias: {0,1,2}]   ;;  %s7024_s1 = inlined_call_operand.vmem [shape: bf16[2,16,16,128], index: 1, kind: input, shape index: {}, may-alias: {0,1,2}]   ;;  %s7025_s2 = inlined_call_operand.vmem [shape: bf16[2,16,16,128], index: 2, kind: input, shape index: {}, may-alias: {0,1,2}]   ;;  %s7026_s3 = inlined_call_operand.vmem [shape: bf16[9,128,128], index: 3, kind: input, shape index: {}]   ;;  %s7027_s4 = inlined_call_operand.vmem [shape: f32[1,128], index: 4, kind: input, shape index: {}]   ;;  %s7028_s5 = inlined_call_operand.vmem [shape: f32[1,128], index: 5, kind: input, shape index: {}]   ;;  %s7029_s6 = inlined_call_operand.vmem [shape: f32[1,128], index: 6, kind: input, shape index: {}]   ;;  %s7030_s7 = inlined_call_operand.vmem [shape: f32[2,16,16,128], index: 7, kind: output, shape index: {}]  }
   0x1   :  { %s5799_s2 = smov 0  }
   0x2 LB: > { %s29_s25 = sadd.s32 1, %s5747_s24  ;;  %p4083_p0 = scmp.ge.s32.totalorder %s5751_s2, 1  ;;  %s5751_s2 = sphi %s5799_s2, %s17_s2   ;;  %s5747_s24 = sphi %s5797_s24, %s7105_s24   ;;  %s5743_s23 = sphi %s5795_s23, %s7104_s23  }
   0x3   : > { %p31_p1 = scmp.ge.s32.totalorder %s29_s25, 2  ;;  %p323_p2 = scmp.lt.s32.totalorder %s5751_s2, 3 }
   0x5   : > { %s7107_s25 = smov (%p31_p1, %s29_s25), 0  ;;  %p324_p3 = pnand %p4083_p0, %p323_p2 }
   0x7   : > { %327 = sbr.rel (%p324_p3) target bundleno = 609 (0x261), region = 48 }
   0xe   : > { %v5519_v0 = vld [vmem:[%s7026_s3 + $0x40] sm:$0xff]   ;;  %vm896_vm0 = vcmask 1040384   ;;  %v5521_v2 = vld [vmem:[%s7026_s3 + $0x48] sm:$0xff]   ;;  %v5753_v3 = vmov 0.0   ;;  %p409_p4 = scmp.lt.s32.totalorder %s5743_s23, 1  ;;  %v5523_v6 = vld [vmem:[%s7026_s3 + $0x50] sm:$0xff]  }
   0xf   : > { %v5520_v1 = vld [vmem:[%s7026_s3 + $0x100] sm:$0xff]   ;;  %4789 = vmatprep.subr.bf16.mxu1 %v5519_v0  ;;  %v5824_v4 = vrot.slane %v5753_v3, 7  ;;  %v5522_v5 = vld [vmem:[%s7026_s3 + $0x108] sm:$0xff]   ;;  %v5524_v8 = vld [vmem:[%s7026_s3 + $0x110] sm:$0xff]   ;;  %vm1093_vm1 = vsmask.f32 7424 }
  0x10   : > { %4981 = vmatprep.subr.bf16.mxu0 %v5520_v1  ;;  %4790 = vmatpush3.bf16.msra.mxu1 %v5519_v0  ;;  %v5525_v12 = vld [vmem:[%s7026_s3 + $0x58] sm:$0xff]   ;;  %s7109_s23 = smov (!%p409_p4, %s5743_s23), 1  ;;  %v5527_v18 = vld [vmem:[%s7026_s3 + $0x60] sm:$0xff]   ;;  %v5529_v22 = vld [vmem:[%s7026_s3 + $0x68] sm:$0xff]   ;;  %vm1769_vm14 = vcmask 1046528  }
  0x11   : > { %4982 = vmatpush3.bf16.msra.mxu0 %v5520_v1  ;;  %4791 = vmatprep.subr.bf16.mxu1 %v5521_v2  ;;  %v1005_v7 = vsel %vm896_vm0, 0.0, %v5824_v4  ;;  %v1023_v9 = vsel %vm896_vm0, %v5824_v4, 0.0  ;;  %v5526_v13 = vld [vmem:[%s7026_s3 + $0x118] sm:$0xff]   ;;  %s4490_s21 = sshll.u32 %s7109_s23, 7  ;;  %v5528_v19 = vld [vmem:[%s7026_s3 + $0x120] sm:$0xff]   ;;  %v5530_v23 = vld [vmem:[%s7026_s3 + $0x128] sm:$0xff]  }
  0x12   : > { %4983 = vmatprep.subr.bf16.mxu0 %v5522_v5  ;;  %v5841_v10 = vpack.c.bf16 %v5824_v4, %v1005_v7  ;;  %v5843_v11 = vpack.c.bf16 %v1023_v9, %v1023_v9  ;;  %s5867_s28 = scalar_lea.vmem %s7024_s1, %s4490_s21  ;;  %v5879_v25 = vld [vmem:[%s7028_s5] ss:$0 sm:$0xff]  ;;  %v5531_v35 = vld [vmem:[%s7026_s3 + $0x70] sm:$0xff]   ;;  %v5533_v48 = vld [vmem:[%s7026_s3 + $0x78] sm:$0xff]   ;;  %s4493_s12 = sshll.u32 %s7109_s23, 8 }
  0x13   : > { %v4495_v24 = vld [vmem:[%s5867_s28] sm:$0xff]   ;;  %v4558_v30 = vld [vmem:[%s5867_s28 + $0x8] sm:$0xff]   ;;  %v4559_v36 = vld [vmem:[%s5867_s28 + $0x10] sm:$0xff]   ;;  %s6930_s14 = scalar_lea.vmem %s7030_s7, %s4493_s12 }
  0x14   : > { %4792 = vmatpush3.bf16.msra.mxu1 %v5521_v2  ;;  %v1097_v14 = vshll.u32 %v5841_v10, 16  ;;  %v1095_v15 = vshrl.u32 %v5841_v10, 16  ;;  %v1102_v16 = vshll.u32 %v5843_v11, 16  ;;  %v4496_v27 = vunpack.c.l.bf16 %v4495_v24  ;;  %v5887_v29 = vld [vmem:[%s7029_s6] ss:$0 sm:$0xff]  ;;  %v5532_v37 = vld [vmem:[%s7026_s3 + $0x130] sm:$0xff]  }
  0x15   : > { %4984 = vmatpush3.bf16.msra.mxu0 %v5522_v5  ;;  %4793 = vmatprep.subr.bf16.mxu1 %v5523_v6  ;;  %v4497_v28 = vunpack.c.h.bf16 %v4495_v24  ;;  %v4500_v33 = vunpack.c.l.bf16 %v4558_v30  ;;  %v4501_v34 = vunpack.c.h.bf16 %v4558_v30  ;;  %v4560_v42 = vld [vmem:[%s5867_s28 + $0x18] sm:$0xff]   ;;  %v4504_v43 = vunpack.c.l.bf16 %v4559_v36  ;;  %v5535_v3 = vld [vmem:[%s7026_s3] sm:$0xff]  }
  0x16   : > { %4985 = vmatprep.subr.bf16.mxu0 %v5524_v8  ;;  %v1099_v17 = vrot.slane %v1097_v14, 1  ;;  %v1104_v21 = vrot.slane %v1102_v16, 1  ;;  %v529_v31 = vmul.f32 %v4496_v27, %v5879_v25  ;;  %v4505_v44 = vunpack.c.h.bf16 %v4559_v36  ;;  %v5534_v53 = vld [vmem:[%s7026_s3 + $0x138] sm:$0xff]  }
  0x17   : > { %v530_v32 = vmul.f32 %v4497_v28, %v5879_v25  ;;  %v531_v40 = vmul.f32 %v4500_v33, %v5879_v25  ;;  %v532_v41 = vmul.f32 %v4501_v34, %v5879_v25  ;;  %v4508_v45 = vunpack.c.l.bf16 %v4560_v42 }
  0x18   : > { %4794 = vmatpush3.bf16.msra.mxu1 %v5523_v6  ;;  %v1100_v20 = vor.u32 %v1099_v17, %v1095_v15  ;;  %v572_v38 = vadd.f32 %v5887_v29, %v529_v31  ;;  %v533_v51 = vmul.f32 %v4504_v43, %v5879_v25  ;;  %v4509_v52 = vunpack.c.h.bf16 %v4560_v42 }
  0x19   : > { %4986 = vmatpush3.bf16.msra.mxu0 %v5524_v8  ;;  %4795 = vmatprep.subr.bf16.mxu1 %v5525_v12  ;;  %v573_v39 = vadd.f32 %v5887_v29, %v530_v32  ;;  %v574_v49 = vadd.f32 %v5887_v29, %v531_v40  ;;  %v575_v50 = vadd.f32 %v5887_v29, %v532_v41 }
  0x1a   : > { %4987 = vmatprep.subr.bf16.mxu0 %v5526_v13  ;;  %v5882_v26 = vsel %vm1093_vm1, %v1100_v20, %v1104_v21  ;;  %vm608_vm2 = vcmp.ge.f32.partialorder %v572_v38, 0.0  ;;  %v644_v46 = vmul.f32 0.2, %v572_v38  ;;  %v534_v56 = vmul.f32 %v4505_v44, %v5879_v25 }
  0x1b   : > { %7062 = vst [vmem:[#allocation2_spill] sm:$0xff] %v5882_v26  ;;  %4805 = vmatprep.mubr.bf16.mxu1 %v5882_v26  ;;  %vm609_vm3 = vcmp.ge.f32.partialorder %v573_v39, 0.0  ;;  %v645_v47 = vmul.f32 0.2, %v573_v39  ;;  %v535_v57 = vmul.f32 %v4508_v45, %v5879_v25  ;;  %vm610_vm4 = vcmp.ge.f32.partialorder %v574_v49, 0.0  ;;  %v4567_v26 = vld [vmem:[%s5867_s28 + $0x50] sm:$0xff]  }
  0x1c   : > { %4796 = vmatpush3.bf16.msra.mxu1 %v5525_v12  ;;  %v680_v54 = vsel %vm608_vm2, %v572_v38, %v644_v46  ;;  %vm611_vm5 = vcmp.ge.f32.partialorder %v575_v50, 0.0  ;;  %v646_v60 = vmul.f32 0.2, %v574_v49  ;;  %v647_v61 = vmul.f32 0.2, %v575_v50  ;;  %v5935_v12 = vld [vmem:[%s7026_s3 + $0x140] sm:$0xff]  }
  0x1d   : > { %4988 = vmatpush3.bf16.msra.mxu0 %v5526_v13  ;;  %4797 = vmatprep.subr.bf16.mxu1 %v5527_v18  ;;  %v681_v55 = vsel %vm609_vm3, %v573_v39, %v645_v47  ;;  %v900_v58 = vrot.slane %v680_v54, 7  ;;  %v576_v62 = vadd.f32 %v5887_v29, %v533_v51  ;;  %v577_v63 = vadd.f32 %v5887_v29, %v534_v56  ;;  %v4561_v39 = vld [vmem:[%s5867_s28 + $0x20] sm:$0xff]   ;;  %v5537_v51 = vld [vmem:[%s7026_s3 + $0x148] sm:$0xff]  }
  0x1e   : > { %4989 = vmatprep.subr.bf16.mxu0 %v5528_v19  ;;  %v901_v59 = vrot.slane %v681_v55, 7  ;;  %v536_v5 = vmul.f32 %v4509_v52, %v5879_v25  ;;  %v682_v9 = vsel %vm610_vm4, %v574_v49, %v646_v60  ;;  %v683_v13 = vsel %vm611_vm5, %v575_v50, %v647_v61  ;;  %v5541_v55 = vld [vmem:[%s7026_s3 + $0x10] sm:$0xff]   ;;  %v4562_v56 = vld [vmem:[%s5867_s28 + $0x28] sm:$0xff]  }
  0x1f   : > { %v1006_v1 = vsel %vm896_vm0, 0.0, %v900_v58  ;;  %v5938_v14 = vrot.slane %v682_v9, 7  ;;  %vm612_vm6 = vcmp.ge.f32.partialorder %v576_v62, 0.0  ;;  %vm613_vm7 = vcmp.ge.f32.partialorder %v577_v63, 0.0  ;;  %v5993_v61 = vld [vmem:[%s5867_s28 + $0x30] sm:$0xff]  }
  0x20   : > { %4798 = vmatpush3.bf16.msra.mxu1 %v5527_v18  ;;  %v902_v0 = vsel %vm896_vm0, %v900_v58, %v901_v59  ;;  %v1024_v2 = vsel %vm896_vm0, %v901_v59, 0.0  ;;  %v904_v18 = vrot.slane %v683_v13, 7  ;;  %v648_v20 = vmul.f32 0.2, %v576_v62 }
  0x21   : > { %4990 = vmatpush3.bf16.msra.mxu0 %v5528_v19  ;;  %4799 = vmatprep.subr.bf16.mxu1 %v5529_v22  ;;  %v5925_v6 = vpack.c.bf16 %v902_v0, %v1006_v1  ;;  %v5927_v7 = vpack.c.bf16 %v1024_v2, %v1024_v2  ;;  %v5929_v8 = vpack.c.bf16 %v902_v0, %v900_v58  ;;  %v1007_v19 = vsel %vm896_vm0, 0.0, %v5938_v14 }
  0x22   : > { %4991 = vmatprep.subr.bf16.mxu0 %v5530_v23  ;;  %v649_v21 = vmul.f32 0.2, %v577_v63  ;;  %v5948_v27 = vsel %vm896_vm0, %v5938_v14, %v904_v18  ;;  %v1025_v28 = vsel %vm896_vm0, %v904_v18, 0.0  ;;  %v684_v32 = vsel %vm612_vm6, %v576_v62, %v648_v20 }
  0x23   : > { %v1107_v15 = vshrl.u32 %v5925_v6, 16  ;;  %v1109_v16 = vshll.u32 %v5925_v6, 16  ;;  %v1114_v17 = vshll.u32 %v5927_v7, 16  ;;  %v5953_v30 = vpack.c.bf16 %v5948_v27, %v1007_v19 }
  0x24   : > { %4800 = vmatpush3.bf16.msra.mxu1 %v5529_v22  ;;  %v578_v22 = vadd.f32 %v5887_v29, %v535_v57  ;;  %v5955_v31 = vpack.c.bf16 %v1025_v28, %v1025_v28  ;;  %v685_v33 = vsel %vm613_vm7, %v577_v63, %v649_v21  ;;  %v579_v38 = vadd.f32 %v5887_v29, %v536_v5  ;;  %v5544_v28 = vld [vmem:[%s7026_s3 + $0x18] sm:$0xff]  }
  0x25   : > { %4992 = vmatpush3.bf16.msra.mxu0 %v5530_v23  ;;  %4801 = vmatprep.subr.bf16.mxu1 %v5531_v35  ;;  %v1111_v23 = vrot.slane %v1109_v16, 1  ;;  %v1116_v24 = vrot.slane %v1114_v17, 1  ;;  %v907_v36 = vrot.slane %v685_v33, 7  ;;  %v1119_v40 = vshrl.u32 %v5953_v30, 16 }
  0x26   : > { %4993 = vmatprep.subr.bf16.mxu0 %v5532_v37  ;;  %v1121_v41 = vshll.u32 %v5953_v30, 16  ;;  %v1126_v42 = vshll.u32 %v5955_v31, 16  ;;  %vm614_vm8 = vcmp.ge.f32.partialorder %v578_v22, 0.0  ;;  %vm615_vm9 = vcmp.ge.f32.partialorder %v579_v38, 0.0 }
  0x27   : > { %v1112_v34 = vor.u32 %v1111_v23, %v1107_v15  ;;  %v1026_v46 = vsel %vm896_vm0, %v907_v36, 0.0  ;;  %v650_v52 = vmul.f32 0.2, %v578_v22  ;;  %v4512_v54 = vunpack.c.l.bf16 %v4561_v39 }
  0x28   : > { %4802 = vmatpush3.bf16.msra.mxu1 %v5531_v35  ;;  %v5959_v35 = vrot.slane %v684_v32, 7  ;;  %v1123_v47 = vrot.slane %v1121_v41, 1  ;;  %v5980_v50 = vpack.c.bf16 %v1026_v46, %v1026_v46  ;;  %v4513_v0 = vunpack.c.h.bf16 %v4561_v39 }
  0x29   : > { %4994 = vmatpush3.bf16.msra.mxu0 %v5532_v37  ;;  %4803 = vmatprep.subr.bf16.mxu1 %v5533_v48  ;;  %v5538_v37 = vld [vmem:[%s7026_s3 + $0x8] sm:$0xff]   ;;  %v1117_v43 = vsel %vm1093_vm1, %v1112_v34, %v1116_v24  ;;  %v686_v62 = vsel %vm614_vm8, %v578_v22, %v650_v52  ;;  %v537_v1 = vmul.f32 %v4512_v54, %v5879_v25  ;;  %v4516_v17 = vunpack.c.l.bf16 %v4562_v56  ;;  %v5539_v24 = vld [vmem:[%s7026_s3 + $0x150] sm:$0xff]  }
  0x2a   : > { %4995 = vmatprep.subr.bf16.mxu0 %v5534_v53  ;;  %v5972_v44 = vsel %vm896_vm0, %v5959_v35, %v907_v36  ;;  %v1008_v45 = vsel %vm896_vm0, 0.0, %v5959_v35  ;;  %4997 = vmatprep.mubr.bf16.mxu0 %v1117_v43  ;;  %v1124_v57 = vor.u32 %v1123_v47, %v1119_v40  ;;  %v1138_v60 = vshll.u32 %v5980_v50, 16 }
  0x2b   : > { %v5978_v49 = vpack.c.bf16 %v5972_v44, %v1008_v45  ;;  %v6000_v9 = vrot.slane %v686_v62, 7  ;;  %v538_v15 = vmul.f32 %v4513_v0, %v5879_v25  ;;  %v580_v16 = vadd.f32 %v5887_v29, %v537_v1  ;;  %v5540_v45 = vld [vmem:[%s7026_s3 + $0x158] sm:$0xff]   ;;  %v5549_v1 = vld [vmem:[%s7026_s3 + $0x28] sm:$0xff]  }
  0x2c   : > { %4804 = vmatpush3.bf16.msra.mxu1 %v5533_v48  ;;  %v1128_v48 = vrot.slane %v1126_v42, 1  ;;  %v1140_v5 = vrot.slane %v1138_v60, 1  ;;  %v4517_v20 = vunpack.c.h.bf16 %v4562_v56  ;;  %v4520_v21 = vunpack.c.l.bf16 %v5993_v61  ;;  %v4564_v60 = vld [vmem:[%s5867_s28 + $0x38] sm:$0xff]  }
  0x2d   : > { %4996 = vmatpush3.bf16.msra.mxu0 %v5534_v53  ;;  %4837 = vmatprep.subr.bf16.mxu1 %v5535_v3  ;;  %v651_v53 = vmul.f32 0.2, %v579_v38  ;;  %v1131_v58 = vshrl.u32 %v5978_v49, 16  ;;  %v1133_v59 = vshll.u32 %v5978_v49, 16  ;;  %v1009_v19 = vsel %vm896_vm0, 0.0, %v6000_v9 }
  0x2e   : > { %5029 = vmatprep.subr.bf16.mxu0 %v5935_v12  ;;  %v5998_v2 = vsel %vm1093_vm1, %v1124_v57, %v1128_v48  ;;  %vm616_vm10 = vcmp.ge.f32.partialorder %v580_v16, 0.0  ;;  %v652_v36 = vmul.f32 0.2, %v580_v16  ;;  %v540_v39 = vmul.f32 %v4517_v20, %v5879_v25 }
  0x2f   : > { %4806 = vmatmul.mubr.bf16.vlgmr.msra.gmra.mrb[0].mxu1 %v1117_v43  ;;  %v687_v63 = vsel %vm615_vm9, %v579_v38, %v651_v53  ;;  %7063 = vst [vmem:[#allocation3_spill] sm:$0xff] %v5998_v2  ;;  %v539_v38 = vmul.f32 %v4516_v17, %v5879_v25  ;;  %v4521_v56 = vunpack.c.h.bf16 %v5993_v61 }
  0x30   : > { %4838 = vmatpush3.bf16.msra.mxu1 %v5535_v3  ;;  %v1135_v3 = vrot.slane %v1133_v59, 1  ;;  %4998 = vmatmul.mubr.bf16.vlgmr.msra.gmra.mrb[0].mxu0 %v5998_v2  ;;  %v910_v13 = vrot.slane %v687_v63, 7  ;;  %v688_v43 = vsel %vm616_vm10, %v580_v16, %v652_v36  ;;  %v5542_v59 = vld [vmem:[%s7026_s3 + $0x160] sm:$0xff]  }
  0x31   : > { %4839 = vmatprep.subr.bf16.mxu1 %v5538_v37  ;;  %4809 = vmatprep.mubr.bf16.mxu1 %v5998_v2  ;;  %v6041_v47 = vrot.slane %v688_v43, 7  ;;  %v582_v48 = vadd.f32 %v5887_v29, %v539_v38 }
  0x32   : > { %5030 = vmatpush3.bf16.msra.mxu0 %v5935_v12  ;;  %v1136_v18 = vor.u32 %v1135_v3, %v1131_v58  ;;  %v6012_v22 = vsel %vm896_vm0, %v6000_v9, %v910_v13  ;;  %v1027_v23 = vsel %vm896_vm0, %v910_v13, 0.0  ;;  %v581_v12 = vadd.f32 %v5887_v29, %v538_v15 }
  0x33   : > { %5031 = vmatprep.subr.bf16.mxu0 %v5537_v51  ;;  %v6026_v33 = vpack.c.bf16 %v6012_v22, %v1009_v19  ;;  %v6028_v34 = vpack.c.bf16 %v1027_v23, %v1027_v23  ;;  %v1010_v57 = vsel %vm896_vm0, 0.0, %v6041_v47  ;;  %vm618_vm12 = vcmp.ge.f32.partialorder %v582_v48, 0.0 }
  0x34   : > { %4840 = vmatpush3.bf16.msra.mxu1 %v5538_v37  ;;  %v6023_v32 = vsel %vm1093_vm1, %v1136_v18, %v1140_v5  ;;  %vm617_vm11 = vcmp.ge.f32.partialorder %v581_v12, 0.0  ;;  %v653_v37 = vmul.f32 0.2, %v581_v12  ;;  %v654_v58 = vmul.f32 0.2, %v582_v48 }
  0x35   : > { %4841 = vmatprep.subr.bf16.mxu1 %v5541_v55  ;;  %7064 = vst [vmem:[#allocation4_spill] sm:$0xff] %v6023_v32  ;;  %5001 = vmatprep.mubr.bf16.mxu0 %v6023_v32  ;;  %v1143_v40 = vshrl.u32 %v6026_v33, 16  ;;  %v1145_v41 = vshll.u32 %v6026_v33, 16  ;;  %v1150_v42 = vshll.u32 %v6028_v34, 16  ;;  %v541_v15 = vmul.f32 %v4520_v21, %v5879_v25 }
  0x36   : > { %5032 = vmatpush3.bf16.msra.mxu0 %v5537_v51  ;;  %v689_v46 = vsel %vm617_vm11, %v581_v12, %v653_v37  ;;  %v583_v51 = vadd.f32 %v5887_v29, %v540_v39  ;;  %v690_v13 = vsel %vm618_vm12, %v582_v48, %v654_v58  ;;  %v542_v19 = vmul.f32 %v4521_v56, %v5879_v25 }
  0x37   : > { %4810 = vmatmul.mubr.bf16.gmra.mrb[4].mxu1 %v6023_v32  ;;  %5033 = vmatprep.subr.bf16.mxu0 %v5539_v24  ;;  %v1147_v52 = vrot.slane %v1145_v41, 1  ;;  %v1152_v53 = vrot.slane %v1150_v42, 1  ;;  %v913_v54 = vrot.slane %v689_v46, 7  ;;  %v6073_v18 = vrot.slane %v690_v13, 7  ;;  %v5543_v42 = vld [vmem:[%s7026_s3 + $0x168] sm:$0xff]  }
  0x38   : > { %4842 = vmatpush3.bf16.msra.mxu1 %v5541_v55  ;;  %v5547_v55 = vld [vmem:[%s7026_s3 + $0x20] sm:$0xff]   ;;  %vm619_vm13 = vcmp.ge.f32.partialorder %v583_v51, 0.0  ;;  %v655_v0 = vmul.f32 0.2, %v583_v51  ;;  %v585_v36 = vadd.f32 %v5887_v29, %v542_v19  ;;  %v4524_v37 = vunpack.c.l.bf16 %v4564_v60 }
  0x39   : > { %4843 = vmatprep.subr.bf16.mxu1 %v5544_v28  ;;  %v1148_v62 = vor.u32 %v1147_v52, %v1143_v40  ;;  %v6057_v61 = vsel %vm896_vm0, %v6041_v47, %v913_v54  ;;  %v1028_v63 = vsel %vm896_vm0, %v913_v54, 0.0  ;;  %v1011_v12 = vsel %vm896_vm0, 0.0, %v6073_v18  ;;  %v5551_v54 = vld [vmem:[%s7026_s3 + $0x30] sm:$0xff]  }
  0x3a   : > { %5034 = vmatpush3.bf16.msra.mxu0 %v5539_v24  ;;  %v6064_v3 = vpack.c.bf16 %v6057_v61, %v1010_v57  ;;  %v6066_v5 = vpack.c.bf16 %v1028_v63, %v1028_v63  ;;  %v691_v17 = vsel %vm619_vm13, %v583_v51, %v655_v0  ;;  %vm621_vm2 = vcmp.ge.f32.partialorder %v585_v36, 0.0 }
  0x3b   : > { %5035 = vmatprep.subr.bf16.mxu0 %v5540_v45  ;;  %v6070_v16 = vsel %vm1093_vm1, %v1148_v62, %v1152_v53  ;;  %v916_v24 = vrot.slane %v691_v17, 7  ;;  %v657_v51 = vmul.f32 0.2, %v585_v36  ;;  %v4525_v52 = vunpack.c.h.bf16 %v4564_v60  ;;  %v5545_v53 = vld [vmem:[%s7026_s3 + $0x170] sm:$0xff]   ;;  %v5553_v60 = vld [vmem:[%s7026_s3 + $0x38] sm:$0xff]  }
  0x3c   : > { %4844 = vmatpush3.bf16.msra.mxu1 %v5544_v28  ;;  %7065 = vst [vmem:[#allocation5_spill] sm:$0xff] %v6070_v16  ;;  %5002 = vmatmul.mubr.bf16.gmra.mrb[4].mxu0 %v6070_v16  ;;  %v1155_v20 = vshrl.u32 %v6064_v3, 16  ;;  %v1157_v23 = vshll.u32 %v6064_v3, 16  ;;  %v1162_v21 = vshll.u32 %v6066_v5, 16  ;;  %v584_v28 = vadd.f32 %v5887_v29, %v541_v15 }
  0x3d   : > { %4845 = vmatprep.subr.bf16.mxu1 %v5547_v55  ;;  %4813 = vmatprep.mubr.bf16.mxu1 %v6070_v16  ;;  %v6087_v40 = vsel %vm896_vm0, %v6073_v18, %v916_v24  ;;  %v1029_v41 = vsel %vm896_vm0, %v916_v24, 0.0  ;;  %v543_v58 = vmul.f32 %v4524_v37, %v5879_v25  ;;  %v693_v0 = vsel %vm621_vm2, %v585_v36, %v657_v51 }
  0x3e   : > { %5036 = vmatpush3.bf16.msra.mxu0 %v5540_v45  ;;  %v1159_v38 = vrot.slane %v1157_v23, 1  ;;  %v1164_v39 = vrot.slane %v1162_v21, 1  ;;  %v6094_v43 = vpack.c.bf16 %v6087_v40, %v1011_v12  ;;  %v6096_v45 = vpack.c.bf16 %v1029_v41, %v1029_v41  ;;  %v5546_v23 = vld [vmem:[%s7026_s3 + $0x178] sm:$0xff]   ;;  %v4565_v12 = vld [vmem:[%s5867_s28 + $0x40] sm:$0xff]  }
  0x3f   : > { %5037 = vmatprep.subr.bf16.mxu0 %v5542_v59  ;;  %vm620_vm15 = vcmp.ge.f32.partialorder %v584_v28, 0.0  ;;  %v656_v48 = vmul.f32 0.2, %v584_v28  ;;  %v544_v13 = vmul.f32 %v4525_v52, %v5879_v25  ;;  %v919_v17 = vrot.slane %v693_v0, 7 }
  0x40   : > { %4846 = vmatpush3.bf16.msra.mxu1 %v5547_v55  ;;  %v1160_v46 = vor.u32 %v1159_v38, %v1155_v20  ;;  %v1167_v56 = vshrl.u32 %v6094_v43, 16  ;;  %v1169_v55 = vshll.u32 %v6094_v43, 16  ;;  %v1174_v57 = vshll.u32 %v6096_v45, 16 }
  0x41   : > { %4847 = vmatprep.subr.bf16.mxu1 %v5549_v1  ;;  %v692_v63 = vsel %vm620_vm15, %v584_v28, %v656_v48  ;;  %v586_v19 = vadd.f32 %v5887_v29, %v543_v58  ;;  %v587_v20 = vadd.f32 %v5887_v29, %v544_v13  ;;  %v1773_v21 = vrot.slane %v5925_v6, 1  ;;  %v6132_v28 = vld [vmem:[%s7026_s3 + $0x80] sm:$0xff]  }
  0x42   : > { %5038 = vmatpush3.bf16.msra.mxu0 %v5542_v59  ;;  %v6112_v62 = vsel %vm1093_vm1, %v1160_v46, %v1164_v39  ;;  %v1171_v59 = vrot.slane %v1169_v55, 1  ;;  %v6119_v15 = vrot.slane %v692_v63, 7  ;;  %v1774_v24 = vrot.slane %v5927_v7, 1  ;;  %v4566_v55 = vld [vmem:[%s5867_s28 + $0x48] sm:$0xff]   ;;  %v6162_v13 = vld [vmem:[%s7026_s3 + $0x180] sm:$0xff]  }
  0x43   : > { %7066 = vst [vmem:[#allocation6_spill] sm:$0xff] %v6112_v62  ;;  %5039 = vmatprep.subr.bf16.mxu0 %v5543_v42  ;;  %5005 = vmatprep.mubr.bf16.mxu0 %v6112_v62  ;;  %v1030_v6 = vsel %vm896_vm0, %v919_v17, 0.0  ;;  %vm622_vm3 = vcmp.ge.f32.partialorder %v586_v19, 0.0  ;;  %vm623_vm4 = vcmp.ge.f32.partialorder %v587_v20, 0.0  ;;  %v659_v46 = vmul.f32 0.2, %v587_v20 }
  0x44   : > { %4848 = vmatpush3.bf16.msra.mxu1 %v5549_v1  ;;  %v1176_v1 = vrot.slane %v1174_v57, 1  ;;  %v1172_v36 = vor.u32 %v1171_v59, %v1167_v56  ;;  %v6136_v37 = vsel %vm896_vm0, %v6119_v15, %v919_v17  ;;  %v1012_v38 = vsel %vm896_vm0, 0.0, %v6119_v15 }
  0x45   : > { %4814 = vmatmul.mubr.bf16.gmra.mrb[8].mxu1 %v6112_v62  ;;  %4849 = vmatprep.subr.bf16.mxu1 %v5551_v54  ;;  %v6142_v7 = vpack.c.bf16 %v6136_v37, %v1012_v38  ;;  %v6144_v39 = vpack.c.bf16 %v1030_v6, %v1030_v6  ;;  %v6150_v48 = vsel %vm1769_vm14, %v1773_v21, %v1774_v24  ;;  %v4528_v56 = vunpack.c.l.bf16 %v4565_v12 }
  0x46   : > { %5040 = vmatpush3.bf16.msra.mxu0 %v5543_v42  ;;  %v6147_v41 = vsel %vm1093_vm1, %v1172_v36, %v1176_v1  ;;  %v658_v42 = vmul.f32 0.2, %v586_v19  ;;  %7068 = vst [vmem:[#allocation8_spill] sm:$0xff] %v6150_v48  ;;  %v695_v58 = vsel %vm623_vm4, %v587_v20, %v659_v46  ;;  %v4529_v63 = vunpack.c.h.bf16 %v4565_v12 }
  0x47   : > { %5041 = vmatprep.subr.bf16.mxu0 %v5545_v53  ;;  %7067 = vst [vmem:[#allocation7_spill] sm:$0xff] %v6147_v41  ;;  %5006 = vmatmul.mubr.bf16.gmra.mrb[8].mxu0 %v6147_v41  ;;  %v1179_v51 = vshrl.u32 %v6142_v7, 16  ;;  %v1181_v52 = vshll.u32 %v6142_v7, 16  ;;  %v1776_v0 = vrot.slane %v5953_v30, 1  ;;  %v922_v21 = vrot.slane %v695_v58, 7 }
  0x48   : > { %4850 = vmatpush3.bf16.msra.mxu1 %v5551_v54  ;;  %4817 = vmatprep.mubr.bf16.mxu1 %v6147_v41  ;;  %v1186_v54 = vshll.u32 %v6144_v39, 16  ;;  %v694_v57 = vsel %vm622_vm3, %v586_v19, %v658_v42  ;;  %v545_v19 = vmul.f32 %v4528_v56, %v5879_v25  ;;  %v1777_v30 = vrot.slane %v5955_v31, 1 }
  0x49   : > { %4851 = vmatprep.subr.bf16.mxu1 %v5553_v60  ;;  %v1183_v59 = vrot.slane %v1181_v52, 1  ;;  %v6164_v17 = vrot.slane %v694_v57, 7  ;;  %v4532_v20 = vunpack.c.l.bf16 %v4566_v55  ;;  %v1031_v36 = vsel %vm896_vm0, %v922_v21, 0.0 }
  0x4a   : > { %5042 = vmatpush3.bf16.msra.mxu0 %v5545_v53  ;;  %v1188_v1 = vrot.slane %v1186_v54, 1  ;;  %v546_v53 = vmul.f32 %v4529_v63, %v5879_v25  ;;  %v6180_v6 = vpack.c.bf16 %v1031_v36, %v1031_v36  ;;  %v588_v42 = vadd.f32 %v5887_v29, %v545_v19 }
  0x4b   : > { %5043 = vmatprep.subr.bf16.mxu0 %v5546_v23  ;;  %v1184_v24 = vor.u32 %v1183_v59, %v1179_v51  ;;  %v6172_v12 = vsel %vm896_vm0, %v6164_v17, %v922_v21  ;;  %v6188_v51 = vsel %vm1769_vm14, %v1776_v0, %v1777_v30  ;;  %v4533_v52 = vunpack.c.h.bf16 %v4566_v55 }
  0x4c   : > { %4852 = vmatpush3.bf16.msra.mxu1 %v5553_v60  ;;  %v1013_v60 = vsel %vm896_vm0, 0.0, %v6164_v17  ;;  %v589_v31 = vadd.f32 %v5887_v29, %v546_v53  ;;  %7070 = vst [vmem:[#allocation10_spill] sm:$0xff] %v6188_v51  ;;  %v547_v54 = vmul.f32 %v4532_v20, %v5879_v25  ;;  %v1198_v57 = vshll.u32 %v6180_v6, 16 }
  0x4d   : > { %4885 = vmatprep.subr.bf16.mxu1 %v6132_v28  ;;  %v6178_v38 = vpack.c.bf16 %v6172_v12, %v1013_v60  ;;  %v6185_v46 = vsel %vm1093_vm1, %v1184_v24, %v1188_v1  ;;  %vm624_vm5 = vcmp.ge.f32.partialorder %v588_v42, 0.0  ;;  %v660_v58 = vmul.f32 0.2, %v588_v42 }
  0x4e   : > { %5044 = vmatpush3.bf16.msra.mxu0 %v5546_v23  ;;  %7069 = vst [vmem:[#allocation9_spill] sm:$0xff] %v6185_v46  ;;  %5009 = vmatprep.mubr.bf16.mxu0 %v6185_v46  ;;  %vm625_vm6 = vcmp.ge.f32.partialorder %v589_v31, 0.0  ;;  %v661_v63 = vmul.f32 0.2, %v589_v31  ;;  %v548_v0 = vmul.f32 %v4533_v52, %v5879_v25  ;;  %v1200_v59 = vrot.slane %v1198_v57, 1 }
  0x4f   : > { %5077 = vmatprep.subr.bf16.mxu0 %v6162_v13  ;;  %4818 = vmatmul.mubr.bf16.gmra.mrb[12].mxu1 %v6185_v46  ;;  %v1191_v23 = vshrl.u32 %v6178_v38, 16  ;;  %v1193_v56 = vshll.u32 %v6178_v38, 16  ;;  %v590_v1 = vadd.f32 %v5887_v29, %v547_v54  ;;  %v1779_v21 = vrot.slane %v5978_v49, 1 }
  0x50   : > { %v696_v19 = vsel %vm624_vm5, %v588_v42, %v660_v58  ;;  %v697_v53 = vsel %vm625_vm6, %v589_v31, %v661_v63  ;;  %v591_v30 = vadd.f32 %v5887_v29, %v548_v0  ;;  %v1780_v20 = vrot.slane %v5980_v50, 1  ;;  %vm4126_vm6 = vmneg %vm896_vm0 }
  0x51   : > { %v1195_v55 = vrot.slane %v1193_v56, 1  ;;  %v6202_v60 = vrot.slane %v696_v19, 7  ;;  %v925_v36 = vrot.slane %v697_v53, 7  ;;  %vm626_vm7 = vcmp.ge.f32.partialorder %v590_v1, 0.0 }
  0x52   : > { %vm627_vm8 = vcmp.ge.f32.partialorder %v591_v30, 0.0  ;;  %v662_v52 = vmul.f32 0.2, %v590_v1  ;;  %v663_v56 = vmul.f32 0.2, %v591_v30  ;;  %v6206_v57 = vsel %vm1769_vm14, %v1779_v21, %v1780_v20 }
  0x53   : > { %v1196_v24 = vor.u32 %v1195_v55, %v1191_v23  ;;  %7071 = vst [vmem:[#allocation11_spill] sm:$0xff] %v6206_v57  ;;  %v6213_v42 = vsel %vm896_vm0, %v6202_v60, %v925_v36  ;;  %v1014_v50 = vsel %vm896_vm0, 0.0, %v6202_v60  ;;  %v1032_v31 = vsel %vm896_vm0, %v925_v36, 0.0  ;;  %v4568_v36 = vld [vmem:[%s5867_s28 + $0x58] sm:$0xff]  }
  0x54   : > { %v6221_v54 = vpack.c.bf16 %v6213_v42, %v1014_v50  ;;  %v6223_v23 = vpack.c.bf16 %v1032_v31, %v1032_v31  ;;  %v698_v58 = vsel %vm626_vm7, %v590_v1, %v662_v52  ;;  %v4536_v63 = vunpack.c.l.bf16 %v4567_v26 }
  0x55   : > { %v6209_v49 = vsel %vm1093_vm1, %v1196_v24, %v1200_v59  ;;  %v699_v0 = vsel %vm627_vm8, %v591_v30, %v663_v56  ;;  %v6226_v55 = vrot.slane %v698_v58, 7  ;;  %v4537_v59 = vunpack.c.h.bf16 %v4567_v26  ;;  %v5550_v58 = vld [vmem:[%s7026_s3 + $0x188] sm:$0xff]  }
  0x56   : > { %7072 = vst [vmem:[#allocation12_spill] sm:$0xff] %v6209_v49  ;;  %5010 = vmatmul.mubr.bf16.gmra.mrb[12].mxu0 %v6209_v49  ;;  %4821 = vmatprep.mubr.bf16.mxu1 %v6209_v49  ;;  %v1782_v21 = vrot.slane %v6026_v33, 1  ;;  %v1203_v19 = vshrl.u32 %v6221_v54, 16  ;;  %v1205_v53 = vshll.u32 %v6221_v54, 16  ;;  %v1210_v20 = vshll.u32 %v6223_v23, 16 }
  0x57   : > { %5045 = vmatprep.mubr.bf16.mxu0 %v6150_v48  ;;  %v928_v24 = vrot.slane %v699_v0, 7  ;;  %v1015_v1 = vsel %vm896_vm0, 0.0, %v6226_v55  ;;  %v549_v52 = vmul.f32 %v4536_v63, %v5879_v25  ;;  %v550_v30 = vmul.f32 %v4537_v59, %v5879_v25 }
  0x58   : > { %v1783_v56 = vrot.slane %v6028_v34, 1  ;;  %v1207_v26 = vrot.slane %v1205_v53, 1  ;;  %v1212_v50 = vrot.slane %v1210_v20, 1  ;;  %v4540_v49 = vunpack.c.l.bf16 %v4568_v36 }
  0x59   : > { %v6240_v33 = vsel %vm896_vm0, %v6226_v55, %v928_v24  ;;  %v1033_v31 = vsel %vm896_vm0, %v928_v24, 0.0  ;;  %v592_v34 = vadd.f32 %v5887_v29, %v549_v52  ;;  %v593_v59 = vadd.f32 %v5887_v29, %v550_v30  ;;  %v4569_v30 = vld [vmem:[%s5867_s28 + $0x60] sm:$0xff]  }
  0x5a   : > { %v6247_v0 = vpack.c.bf16 %v6240_v33, %v1015_v1  ;;  %v6249_v63 = vpack.c.bf16 %v1033_v31, %v1033_v31  ;;  %v1208_v53 = vor.u32 %v1207_v26, %v1203_v19  ;;  %v6254_v20 = vsel %vm1769_vm14, %v1782_v21, %v1783_v56 }
  0x5b   : > { %7073 = vst [vmem:[#allocation13_spill] sm:$0xff] %v6254_v20  ;;  %v4541_v24 = vunpack.c.h.bf16 %v4568_v36  ;;  %vm628_vm9 = vcmp.ge.f32.partialorder %v592_v34, 0.0  ;;  %vm629_vm10 = vcmp.ge.f32.partialorder %v593_v59, 0.0  ;;  %v664_v52 = vmul.f32 0.2, %v592_v34 }
  0x5c   : > { %v1215_v46 = vshrl.u32 %v6247_v0, 16  ;;  %v1217_v41 = vshll.u32 %v6247_v0, 16  ;;  %v1222_v1 = vshll.u32 %v6249_v63, 16  ;;  %v6260_v31 = vsel %vm1093_vm1, %v1208_v53, %v1212_v50 }
  0x5d   : > { %7074 = vst [vmem:[#allocation14_spill] sm:$0xff] %v6260_v31  ;;  %v665_v19 = vmul.f32 0.2, %v593_v59  ;;  %4822 = vmatmul.mubr.bf16.gmra.mrb[16].mxu1 %v6260_v31  ;;  %v551_v56 = vmul.f32 %v4540_v49, %v5879_v25  ;;  %v552_v26 = vmul.f32 %v4541_v24, %v5879_v25  ;;  %v700_v50 = vsel %vm628_vm9, %v592_v34, %v664_v52  ;;  %v5552_v31 = vld [vmem:[%s7026_s3 + $0x190] sm:$0xff]  }
  0x5e   : > { %5046 = vmatmul.mubr.bf16.vlgmr.msra.gmra.mrb[0].mxu0 %v6188_v51  ;;  %v1219_v21 = vrot.slane %v1217_v41, 1  ;;  %v1224_v36 = vrot.slane %v1222_v1, 1  ;;  %v1785_v62 = vrot.slane %v6064_v3, 1  ;;  %v1786_v16 = vrot.slane %v6066_v5, 1 }
  0x5f   : > { %5078 = vmatpush3.bf16.msra.mxu0 %v6162_v13  ;;  %5049 = vmatprep.mubr.bf16.mxu0 %v6206_v57  ;;  %v701_v53 = vsel %vm629_vm10, %v593_v59, %v665_v19  ;;  %v6274_v41 = vrot.slane %v700_v50, 7  ;;  %v594_v49 = vadd.f32 %v5887_v29, %v551_v56  ;;  %v595_v25 = vadd.f32 %v5887_v29, %v552_v26 }
  0x60   : > { %5079 = vmatprep.subr.bf16.mxu0 %v5550_v58  ;;  %v1220_v13 = vor.u32 %v1219_v21, %v1215_v46  ;;  %v931_v1 = vrot.slane %v701_v53, 7  ;;  %v6279_v34 = vsel %vm1769_vm14, %v1785_v62, %v1786_v16  ;;  %v4544_v59 = vunpack.c.l.bf16 %v4569_v30 }
  0x61   : > { %7075 = vst [vmem:[#allocation15_spill] sm:$0xff] %v6279_v34  ;;  %v4545_v24 = vunpack.c.h.bf16 %v4569_v30  ;;  %v1016_v46 = vsel %vm896_vm0, 0.0, %v6274_v41  ;;  %vm630_vm11 = vcmp.ge.f32.partialorder %v594_v49, 0.0  ;;  %vm631_vm12 = vcmp.ge.f32.partialorder %v595_v25, 0.0  ;;  %v6300_v30 = vld [vmem:[%s7028_s5] ss:$0 sm:$0xff] }
  0x62   : > { %v6282_v3 = vsel %vm1093_vm1, %v1220_v13, %v1224_v36  ;;  %v6286_v5 = vsel %vm896_vm0, %v6274_v41, %v931_v1  ;;  %v1034_v52 = vsel %vm896_vm0, %v931_v1, 0.0  ;;  %v666_v62 = vmul.f32 0.2, %v594_v49  ;;  %v5554_v36 = vld [vmem:[%s7026_s3 + $0x198] sm:$0xff]  }
  0x63   : > { %7076 = vst [vmem:[#allocation16_spill] sm:$0xff] %v6282_v3  ;;  %5080 = vmatpush3.bf16.msra.mxu0 %v5550_v58  ;;  %4825 = vmatprep.mubr.bf16.mxu1 %v6282_v3  ;;  %v6293_v29 = vpack.c.bf16 %v6286_v5, %v1016_v46  ;;  %v6295_v16 = vpack.c.bf16 %v1034_v52, %v1034_v52  ;;  %v667_v19 = vmul.f32 0.2, %v595_v25  ;;  %v1788_v53 = vrot.slane %v6094_v43, 1  ;;  %v5556_v43 = vld [vmem:[%s7026_s3 + $0x1a0] sm:$0xff]  }
  0x64   : > { %5081 = vmatprep.subr.bf16.mxu0 %v5552_v31  ;;  %v553_v21 = vmul.f32 %v6300_v30, %v4544_v59  ;;  %v554_v58 = vmul.f32 %v6300_v30, %v4545_v24  ;;  %v702_v13 = vsel %vm630_vm11, %v594_v49, %v666_v62  ;;  %v6316_v59 = vld [vmem:[%s7029_s6] ss:$0 sm:$0xff]  ;;  %v1791_v48 = vrot.slane %v6142_v7, 1 }
  0x65   : > { %v1227_v56 = vshrl.u32 %v6293_v29, 16  ;;  %v1229_v26 = vshll.u32 %v6293_v29, 16  ;;  %v1234_v50 = vshll.u32 %v6295_v16, 16  ;;  %v703_v1 = vsel %vm631_vm12, %v595_v25, %v667_v19 }
  0x66   : > { %5050 = vmatmul.mubr.bf16.gmra.mrb[4].mxu0 %v6254_v20  ;;  %v596_v24 = vadd.f32 %v6316_v59, %v553_v21  ;;  %v597_v46 = vadd.f32 %v6316_v59, %v554_v58  ;;  %v6320_v32 = vrot.slane %v702_v13, 7  ;;  %v934_v2 = vrot.slane %v703_v1, 7 }
  0x67   : > { %5053 = vmatprep.mubr.bf16.mxu0 %v6279_v34  ;;  %v1231_v52 = vrot.slane %v1229_v26, 1  ;;  %v1236_v3 = vrot.slane %v1234_v50, 1  ;;  %5082 = vmatpush3.bf16.msra.mxu0 %v5552_v31  ;;  %v4570_v31 = vld [vmem:[%s5867_s28 + $0x68] sm:$0xff]   ;;  %v1789_v20 = vrot.slane %v6096_v45, 1  ;;  %vm5754_vm7 = vmmov 1  }
  0x68   : > { %vm632_vm13 = vcmp.ge.f32.partialorder %v596_v24, 0.0  ;;  %vm633_vm15 = vcmp.ge.f32.partialorder %v597_v46, 0.0  ;;  %v668_v49 = vmul.f32 0.2, %v596_v24  ;;  %v669_v25 = vmul.f32 0.2, %v597_v46  ;;  %5083 = vmatprep.subr.bf16.mxu0 %v5554_v36  ;;  %vm6470_vm8 = vmpackc.low %vm5754_vm7, %vm4126_vm6 }
  0x69   : > { %v1232_v62 = vor.u32 %v1231_v52, %v1227_v56  ;;  %v6327_v19 = vsel %vm896_vm0, %v6320_v32, %v934_v2  ;;  %v1017_v21 = vsel %vm896_vm0, 0.0, %v6320_v32  ;;  %v1035_v58 = vsel %vm896_vm0, %v934_v2, 0.0 }
  0x6a   : > { %v6334_v26 = vpack.c.bf16 %v6327_v19, %v1017_v21  ;;  %v6336_v50 = vpack.c.bf16 %v1035_v58, %v1035_v58  ;;  %v704_v13 = vsel %vm632_vm13, %v596_v24, %v668_v49  ;;  %v705_v1 = vsel %vm633_vm15, %v597_v46, %v669_v25 }
  0x6b   : > { %v6339_v34 = vsel %vm1093_vm1, %v1232_v62, %v1236_v3  ;;  %v6341_v56 = vrot.slane %v704_v13, 7  ;;  %v937_v52 = vrot.slane %v705_v1, 7  ;;  %5084 = vmatpush3.bf16.msra.mxu0 %v5554_v36  ;;  %v4548_v24 = vunpack.c.l.bf16 %v4570_v31  ;;  %v5558_v3 = vld [vmem:[%s7026_s3 + $0x1a8] sm:$0xff]  }
  0x6c   : > { %7077 = vst [vmem:[#allocation17_spill] sm:$0xff] %v6339_v34  ;;  %4826 = vmatmul.mubr.bf16.gmra.mrb[20].mxu1 %v6339_v34  ;;  %v1239_v2 = vshrl.u32 %v6334_v26, 16  ;;  %v1241_v21 = vshll.u32 %v6334_v26, 16  ;;  %v1246_v58 = vshll.u32 %v6336_v50, 16  ;;  %5085 = vmatprep.subr.bf16.mxu0 %v5556_v43  ;;  %v6359_v49 = vsel %vm1769_vm14, %v1788_v53, %v1789_v20  ;;  %v4571_v34 = vld [vmem:[%s5867_s28 + $0x70] sm:$0xff]  }
  0x6d   : > { %v6353_v46 = vsel %vm896_vm0, %v6341_v56, %v937_v52  ;;  %v1018_v45 = vsel %vm896_vm0, 0.0, %v6341_v56  ;;  %v1036_v36 = vsel %vm896_vm0, %v937_v52, 0.0  ;;  %7078 = vst [vmem:[#allocation18_spill] sm:$0xff] %v6359_v49  ;;  %v4549_v57 = vunpack.c.h.bf16 %v4570_v31 }
  0x6e   : > { %v1243_v25 = vrot.slane %v1241_v21, 1  ;;  %v1248_v62 = vrot.slane %v1246_v58, 1  ;;  %v6362_v13 = vpack.c.bf16 %v6353_v46, %v1018_v45  ;;  %v6364_v1 = vpack.c.bf16 %v1036_v36, %v1036_v36  ;;  %5054 = vmatmul.mubr.bf16.gmra.mrb[8].mxu0 %v6359_v49  ;;  %v5560_v45 = vld [vmem:[%s7026_s3 + $0x1b0] sm:$0xff]  }
  0x6f   : > { %v555_v51 = vmul.f32 %v6300_v30, %v4548_v24  ;;  %v1792_v52 = vrot.slane %v6144_v39, 1  ;;  %5086 = vmatpush3.bf16.msra.mxu0 %v5556_v43  ;;  %v556_v31 = vmul.f32 %v6300_v30, %v4549_v57  ;;  %v4552_v39 = vunpack.c.l.bf16 %v4571_v34 }
  0x70   : > { %v1244_v20 = vor.u32 %v1243_v25, %v1239_v2  ;;  %v1251_v53 = vshrl.u32 %v6362_v13, 16  ;;  %v1253_v21 = vshll.u32 %v6362_v13, 16  ;;  %v1258_v58 = vshll.u32 %v6364_v1, 16  ;;  %5087 = vmatprep.subr.bf16.mxu0 %v5558_v3 }
  0x71   : > { %v598_v24 = vadd.f32 %v6316_v59, %v555_v51  ;;  %v6380_v7 = vsel %vm1769_vm14, %v1791_v48, %v1792_v52  ;;  %v4553_v25 = vunpack.c.h.bf16 %v4571_v34  ;;  %v599_v49 = vadd.f32 %v6316_v59, %v556_v31  ;;  %v5562_v31 = vld [vmem:[%s7026_s3 + $0x1b8] sm:$0xff]  }
  0x72   : > { %v6383_v43 = vsel %vm1093_vm1, %v1244_v20, %v1248_v62  ;;  %v1255_v2 = vrot.slane %v1253_v21, 1  ;;  %v1260_v36 = vrot.slane %v1258_v58, 1  ;;  %5057 = vmatprep.mubr.bf16.mxu0 %v6380_v7  ;;  %v557_v51 = vmul.f32 %v6300_v30, %v4552_v39 }
  0x73   : > { %7079 = vst [vmem:[#allocation19_spill] sm:$0xff] %v6383_v43  ;;  %4829 = vmatprep.mubr.bf16.mxu1 %v6383_v43  ;;  %vm634_vm2 = vcmp.ge.f32.partialorder %v598_v24, 0.0  ;;  %v670_v57 = vmul.f32 0.2, %v598_v24  ;;  %5088 = vmatpush3.bf16.msra.mxu0 %v5558_v3  ;;  %v558_v52 = vmul.f32 %v6300_v30, %v4553_v25  ;;  %v1794_v62 = vrot.slane %v6178_v38, 1 }
  0x74   : > { %v1256_v48 = vor.u32 %v1255_v2, %v1251_v53  ;;  %v1795_v20 = vrot.slane %v6180_v6, 1  ;;  %5089 = vmatprep.subr.bf16.mxu0 %v5560_v45  ;;  %vm635_vm3 = vcmp.ge.f32.partialorder %v599_v49, 0.0  ;;  %v671_v21 = vmul.f32 0.2, %v599_v49 }
  0x75   : > { %v706_v34 = vsel %vm634_vm2, %v598_v24, %v670_v57  ;;  %v600_v58 = vadd.f32 %v6316_v59, %v557_v51  ;;  %v601_v53 = vadd.f32 %v6316_v59, %v558_v52  ;;  %v1797_v2 = vrot.slane %v6221_v54, 1 }
  0x76   : > { %v6397_v39 = vsel %vm1093_vm1, %v1256_v48, %v1260_v36  ;;  %v6399_v3 = vrot.slane %v706_v34, 7  ;;  %v6403_v38 = vsel %vm1769_vm14, %v1794_v62, %v1795_v20  ;;  %v707_v6 = vsel %vm635_vm3, %v599_v49, %v671_v21  ;;  %v6416_v62 = vld [vmem:[%s7026_s3 + $0x1c0] sm:$0xff]  }
  0x77   : > { %7080 = vst [vmem:[#allocation20_spill] sm:$0xff] %v6397_v39  ;;  %4830 = vmatmul.mubr.bf16.gmra.mrb[24].mxu1 %v6397_v39  ;;  %vm636_vm4 = vcmp.ge.f32.partialorder %v600_v58, 0.0  ;;  %v672_v24 = vmul.f32 0.2, %v600_v58  ;;  %5058 = vmatmul.mubr.bf16.gmra.mrb[12].mxu0 %v6403_v38  ;;  %v940_v25 = vrot.slane %v707_v6, 7  ;;  %vm637_vm5 = vcmp.ge.f32.partialorder %v601_v53, 0.0 }
  0x78   : > { %v1019_v36 = vsel %vm896_vm0, 0.0, %v6399_v3  ;;  %v673_v57 = vmul.f32 0.2, %v601_v53  ;;  %5090 = vmatpush3.bf16.msra.mxu0 %v5560_v45  ;;  %v1798_v48 = vrot.slane %v6223_v23, 1  ;;  %v1800_v52 = vrot.slane %v6247_v0, 1 }
  0x79   : > { %v708_v51 = vsel %vm636_vm4, %v600_v58, %v672_v24  ;;  %v1801_v49 = vrot.slane %v6249_v63, 1  ;;  %5091 = vmatprep.subr.bf16.mxu0 %v5562_v31  ;;  %v6420_v54 = vsel %vm896_vm0, %v6399_v3, %v940_v25  ;;  %v1037_v20 = vsel %vm896_vm0, %v940_v25, 0.0 }
  0x7a   : > { %v709_v45 = vsel %vm637_vm5, %v601_v53, %v673_v57  ;;  %v6423_v21 = vrot.slane %v708_v51, 7  ;;  %v6426_v23 = vpack.c.bf16 %v6420_v54, %v1019_v36  ;;  %v6428_v0 = vpack.c.bf16 %v1037_v20, %v1037_v20 }
  0x7b   : > { %v943_v63 = vrot.slane %v709_v45, 7  ;;  %v6431_v34 = vsel %vm1769_vm14, %v1797_v2, %v1798_v48  ;;  %v6437_v6 = vsel %vm1769_vm14, %v1800_v52, %v1801_v49  ;;  %v1803_v53 = vrot.slane %v6293_v29, 1 }
  0x7c   : > { %7081 = vst [vmem:[#allocation21_spill] sm:$0xff] %v6431_v34  ;;  %v1020_v58 = vsel %vm896_vm0, 0.0, %v6423_v21  ;;  %5061 = vmatprep.mubr.bf16.mxu0 %v6431_v34  ;;  %5092 = vmatpush3.bf16.msra.mxu0 %v5562_v31  ;;  %v1263_v24 = vshrl.u32 %v6426_v23, 16  ;;  %v1265_v25 = vshll.u32 %v6426_v23, 16  ;;  %v1270_v36 = vshll.u32 %v6428_v0, 16 }
  0x7d   : > { %v944_v2 = vsel %vm896_vm0, %v6423_v21, %v943_v63  ;;  %5125 = vmatprep.subr.bf16.mxu0 %v6416_v62  ;;  %v1038_v57 = vsel %vm896_vm0, %v943_v63, 0.0  ;;  %v1804_v48 = vrot.slane %v6295_v16, 1  ;;  %v1806_v49 = vrot.slane %v6334_v26, 1 }
  0x7e   : > { %v1071_v51 = vpack.c.bf16 %v944_v2, %v1020_v58  ;;  %v1267_v52 = vrot.slane %v1265_v25, 1  ;;  %v1272_v29 = vrot.slane %v1270_v36, 1  ;;  %v1072_v31 = vpack.c.bf16 %v1038_v57, %v1038_v57  ;;  %v4572_v36 = vld [vmem:[%s5867_s28 + $0x78] sm:$0xff]  }
  0x7f   : > { %5062 = vmatmul.mubr.bf16.gmra.mrb[16].mxu0 %v6437_v6  ;;  %v6451_v39 = vsel %vm1769_vm14, %v1803_v53, %v1804_v48  ;;  %v1807_v43 = vrot.slane %v6336_v50, 1  ;;  %v1809_v16 = vrot.slane %v6362_v13, 1  ;;  %v1810_v25 = vrot.slane %v6364_v1, 1 }
  0x80   : > { %v1275_v20 = vshrl.u32 %v1071_v51, 16  ;;  %v1277_v45 = vshll.u32 %v1071_v51, 16  ;;  %v1268_v34 = vor.u32 %v1267_v52, %v1263_v24  ;;  %v1282_v63 = vshll.u32 %v1072_v31, 16  ;;  %5065 = vmatprep.mubr.bf16.mxu0 %v6451_v39 }
  0x81   : > { %v6465_v50 = vpack.c.bf16 %v5824_v4, %v5824_v4  ;;  %v6468_v24 = vsel %vm1769_vm14, %v1806_v49, %v1807_v43  ;;  %v6475_v1 = vsel %vm1769_vm14, %v1809_v16, %v1810_v25  ;;  %v4557_v52 = vunpack.c.h.bf16 %v4572_v36 }
  0x82   : > { %v1279_v58 = vrot.slane %v1277_v45, 1  ;;  %v6460_v26 = vsel %vm1093_vm1, %v1268_v34, %v1272_v29  ;;  %v1284_v57 = vrot.slane %v1282_v63, 1  ;;  %v4556_v34 = vunpack.c.l.bf16 %v4572_v36 }
  0x83   : > { %4833 = vmatprep.mubr.bf16.mxu1 %v6460_v26  ;;  %v6482_v4 = vpack.c.bf16 %v6172_v12, %v6164_v17  ;;  %v6486_v43 = vpack.c.bf16 %v6213_v42, %v6202_v60  ;;  %v1812_v29 = vrot.slane %v6426_v23, 1  ;;  %v1813_v17 = vrot.slane %v6428_v0, 1 }
  0x84   : > { %v1280_v53 = vor.u32 %v1279_v58, %v1275_v20  ;;  %v559_v49 = vmul.f32 %v6300_v30, %v4556_v34  ;;  %v6494_v20 = vpack.c.bf16 %v6240_v33, %v6226_v55  ;;  %v560_v12 = vmul.f32 %v6300_v30, %v4557_v52  ;;  %v5566_v34 = vld [vmem:[%s7026_s3 + $0x1c8] sm:$0xff]  }
  0x85   : > { %v6504_v60 = vpack.c.bf16 %v6286_v5, %v6274_v41  ;;  %v6508_v42 = vpack.c.bf16 %v6327_v19, %v6320_v32  ;;  %v6513_v33 = vpack.c.bf16 %v6353_v46, %v6341_v56  ;;  %v6517_v23 = vpack.c.bf16 %v6420_v54, %v6399_v3  ;;  %v5557_v3 = vld [vmem:[%s7026_s3 + $0x88] sm:$0xff]  }
  0x86   : > { %v6478_v48 = vsel %vm1093_vm1, %v1280_v53, %v1284_v57  ;;  %v602_v55 = vadd.f32 %v6316_v59, %v559_v49  ;;  %v6520_v30 = vpack.c.bf16 %v944_v2, %v6423_v21  ;;  %v1815_v0 = vrot.slane %v1071_v51, 1  ;;  %v5559_v51 = vld [vmem:[%s7026_s3 + $0x90] sm:$0xff]   ;;  %v5561_v57 = vld [vmem:[%s7026_s3 + $0x98] sm:$0xff]  }
  0x87   : > { %4834 = vmatmul.mubr.bf16.gmra.mrb[28].mxu1 %v6478_v48  ;;  %5066 = vmatmul.mubr.bf16.gmra.mrb[20].mxu0 %v6468_v24  ;;  %v1816_v41 = vrot.slane %v1072_v31, 1  ;;  %v603_v5 = vadd.f32 %v6316_v59, %v560_v12  ;;  %v6525_v19 = vpack.c.bf16 %v5948_v27, %v5938_v14  ;;  %v6528_v56 = vsel %vm1769_vm14, %v1812_v29, %v1813_v17  ;;  %v5568_v29 = vld [vmem:[%s7026_s3 + $0x1d0] sm:$0xff]  }
  0x88   : > { %4853 = vmatprep.mubr.msk.bf16.mxu1 %vm6470_vm8, %v6465_v50  ;;  %5069 = vmatprep.mubr.bf16.mxu0 %v6475_v1  ;;  %vm638_vm9 = vcmp.ge.f32.partialorder %v602_v55, 0.0  ;;  %v674_v32 = vmul.f32 0.2, %v602_v55  ;;  %v6560_v16 = vpack.c.bf16 %v5972_v44, %v5959_v35  ;;  %v6564_v58 = vpack.c.bf16 %v6012_v22, %v6000_v9  ;;  %v5563_v35 = vld [vmem:[%s7026_s3 + $0xa0] sm:$0xff]   ;;  %v5565_v22 = vld [vmem:[%s7026_s3 + $0xa8] sm:$0xff]  }
  0x89   : > { %vm639_vm10 = vcmp.ge.f32.partialorder %v603_v5, 0.0  ;;  %v675_v46 = vmul.f32 0.2, %v603_v5  ;;  %v6534_v21 = vsel %vm1769_vm14, %v1815_v0, %v1816_v41  ;;  %v6587_v44 = vpack.c.bf16 %v6057_v61, %v6041_v47  ;;  %v5570_v0 = vld [vmem:[%s7026_s3 + $0x1d8] sm:$0xff]   ;;  %v5574_v41 = vld [vmem:[%s7026_s3 + $0x1e8] sm:$0xff]  }
  0x8a   : > { %v710_v54 = vsel %vm638_vm9, %v602_v55, %v674_v32  ;;  %v6591_v9 = vpack.c.bf16 %v6087_v40, %v6073_v18  ;;  %v5567_v40 = vld [vmem:[%s7026_s3 + $0xb0] sm:$0xff]   ;;  %v6620_v17 = vpack.c.bf16 %v6136_v37, %v6119_v15  ;;  %v5569_v55 = vld [vmem:[%s7026_s3 + $0xb8] sm:$0xff]   ;;  %v5571_v15 = vld [vmem:[%s7026_s3 + $0xc0] sm:$0xff]  }
  0x8b   : > { %v711_v59 = vsel %vm639_vm10, %v603_v5, %v675_v46  ;;  %v6536_v2 = vrot.slane %v710_v54, 7  ;;  %v5572_v37 = vld [vmem:[%s7026_s3 + $0x1e0] sm:$0xff]   ;;  %v5576_v5 = vld [vmem:[%s7026_s3 + $0x1f0] sm:$0xff]   ;;  %v5578_v32 = vld [vmem:[%s7026_s3 + $0x1f8] sm:$0xff]   ;;  %v1771_v54 = vrot.slane %v5843_v11, 1 }
  0x8c   : > { %v946_v14 = vrot.slane %v711_v59, 7  ;;  %v5580_v46 = vld [vmem:[%s7026_s3 + $0x200] sm:$0xff]  }
  0x8d   : > { %v1021_v27 = vsel %vm896_vm0, 0.0, %v6536_v2 }
  0x8e   : > { %v6554_v31 = vsel %vm896_vm0, %v6536_v2, %v946_v14 }
  0x8f   : > { %4854 = vmatmul.mubr.msk.bf16.vlgmr.msra.gmra.mrb[0].mxu1 %vm6470_vm8, %v5929_v8  ;;  %5070 = vmatmul.mubr.bf16.gmra.mrb[24].mxu0 %v6528_v56  ;;  %v1073_v45 = vpack.c.bf16 %v6554_v31, %v1021_v27  ;;  %v6717_v11 = vpack.c.bf16 %v6554_v31, %v6536_v2  ;;  %v7085_v27 = vld [vmem:[#allocation10_spill] sm:$0xff]  ;;  %v5577_v2 = vld [vmem:[%s7026_s3 + $0xd8] sm:$0xff]   ;;  %v7086_v31 = vld [vmem:[#allocation11_spill] sm:$0xff] }
  0x90   : > { %4886 = vmatpush3.bf16.msra.mxu1 %v6132_v28  ;;  %4857 = vmatprep.mubr.msk.bf16.mxu1 %vm6470_vm8, %v6525_v19  ;;  %v1039_v28 = vsel %vm896_vm0, %v946_v14, 0.0  ;;  %v7084_v14 = vld [vmem:[#allocation8_spill] sm:$0xff] }
  0x91   : > { %4887 = vmatprep.subr.bf16.mxu1 %v5557_v3  ;;  %5073 = vmatprep.mubr.bf16.mxu0 %v6534_v21  ;;  %v1074_v63 = vpack.c.bf16 %v1039_v28, %v1039_v28  ;;  %v2623_v25 = vrot.slane %v1073_v45, 1  ;;  %v2353_v47 = vshll.u32 %v1073_v45, 16  ;;  %v2351_v61 = vshrl.u32 %v1073_v45, 16  ;;  %v7087_v28 = vld [vmem:[#allocation13_spill] sm:$0xff]  ;;  %v7088_v45 = vld [vmem:[#allocation3_spill] sm:$0xff] }
  0x93   : > { %v2624_v36 = vrot.slane %v1074_v63, 1  ;;  %v2358_v18 = vshll.u32 %v1074_v63, 16  ;;  %v2355_v52 = vrot.slane %v2353_v47, 1  ;;  %v5579_v63 = vld [vmem:[%s7026_s3 + $0xe0] sm:$0xff]   ;;  %v5584_v47 = vld [vmem:[%s7026_s3 + $0x210] sm:$0xff]  }
  0x94   : > { %4888 = vmatpush3.bf16.msra.mxu1 %v5557_v3  ;;  %v1770_v3 = vrot.slane %v5841_v10, 1  ;;  %v5573_v10 = vld [vmem:[%s7026_s3 + $0xc8] sm:$0xff]  }
  0x95   : > { %4889 = vmatprep.subr.bf16.mxu1 %v5559_v51  ;;  %v6570_v53 = vsel %vm1769_vm14, %v2623_v25, %v2624_v36  ;;  %v2360_v49 = vrot.slane %v2358_v18, 1  ;;  %v5581_v25 = vld [vmem:[%s7026_s3 + $0xe8] sm:$0xff]   ;;  %v5586_v18 = vld [vmem:[%s7026_s3 + $0x218] sm:$0xff]  }
  0x96   : > { %v6700_v59 = vsel %vm1769_vm14, %v1770_v3, %v1771_v54  ;;  %v7089_v36 = vld [vmem:[#allocation15_spill] sm:$0xff]  ;;  %v7102_v54 = vld [vmem:[#allocation20_spill] sm:$0xff] }
  0x97   : > { %4858 = vmatmul.mubr.msk.bf16.gmra.mrb[4].mxu1 %vm6470_vm8, %v6560_v16  ;;  %5074 = vmatmul.mubr.bf16.gmra.mrb[28].mxu0 %v6570_v53  ;;  %v7101_v3 = vld [vmem:[#allocation19_spill] sm:$0xff] }
  0x98   : > { %4861 = vmatprep.mubr.msk.bf16.mxu1 %vm6470_vm8, %v6564_v58  ;;  %4890 = vmatpush3.bf16.msra.mxu1 %v5559_v51  ;;  %v5575_v51 = vld [vmem:[%s7026_s3 + $0xd0] sm:$0xff]  }
  0x99   : > { %4891 = vmatprep.subr.bf16.mxu1 %v5561_v57  ;;  %5093 = vmatprep.mubr.msk.bf16.mxu0 %vm6470_vm8, %v6525_v19 }
  0x9c   : > { %4892 = vmatpush3.bf16.msra.mxu1 %v5561_v57  ;;  %v7090_v57 = vld [vmem:[#allocation4_spill] sm:$0xff] }
  0x9d   : > { %4893 = vmatprep.subr.bf16.mxu1 %v5563_v35 }
  0x9f   : > { %4862 = vmatmul.mubr.msk.bf16.gmra.mrb[8].mxu1 %vm6470_vm8, %v6587_v44  ;;  %5094 = vmatmul.mubr.msk.bf16.vlgmr.msra.gmra.mrb[0].mxu0 %vm6470_vm8, %v6560_v16 }
  0xa0   : > { %4865 = vmatprep.mubr.msk.bf16.mxu1 %vm6470_vm8, %v6591_v9  ;;  %4894 = vmatpush3.bf16.msra.mxu1 %v5563_v35  ;;  %v7091_v35 = vld [vmem:[#allocation18_spill] sm:$0xff] }
  0xa1   : > { %5126 = vmatpush3.bf16.msra.mxu0 %v6416_v62  ;;  %5097 = vmatprep.mubr.msk.bf16.mxu0 %vm6470_vm8, %v6564_v58  ;;  %v2356_v62 = vor.u32 %v2355_v52, %v2351_v61  ;;  %v5585_v61 = vld [vmem:[%s7026_s3 + $0xf8] sm:$0xff]   ;;  %v7094_v52 = vld [vmem:[#allocation7_spill] sm:$0xff] }
  0xa2   : > { %4895 = vmatprep.subr.bf16.mxu1 %v5565_v22  ;;  %5127 = vmatprep.subr.bf16.mxu0 %v5566_v34 }
  0xa3   : > { %v6623_v12 = vsel %vm1093_vm1, %v2356_v62, %v2360_v49  ;;  %v5721_v49 = vld [vmem:[%s7026_s3 + $0x100] sm:$0xff]   ;;  %v5588_v62 = vld [vmem:[%s7026_s3 + $0x228] sm:$0xff]  }
  0xa4   : > { %4896 = vmatpush3.bf16.msra.mxu1 %v5565_v22  ;;  %v7092_v22 = vld [vmem:[#allocation5_spill] sm:$0xff] }
  0xa5   : > { %5128 = vmatpush3.bf16.msra.mxu0 %v5566_v34  ;;  %4897 = vmatprep.subr.bf16.mxu1 %v5567_v40  ;;  %v5583_v34 = vld [vmem:[%s7026_s3 + $0xf0] sm:$0xff]  }
  0xa6   : > { %5129 = vmatprep.subr.bf16.mxu0 %v5568_v29 }
  0xa7   : > { %4866 = vmatmul.mubr.msk.bf16.gmra.mrb[12].mxu1 %vm6470_vm8, %v6620_v17  ;;  %5098 = vmatmul.mubr.msk.bf16.gmra.mrb[4].mxu0 %vm6470_vm8, %v6587_v44 }
  0xa8   : > { %4869 = vmatprep.mubr.msk.bf16.mxu1 %vm6470_vm8, %v6482_v4  ;;  %5101 = vmatprep.mubr.msk.bf16.mxu0 %vm6470_vm8, %v6591_v9 }
  0xa9   : > { %4898 = vmatpush3.bf16.msra.mxu1 %v5567_v40  ;;  %5130 = vmatpush3.bf16.msra.mxu0 %v5568_v29  ;;  %v7093_v40 = vld [vmem:[#allocation6_spill] sm:$0xff] }
  0xaa   : > { %4899 = vmatprep.subr.bf16.mxu1 %v5569_v55  ;;  %5131 = vmatprep.subr.bf16.mxu0 %v5570_v0  ;;  %v5587_v29 = vld [vmem:[%s7026_s3 + $0x220] sm:$0xff]  }
  0xad   : > { %4900 = vmatpush3.bf16.msra.mxu1 %v5569_v55  ;;  %5132 = vmatpush3.bf16.msra.mxu0 %v5570_v0  ;;  %v7095_v55 = vld [vmem:[#allocation21_spill] sm:$0xff] }
  0xae   : > { %4933 = vmatprep.subr.bf16.mxu1 %v5571_v15  ;;  %5133 = vmatprep.subr.bf16.mxu0 %v5572_v37  ;;  %v7096_v0 = vld [vmem:[#allocation9_spill] sm:$0xff] }
  0xaf   : > { %4870 = vmatmul.mubr.msk.bf16.gmra.mrb[16].mxu1 %vm6470_vm8, %v6486_v43  ;;  %5102 = vmatmul.mubr.msk.bf16.gmra.mrb[8].mxu0 %vm6470_vm8, %v6620_v17 }
  0xb0   : > { %4873 = vmatprep.mubr.msk.bf16.mxu1 %vm6470_vm8, %v6494_v20  ;;  %5105 = vmatprep.mubr.msk.bf16.mxu0 %vm6470_vm8, %v6482_v4 }
  0xb1   : > { %5134 = vmatpush3.bf16.msra.mxu0 %v5572_v37  ;;  %v5589_v37 = vld [vmem:[%s7026_s3 + $0x230] sm:$0xff]  }
  0xb2   : > { %5135 = vmatprep.subr.bf16.mxu0 %v5574_v41 }
  0xb5   : > { %5136 = vmatpush3.bf16.msra.mxu0 %v5574_v41  ;;  %v5590_v41 = vld [vmem:[%s7026_s3 + $0x238] sm:$0xff]  }
  0xb6   : > { %5137 = vmatprep.subr.bf16.mxu0 %v5576_v5 }
  0xb7   : > { %4874 = vmatmul.mubr.msk.bf16.gmra.mrb[20].mxu1 %vm6470_vm8, %v6504_v60  ;;  %5106 = vmatmul.mubr.msk.bf16.gmra.mrb[12].mxu0 %vm6470_vm8, %v6486_v43 }
  0xb8   : > { %4877 = vmatprep.mubr.msk.bf16.mxu1 %vm6470_vm8, %v6508_v42  ;;  %5109 = vmatprep.mubr.msk.bf16.mxu0 %vm6470_vm8, %v6494_v20 }
  0xb9   : > { %5138 = vmatpush3.bf16.msra.mxu0 %v5576_v5  ;;  %v7098_v5 = vld [vmem:[#allocation14_spill] sm:$0xff] }
  0xba   : > { %5139 = vmatprep.subr.bf16.mxu0 %v5578_v32 }
  0xbd   : > { %5140 = vmatpush3.bf16.msra.mxu0 %v5578_v32  ;;  %v7099_v32 = vld [vmem:[#allocation16_spill] sm:$0xff] }
  0xbe   : > { %5173 = vmatprep.subr.bf16.mxu0 %v5580_v46 }
  0xbf   : > { %4878 = vmatmul.mubr.msk.bf16.gmra.mrb[24].mxu1 %vm6470_vm8, %v6513_v33  ;;  %5110 = vmatmul.mubr.msk.bf16.gmra.mrb[16].mxu0 %vm6470_vm8, %v6504_v60 }
  0xc0   : > { %4881 = vmatprep.mubr.msk.bf16.mxu1 %vm6470_vm8, %v6517_v23  ;;  %5113 = vmatprep.mubr.msk.bf16.mxu0 %vm6470_vm8, %v6508_v42 }
  0xc7   : > { %4882 = vmatmul.mubr.msk.bf16.gmra.mrb[28].mxu1 %vm6470_vm8, %v6520_v30  ;;  %5114 = vmatmul.mubr.msk.bf16.gmra.mrb[20].mxu0 %vm6470_vm8, %v6513_v33 }
  0xc8   : > { %4901 = vmatprep.mubr.bf16.mxu1 %v6700_v59  ;;  %5117 = vmatprep.mubr.msk.bf16.mxu0 %vm6470_vm8, %v6517_v23 }
  0xcf   : > { %4902 = vmatmul.mubr.bf16.vlgmr.msra.gmra.mrb[0].mxu1 %v7084_v14  ;;  %5118 = vmatmul.mubr.msk.bf16.gmra.mrb[24].mxu0 %vm6470_vm8, %v6520_v30  ;;  %v5725_v14 = vld [vmem:[%s7026_s3 + $0x120] sm:$0xff]  }
  0xd0   : > { %4934 = vmatpush3.bf16.msra.mxu1 %v5571_v15  ;;  %4905 = vmatprep.mubr.bf16.mxu1 %v7085_v27  ;;  %v7097_v15 = vld [vmem:[#allocation12_spill] sm:$0xff] }
  0xd1   : > { %4935 = vmatprep.subr.bf16.mxu1 %v5573_v10  ;;  %5121 = vmatprep.mubr.msk.bf16.mxu0 %vm6470_vm8, %v6717_v11 }
  0xd4   : > { %4936 = vmatpush3.bf16.msra.mxu1 %v5573_v10  ;;  %v5722_v10 = vld [vmem:[%s7026_s3 + $0x108] sm:$0xff]  }
  0xd5   : > { %4937 = vmatprep.subr.bf16.mxu1 %v5575_v51 }
  0xd7   : > { %4906 = vmatmul.mubr.bf16.gmra.mrb[4].mxu1 %v7086_v31  ;;  %5122 = vmatmul.mubr.msk.bf16.gmra.mrb[28].mxu0 %vm6470_vm8, %v6465_v50  ;;  %v5582_v50 = vld [vmem:[%s7026_s3 + $0x208] sm:$0xff]  }
  0xd8   : > { %4909 = vmatprep.mubr.bf16.mxu1 %v7087_v28  ;;  %4938 = vmatpush3.bf16.msra.mxu1 %v5575_v51 }
  0xd9   : > { %4939 = vmatprep.subr.bf16.mxu1 %v5577_v2  ;;  %5141 = vmatprep.mubr.bf16.mxu0 %v7088_v45 }
  0xdc   : > { %4940 = vmatpush3.bf16.msra.mxu1 %v5577_v2 }
  0xdd   : > { %4941 = vmatprep.subr.bf16.mxu1 %v5579_v63 }
  0xdf   : > { %4910 = vmatmul.mubr.bf16.gmra.mrb[8].mxu1 %v7089_v36  ;;  %5142 = vmatmul.mubr.bf16.vlgmr.msra.gmra.mrb[0].mxu0 %v7090_v57 }
  0xe0   : > { %4913 = vmatprep.mubr.bf16.mxu1 %v7091_v35  ;;  %4942 = vmatpush3.bf16.msra.mxu1 %v5579_v63 }
  0xe1   : > { %5174 = vmatpush3.bf16.msra.mxu0 %v5580_v46  ;;  %5145 = vmatprep.mubr.bf16.mxu0 %v7092_v22  ;;  %v7100_v46 = vld [vmem:[#allocation17_spill] sm:$0xff] }
  0xe2   : > { %4943 = vmatprep.subr.bf16.mxu1 %v5581_v25  ;;  %5175 = vmatprep.subr.bf16.mxu0 %v5582_v50 }
  0xe4   : > { %4944 = vmatpush3.bf16.msra.mxu1 %v5581_v25 }
  0xe5   : > { %5176 = vmatpush3.bf16.msra.mxu0 %v5582_v50  ;;  %4945 = vmatprep.subr.bf16.mxu1 %v5583_v34 }
  0xe6   : > { %5177 = vmatprep.subr.bf16.mxu0 %v5584_v47 }
  0xe7   : > { %4914 = vmatmul.mubr.bf16.gmra.mrb[12].mxu1 %v6380_v7  ;;  %5146 = vmatmul.mubr.bf16.gmra.mrb[4].mxu0 %v7093_v40 }
  0xe8   : > { %4917 = vmatprep.mubr.bf16.mxu1 %v6403_v38  ;;  %5149 = vmatprep.mubr.bf16.mxu0 %v7094_v52 }
  0xe9   : > { %4946 = vmatpush3.bf16.msra.mxu1 %v5583_v34  ;;  %5178 = vmatpush3.bf16.msra.mxu0 %v5584_v47 }
  0xea   : > { %4947 = vmatprep.subr.bf16.mxu1 %v5585_v61  ;;  %5179 = vmatprep.subr.bf16.mxu0 %v5586_v18 }
  0xed   : > { %4948 = vmatpush3.bf16.msra.mxu1 %v5585_v61  ;;  %5180 = vmatpush3.bf16.msra.mxu0 %v5586_v18 }
  0xee   : > { %5221 = vmatprep.subr.bf16.mxu1 %v5721_v49  ;;  %5181 = vmatprep.subr.bf16.mxu0 %v5587_v29 }
  0xef   : > { %4918 = vmatmul.mubr.bf16.gmra.mrb[16].mxu1 %v7095_v55  ;;  %5150 = vmatmul.mubr.bf16.gmra.mrb[8].mxu0 %v7096_v0 }
  0xf0   : > { %4921 = vmatprep.mubr.bf16.mxu1 %v6437_v6  ;;  %5153 = vmatprep.mubr.bf16.mxu0 %v7097_v15 }
  0xf1   : > { %5182 = vmatpush3.bf16.msra.mxu0 %v5587_v29 }
  0xf2   : > { %5183 = vmatprep.subr.bf16.mxu0 %v5588_v62 }
  0xf5   : > { %5184 = vmatpush3.bf16.msra.mxu0 %v5588_v62 }
  0xf6   : > { %5185 = vmatprep.subr.bf16.mxu0 %v5589_v37 }
  0xf7   : > { %4922 = vmatmul.mubr.bf16.gmra.mrb[20].mxu1 %v6451_v39  ;;  %5154 = vmatmul.mubr.bf16.gmra.mrb[12].mxu0 %v7098_v5 }
  0xf8   : > { %4925 = vmatprep.mubr.bf16.mxu1 %v6468_v24  ;;  %5157 = vmatprep.mubr.bf16.mxu0 %v7099_v32 }
  0xf9   : > { %5186 = vmatpush3.bf16.msra.mxu0 %v5589_v37 }
  0xfa   : > { %5187 = vmatprep.subr.bf16.mxu0 %v5590_v41 }
  0xfd   : > { %5188 = vmatpush3.bf16.msra.mxu0 %v5590_v41 }
  0xff   : > { %4926 = vmatmul.mubr.bf16.gmra.mrb[24].mxu1 %v6475_v1  ;;  %5158 = vmatmul.mubr.bf16.gmra.mrb[16].mxu0 %v7100_v46 }
 0x100   : > { %4929 = vmatprep.mubr.bf16.mxu1 %v6528_v56  ;;  %5161 = vmatprep.mubr.bf16.mxu0 %v7101_v3 }
 0x107   : > { %4930 = vmatmul.mubr.bf16.gmra.mrb[28].mxu1 %v6534_v21  ;;  %5162 = vmatmul.mubr.bf16.gmra.mrb[20].mxu0 %v7102_v54 }
 0x108   : > { %4949 = vmatprep.mubr.msk.bf16.mxu1 %vm6470_vm8, %v5929_v8  ;;  %5165 = vmatprep.mubr.bf16.mxu0 %v6460_v26  ;;  %v5723_v8 = vld [vmem:[%s7026_s3 + $0x110] sm:$0xff]  }
 0x10f   : > { %4950 = vmatmul.mubr.msk.bf16.vlgmr.msra.gmra.mrb[0].mxu1 %vm6470_vm8, %v6525_v19  ;;  %5166 = vmatmul.mubr.bf16.gmra.mrb[24].mxu0 %v6478_v48  ;;  %v7103_v19 = vld [vmem:[#allocation2_spill] sm:$0xff] }
 0x110   : > { %5229 = vmatpush3.bf16.msra.mxu1 %v5721_v49  ;;  %4953 = vmatprep.mubr.msk.bf16.mxu1 %vm6470_vm8, %v6560_v16  ;;  %v5724_v16 = vld [vmem:[%s7026_s3 + $0x118] sm:$0xff]  }
 0x111   : > { %5222 = vmatprep.subr.bf16.mxu1 %v5722_v10  ;;  %5169 = vmatprep.mubr.bf16.mxu0 %v6623_v12 }
 0x114   : > { %5230 = vmatpush3.bf16.msra.mxu1 %v5722_v10 }
 0x115   : > { %5223 = vmatprep.subr.bf16.mxu1 %v5723_v8 }
 0x117   : > { %4954 = vmatmul.mubr.msk.bf16.gmra.mrb[4].mxu1 %vm6470_vm8, %v6564_v58  ;;  %5170 = vmatmul.mubr.bf16.gmra.mrb[28].mxu0 %v7103_v19  ;;  %v5726_v58 = vld [vmem:[%s7026_s3 + $0x128] sm:$0xff]  }
 0x118   : > { %4957 = vmatprep.mubr.msk.bf16.mxu1 %vm6470_vm8, %v6587_v44  ;;  %5231 = vmatpush3.bf16.msra.mxu1 %v5723_v8  ;;  %v5727_v44 = vld [vmem:[%s7026_s3 + $0x130] sm:$0xff]  }
 0x119   : > { %5224 = vmatprep.subr.bf16.mxu1 %v5724_v16  ;;  %5189 = vmatprep.mubr.bf16.mxu0 %v7085_v27 }
 0x11c   : > { %5232 = vmatpush3.bf16.msra.mxu1 %v5724_v16 }
 0x11d   : > { %5225 = vmatprep.subr.bf16.mxu1 %v5725_v14 }
 0x11f   : > { %4958 = vmatmul.mubr.msk.bf16.gmra.mrb[8].mxu1 %vm6470_vm8, %v6591_v9  ;;  %5190 = vmatmul.mubr.bf16.vlgmr.msra.gmra.mrb[0].mxu0 %v7086_v31  ;;  %v5728_v9 = vld [vmem:[%s7026_s3 + $0x138] sm:$0xff]  }
 0x120   : > { %4961 = vmatprep.mubr.msk.bf16.mxu1 %vm6470_vm8, %v6620_v17  ;;  %5233 = vmatpush3.bf16.msra.mxu1 %v5725_v14 }
 0x121   : > { %5193 = vmatprep.mubr.bf16.mxu0 %v7087_v28  ;;  %5226 = vmatprep.subr.bf16.mxu1 %v5726_v58 }
 0x124   : > { %5234 = vmatpush3.bf16.msra.mxu1 %v5726_v58 }
 0x125   : > { %5227 = vmatprep.subr.bf16.mxu1 %v5727_v44 }
 0x127   : > { %4962 = vmatmul.mubr.msk.bf16.gmra.mrb[12].mxu1 %vm6470_vm8, %v6482_v4  ;;  %5194 = vmatmul.mubr.bf16.gmra.mrb[4].mxu0 %v7089_v36 }
 0x128   : > { %4965 = vmatprep.mubr.msk.bf16.mxu1 %vm6470_vm8, %v6486_v43  ;;  %5197 = vmatprep.mubr.bf16.mxu0 %v7091_v35 }
 0x129   : > { %5235 = vmatpush3.bf16.msra.mxu1 %v5727_v44 }
 0x12a   : > { %5228 = vmatprep.subr.bf16.mxu1 %v5728_v9 }
 0x12d   : > { %5236 = vmatpush3.bf16.msra.mxu1 %v5728_v9 }
 0x12f   : > { %4966 = vmatmul.mubr.msk.bf16.gmra.mrb[16].mxu1 %vm6470_vm8, %v6494_v20  ;;  %5198 = vmatmul.mubr.bf16.gmra.mrb[8].mxu0 %v6380_v7 }
 0x130   : > { %4969 = vmatprep.mubr.msk.bf16.mxu1 %vm6470_vm8, %v6504_v60  ;;  %5201 = vmatprep.mubr.bf16.mxu0 %v6403_v38  ;;  %v6897_v60 = vld [vmem:[%s7027_s4] ss:$0 sm:$0xff] }
 0x137   : > { %4970 = vmatmul.mubr.msk.bf16.gmra.mrb[20].mxu1 %vm6470_vm8, %v6508_v42  ;;  %5202 = vmatmul.mubr.bf16.gmra.mrb[12].mxu0 %v7095_v55 }
 0x138   : > { %4973 = vmatprep.mubr.msk.bf16.mxu1 %vm6470_vm8, %v6513_v33  ;;  %5205 = vmatprep.mubr.bf16.mxu0 %v6437_v6 }
 0x13f   : > { %4974 = vmatmul.mubr.msk.bf16.gmra.mrb[24].mxu1 %vm6470_vm8, %v6517_v23  ;;  %5206 = vmatmul.mubr.bf16.gmra.mrb[16].mxu0 %v6451_v39 }
 0x140   : > { %4977 = vmatprep.mubr.msk.bf16.mxu1 %vm6470_vm8, %v6520_v30  ;;  %5209 = vmatprep.mubr.bf16.mxu0 %v6468_v24 }
 0x147   : > { %4978 = vmatmul.mubr.msk.bf16.gmra.mrb[28].mxu1 %vm6470_vm8, %v6717_v11  ;;  %5210 = vmatmul.mubr.bf16.gmra.mrb[20].mxu0 %v6475_v1 }
 0x148   : > { %5013 = vmatprep.mubr.bf16.mxu1 %v7098_v5  ;;  %5213 = vmatprep.mubr.bf16.mxu0 %v6528_v56 }
 0x14f   : > { %5014 = vmatmul.mubr.bf16.vlgmr.msra.gmra.mrb[16].mxu1 %v7099_v32  ;;  %5214 = vmatmul.mubr.bf16.gmra.mrb[24].mxu0 %v6534_v21 }
 0x150   : > { %5017 = vmatprep.mubr.bf16.mxu1 %v7100_v46  ;;  %5217 = vmatprep.mubr.bf16.mxu0 %v6570_v53 }
 0x157   : > { %5018 = vmatmul.mubr.bf16.gmra.mrb[20].mxu1 %v7101_v3  ;;  %5218 = vmatmul.mubr.bf16.gmra.mrb[28].mxu0 %v6700_v59 }
 0x158   : > { %5021 = vmatprep.mubr.bf16.mxu1 %v7102_v54 }
 0x15f   : > { %5022 = vmatmul.mubr.bf16.gmra.mrb[24].mxu1 %v6460_v26 }
 0x160   : > { %5025 = vmatprep.mubr.bf16.mxu1 %v6478_v48 }
 0x167   : > { %5026 = vmatmul.mubr.bf16.gmra.mrb[28].mxu1 %v6623_v12 }
 0x1e2   : > { %v4951_v7 = vpop.f32.mrb[0].mxu1 }
 0x1e3   : > { %v2191_v39 = vpop.f32.mrb[1].mxu1 }
 0x1e4   : > { %v4952_v38 = vpop.f32.mrb[2].mxu1 }
 0x1e5   : > { %v2194_v6 = vpop.f32.mrb[3].mxu1 }
 0x1ea   : > { %v4955_v24 = vpop.f32.mrb[4].mxu1 }
 0x1eb   : > { %v2207_v13 = vpop.f32.mrb[5].mxu1 }
 0x1ec   : > { %v4956_v1 = vpop.f32.mrb[6].mxu1 }
 0x1ed   : > { %v2210_v4 = vpop.f32.mrb[7].mxu1 }
 0x1f2   : > { %v4959_v43 = vpop.f32.mrb[8].mxu1  ;;  %v5191_v20 = vpop.f32.mrb[0].mxu0 }
 0x1f3   : > { %v2223_v26 = vpop.f32.mrb[9].mxu1  ;;  %v5237_v42 = vadd.f32 %v5191_v20, %v4951_v7  ;;  %v3519_v48 = vpop.f32.mrb[1].mxu0 }
 0x1f4   : > { %v4960_v33 = vpop.f32.mrb[10].mxu1  ;;  %v5238_v23 = vadd.f32 %v3519_v48, %v2191_v39  ;;  %v5192_v30 = vpop.f32.mrb[2].mxu0 }
 0x1f5   : > { %v2226_v56 = vpop.f32.mrb[11].mxu1  ;;  %v3687_v21 = vadd.f32 %v5237_v42, %v6897_v60  ;;  %v5239_v53 = vadd.f32 %v5192_v30, %v4952_v38  ;;  %v3522_v17 = vpop.f32.mrb[3].mxu0 }
 0x1f6   : > { %v3685_v12 = vadd.f32 %v5238_v23, %v6897_v60  ;;  %v5240_v59 = vadd.f32 %v3522_v17, %v2194_v6 }
 0x1f7   : > { %v3719_v11 = vsub.f32 0.0, %v3687_v21  ;;  %v3688_v27 = vadd.f32 %v5239_v53, %v6897_v60 }
 0x1f8   : > { %v3717_v51 = vsub.f32 0.0, %v3685_v12  ;;  %v3686_v2 = vadd.f32 %v5240_v59, %v6897_v60 }
 0x1f9   : > { %v3753_v31 = vmul.f32 1.442695, %v3719_v11  ;;  %v3720_v28 = vsub.f32 0.0, %v3688_v27 }
 0x1fa   : > { %v6903_v45 = vpop.f32.mrb[12].mxu1  ;;  %v3749_v63 = vmul.f32 1.442695, %v3717_v51  ;;  %v3718_v25 = vsub.f32 0.0, %v3686_v2  ;;  %v5195_v50 = vpop.f32.mrb[4].mxu0 }
 0x1fb   : > { %v6905_v36 = vpop.f32.mrb[13].mxu1  ;;  %5591 = vpow2.f32 %v3753_v31  ;;  %v3755_v57 = vmul.f32 1.442695, %v3720_v28  ;;  %v5241_v35 = vadd.f32 %v5195_v50, %v4955_v24  ;;  %v3535_v22 = vpop.f32.mrb[5].mxu0 }
 0x1fc   : > { %v6907_v34 = vpop.f32.mrb[14].mxu1  ;;  %5593 = vpow2.f32 %v3749_v63  ;;  %v3751_v47 = vmul.f32 1.442695, %v3718_v25  ;;  %v5242_v61 = vadd.f32 %v3535_v22, %v2207_v13  ;;  %v5196_v18 = vpop.f32.mrb[6].mxu0 }
 0x1fd   : > { %v6909_v40 = vpop.f32.mrb[15].mxu1  ;;  %5595 = vpow2.f32 %v3755_v57  ;;  %v3691_v52 = vadd.f32 %v5241_v35, %v6897_v60  ;;  %v5243_v29 = vadd.f32 %v5196_v18, %v4956_v1  ;;  %v3538_v49 = vpop.f32.mrb[7].mxu0 }
 0x1fe   : > { %5597 = vpow2.f32 %v3751_v47  ;;  %v3689_v62 = vadd.f32 %v5242_v61, %v6897_v60  ;;  %v5244_v55 = vadd.f32 %v3538_v49, %v2210_v4 }
 0x1ff   : > { %v3723_v0 = vsub.f32 0.0, %v3691_v52  ;;  %v3692_v15 = vadd.f32 %v5243_v29, %v6897_v60 }
 0x200   : > { %v3721_v37 = vsub.f32 0.0, %v3689_v62  ;;  %v3690_v41 = vadd.f32 %v5244_v55, %v6897_v60 }
 0x201   : > { %v3761_v5 = vmul.f32 1.442695, %v3723_v0  ;;  %v3724_v32 = vsub.f32 0.0, %v3692_v15 }
 0x202   : > { %v3757_v46 = vmul.f32 1.442695, %v3721_v37  ;;  %v3722_v3 = vsub.f32 0.0, %v3690_v41  ;;  %v5199_v54 = vpop.f32.mrb[8].mxu0 }
 0x203   : > { %5599 = vpow2.f32 %v3761_v5  ;;  %v3763_v10 = vmul.f32 1.442695, %v3724_v32  ;;  %v5245_v8 = vadd.f32 %v5199_v54, %v4959_v43  ;;  %v3551_v19 = vpop.f32.mrb[9].mxu0 }
 0x204   : > { %5601 = vpow2.f32 %v3757_v46  ;;  %v3759_v16 = vmul.f32 1.442695, %v3722_v3  ;;  %v5246_v14 = vadd.f32 %v3551_v19, %v2223_v26  ;;  %v5200_v58 = vpop.f32.mrb[10].mxu0 }
 0x205   : > { %v5592_v44 = vpop.eup %5591  ;;  %5603 = vpow2.f32 %v3763_v10  ;;  %v3695_v9 = vadd.f32 %v5245_v8, %v6897_v60  ;;  %v5247_v7 = vadd.f32 %v5200_v58, %v4960_v33  ;;  %v3554_v39 = vpop.f32.mrb[11].mxu0 }
 0x206   : > { %v5594_v38 = vpop.eup %5593  ;;  %v3815_v6 = vadd.f32 1.0, %v5592_v44  ;;  %5605 = vpow2.f32 %v3759_v16  ;;  %v3693_v24 = vadd.f32 %v5246_v14, %v6897_v60  ;;  %v5248_v13 = vadd.f32 %v3554_v39, %v2226_v56 }
 0x207   : > { %v5596_v1 = vpop.eup %5595  ;;  %v3813_v4 = vadd.f32 1.0, %v5594_v38  ;;  %v3727_v43 = vsub.f32 0.0, %v3695_v9  ;;  %v3696_v20 = vadd.f32 %v5247_v7, %v6897_v60 }
 0x208   : > { %v5598_v42 = vpop.eup %5597  ;;  %5607 = vrcp.f32 %v3815_v6  ;;  %v3816_v26 = vadd.f32 1.0, %v5596_v1  ;;  %v3725_v48 = vsub.f32 0.0, %v3693_v24  ;;  %v3694_v23 = vadd.f32 %v5248_v13, %v6897_v60 }
 0x209   : > { %5609 = vrcp.f32 %v3813_v4  ;;  %v3814_v33 = vadd.f32 1.0, %v5598_v42  ;;  %v3769_v30 = vmul.f32 1.442695, %v3727_v43  ;;  %v3728_v21 = vsub.f32 0.0, %v3696_v20 }
 0x20a   : > { %5611 = vrcp.f32 %v3816_v26  ;;  %v3765_v53 = vmul.f32 1.442695, %v3725_v48  ;;  %v3726_v17 = vsub.f32 0.0, %v3694_v23  ;;  %v5203_v56 = vpop.f32.mrb[12].mxu0 }
 0x20b   : > { %5613 = vrcp.f32 %v3814_v33  ;;  %v3771_v12 = vmul.f32 1.442695, %v3728_v21  ;;  %v5249_v59 = vadd.f32 %v5203_v56, %v6903_v45  ;;  %v3567_v11 = vpop.f32.mrb[13].mxu0 }
 0x20c   : > { %5615 = vpow2.f32 %v3769_v30  ;;  %v3767_v27 = vmul.f32 1.442695, %v3726_v17  ;;  %v5250_v51 = vadd.f32 %v3567_v11, %v6905_v36  ;;  %v5204_v2 = vpop.f32.mrb[14].mxu0 }
 0x20d   : > { %v5600_v31 = vpop.eup %5599  ;;  %5617 = vpow2.f32 %v3765_v53  ;;  %v3699_v28 = vadd.f32 %v5249_v59, %v6897_v60  ;;  %v5251_v63 = vadd.f32 %v5204_v2, %v6907_v34  ;;  %v3570_v25 = vpop.f32.mrb[15].mxu0 }
 0x20e   : > { %v5602_v50 = vpop.eup %5601  ;;  %v3819_v57 = vadd.f32 1.0, %v5600_v31  ;;  %5619 = vpow2.f32 %v3771_v12  ;;  %v3697_v35 = vadd.f32 %v5250_v51, %v6897_v60  ;;  %v5252_v45 = vadd.f32 %v3570_v25, %v6909_v40 }
 0x20f   : > { %v5604_v22 = vpop.eup %5603  ;;  %v3817_v47 = vadd.f32 1.0, %v5602_v50  ;;  %5621 = vpow2.f32 %v3767_v27  ;;  %v3731_v36 = vsub.f32 0.0, %v3699_v28  ;;  %v3700_v61 = vadd.f32 %v5251_v63, %v6897_v60 }
 0x210   : > { %v5606_v18 = vpop.eup %5605  ;;  %5623 = vrcp.f32 %v3819_v57  ;;  %v3820_v34 = vadd.f32 1.0, %v5604_v22  ;;  %v3729_v52 = vsub.f32 0.0, %v3697_v35  ;;  %v3698_v29 = vadd.f32 %v5252_v45, %v6897_v60 }
 0x211   : > { %5625 = vrcp.f32 %v3817_v47  ;;  %v3818_v40 = vadd.f32 1.0, %v5606_v18  ;;  %v3777_v49 = vmul.f32 1.442695, %v3731_v36  ;;  %v3732_v62 = vsub.f32 0.0, %v3700_v61 }
 0x212   : > { %v5608_v55 = vpop.eup %5607  ;;  %5627 = vrcp.f32 %v3820_v34  ;;  %v3773_v0 = vmul.f32 1.442695, %v3729_v52  ;;  %v3730_v15 = vsub.f32 0.0, %v3698_v29  ;;  %v5207_v37 = vpop.f32.mrb[16].mxu0 }
 0x213   : > { %v5610_v41 = vpop.eup %5609  ;;  %3911 = vst [vmem:[%s6930_s14 + $0x10] sm:$0xff] %v5608_v55  ;;  %5629 = vrcp.f32 %v3818_v40  ;;  %v3779_v5 = vmul.f32 1.442695, %v3732_v62  ;;  %v3583_v32 = vpop.f32.mrb[17].mxu0 }
 0x214   : > { %v5612_v46 = vpop.eup %5611  ;;  %3909 = vst [vmem:[%s6930_s14] sm:$0xff] %v5610_v41  ;;  %5631 = vpow2.f32 %v3777_v49  ;;  %v3775_v3 = vmul.f32 1.442695, %v3730_v15  ;;  %v5208_v54 = vpop.f32.mrb[18].mxu0 }
 0x215   : > { %v5614_v10 = vpop.eup %5613  ;;  %3912 = vst [vmem:[%s6930_s14 + $0x18] sm:$0xff] %v5612_v46  ;;  %5633 = vpow2.f32 %v3773_v0  ;;  %v3586_v8 = vpop.f32.mrb[19].mxu0 }
 0x216   : > { %v5616_v19 = vpop.eup %5615  ;;  %3910 = vst [vmem:[%s6930_s14 + $0x8] sm:$0xff] %v5614_v10  ;;  %5635 = vpow2.f32 %v3779_v5 }
 0x217   : > { %v5618_v16 = vpop.eup %5617  ;;  %v3823_v14 = vadd.f32 1.0, %v5616_v19  ;;  %5637 = vpow2.f32 %v3775_v3 }
 0x218   : > { %v5620_v58 = vpop.eup %5619  ;;  %v3821_v44 = vadd.f32 1.0, %v5618_v16 }
 0x219   : > { %v5622_v9 = vpop.eup %5621  ;;  %5639 = vrcp.f32 %v3823_v14  ;;  %v3824_v7 = vadd.f32 1.0, %v5620_v58 }
 0x21a   : > { %v5624_v39 = vpop.eup %5623  ;;  %5641 = vrcp.f32 %v3821_v44  ;;  %v3822_v38 = vadd.f32 1.0, %v5622_v9  ;;  %v5211_v6 = vpop.f32.mrb[20].mxu0 }
 0x21b   : > { %v5626_v24 = vpop.eup %5625  ;;  %3915 = vst [vmem:[%s6930_s14 + $0x30] sm:$0xff] %v5624_v39  ;;  %5643 = vrcp.f32 %v3824_v7  ;;  %v6938_v13 = vpop.f32.mrb[21].mxu0 }
 0x21c   : > { %v5628_v1 = vpop.eup %5627  ;;  %3913 = vst [vmem:[%s6930_s14 + $0x20] sm:$0xff] %v5626_v24  ;;  %5645 = vrcp.f32 %v3822_v38  ;;  %v6941_v4 = vpop.f32.mrb[22].mxu0 }
 0x21d   : > { %v5630_v43 = vpop.eup %5629  ;;  %3916 = vst [vmem:[%s6930_s14 + $0x38] sm:$0xff] %v5628_v1  ;;  %v6944_v20 = vpop.f32.mrb[23].mxu0 }
 0x21e   : > { %v5632_v42 = vpop.eup %5631  ;;  %3914 = vst [vmem:[%s6930_s14 + $0x28] sm:$0xff] %v5630_v43 }
 0x21f   : > { %v5634_v26 = vpop.eup %5633  ;;  %v3827_v48 = vadd.f32 1.0, %v5632_v42 }
 0x220   : > { %v5636_v23 = vpop.eup %5635  ;;  %v3825_v33 = vadd.f32 1.0, %v5634_v26 }
 0x221   : > { %v5638_v30 = vpop.eup %5637  ;;  %5647 = vrcp.f32 %v3827_v48  ;;  %v3828_v21 = vadd.f32 1.0, %v5636_v23 }
 0x222   : > { %5649 = vrcp.f32 %v3825_v33  ;;  %v3826_v53 = vadd.f32 1.0, %v5638_v30  ;;  %v5015_v17 = vpop.f32.mrb[16].mxu1  ;;  %v6947_v56 = vpop.f32.mrb[24].mxu0 }
 0x223   : > { %v5640_v12 = vpop.eup %5639  ;;  %5651 = vrcp.f32 %v3828_v21  ;;  %v5253_v59 = vadd.f32 %v5207_v37, %v5015_v17  ;;  %v2526_v11 = vpop.f32.mrb[17].mxu1 }
 0x224   : > { %v6949_v27 = vpop.f32.mrb[25].mxu0  ;;  %v5642_v51 = vpop.eup %5641  ;;  %3919 = vst [vmem:[%s6930_s14 + $0x50] sm:$0xff] %v5640_v12  ;;  %5653 = vrcp.f32 %v3826_v53  ;;  %v5254_v2 = vadd.f32 %v3583_v32, %v2526_v11 }
 0x225   : > { %v5016_v31 = vpop.f32.mrb[18].mxu1  ;;  %v6952_v28 = vpop.f32.mrb[26].mxu0  ;;  %3917 = vst [vmem:[%s6930_s14 + $0x40] sm:$0xff] %v5642_v51  ;;  %v3703_v25 = vadd.f32 %v5253_v59, %v6897_v60 }
 0x226   : > { %v5644_v63 = vpop.eup %5643  ;;  %v5255_v50 = vadd.f32 %v5208_v54, %v5016_v31  ;;  %v2529_v57 = vpop.f32.mrb[19].mxu1  ;;  %v3701_v22 = vadd.f32 %v5254_v2, %v6897_v60 }
 0x227   : > { %v6956_v35 = vpop.f32.mrb[27].mxu0  ;;  %v5646_v45 = vpop.eup %5645  ;;  %3920 = vst [vmem:[%s6930_s14 + $0x58] sm:$0xff] %v5644_v63  ;;  %v5256_v47 = vadd.f32 %v3586_v8, %v2529_v57  ;;  %v3735_v36 = vsub.f32 0.0, %v3703_v25 }
 0x228   : > { %3918 = vst [vmem:[%s6930_s14 + $0x48] sm:$0xff] %v5646_v45  ;;  %v3704_v61 = vadd.f32 %v5255_v50, %v6897_v60  ;;  %v3733_v18 = vsub.f32 0.0, %v3701_v22 }
 0x229   : > { %v3702_v34 = vadd.f32 %v5256_v47, %v6897_v60  ;;  %v3785_v52 = vmul.f32 1.442695, %v3735_v36 }
 0x22a   : > { %v3736_v29 = vsub.f32 0.0, %v3704_v61  ;;  %v3781_v40 = vmul.f32 1.442695, %v3733_v18  ;;  %v5019_v62 = vpop.f32.mrb[20].mxu1  ;;  %v6963_v55 = vpop.f32.mrb[28].mxu0 }
 0x22b   : > { %v3734_v49 = vsub.f32 0.0, %v3702_v34  ;;  %v5648_v0 = vpop.eup %5647  ;;  %5655 = vpow2.f32 %v3785_v52  ;;  %v5257_v37 = vadd.f32 %v5211_v6, %v5019_v62  ;;  %v2542_v41 = vpop.f32.mrb[21].mxu1 }
 0x22c   : > { %v3787_v15 = vmul.f32 1.442695, %v3736_v29  ;;  %v6965_v5 = vpop.f32.mrb[29].mxu0  ;;  %v5650_v32 = vpop.eup %5649  ;;  %3923 = vst [vmem:[%s6930_s14 + $0x70] sm:$0xff] %v5648_v0  ;;  %5657 = vpow2.f32 %v3781_v40  ;;  %v5258_v3 = vadd.f32 %v6938_v13, %v2542_v41 }
 0x22d   : > { %v3783_v46 = vmul.f32 1.442695, %v3734_v49  ;;  %v5020_v54 = vpop.f32.mrb[22].mxu1  ;;  %v6969_v10 = vpop.f32.mrb[30].mxu0  ;;  %3921 = vst [vmem:[%s6930_s14 + $0x60] sm:$0xff] %v5650_v32  ;;  %v3707_v19 = vadd.f32 %v5257_v37, %v6897_v60 }
 0x22e   : > { %v5652_v8 = vpop.eup %5651  ;;  %5659 = vpow2.f32 %v3787_v15  ;;  %v5259_v16 = vadd.f32 %v6941_v4, %v5020_v54  ;;  %v2545_v14 = vpop.f32.mrb[23].mxu1  ;;  %v3705_v9 = vadd.f32 %v5258_v3, %v6897_v60 }
 0x22f   : > { %v6974_v58 = vpop.f32.mrb[31].mxu0  ;;  %v5654_v44 = vpop.eup %5653  ;;  %3924 = vst [vmem:[%s6930_s14 + $0x78] sm:$0xff] %v5652_v8  ;;  %5661 = vpow2.f32 %v3783_v46  ;;  %v5260_v7 = vadd.f32 %v6944_v20, %v2545_v14  ;;  %v3739_v39 = vsub.f32 0.0, %v3707_v19 }
 0x230   : > { %3922 = vst [vmem:[%s6930_s14 + $0x68] sm:$0xff] %v5654_v44  ;;  %v3708_v38 = vadd.f32 %v5259_v16, %v6897_v60  ;;  %v3737_v6 = vsub.f32 0.0, %v3705_v9 }
 0x231   : > { %v3706_v24 = vadd.f32 %v5260_v7, %v6897_v60  ;;  %v3793_v13 = vmul.f32 1.442695, %v3739_v39 }
 0x232   : > { %v3740_v1 = vsub.f32 0.0, %v3708_v38  ;;  %v3789_v4 = vmul.f32 1.442695, %v3737_v6  ;;  %v5023_v42 = vpop.f32.mrb[24].mxu1 }
 0x233   : > { %v3738_v43 = vsub.f32 0.0, %v3706_v24  ;;  %5663 = vpow2.f32 %v3793_v13  ;;  %v5261_v48 = vadd.f32 %v6947_v56, %v5023_v42  ;;  %v2558_v23 = vpop.f32.mrb[25].mxu1 }
 0x234   : > { %v3795_v26 = vmul.f32 1.442695, %v3740_v1  ;;  %5665 = vpow2.f32 %v3789_v4  ;;  %v5262_v20 = vadd.f32 %v6949_v27, %v2558_v23  ;;  %v5024_v30 = vpop.f32.mrb[26].mxu1 }
 0x235   : > { %v3791_v33 = vmul.f32 1.442695, %v3738_v43  ;;  %v5656_v21 = vpop.eup %5655  ;;  %v3711_v53 = vadd.f32 %v5261_v48, %v6897_v60  ;;  %v5263_v17 = vadd.f32 %v6952_v28, %v5024_v30  ;;  %v2561_v12 = vpop.f32.mrb[27].mxu1 }
 0x236   : > { %5667 = vpow2.f32 %v3795_v26  ;;  %v5658_v59 = vpop.eup %5657  ;;  %v3831_v11 = vadd.f32 1.0, %v5656_v21  ;;  %v3709_v51 = vadd.f32 %v5262_v20, %v6897_v60  ;;  %v5264_v56 = vadd.f32 %v6956_v35, %v2561_v12 }
 0x237   : > { %5669 = vpow2.f32 %v3791_v33  ;;  %v3829_v31 = vadd.f32 1.0, %v5658_v59  ;;  %v3743_v63 = vsub.f32 0.0, %v3711_v53  ;;  %v3712_v27 = vadd.f32 %v5263_v17, %v6897_v60 }
 0x238   : > { %v5660_v2 = vpop.eup %5659  ;;  %5671 = vrcp.f32 %v3831_v11  ;;  %v3741_v57 = vsub.f32 0.0, %v3709_v51  ;;  %v3710_v45 = vadd.f32 %v5264_v56, %v6897_v60 }
 0x239   : > { %v5662_v25 = vpop.eup %5661  ;;  %v3832_v50 = vadd.f32 1.0, %v5660_v2  ;;  %5673 = vrcp.f32 %v3829_v31  ;;  %v3801_v22 = vmul.f32 1.442695, %v3743_v63  ;;  %v3744_v47 = vsub.f32 0.0, %v3712_v27 }
 0x23a   : > { %v3830_v28 = vadd.f32 1.0, %v5662_v25  ;;  %v3797_v36 = vmul.f32 1.442695, %v3741_v57  ;;  %v3742_v61 = vsub.f32 0.0, %v3710_v45  ;;  %v5027_v18 = vpop.f32.mrb[28].mxu1 }
 0x23b   : > { %5675 = vrcp.f32 %v3832_v50  ;;  %v3803_v35 = vmul.f32 1.442695, %v3744_v47  ;;  %v5265_v34 = vadd.f32 %v6963_v55, %v5027_v18  ;;  %v2574_v52 = vpop.f32.mrb[29].mxu1 }
 0x23c   : > { %5677 = vrcp.f32 %v3830_v28  ;;  %v3799_v29 = vmul.f32 1.442695, %v3742_v61  ;;  %v5266_v40 = vadd.f32 %v6965_v5, %v2574_v52  ;;  %v5028_v49 = vpop.f32.mrb[30].mxu1 }
 0x23d   : > { %5679 = vpow2.f32 %v3801_v22  ;;  %v5664_v62 = vpop.eup %5663  ;;  %v3715_v0 = vadd.f32 %v5265_v34, %v6897_v60  ;;  %v5267_v15 = vadd.f32 %v6969_v10, %v5028_v49  ;;  %v2577_v37 = vpop.f32.mrb[31].mxu1 }
 0x23e   : > { %5681 = vpow2.f32 %v3797_v36  ;;  %v5666_v41 = vpop.eup %5665  ;;  %v3835_v32 = vadd.f32 1.0, %v5664_v62  ;;  %v3713_v46 = vadd.f32 %v5266_v40, %v6897_v60  ;;  %v5268_v55 = vadd.f32 %v6974_v58, %v2577_v37 }
 0x23f   : > { %5683 = vpow2.f32 %v3803_v35  ;;  %v3833_v54 = vadd.f32 1.0, %v5666_v41  ;;  %v3747_v8 = vsub.f32 0.0, %v3715_v0  ;;  %v3716_v5 = vadd.f32 %v5267_v15, %v6897_v60 }
 0x240   : > { %v5668_v3 = vpop.eup %5667  ;;  %5685 = vpow2.f32 %v3799_v29  ;;  %v3745_v10 = vsub.f32 0.0, %v3713_v46  ;;  %v3714_v14 = vadd.f32 %v5268_v55, %v6897_v60 }
 0x241   : > { %v5670_v19 = vpop.eup %5669  ;;  %5687 = vrcp.f32 %v3835_v32  ;;  %v3836_v16 = vadd.f32 1.0, %v5668_v3  ;;  %v3809_v9 = vmul.f32 1.442695, %v3747_v8  ;;  %v3748_v7 = vsub.f32 0.0, %v3716_v5 }
 0x242   : > { %5689 = vrcp.f32 %v3833_v54  ;;  %v3834_v44 = vadd.f32 1.0, %v5670_v19  ;;  %v5672_v58 = vpop.eup %5671  ;;  %v3805_v39 = vmul.f32 1.442695, %v3745_v10  ;;  %v3746_v38 = vsub.f32 0.0, %v3714_v14 }
 0x243   : > { %5691 = vrcp.f32 %v3836_v16  ;;  %v5674_v6 = vpop.eup %5673  ;;  %3927 = vst [vmem:[%s6930_s14 + $0x90] sm:$0xff] %v5672_v58  ;;  %v3811_v24 = vmul.f32 1.442695, %v3748_v7 }
 0x244   : > { %5693 = vrcp.f32 %v3834_v44  ;;  %3925 = vst [vmem:[%s6930_s14 + $0x80] sm:$0xff] %v5674_v6  ;;  %v3807_v1 = vmul.f32 1.442695, %v3746_v38 }
 0x245   : > { %v5676_v13 = vpop.eup %5675  ;;  %5695 = vpow2.f32 %v3809_v9 }
 0x246   : > { %v5678_v4 = vpop.eup %5677  ;;  %3928 = vst [vmem:[%s6930_s14 + $0x98] sm:$0xff] %v5676_v13  ;;  %5697 = vpow2.f32 %v3805_v39 }
 0x247   : > { %v5680_v60 = vpop.eup %5679  ;;  %3926 = vst [vmem:[%s6930_s14 + $0x88] sm:$0xff] %v5678_v4  ;;  %5699 = vpow2.f32 %v3811_v24 }
 0x248   : > { %v5682_v43 = vpop.eup %5681  ;;  %v3839_v42 = vadd.f32 1.0, %v5680_v60  ;;  %5701 = vpow2.f32 %v3807_v1 }
 0x249   : > { %v5684_v26 = vpop.eup %5683  ;;  %v3837_v48 = vadd.f32 1.0, %v5682_v43 }
 0x24a   : > { %v5686_v23 = vpop.eup %5685  ;;  %5703 = vrcp.f32 %v3839_v42  ;;  %v3840_v33 = vadd.f32 1.0, %v5684_v26 }
 0x24b   : > { %v5688_v20 = vpop.eup %5687  ;;  %5705 = vrcp.f32 %v3837_v48  ;;  %v3838_v30 = vadd.f32 1.0, %v5686_v23 }
 0x24c   : > { %v5690_v21 = vpop.eup %5689  ;;  %3931 = vst [vmem:[%s6930_s14 + $0xb0] sm:$0xff] %v5688_v20  ;;  %5707 = vrcp.f32 %v3840_v33 }
 0x24d   : > { %v5692_v53 = vpop.eup %5691  ;;  %3929 = vst [vmem:[%s6930_s14 + $0xa0] sm:$0xff] %v5690_v21  ;;  %5709 = vrcp.f32 %v3838_v30 }
 0x24e   : > { %v5694_v17 = vpop.eup %5693  ;;  %3932 = vst [vmem:[%s6930_s14 + $0xb8] sm:$0xff] %v5692_v53 }
 0x24f   : > { %v5696_v12 = vpop.eup %5695  ;;  %3930 = vst [vmem:[%s6930_s14 + $0xa8] sm:$0xff] %v5694_v17 }
 0x250   : > { %v5698_v59 = vpop.eup %5697  ;;  %v3843_v11 = vadd.f32 1.0, %v5696_v12 }
 0x251   : > { %v5700_v51 = vpop.eup %5699  ;;  %v3841_v56 = vadd.f32 1.0, %v5698_v59 }
 0x252   : > { %v5702_v2 = vpop.eup %5701  ;;  %5711 = vrcp.f32 %v3843_v11  ;;  %v3844_v31 = vadd.f32 1.0, %v5700_v51 }
 0x253   : > { %5713 = vrcp.f32 %v3841_v56  ;;  %v3842_v63 = vadd.f32 1.0, %v5702_v2 }
 0x254   : > { %v5704_v27 = vpop.eup %5703  ;;  %5715 = vrcp.f32 %v3844_v31 }
 0x255   : > { %v5706_v25 = vpop.eup %5705  ;;  %3935 = vst [vmem:[%s6930_s14 + $0xd0] sm:$0xff] %v5704_v27  ;;  %5717 = vrcp.f32 %v3842_v63 }
 0x256   : > { %v5708_v50 = vpop.eup %5707  ;;  %3933 = vst [vmem:[%s6930_s14 + $0xc0] sm:$0xff] %v5706_v25 }
 0x257   : > { %v5710_v57 = vpop.eup %5709  ;;  %3936 = vst [vmem:[%s6930_s14 + $0xd8] sm:$0xff] %v5708_v50 }
 0x258   : > { %3934 = vst [vmem:[%s6930_s14 + $0xc8] sm:$0xff] %v5710_v57 }
 0x25c   : > { %v5712_v45 = vpop.eup %5711 }
 0x25d   : > { %v5714_v28 = vpop.eup %5713  ;;  %3939 = vst [vmem:[%s6930_s14 + $0xf0] sm:$0xff] %v5712_v45 }
 0x25e   : > { %v5716_v22 = vpop.eup %5715  ;;  %3937 = vst [vmem:[%s6930_s14 + $0xe0] sm:$0xff] %v5714_v28 }
 0x25f   : > { %v5718_v47 = vpop.eup %5717  ;;  %3940 = vst [vmem:[%s6930_s14 + $0xf8] sm:$0xff] %v5716_v22 }
 0x260   : > { %3938 = vst [vmem:[%s6930_s14 + $0xe8] sm:$0xff] %v5718_v47 }
 0x261 PF: > { %s17_s2 = sadd.s32 1, %s5751_s2   ;;  %s7104_s23 = smov %s5747_s24 }
 0x262   : > { %p14_p5 = scmp.ge.s32.totalorder %s17_s2, 4   ;;  %s7105_s24 = smov %s7107_s25 }
 0x264   :  { %16 = sbr.rel (!%p14_p5) target bundleno = 2 (0x2), region = 92 }

// kernel: _lambda_.10
= control target key start
LH: loop header
LB: loop body
LE: loop exit
PB: predicated region body
PF: predicated region fallthrough
CT: control target
= control target key end

     0   :  { %s5654_s23 = smov 0   ;;  %s5656_s24 = smov 0   ;;  %s6811_s0 = inlined_call_operand.vmem [shape: bf16[2,16,16,128], index: 0, kind: input, shape index: {}, may-alias: {0,1,2}]   ;;  %s6812_s1 = inlined_call_operand.vmem [shape: bf16[2,16,16,128], index: 1, kind: input, shape index: {}, may-alias: {0,1,2}]   ;;  %s6813_s2 = inlined_call_operand.vmem [shape: bf16[2,16,16,128], index: 2, kind: input, shape index: {}, may-alias: {0,1,2}]   ;;  %s6814_s3 = inlined_call_operand.vmem [shape: bf16[9,128,128], index: 3, kind: input, shape index: {}]   ;;  %s6815_s4 = inlined_call_operand.vmem [shape: f32[1,128], index: 4, kind: input, shape index: {}]   ;;  %s6816_s5 = inlined_call_operand.vmem [shape: f32[1,128], index: 5, kind: input, shape index: {}]   ;;  %s6817_s6 = inlined_call_operand.vmem [shape: f32[1,128], index: 6, kind: input, shape index: {}]   ;;  %s6818_s7 = inlined_call_operand.vmem [shape: bf16[2,16,16,128], index: 7, kind: output, shape index: {}]  }
   0x1   :  { %s5658_s2 = smov 0  }
   0x2 LB: > { %s29_s25 = sadd.s32 1, %s5606_s24  ;;  %p3911_p0 = scmp.ge.s32.totalorder %s5610_s2, 1  ;;  %s5610_s2 = sphi %s5658_s2, %s17_s2   ;;  %s5606_s24 = sphi %s5656_s24, %s6895_s24   ;;  %s5602_s23 = sphi %s5654_s23, %s6894_s23  }
   0x3   : > { %p31_p1 = scmp.ge.s32.totalorder %s29_s25, 2  ;;  %p323_p2 = scmp.lt.s32.totalorder %s5610_s2, 3 }
   0x5   : > { %s6897_s25 = smov (%p31_p1, %s29_s25), 0  ;;  %p324_p3 = pnand %p3911_p0, %p323_p2 }
   0x7   : > { %327 = sbr.rel (%p324_p3) target bundleno = 564 (0x234), region = 48 }
   0xe   : > { %v5506_v0 = vld [vmem:[%s6814_s3 + $0x40] sm:$0xff]   ;;  %vm788_vm0 = vcmask 1040384   ;;  %v5508_v2 = vld [vmem:[%s6814_s3 + $0x48] sm:$0xff]   ;;  %v5612_v3 = vmov 0.0   ;;  %p409_p4 = scmp.lt.s32.totalorder %s5602_s23, 1  ;;  %v5510_v6 = vld [vmem:[%s6814_s3 + $0x50] sm:$0xff]  }
   0xf   : > { %v5507_v1 = vld [vmem:[%s6814_s3 + $0x100] sm:$0xff]   ;;  %4776 = vmatprep.subr.bf16.mxu1 %v5506_v0  ;;  %v5683_v4 = vrot.slane %v5612_v3, 7  ;;  %v5509_v5 = vld [vmem:[%s6814_s3 + $0x108] sm:$0xff]   ;;  %v5511_v8 = vld [vmem:[%s6814_s3 + $0x110] sm:$0xff]   ;;  %vm985_vm1 = vsmask.f32 7424 }
  0x10   : > { %4968 = vmatprep.subr.bf16.mxu0 %v5507_v1  ;;  %4777 = vmatpush3.bf16.msra.mxu1 %v5506_v0  ;;  %v5512_v12 = vld [vmem:[%s6814_s3 + $0x58] sm:$0xff]   ;;  %s6899_s23 = smov (!%p409_p4, %s5602_s23), 1  ;;  %v5514_v18 = vld [vmem:[%s6814_s3 + $0x60] sm:$0xff]   ;;  %v5516_v22 = vld [vmem:[%s6814_s3 + $0x68] sm:$0xff]   ;;  %vm1661_vm2 = vcmask 1046528   ;;  %vm5613_vm4 = vmmov 1  }
  0x11   : > { %4969 = vmatpush3.bf16.msra.mxu0 %v5507_v1  ;;  %4778 = vmatprep.subr.bf16.mxu1 %v5508_v2  ;;  %v897_v7 = vsel %vm788_vm0, 0.0, %v5683_v4  ;;  %v915_v9 = vsel %vm788_vm0, %v5683_v4, 0.0  ;;  %v5513_v13 = vld [vmem:[%s6814_s3 + $0x118] sm:$0xff]   ;;  %s4350_s21 = sshll.u32 %s6899_s23, 7  ;;  %v5515_v19 = vld [vmem:[%s6814_s3 + $0x120] sm:$0xff]   ;;  %v5517_v23 = vld [vmem:[%s6814_s3 + $0x128] sm:$0xff]  }
  0x12   : > { %4970 = vmatprep.subr.bf16.mxu0 %v5509_v5  ;;  %v5700_v10 = vpack.c.bf16 %v5683_v4, %v897_v7  ;;  %v5702_v11 = vpack.c.bf16 %v915_v9, %v915_v9  ;;  %s5728_s28 = scalar_lea.vmem %s6812_s1, %s4350_s21  ;;  %v5740_v25 = vld [vmem:[%s6816_s5] ss:$0 sm:$0xff]  ;;  %v5518_v35 = vld [vmem:[%s6814_s3 + $0x70] sm:$0xff]   ;;  %v5520_v51 = vld [vmem:[%s6814_s3 + $0x78] sm:$0xff]  }
  0x13   : > { %v4387_v24 = vld [vmem:[%s5728_s28] sm:$0xff]   ;;  %v4530_v30 = vld [vmem:[%s5728_s28 + $0x8] sm:$0xff]   ;;  %v4531_v36 = vld [vmem:[%s5728_s28 + $0x10] sm:$0xff]  }
  0x14   : > { %6850 = vst [vmem:[#allocation2_spill] sm:$0xff] %v5700_v10  ;;  %6851 = vst [vmem:[#allocation3_spill] sm:$0xff] %v5702_v11  ;;  %4779 = vmatpush3.bf16.msra.mxu1 %v5508_v2  ;;  %v989_v14 = vshll.u32 %v5700_v10, 16  ;;  %v987_v15 = vshrl.u32 %v5700_v10, 16  ;;  %v994_v16 = vshll.u32 %v5702_v11, 16  ;;  %v4388_v27 = vunpack.c.l.bf16 %v4387_v24  ;;  %v5519_v37 = vld [vmem:[%s6814_s3 + $0x130] sm:$0xff]  }
  0x15   : > { %4971 = vmatpush3.bf16.msra.mxu0 %v5509_v5  ;;  %4780 = vmatprep.subr.bf16.mxu1 %v5510_v6  ;;  %v4389_v28 = vunpack.c.h.bf16 %v4387_v24  ;;  %v5748_v29 = vld [vmem:[%s6817_s6] ss:$0 sm:$0xff]  ;;  %v4392_v33 = vunpack.c.l.bf16 %v4530_v30  ;;  %v4393_v34 = vunpack.c.h.bf16 %v4530_v30  ;;  %v4532_v42 = vld [vmem:[%s5728_s28 + $0x18] sm:$0xff]   ;;  %v4396_v43 = vunpack.c.l.bf16 %v4531_v36  ;;  %vm3954_vm3 = vmneg %vm788_vm0 }
  0x16   : > { %4972 = vmatprep.subr.bf16.mxu0 %v5511_v8  ;;  %v991_v17 = vrot.slane %v989_v14, 1  ;;  %v996_v21 = vrot.slane %v994_v16, 1  ;;  %v529_v31 = vmul.f32 %v4388_v27, %v5740_v25  ;;  %v4397_v44 = vunpack.c.h.bf16 %v4531_v36  ;;  %v5521_v55 = vld [vmem:[%s6814_s3 + $0x138] sm:$0xff]   ;;  %v5523_v14 = vld [vmem:[%s6814_s3 + $0x140] sm:$0xff]   ;;  %v5525_v27 = vld [vmem:[%s6814_s3 + $0x8] sm:$0xff]  }
  0x17   : > { %v530_v32 = vmul.f32 %v4389_v28, %v5740_v25  ;;  %v531_v40 = vmul.f32 %v4392_v33, %v5740_v25  ;;  %v532_v41 = vmul.f32 %v4393_v34, %v5740_v25  ;;  %v4400_v45 = vunpack.c.l.bf16 %v4532_v42  ;;  %vm6337_vm5 = vmpackc.low %vm5613_vm4, %vm3954_vm3 }
  0x18   : > { %4781 = vmatpush3.bf16.msra.mxu1 %v5510_v6  ;;  %v992_v20 = vor.u32 %v991_v17, %v987_v15  ;;  %v572_v38 = vadd.f32 %v5748_v29, %v529_v31  ;;  %v4401_v46 = vunpack.c.h.bf16 %v4532_v42  ;;  %v533_v52 = vmul.f32 %v4396_v43, %v5740_v25 }
  0x19   : > { %4973 = vmatpush3.bf16.msra.mxu0 %v5511_v8  ;;  %4782 = vmatprep.subr.bf16.mxu1 %v5512_v12  ;;  %v573_v39 = vadd.f32 %v5748_v29, %v530_v32  ;;  %v574_v49 = vadd.f32 %v5748_v29, %v531_v40  ;;  %v575_v50 = vadd.f32 %v5748_v29, %v532_v41  ;;  %v5522_v8 = vld [vmem:[%s6814_s3] sm:$0xff]  }
  0x1a   : > { %4974 = vmatprep.subr.bf16.mxu0 %v5513_v13  ;;  %v5743_v26 = vsel %vm985_vm1, %v992_v20, %v996_v21  ;;  %v792_v47 = vrot.slane %v572_v38, 7  ;;  %v534_v53 = vmul.f32 %v4397_v44, %v5740_v25  ;;  %v535_v54 = vmul.f32 %v4400_v45, %v5740_v25  ;;  %v4534_v38 = vld [vmem:[%s5728_s28 + $0x28] sm:$0xff]  }
  0x1b   : > { %6852 = vst [vmem:[#allocation4_spill] sm:$0xff] %v5743_v26  ;;  %4792 = vmatprep.mubr.bf16.mxu1 %v5743_v26  ;;  %v793_v48 = vrot.slane %v573_v39, 7  ;;  %v5780_v59 = vrot.slane %v574_v49, 7  ;;  %v796_v63 = vrot.slane %v575_v50, 7  ;;  %v576_v1 = vadd.f32 %v5748_v29, %v533_v52  ;;  %v5524_v44 = vld [vmem:[%s6814_s3 + $0x148] sm:$0xff]  }
  0x1c   : > { %4783 = vmatpush3.bf16.msra.mxu1 %v5512_v12  ;;  %v898_v57 = vsel %vm788_vm0, 0.0, %v792_v47  ;;  %v577_v2 = vadd.f32 %v5748_v29, %v534_v53  ;;  %v536_v3 = vmul.f32 %v4401_v46, %v5740_v25  ;;  %v578_v20 = vadd.f32 %v5748_v29, %v535_v54  ;;  %v4535_v53 = vld [vmem:[%s5728_s28 + $0x30] sm:$0xff]  }
  0x1d   : > { %4975 = vmatpush3.bf16.msra.mxu0 %v5513_v13  ;;  %4784 = vmatprep.subr.bf16.mxu1 %v5514_v18  ;;  %v794_v56 = vsel %vm788_vm0, %v792_v47, %v793_v48  ;;  %v916_v58 = vsel %vm788_vm0, %v793_v48, 0.0  ;;  %v899_v0 = vsel %vm788_vm0, 0.0, %v5780_v59  ;;  %v5801_v9 = vsel %vm788_vm0, %v5780_v59, %v796_v63 }
  0x1e   : > { %4976 = vmatprep.subr.bf16.mxu0 %v5515_v19  ;;  %v5782_v60 = vpack.c.bf16 %v794_v56, %v898_v57  ;;  %v5784_v61 = vpack.c.bf16 %v916_v58, %v916_v58  ;;  %v5786_v62 = vpack.c.bf16 %v794_v56, %v792_v47  ;;  %v917_v12 = vsel %vm788_vm0, %v796_v63, 0.0 }
  0x1f   : > { %v5805_v13 = vpack.c.bf16 %v5801_v9, %v899_v0  ;;  %v5810_v15 = vrot.slane %v576_v1, 7  ;;  %v799_v16 = vrot.slane %v577_v2, 7  ;;  %v5834_v36 = vrot.slane %v578_v20, 7  ;;  %v5526_v2 = vld [vmem:[%s6814_s3 + $0x150] sm:$0xff]  }
  0x20   : > { %4785 = vmatpush3.bf16.msra.mxu1 %v5514_v18  ;;  %v999_v5 = vshrl.u32 %v5782_v60, 16  ;;  %v1001_v6 = vshll.u32 %v5782_v60, 16  ;;  %v1006_v7 = vshll.u32 %v5784_v61, 16  ;;  %v4408_v52 = vunpack.c.l.bf16 %v4534_v38 }
  0x21   : > { %4977 = vmatpush3.bf16.msra.mxu0 %v5515_v19  ;;  %4786 = vmatprep.subr.bf16.mxu1 %v5516_v22  ;;  %v5812_v19 = vpack.c.bf16 %v917_v12, %v917_v12  ;;  %v1011_v21 = vshrl.u32 %v5805_v13, 16  ;;  %v900_v24 = vsel %vm788_vm0, 0.0, %v5810_v15  ;;  %v918_v31 = vsel %vm788_vm0, %v799_v16, 0.0 }
  0x22   : > { %4978 = vmatprep.subr.bf16.mxu0 %v5517_v23  ;;  %v1003_v17 = vrot.slane %v1001_v6, 1  ;;  %v1008_v18 = vrot.slane %v1006_v7, 1  ;;  %v5831_v34 = vpack.c.bf16 %v918_v31, %v918_v31  ;;  %v901_v47 = vsel %vm788_vm0, 0.0, %v5834_v36 }
  0x23   : > { %v1018_v30 = vshll.u32 %v5812_v19, 16  ;;  %v4409_v1 = vunpack.c.h.bf16 %v4534_v38  ;;  %v539_v6 = vmul.f32 %v4408_v52, %v5740_v25  ;;  %v4412_v7 = vunpack.c.l.bf16 %v4535_v53 }
  0x24   : > { %4787 = vmatpush3.bf16.msra.mxu1 %v5516_v22  ;;  %v1013_v22 = vshll.u32 %v5805_v13, 16  ;;  %v1004_v28 = vor.u32 %v1003_v17, %v999_v5  ;;  %v1030_v45 = vshll.u32 %v5831_v34, 16 }
  0x25   : > { %4979 = vmatpush3.bf16.msra.mxu0 %v5517_v23  ;;  %4788 = vmatprep.subr.bf16.mxu1 %v5518_v35  ;;  %v5819_v23 = vsel %vm788_vm0, %v5810_v15, %v799_v16  ;;  %v1020_v40 = vrot.slane %v1018_v30, 1  ;;  %v582_v31 = vadd.f32 %v5748_v29, %v539_v6 }
  0x26   : > { %4980 = vmatprep.subr.bf16.mxu0 %v5519_v37  ;;  %v5829_v32 = vpack.c.bf16 %v5819_v23, %v900_v24  ;;  %v1015_v33 = vrot.slane %v1013_v22, 1  ;;  %v1009_v39 = vsel %vm985_vm1, %v1004_v28, %v1008_v18  ;;  %v5882_v18 = vld [vmem:[%s5728_s28 + $0x38] sm:$0xff]   ;;  %v540_v22 = vmul.f32 %v4409_v1, %v5740_v25 }
  0x27   : > { %4984 = vmatprep.mubr.bf16.mxu0 %v1009_v39  ;;  %v4413_v24 = vunpack.c.h.bf16 %v4535_v53 }
  0x28   : > { %4789 = vmatpush3.bf16.msra.mxu1 %v5518_v35  ;;  %v579_v35 = vadd.f32 %v5748_v29, %v536_v3  ;;  %v1023_v41 = vshrl.u32 %v5829_v32, 16  ;;  %v1025_v42 = vshll.u32 %v5829_v32, 16  ;;  %v1016_v43 = vor.u32 %v1015_v33, %v1011_v21 }
  0x29   : > { %4981 = vmatpush3.bf16.msra.mxu0 %v5519_v37  ;;  %4790 = vmatprep.subr.bf16.mxu1 %v5520_v51  ;;  %v4533_v37 = vld [vmem:[%s5728_s28 + $0x20] sm:$0xff]   ;;  %v541_v33 = vmul.f32 %v4412_v7, %v5740_v25  ;;  %v542_v38 = vmul.f32 %v4413_v24, %v5740_v25 }
  0x2a   : > { %4982 = vmatprep.subr.bf16.mxu0 %v5521_v55  ;;  %v802_v46 = vrot.slane %v579_v35, 7  ;;  %v1027_v48 = vrot.slane %v1025_v42, 1  ;;  %v4404_v49 = vunpack.c.l.bf16 %v4533_v37  ;;  %v4405_v50 = vunpack.c.h.bf16 %v4533_v37 }
  0x2b   : > { %v5852_v54 = vsel %vm985_vm1, %v1016_v43, %v1020_v40  ;;  %v583_v37 = vadd.f32 %v5748_v29, %v540_v22  ;;  %v5527_v40 = vld [vmem:[%s6814_s3 + $0x158] sm:$0xff]   ;;  %v584_v42 = vadd.f32 %v5748_v29, %v541_v33  ;;  %v4416_v43 = vunpack.c.l.bf16 %v5882_v18 }
  0x2c   : > { %4791 = vmatpush3.bf16.msra.mxu1 %v5520_v51  ;;  %v5528_v51 = vld [vmem:[%s6814_s3 + $0x10] sm:$0xff]   ;;  %6853 = vst [vmem:[#allocation5_spill] sm:$0xff] %v5852_v54  ;;  %v5856_v56 = vsel %vm788_vm0, %v5834_v36, %v802_v46  ;;  %v919_v57 = vsel %vm788_vm0, %v802_v46, 0.0  ;;  %v1028_v58 = vor.u32 %v1027_v48, %v1023_v41  ;;  %v537_v3 = vmul.f32 %v4404_v49, %v5740_v25  ;;  %v5534_v48 = vld [vmem:[%s6814_s3 + $0x20] sm:$0xff]  }
  0x2d   : > { %4983 = vmatpush3.bf16.msra.mxu0 %v5521_v55  ;;  %4824 = vmatprep.subr.bf16.mxu1 %v5522_v8  ;;  %v1032_v55 = vrot.slane %v1030_v45, 1  ;;  %v5862_v63 = vpack.c.bf16 %v5856_v56, %v901_v47  ;;  %v5864_v0 = vpack.c.bf16 %v919_v57, %v919_v57  ;;  %v538_v5 = vmul.f32 %v4405_v50, %v5740_v25  ;;  %v5529_v57 = vld [vmem:[%s6814_s3 + $0x160] sm:$0xff]  }
  0x2e   : > { %5016 = vmatprep.subr.bf16.mxu0 %v5523_v14  ;;  %v580_v20 = vadd.f32 %v5748_v29, %v537_v3  ;;  %v5898_v41 = vrot.slane %v582_v31, 7  ;;  %v808_v47 = vrot.slane %v583_v37, 7  ;;  %v5933_v1 = vrot.slane %v584_v42, 7  ;;  %v5530_v42 = vld [vmem:[%s6814_s3 + $0x168] sm:$0xff]  }
  0x2f   : > { %4793 = vmatmul.mubr.bf16.vlgmr.msra.gmra.mrb[0].mxu1 %v1009_v39  ;;  %v5876_v12 = vsel %vm985_vm1, %v1028_v58, %v1032_v55  ;;  %v1037_v16 = vshll.u32 %v5862_v63, 16  ;;  %v1042_v17 = vshll.u32 %v5864_v0, 16  ;;  %v581_v21 = vadd.f32 %v5748_v29, %v538_v5 }
  0x30   : > { %4825 = vmatpush3.bf16.msra.mxu1 %v5522_v8  ;;  %4985 = vmatmul.mubr.bf16.vlgmr.msra.gmra.mrb[0].mxu0 %v5852_v54  ;;  %v5531_v8 = vld [vmem:[%s6814_s3 + $0x18] sm:$0xff]   ;;  %6854 = vst [vmem:[#allocation6_spill] sm:$0xff] %v5876_v12  ;;  %v903_v52 = vsel %vm788_vm0, 0.0, %v5898_v41  ;;  %v5926_v53 = vsel %vm788_vm0, %v5898_v41, %v808_v47  ;;  %v921_v55 = vsel %vm788_vm0, %v808_v47, 0.0  ;;  %v585_v58 = vadd.f32 %v5748_v29, %v542_v38 }
  0x31   : > { %4826 = vmatprep.subr.bf16.mxu1 %v5525_v27  ;;  %4796 = vmatprep.mubr.bf16.mxu1 %v5852_v54  ;;  %v1039_v28 = vrot.slane %v1037_v16, 1  ;;  %v1044_v30 = vrot.slane %v1042_v17, 1  ;;  %v805_v35 = vrot.slane %v581_v21, 7  ;;  %v5939_v7 = vpack.c.bf16 %v5926_v53, %v903_v52 }
  0x32   : > { %5017 = vmatpush3.bf16.msra.mxu0 %v5523_v14  ;;  %v1035_v14 = vshrl.u32 %v5862_v63, 16  ;;  %4988 = vmatprep.mubr.bf16.mxu0 %v5876_v12  ;;  %v5944_v16 = vpack.c.bf16 %v921_v55, %v921_v55  ;;  %v811_v17 = vrot.slane %v585_v58, 7  ;;  %v543_v33 = vmul.f32 %v4416_v43, %v5740_v25  ;;  %v4537_v43 = vld [vmem:[%s5728_s28 + $0x40] sm:$0xff]   ;;  %v5538_v58 = vld [vmem:[%s6814_s3 + $0x30] sm:$0xff]  }
  0x33   : > { %5018 = vmatprep.subr.bf16.mxu0 %v5524_v44  ;;  %v920_v46 = vsel %vm788_vm0, %v805_v35, 0.0  ;;  %v1059_v24 = vshrl.u32 %v5939_v7, 16 }
  0x34   : > { %4827 = vmatpush3.bf16.msra.mxu1 %v5525_v27  ;;  %v5891_v27 = vrot.slane %v580_v20, 7  ;;  %v1040_v39 = vor.u32 %v1039_v28, %v1035_v14  ;;  %v5536_v14 = vld [vmem:[%s6814_s3 + $0x28] sm:$0xff]   ;;  %v4417_v20 = vunpack.c.h.bf16 %v5882_v18  ;;  %v1066_v28 = vshll.u32 %v5944_v16, 16 }
  0x35   : > { %4828 = vmatprep.subr.bf16.mxu1 %v5528_v51  ;;  %v922_v31 = vsel %vm788_vm0, %v811_v17, 0.0 }
  0x36   : > { %5019 = vmatpush3.bf16.msra.mxu0 %v5524_v44  ;;  %v5904_v44 = vsel %vm788_vm0, %v5891_v27, %v805_v35  ;;  %v902_v45 = vsel %vm788_vm0, 0.0, %v5891_v27  ;;  %v5913_v49 = vsel %vm985_vm1, %v1040_v39, %v1044_v30  ;;  %v5954_v30 = vsel %vm788_vm0, %v5933_v1, %v811_v17 }
  0x37   : > { %4797 = vmatmul.mubr.bf16.gmra.mrb[4].mxu1 %v5876_v12  ;;  %5020 = vmatprep.subr.bf16.mxu0 %v5526_v2  ;;  %6855 = vst [vmem:[#allocation7_spill] sm:$0xff] %v5913_v49  ;;  %v5916_v50 = vpack.c.bf16 %v5904_v44, %v902_v45  ;;  %v5961_v38 = vpack.c.bf16 %v922_v31, %v922_v31  ;;  %v1068_v39 = vrot.slane %v1066_v28, 1 }
  0x38   : > { %4829 = vmatpush3.bf16.msra.mxu1 %v5528_v51  ;;  %v5918_v51 = vpack.c.bf16 %v920_v46, %v920_v46  ;;  %4989 = vmatmul.mubr.bf16.gmra.mrb[4].mxu0 %v5913_v49  ;;  %v544_v45 = vmul.f32 %v4417_v20, %v5740_v25  ;;  %v586_v46 = vadd.f32 %v5748_v29, %v543_v33  ;;  %v4420_v20 = vunpack.c.l.bf16 %v4537_v43 }
  0x39   : > { %4830 = vmatprep.subr.bf16.mxu1 %v5531_v8  ;;  %4800 = vmatprep.mubr.bf16.mxu1 %v5913_v49  ;;  %v1047_v3 = vshrl.u32 %v5916_v50, 16  ;;  %v1049_v5 = vshll.u32 %v5916_v50, 16 }
  0x3a   : > { %5021 = vmatpush3.bf16.msra.mxu0 %v5526_v2  ;;  %v1054_v6 = vshll.u32 %v5918_v51, 16  ;;  %v904_v2 = vsel %vm788_vm0, 0.0, %v5933_v1 }
  0x3b   : > { %5022 = vmatprep.subr.bf16.mxu0 %v5527_v40  ;;  %v1051_v21 = vrot.slane %v1049_v5, 1  ;;  %v5959_v37 = vpack.c.bf16 %v5954_v30, %v904_v2  ;;  %v5982_v5 = vrot.slane %v586_v46, 7  ;;  %v1669_v46 = vrot.slane %v5812_v19, 1  ;;  %v5533_v19 = vld [vmem:[%s6814_s3 + $0x178] sm:$0xff]  }
  0x3c   : > { %4831 = vmatpush3.bf16.msra.mxu1 %v5531_v8  ;;  %v1056_v22 = vrot.slane %v1054_v6, 1  ;;  %v1061_v8 = vshll.u32 %v5939_v7, 16  ;;  %v1666_v6 = vrot.slane %v5784_v61, 1  ;;  %v5532_v61 = vld [vmem:[%s6814_s3 + $0x170] sm:$0xff]  }
  0x3d   : > { %4832 = vmatprep.subr.bf16.mxu1 %v5534_v48  ;;  %v1052_v18 = vor.u32 %v1051_v21, %v1047_v3  ;;  %v1073_v55 = vshll.u32 %v5959_v37, 16  ;;  %v587_v3 = vadd.f32 %v5748_v29, %v544_v45  ;;  %v4421_v21 = vunpack.c.h.bf16 %v4537_v43 }
  0x3e   : > { %5023 = vmatpush3.bf16.msra.mxu0 %v5527_v40  ;;  %v1063_v35 = vrot.slane %v1061_v8, 1  ;;  %v1665_v40 = vrot.slane %v5782_v60, 1  ;;  %v1078_v60 = vshll.u32 %v5961_v38, 16  ;;  %v905_v28 = vsel %vm788_vm0, 0.0, %v5982_v5 }
  0x3f   : > { %5024 = vmatprep.subr.bf16.mxu0 %v5529_v57  ;;  %v5971_v47 = vsel %vm985_vm1, %v1052_v18, %v1056_v22  ;;  %v1075_v2 = vrot.slane %v1073_v55, 1  ;;  %v4538_v22 = vld [vmem:[%s5728_s28 + $0x48] sm:$0xff]   ;;  %v814_v8 = vrot.slane %v587_v3, 7  ;;  %v546_v33 = vmul.f32 %v4421_v21, %v5740_v25 }
  0x40   : > { %4833 = vmatpush3.bf16.msra.mxu1 %v5534_v48  ;;  %6856 = vst [vmem:[#allocation8_spill] sm:$0xff] %v5971_v47  ;;  %v1064_v52 = vor.u32 %v1063_v35, %v1059_v24  ;;  %v1071_v48 = vshrl.u32 %v5959_v37, 16  ;;  %4992 = vmatprep.mubr.bf16.mxu0 %v5971_v47  ;;  %v1080_v24 = vrot.slane %v1078_v60, 1  ;;  %v5996_v31 = vsel %vm1661_vm2, %v1665_v40, %v1666_v6  ;;  %v5540_v35 = vld [vmem:[%s6814_s3 + $0x38] sm:$0xff]  }
  0x41   : > { %4834 = vmatprep.subr.bf16.mxu1 %v5536_v14  ;;  %4801 = vmatmul.mubr.bf16.gmra.mrb[8].mxu1 %v5971_v47  ;;  %6858 = vst [vmem:[#allocation10_spill] sm:$0xff] %v5996_v31  ;;  %v1668_v18 = vrot.slane %v5805_v13, 1  ;;  %v923_v45 = vsel %vm788_vm0, %v814_v8, 0.0  ;;  %v4424_v40 = vunpack.c.l.bf16 %v4538_v22  ;;  %v4425_v60 = vunpack.c.h.bf16 %v4538_v22 }
  0x42   : > { %v5986_v17 = vsel %vm985_vm1, %v1064_v52, %v1068_v39  ;;  %5025 = vmatpush3.bf16.msra.mxu0 %v5529_v57  ;;  %v1076_v57 = vor.u32 %v1075_v2, %v1071_v48  ;;  %v6007_v39 = vsel %vm788_vm0, %v5982_v5, %v814_v8  ;;  %v6017_v52 = vpack.c.bf16 %v923_v45, %v923_v45 }
  0x43   : > { %6857 = vst [vmem:[#allocation9_spill] sm:$0xff] %v5986_v17  ;;  %4993 = vmatmul.mubr.bf16.gmra.mrb[8].mxu0 %v5986_v17  ;;  %5026 = vmatprep.subr.bf16.mxu0 %v5530_v42  ;;  %v6015_v13 = vpack.c.bf16 %v6007_v39, %v905_v28  ;;  %v6026_v55 = vsel %vm1661_vm2, %v1668_v18, %v1669_v46  ;;  %v1671_v22 = vrot.slane %v5829_v32, 1  ;;  %v1672_v45 = vrot.slane %v5831_v34, 1  ;;  %v5535_v34 = vld [vmem:[%s6814_s3 + $0x180] sm:$0xff]  }
  0x44   : > { %4835 = vmatpush3.bf16.msra.mxu1 %v5536_v14  ;;  %4804 = vmatprep.mubr.bf16.mxu1 %v5986_v17  ;;  %v545_v14 = vmul.f32 %v4420_v20, %v5740_v25  ;;  %v6012_v43 = vsel %vm985_vm1, %v1076_v57, %v1080_v24  ;;  %6860 = vst [vmem:[#allocation12_spill] sm:$0xff] %v6026_v55  ;;  %v1090_v20 = vshll.u32 %v6017_v52, 16  ;;  %v4539_v57 = vld [vmem:[%s5728_s28 + $0x50] sm:$0xff]  }
  0x45   : > { %4836 = vmatprep.subr.bf16.mxu1 %v5538_v58  ;;  %6859 = vst [vmem:[#allocation11_spill] sm:$0xff] %v6012_v43  ;;  %4996 = vmatprep.mubr.bf16.mxu0 %v6012_v43  ;;  %v547_v3 = vmul.f32 %v4424_v40, %v5740_v25  ;;  %v1083_v6 = vshrl.u32 %v6015_v13, 16  ;;  %v1085_v2 = vshll.u32 %v6015_v13, 16  ;;  %v548_v8 = vmul.f32 %v4425_v60, %v5740_v25 }
  0x46   : > { %5027 = vmatpush3.bf16.msra.mxu0 %v5530_v42  ;;  %v588_v48 = vadd.f32 %v5748_v29, %v545_v14  ;;  %v589_v42 = vadd.f32 %v5748_v29, %v546_v33  ;;  %v6042_v14 = vld [vmem:[%s6814_s3 + $0x80] sm:$0xff]   ;;  %v1092_v18 = vrot.slane %v1090_v20, 1 }
  0x47   : > { %5028 = vmatprep.subr.bf16.mxu0 %v5532_v61  ;;  %v590_v28 = vadd.f32 %v5748_v29, %v547_v3  ;;  %v1087_v33 = vrot.slane %v1085_v2, 1  ;;  %v591_v40 = vadd.f32 %v5748_v29, %v548_v8  ;;  %v6064_v3 = vsel %vm1661_vm2, %v1671_v22, %v1672_v45 }
  0x48   : > { %v6032_v21 = vrot.slane %v588_v48, 7  ;;  %4837 = vmatpush3.bf16.msra.mxu1 %v5538_v58  ;;  %v817_v24 = vrot.slane %v589_v42, 7  ;;  %6861 = vst [vmem:[#allocation13_spill] sm:$0xff] %v6064_v3 }
  0x49   : > { %4805 = vmatmul.mubr.bf16.gmra.mrb[12].mxu1 %v6012_v43  ;;  %4838 = vmatprep.subr.bf16.mxu1 %v5540_v35  ;;  %v6053_v48 = vrot.slane %v590_v28, 7  ;;  %v1088_v42 = vor.u32 %v1087_v33, %v1083_v6  ;;  %v820_v2 = vrot.slane %v591_v40, 7  ;;  %v4429_v6 = vunpack.c.h.bf16 %v4539_v57 }
  0x4a   : > { %5029 = vmatpush3.bf16.msra.mxu0 %v5532_v61  ;;  %v906_v58 = vsel %vm788_vm0, 0.0, %v6032_v21  ;;  %v6049_v46 = vsel %vm788_vm0, %v6032_v21, %v817_v24  ;;  %v924_v32 = vsel %vm788_vm0, %v817_v24, 0.0  ;;  %v4428_v24 = vunpack.c.l.bf16 %v4539_v57 }
  0x4b   : > { %5030 = vmatprep.subr.bf16.mxu0 %v5533_v19  ;;  %v6056_v60 = vpack.c.bf16 %v6049_v46, %v906_v58  ;;  %v6058_v61 = vpack.c.bf16 %v924_v32, %v924_v32  ;;  %v907_v20 = vsel %vm788_vm0, 0.0, %v6053_v48  ;;  %v6070_v8 = vsel %vm985_vm1, %v1088_v42, %v1092_v18  ;;  %v4540_v58 = vld [vmem:[%s5728_s28 + $0x58] sm:$0xff]  }
  0x4c   : > { %4839 = vmatpush3.bf16.msra.mxu1 %v5540_v35  ;;  %6862 = vst [vmem:[#allocation14_spill] sm:$0xff] %v6070_v8  ;;  %4997 = vmatmul.mubr.bf16.gmra.mrb[12].mxu0 %v6070_v8  ;;  %v6079_v35 = vsel %vm788_vm0, %v6053_v48, %v820_v2  ;;  %v925_v57 = vsel %vm788_vm0, %v820_v2, 0.0  ;;  %v549_v18 = vmul.f32 %v4428_v24, %v5740_v25  ;;  %v1674_v24 = vrot.slane %v5862_v63, 1 }
  0x4d   : > { %4872 = vmatprep.subr.bf16.mxu1 %v6042_v14  ;;  %v1095_v28 = vshrl.u32 %v6056_v60, 16  ;;  %v1097_v33 = vshll.u32 %v6056_v60, 16  ;;  %v1102_v22 = vshll.u32 %v6058_v61, 16  ;;  %4808 = vmatprep.mubr.bf16.mxu1 %v6070_v8  ;;  %v6087_v40 = vpack.c.bf16 %v6079_v35, %v907_v20 }
  0x4e   : > { %5031 = vmatpush3.bf16.msra.mxu0 %v5533_v19  ;;  %v550_v19 = vmul.f32 %v4429_v6, %v5740_v25  ;;  %5032 = vmatprep.mubr.bf16.mxu0 %v5996_v31  ;;  %v6089_v42 = vpack.c.bf16 %v925_v57, %v925_v57  ;;  %v592_v26 = vadd.f32 %v5748_v29, %v549_v18  ;;  %v1675_v6 = vrot.slane %v5864_v0, 1  ;;  %v5537_v18 = vld [vmem:[%s6814_s3 + $0x188] sm:$0xff]  }
  0x4f   : > { %v1099_v45 = vrot.slane %v1097_v33, 1  ;;  %v1104_v32 = vrot.slane %v1102_v22, 1  ;;  %5064 = vmatprep.subr.bf16.mxu0 %v5535_v34  ;;  %v1107_v43 = vshrl.u32 %v6087_v40, 16  ;;  %v1109_v33 = vshll.u32 %v6087_v40, 16 }
  0x50   : > { %v593_v2 = vadd.f32 %v5748_v29, %v550_v19  ;;  %v1114_v22 = vshll.u32 %v6089_v42, 16  ;;  %v6098_v17 = vrot.slane %v592_v26, 7  ;;  %v6101_v57 = vsel %vm1661_vm2, %v1674_v24, %v1675_v6  ;;  %v4541_v19 = vld [vmem:[%s5728_s28 + $0x60] sm:$0xff]  }
  0x51   : > { %v1100_v8 = vor.u32 %v1099_v45, %v1095_v28  ;;  %6863 = vst [vmem:[#allocation15_spill] sm:$0xff] %v6101_v57  ;;  %v4432_v63 = vunpack.c.l.bf16 %v4540_v58  ;;  %v1111_v28 = vrot.slane %v1109_v33, 1  ;;  %v4433_v47 = vunpack.c.h.bf16 %v4540_v58 }
  0x52   : > { %v823_v20 = vrot.slane %v593_v2, 7  ;;  %v1116_v45 = vrot.slane %v1114_v22, 1  ;;  %v908_v2 = vsel %vm788_vm0, 0.0, %v6098_v17  ;;  %v1677_v22 = vrot.slane %v5916_v50, 1 }
  0x53   : > { %v6108_v0 = vsel %vm985_vm1, %v1100_v8, %v1104_v32  ;;  %v551_v6 = vmul.f32 %v4432_v63, %v5740_v25  ;;  %v1112_v49 = vor.u32 %v1111_v28, %v1107_v43  ;;  %v552_v58 = vmul.f32 %v4433_v47, %v5740_v25 }
  0x54   : > { %6864 = vst [vmem:[#allocation16_spill] sm:$0xff] %v6108_v0  ;;  %4809 = vmatmul.mubr.bf16.gmra.mrb[16].mxu1 %v6108_v0  ;;  %v6113_v26 = vsel %vm788_vm0, %v6098_v17, %v823_v20  ;;  %v926_v24 = vsel %vm788_vm0, %v823_v20, 0.0  ;;  %5033 = vmatmul.mubr.bf16.vlgmr.msra.gmra.mrb[0].mxu0 %v6026_v55  ;;  %v1678_v0 = vrot.slane %v5918_v51, 1  ;;  %v4436_v20 = vunpack.c.l.bf16 %v4541_v19 }
  0x55   : > { %v6120_v8 = vpack.c.bf16 %v6113_v26, %v908_v2  ;;  %v6122_v32 = vpack.c.bf16 %v926_v24, %v926_v24  ;;  %v594_v33 = vadd.f32 %v5748_v29, %v551_v6  ;;  %5065 = vmatpush3.bf16.msra.mxu0 %v5535_v34  ;;  %v6130_v43 = vsel %vm985_vm1, %v1112_v49, %v1116_v45  ;;  %v5539_v34 = vld [vmem:[%s6814_s3 + $0x190] sm:$0xff]   ;;  %v4542_v45 = vld [vmem:[%s5728_s28 + $0x68] sm:$0xff]  }
  0x56   : > { %6865 = vst [vmem:[#allocation17_spill] sm:$0xff] %v6130_v43  ;;  %5036 = vmatprep.mubr.bf16.mxu0 %v6064_v3  ;;  %4812 = vmatprep.mubr.bf16.mxu1 %v6130_v43  ;;  %v595_v50 = vadd.f32 %v5748_v29, %v552_v58  ;;  %v6141_v51 = vsel %vm1661_vm2, %v1677_v22, %v1678_v0  ;;  %v4437_v49 = vunpack.c.h.bf16 %v4541_v19  ;;  %v1680_v43 = vrot.slane %v5939_v7, 1 }
  0x57   : > { %v1119_v63 = vshrl.u32 %v6120_v8, 16  ;;  %v1121_v47 = vshll.u32 %v6120_v8, 16  ;;  %v1126_v28 = vshll.u32 %v6122_v32, 16  ;;  %5066 = vmatprep.subr.bf16.mxu0 %v5537_v18  ;;  %v6138_v2 = vrot.slane %v594_v33, 7  ;;  %6866 = vst [vmem:[#allocation18_spill] sm:$0xff] %v6141_v51 }
  0x58   : > { %v553_v12 = vmul.f32 %v4436_v20, %v5740_v25  ;;  %v826_v54 = vrot.slane %v595_v50, 7  ;;  %v554_v33 = vmul.f32 %v4437_v49, %v5740_v25  ;;  %v1681_v0 = vrot.slane %v5944_v16, 1  ;;  %v5541_v16 = vld [vmem:[%s6814_s3 + $0x198] sm:$0xff]  }
  0x59   : > { %v1123_v24 = vrot.slane %v1121_v47, 1  ;;  %v1128_v6 = vrot.slane %v1126_v28, 1  ;;  %v909_v58 = vsel %vm788_vm0, 0.0, %v6138_v2  ;;  %5067 = vmatpush3.bf16.msra.mxu0 %v5537_v18  ;;  %v4440_v3 = vunpack.c.l.bf16 %v4542_v45 }
  0x5a   : > { %v596_v22 = vadd.f32 %v5748_v29, %v553_v12  ;;  %v4441_v47 = vunpack.c.h.bf16 %v4542_v45  ;;  %v6156_v20 = vsel %vm788_vm0, %v6138_v2, %v826_v54  ;;  %v927_v7 = vsel %vm788_vm0, %v826_v54, 0.0  ;;  %5068 = vmatprep.subr.bf16.mxu0 %v5539_v34  ;;  %v4543_v54 = vld [vmem:[%s5728_s28 + $0x70] sm:$0xff]  }
  0x5b   : > { %v1124_v19 = vor.u32 %v1123_v24, %v1119_v63  ;;  %v597_v28 = vadd.f32 %v5748_v29, %v554_v33  ;;  %v6161_v50 = vsel %vm1661_vm2, %v1680_v43, %v1681_v0  ;;  %v6170_v18 = vpack.c.bf16 %v6156_v20, %v909_v58 }
  0x5c   : > { %6867 = vst [vmem:[#allocation19_spill] sm:$0xff] %v6161_v50  ;;  %v6172_v63 = vpack.c.bf16 %v927_v7, %v927_v7  ;;  %v6174_v49 = vrot.slane %v596_v22, 7  ;;  %5037 = vmatmul.mubr.bf16.gmra.mrb[4].mxu0 %v6101_v57  ;;  %v555_v45 = vmul.f32 %v4440_v3, %v5740_v25  ;;  %v556_v24 = vmul.f32 %v4441_v47, %v5740_v25  ;;  %v5543_v47 = vld [vmem:[%s6814_s3 + $0x1a0] sm:$0xff]  }
  0x5d   : > { %v6167_v12 = vsel %vm985_vm1, %v1124_v19, %v1128_v6  ;;  %v829_v43 = vrot.slane %v597_v28, 7  ;;  %v1683_v6 = vrot.slane %v5959_v37, 1  ;;  %v1131_v33 = vshrl.u32 %v6170_v18, 16  ;;  %5040 = vmatprep.mubr.bf16.mxu0 %v6141_v51  ;;  %5069 = vmatpush3.bf16.msra.mxu0 %v5539_v34 }
  0x5e   : > { %6868 = vst [vmem:[#allocation20_spill] sm:$0xff] %v6167_v12  ;;  %4813 = vmatmul.mubr.bf16.gmra.mrb[20].mxu1 %v6167_v12  ;;  %v1133_v58 = vshll.u32 %v6170_v18, 16  ;;  %v1138_v0 = vshll.u32 %v6172_v63, 16  ;;  %v910_v19 = vsel %vm788_vm0, 0.0, %v6174_v49  ;;  %v598_v37 = vadd.f32 %v5748_v29, %v555_v45  ;;  %5070 = vmatprep.subr.bf16.mxu0 %v5541_v16 }
  0x5f   : > { %v6190_v22 = vsel %vm788_vm0, %v6174_v49, %v829_v43  ;;  %v928_v25 = vsel %vm788_vm0, %v829_v43, 0.0  ;;  %v599_v3 = vadd.f32 %v5748_v29, %v556_v24  ;;  %v1684_v43 = vrot.slane %v5961_v38, 1 }
  0x60   : > { %v1135_v7 = vrot.slane %v1133_v58, 1  ;;  %v1140_v28 = vrot.slane %v1138_v0, 1  ;;  %v6199_v12 = vpack.c.bf16 %v6190_v22, %v910_v19  ;;  %v6201_v34 = vpack.c.bf16 %v928_v25, %v928_v25 }
  0x61   : > { %v6203_v51 = vrot.slane %v598_v37, 7  ;;  %v832_v57 = vrot.slane %v599_v3, 7  ;;  %v4444_v45 = vunpack.c.l.bf16 %v4543_v54  ;;  %5071 = vmatpush3.bf16.msra.mxu0 %v5541_v16  ;;  %v6217_v38 = vsel %vm1661_vm2, %v1683_v6, %v1684_v43 }
  0x62   : > { %v1136_v55 = vor.u32 %v1135_v7, %v1131_v33  ;;  %v1143_v29 = vshrl.u32 %v6199_v12, 16  ;;  %v1145_v24 = vshll.u32 %v6199_v12, 16  ;;  %v1150_v31 = vshll.u32 %v6201_v34, 16  ;;  %6869 = vst [vmem:[#allocation21_spill] sm:$0xff] %v6217_v38  ;;  %5072 = vmatprep.subr.bf16.mxu0 %v5543_v47  ;;  %v5545_v33 = vld [vmem:[%s6814_s3 + $0x1a8] sm:$0xff]  }
  0x63   : > { %v6211_v58 = vsel %vm788_vm0, %v6203_v51, %v832_v57  ;;  %v911_v0 = vsel %vm788_vm0, 0.0, %v6203_v51  ;;  %v929_v19 = vsel %vm788_vm0, %v832_v57, 0.0  ;;  %v4445_v6 = vunpack.c.h.bf16 %v4543_v54  ;;  %v6235_v7 = vld [vmem:[%s6816_s5] ss:$0 sm:$0xff] }
  0x64   : > { %v6223_v25 = vsel %vm985_vm1, %v1136_v55, %v1140_v28  ;;  %v1147_v16 = vrot.slane %v1145_v24, 1  ;;  %v1152_v37 = vrot.slane %v1150_v31, 1  ;;  %v6226_v3 = vpack.c.bf16 %v6211_v58, %v911_v0  ;;  %5041 = vmatmul.mubr.bf16.gmra.mrb[8].mxu0 %v6161_v50 }
  0x65   : > { %6870 = vst [vmem:[#allocation22_spill] sm:$0xff] %v6223_v25  ;;  %4816 = vmatprep.mubr.bf16.mxu1 %v6223_v25  ;;  %v6230_v57 = vpack.c.bf16 %v929_v19, %v929_v19  ;;  %v557_v55 = vmul.f32 %v6235_v7, %v4444_v45  ;;  %v1686_v28 = vrot.slane %v6015_v13, 1  ;;  %5044 = vmatprep.mubr.bf16.mxu0 %v6217_v38  ;;  %v1687_v0 = vrot.slane %v6017_v52, 1  ;;  %v6248_v45 = vld [vmem:[%s6817_s6] ss:$0 sm:$0xff] }
  0x66   : > { %v1148_v31 = vor.u32 %v1147_v16, %v1143_v29  ;;  %v1155_v43 = vshrl.u32 %v6226_v3, 16  ;;  %v1157_v24 = vshll.u32 %v6226_v3, 16  ;;  %5073 = vmatpush3.bf16.msra.mxu0 %v5543_v47  ;;  %v558_v19 = vmul.f32 %v6235_v7, %v4445_v6  ;;  %v5547_v16 = vld [vmem:[%s6814_s3 + $0x1b0] sm:$0xff]  }
  0x67   : > { %v1162_v54 = vshll.u32 %v6230_v57, 16  ;;  %v600_v13 = vadd.f32 %v6248_v45, %v557_v55  ;;  %v1689_v29 = vrot.slane %v6056_v60, 1  ;;  %5074 = vmatprep.subr.bf16.mxu0 %v5545_v33  ;;  %v1690_v6 = vrot.slane %v6058_v61, 1  ;;  %v5549_v61 = vld [vmem:[%s6814_s3 + $0x1b8] sm:$0xff]  }
  0x68   : > { %v6256_v52 = vsel %vm985_vm1, %v1148_v31, %v1152_v37  ;;  %v1159_v47 = vrot.slane %v1157_v24, 1  ;;  %v601_v38 = vadd.f32 %v6248_v45, %v558_v19  ;;  %v6262_v60 = vsel %vm1661_vm2, %v1686_v28, %v1687_v0 }
  0x69   : > { %4817 = vmatmul.mubr.bf16.gmra.mrb[24].mxu1 %v6256_v52  ;;  %v1164_v25 = vrot.slane %v1162_v54, 1  ;;  %v834_v50 = vrot.slane %v600_v13, 7  ;;  %v6266_v37 = vsel %vm1661_vm2, %v1689_v29, %v1690_v6  ;;  %v1696_v54 = vrot.slane %v6122_v32, 1  ;;  %v4544_v13 = vld [vmem:[%s5728_s28 + $0x78] sm:$0xff]   ;;  %s6755_s28 = scalar_lea.vmem %s6818_s7, %s4350_s21 }
  0x6a   : > { %v1160_v55 = vor.u32 %v1159_v47, %v1155_v43  ;;  %5075 = vmatpush3.bf16.msra.mxu0 %v5545_v33  ;;  %v835_v11 = vrot.slane %v601_v38, 7  ;;  %v1692_v38 = vrot.slane %v6087_v40, 1  ;;  %v1693_v43 = vrot.slane %v6089_v42, 1  ;;  %v6294_v40 = vld [vmem:[%s6814_s3 + $0x1c0] sm:$0xff]  }
  0x6b   : > { %v912_v10 = vsel %vm788_vm0, 0.0, %v834_v50  ;;  %5076 = vmatprep.subr.bf16.mxu0 %v5547_v16  ;;  %v6315_v47 = vpack.c.bf16 %v5954_v30, %v5933_v1  ;;  %v4448_v6 = vunpack.c.l.bf16 %v4544_v13  ;;  %v6331_v1 = vpack.c.bf16 %v6079_v35, %v6053_v48 }
  0x6c   : > { %v6272_v31 = vsel %vm985_vm1, %v1160_v55, %v1164_v25  ;;  %v836_v28 = vsel %vm788_vm0, %v834_v50, %v835_v11  ;;  %v930_v33 = vsel %vm788_vm0, %v835_v11, 0.0  ;;  %5045 = vmatmul.mubr.bf16.gmra.mrb[12].mxu0 %v6262_v60  ;;  %v1695_v25 = vrot.slane %v6120_v8, 1 }
  0x6d   : > { %4820 = vmatprep.mubr.bf16.mxu1 %v6272_v31  ;;  %v6280_v24 = vpack.c.bf16 %v836_v28, %v912_v10  ;;  %v6282_v0 = vpack.c.bf16 %v930_v33, %v930_v33  ;;  %5048 = vmatprep.mubr.bf16.mxu0 %v6266_v37  ;;  %v6289_v11 = vpack.c.bf16 %v5904_v44, %v5891_v27  ;;  %v4449_v55 = vunpack.c.h.bf16 %v4544_v13 }
  0x6e   : > { %5077 = vmatpush3.bf16.msra.mxu0 %v5547_v16  ;;  %v6302_v8 = vpack.c.bf16 %v5683_v4, %v5683_v4  ;;  %v6305_v27 = vsel %vm1661_vm2, %v1692_v38, %v1693_v43  ;;  %v6309_v44 = vpack.c.bf16 %v5926_v53, %v5898_v41  ;;  %v1698_v16 = vrot.slane %v6170_v18, 1 }
  0x6f   : > { %5078 = vmatprep.subr.bf16.mxu0 %v5549_v61  ;;  %v1167_v10 = vshrl.u32 %v6280_v24, 16  ;;  %v1169_v42 = vshll.u32 %v6280_v24, 16  ;;  %v1174_v19 = vshll.u32 %v6282_v0, 16  ;;  %v6318_v4 = vsel %vm1661_vm2, %v1695_v25, %v1696_v54  ;;  %v5548_v54 = vld [vmem:[%s6814_s3 + $0x98] sm:$0xff]  }
  0x70   : > { %v6322_v41 = vpack.c.bf16 %v6007_v39, %v5982_v5  ;;  %v6327_v18 = vpack.c.bf16 %v6049_v46, %v6032_v21  ;;  %v6335_v30 = vpack.c.bf16 %v6113_v26, %v6098_v17  ;;  %v559_v5 = vmul.f32 %v6235_v7, %v4448_v6  ;;  %v5553_v6 = vld [vmem:[%s6814_s3 + $0x1c8] sm:$0xff]  }
  0x71   : > { %v1171_v32 = vrot.slane %v1169_v42, 1  ;;  %v1176_v29 = vrot.slane %v1174_v19, 1  ;;  %v560_v39 = vmul.f32 %v6235_v7, %v4449_v55  ;;  %v6346_v21 = vpack.c.bf16 %v6156_v20, %v6138_v2 }
  0x72   : > { %5079 = vmatpush3.bf16.msra.mxu0 %v5549_v61  ;;  %v6350_v46 = vpack.c.bf16 %v6190_v22, %v6174_v49  ;;  %v1699_v48 = vrot.slane %v6172_v63, 1  ;;  %v6359_v35 = vpack.c.bf16 %v6211_v58, %v6203_v51  ;;  %v6361_v26 = vpack.c.bf16 %v836_v28, %v834_v50 }
  0x73   : > { %5112 = vmatprep.subr.bf16.mxu0 %v6294_v40  ;;  %v1172_v53 = vor.u32 %v1171_v32, %v1167_v10  ;;  %v1701_v2 = vrot.slane %v6199_v12, 1  ;;  %v1702_v20 = vrot.slane %v6201_v34, 1  ;;  %v602_v49 = vadd.f32 %v6248_v45, %v559_v5  ;;  %v5544_v34 = vld [vmem:[%s6814_s3 + $0x88] sm:$0xff]   ;;  %v5554_v32 = vld [vmem:[%s6814_s3 + $0xb0] sm:$0xff]  }
  0x74   : > { %5049 = vmatmul.mubr.bf16.gmra.mrb[16].mxu0 %v6305_v27  ;;  %v603_v22 = vadd.f32 %v6248_v45, %v560_v39  ;;  %v6372_v63 = vsel %vm1661_vm2, %v1698_v16, %v1699_v48  ;;  %v6381_v12 = vpack.c.bf16 %v5801_v9, %v5780_v59  ;;  %v1704_v7 = vrot.slane %v6226_v3, 1  ;;  %v5546_v3 = vld [vmem:[%s6814_s3 + $0x90] sm:$0xff]   ;;  %v5557_v48 = vld [vmem:[%s6814_s3 + $0x1d8] sm:$0xff]  }
  0x75   : > { %v6353_v17 = vsel %vm985_vm1, %v1172_v53, %v1176_v29  ;;  %5052 = vmatprep.mubr.bf16.mxu0 %v6318_v4  ;;  %v6375_v51 = vsel %vm1661_vm2, %v1701_v2, %v1702_v20  ;;  %v6377_v50 = vrot.slane %v602_v49, 7  ;;  %v1705_v45 = vrot.slane %v6230_v57, 1  ;;  %v5556_v53 = vld [vmem:[%s6814_s3 + $0xb8] sm:$0xff]   ;;  %v5555_v39 = vld [vmem:[%s6814_s3 + $0x1d0] sm:$0xff]   ;;  %v5559_v2 = vld [vmem:[%s6814_s3 + $0x1e0] sm:$0xff]  }
  0x76   : > { %4821 = vmatmul.mubr.bf16.gmra.mrb[28].mxu1 %v6353_v17  ;;  %v838_v58 = vrot.slane %v603_v22, 7  ;;  %v1707_v28 = vrot.slane %v6280_v24, 1  ;;  %v1708_v59 = vrot.slane %v6282_v0, 1  ;;  %v6415_v0 = vpack.c.bf16 %v5819_v23, %v5810_v15  ;;  %v5550_v23 = vld [vmem:[%s6814_s3 + $0xa0] sm:$0xff]   ;;  %v5561_v20 = vld [vmem:[%s6814_s3 + $0x1e8] sm:$0xff]   ;;  %v5563_v49 = vld [vmem:[%s6814_s3 + $0x1f0] sm:$0xff]  }
  0x77   : > { %4840 = vmatprep.mubr.msk.bf16.mxu1 %vm6337_vm5, %v6302_v8  ;;  %v913_v33 = vsel %vm788_vm0, 0.0, %v6377_v50  ;;  %v6410_v57 = vsel %vm1661_vm2, %v1704_v7, %v1705_v45  ;;  %v6422_v25 = vpack.c.bf16 %v5856_v56, %v5834_v36  ;;  %v5552_v56 = vld [vmem:[%s6814_s3 + $0xa8] sm:$0xff]   ;;  %v5565_v22 = vld [vmem:[%s6814_s3 + $0x1f8] sm:$0xff]  }
  0x78   : > { %v6397_v9 = vsel %vm788_vm0, %v6377_v50, %v838_v58  ;;  %v931_v38 = vsel %vm788_vm0, %v838_v58, 0.0  ;;  %v5567_v58 = vld [vmem:[%s6814_s3 + $0x200] sm:$0xff]   ;;  %v6874_v45 = vld [vmem:[#allocation3_spill] sm:$0xff] }
  0x79   : > { %v965_v43 = vpack.c.bf16 %v6397_v9, %v913_v33  ;;  %v966_v24 = vpack.c.bf16 %v931_v38, %v931_v38  ;;  %v5560_v33 = vld [vmem:[%s6814_s3 + $0xc8] sm:$0xff]   ;;  %v6875_v38 = vld [vmem:[#allocation10_spill] sm:$0xff] }
  0x7b   : > { %v2515_v10 = vrot.slane %v965_v43, 1  ;;  %v2516_v15 = vrot.slane %v966_v24, 1  ;;  %v2245_v42 = vshll.u32 %v965_v43, 16  ;;  %v2243_v19 = vshrl.u32 %v965_v43, 16  ;;  %v5562_v43 = vld [vmem:[%s6814_s3 + $0xd0] sm:$0xff]  }
  0x7c   : > { %5053 = vmatmul.mubr.bf16.gmra.mrb[20].mxu0 %v6372_v63  ;;  %v2250_v13 = vshll.u32 %v966_v24, 16  ;;  %v6570_v24 = vpack.c.bf16 %v6397_v9, %v6377_v50  ;;  %v5566_v50 = vld [vmem:[%s6814_s3 + $0xe0] sm:$0xff]   ;;  %v5568_v9 = vld [vmem:[%s6814_s3 + $0xe8] sm:$0xff]  }
  0x7d   : > { %5056 = vmatprep.mubr.bf16.mxu0 %v6375_v51  ;;  %v6439_v36 = vsel %vm1661_vm2, %v2515_v10, %v2516_v15  ;;  %v2247_v29 = vrot.slane %v2245_v42, 1  ;;  %v6877_v10 = vld [vmem:[#allocation13_spill] sm:$0xff]  ;;  %v6878_v15 = vld [vmem:[#allocation15_spill] sm:$0xff] }
  0x7e   : > { %4841 = vmatmul.mubr.msk.bf16.vlgmr.msra.gmra.mrb[0].mxu1 %vm6337_vm5, %v5786_v62  ;;  %v2252_v16 = vrot.slane %v2250_v13, 1  ;;  %v6881_v42 = vld [vmem:[#allocation19_spill] sm:$0xff]  ;;  %v6882_v13 = vld [vmem:[#allocation6_spill] sm:$0xff] }
  0x7f   : > { %4873 = vmatpush3.bf16.msra.mxu1 %v6042_v14  ;;  %4844 = vmatprep.mubr.msk.bf16.mxu1 %vm6337_vm5, %v6381_v12  ;;  %v6418_v14 = vsel %vm1661_vm2, %v1707_v28, %v1708_v59  ;;  %v2248_v55 = vor.u32 %v2247_v29, %v2243_v19  ;;  %v1663_v28 = vrot.slane %v6874_v45, 1  ;;  %v5570_v19 = vld [vmem:[%s6814_s3 + $0xf0] sm:$0xff]   ;;  %v6883_v29 = vld [vmem:[#allocation7_spill] sm:$0xff] }
  0x80   : > { %4874 = vmatprep.subr.bf16.mxu1 %v5544_v34  ;;  %v6891_v45 = vld [vmem:[#allocation20_spill] sm:$0xff] }
  0x81   : > { %v6467_v5 = vsel %vm985_vm1, %v2248_v55, %v2252_v16  ;;  %v6884_v16 = vld [vmem:[#allocation21_spill] sm:$0xff] }
  0x82   : > { %v5573_v55 = vld [vmem:[%s6814_s3 + $0x218] sm:$0xff]  }
  0x83   : > { %4875 = vmatpush3.bf16.msra.mxu1 %v5544_v34  ;;  %v6873_v34 = vld [vmem:[#allocation2_spill] sm:$0xff] }
  0x84   : > { %4876 = vmatprep.subr.bf16.mxu1 %v5546_v3  ;;  %5057 = vmatmul.mubr.bf16.gmra.mrb[24].mxu0 %v6410_v57  ;;  %v1662_v7 = vrot.slane %v6873_v34, 1  ;;  %v6889_v34 = vld [vmem:[#allocation16_spill] sm:$0xff] }
  0x85   : > { %5060 = vmatprep.mubr.bf16.mxu0 %v6418_v14 }
  0x86   : > { %4845 = vmatmul.mubr.msk.bf16.gmra.mrb[4].mxu1 %vm6337_vm5, %v6415_v0  ;;  %v6542_v59 = vsel %vm1661_vm2, %v1662_v7, %v1663_v28  ;;  %v6890_v7 = vld [vmem:[#allocation17_spill] sm:$0xff]  ;;  %v6892_v28 = vld [vmem:[#allocation22_spill] sm:$0xff] }
  0x87   : > { %4848 = vmatprep.mubr.msk.bf16.mxu1 %vm6337_vm5, %v6422_v25  ;;  %4877 = vmatpush3.bf16.msra.mxu1 %v5546_v3  ;;  %v6876_v3 = vld [vmem:[#allocation12_spill] sm:$0xff] }
  0x88   : > { %4878 = vmatprep.subr.bf16.mxu1 %v5548_v54 }
  0x8b   : > { %4879 = vmatpush3.bf16.msra.mxu1 %v5548_v54  ;;  %v5564_v54 = vld [vmem:[%s6814_s3 + $0xd8] sm:$0xff]  }
  0x8c   : > { %5061 = vmatmul.mubr.bf16.gmra.mrb[28].mxu0 %v6439_v36  ;;  %4880 = vmatprep.subr.bf16.mxu1 %v5550_v23 }
  0x8d   : > { %5080 = vmatprep.mubr.msk.bf16.mxu0 %vm6337_vm5, %v6381_v12 }
  0x8e   : > { %4849 = vmatmul.mubr.msk.bf16.gmra.mrb[8].mxu1 %vm6337_vm5, %v6289_v11 }
  0x8f   : > { %4852 = vmatprep.mubr.msk.bf16.mxu1 %vm6337_vm5, %v6309_v44  ;;  %4881 = vmatpush3.bf16.msra.mxu1 %v5550_v23  ;;  %v6879_v23 = vld [vmem:[#allocation5_spill] sm:$0xff] }
  0x90   : > { %4882 = vmatprep.subr.bf16.mxu1 %v5552_v56 }
  0x93   : > { %4883 = vmatpush3.bf16.msra.mxu1 %v5552_v56  ;;  %v6880_v56 = vld [vmem:[#allocation18_spill] sm:$0xff] }
  0x94   : > { %5081 = vmatmul.mubr.msk.bf16.vlgmr.msra.gmra.mrb[0].mxu0 %vm6337_vm5, %v6415_v0  ;;  %4884 = vmatprep.subr.bf16.mxu1 %v5554_v32 }
  0x95   : > { %5113 = vmatpush3.bf16.msra.mxu0 %v6294_v40  ;;  %5084 = vmatprep.mubr.msk.bf16.mxu0 %vm6337_vm5, %v6422_v25  ;;  %v5558_v40 = vld [vmem:[%s6814_s3 + $0xc0] sm:$0xff]  }
  0x96   : > { %4853 = vmatmul.mubr.msk.bf16.gmra.mrb[12].mxu1 %vm6337_vm5, %v6315_v47  ;;  %5114 = vmatprep.subr.bf16.mxu0 %v5553_v6 }
  0x97   : > { %4856 = vmatprep.mubr.msk.bf16.mxu1 %vm6337_vm5, %v6322_v41  ;;  %4885 = vmatpush3.bf16.msra.mxu1 %v5554_v32  ;;  %v5572_v32 = vld [vmem:[%s6814_s3 + $0xf8] sm:$0xff]  }
  0x98   : > { %4886 = vmatprep.subr.bf16.mxu1 %v5556_v53 }
  0x99   : > { %5115 = vmatpush3.bf16.msra.mxu0 %v5553_v6  ;;  %v5571_v6 = vld [vmem:[%s6814_s3 + $0x210] sm:$0xff]  }
  0x9a   : > { %5116 = vmatprep.subr.bf16.mxu0 %v5555_v39 }
  0x9b   : > { %4887 = vmatpush3.bf16.msra.mxu1 %v5556_v53  ;;  %v6885_v53 = vld [vmem:[#allocation8_spill] sm:$0xff] }
  0x9c   : > { %5085 = vmatmul.mubr.msk.bf16.gmra.mrb[4].mxu0 %vm6337_vm5, %v6289_v11  ;;  %4920 = vmatprep.subr.bf16.mxu1 %v5558_v40 }
  0x9d   : > { %5088 = vmatprep.mubr.msk.bf16.mxu0 %vm6337_vm5, %v6309_v44  ;;  %5117 = vmatpush3.bf16.msra.mxu0 %v5555_v39  ;;  %v5580_v39 = vld [vmem:[%s6814_s3 + $0x100] sm:$0xff]  }
  0x9e   : > { %4857 = vmatmul.mubr.msk.bf16.gmra.mrb[16].mxu1 %vm6337_vm5, %v6327_v18  ;;  %5118 = vmatprep.subr.bf16.mxu0 %v5557_v48 }
  0x9f   : > { %4860 = vmatprep.mubr.msk.bf16.mxu1 %vm6337_vm5, %v6331_v1 }
  0xa1   : > { %5119 = vmatpush3.bf16.msra.mxu0 %v5557_v48  ;;  %v5574_v48 = vld [vmem:[%s6814_s3 + $0x220] sm:$0xff]  }
  0xa2   : > { %5120 = vmatprep.subr.bf16.mxu0 %v5559_v2 }
  0xa4   : > { %5089 = vmatmul.mubr.msk.bf16.gmra.mrb[8].mxu0 %vm6337_vm5, %v6315_v47 }
  0xa5   : > { %5092 = vmatprep.mubr.msk.bf16.mxu0 %vm6337_vm5, %v6322_v41  ;;  %5121 = vmatpush3.bf16.msra.mxu0 %v5559_v2  ;;  %v5575_v2 = vld [vmem:[%s6814_s3 + $0x228] sm:$0xff]  }
  0xa6   : > { %4861 = vmatmul.mubr.msk.bf16.gmra.mrb[20].mxu1 %vm6337_vm5, %v6335_v30  ;;  %5122 = vmatprep.subr.bf16.mxu0 %v5561_v20 }
  0xa7   : > { %4864 = vmatprep.mubr.msk.bf16.mxu1 %vm6337_vm5, %v6346_v21 }
  0xa9   : > { %5123 = vmatpush3.bf16.msra.mxu0 %v5561_v20  ;;  %v6887_v20 = vld [vmem:[#allocation11_spill] sm:$0xff] }
  0xaa   : > { %5124 = vmatprep.subr.bf16.mxu0 %v5563_v49 }
  0xac   : > { %5093 = vmatmul.mubr.msk.bf16.gmra.mrb[12].mxu0 %vm6337_vm5, %v6327_v18 }
  0xad   : > { %5096 = vmatprep.mubr.msk.bf16.mxu0 %vm6337_vm5, %v6331_v1  ;;  %5125 = vmatpush3.bf16.msra.mxu0 %v5563_v49  ;;  %v6888_v49 = vld [vmem:[#allocation14_spill] sm:$0xff] }
  0xae   : > { %4865 = vmatmul.mubr.msk.bf16.gmra.mrb[24].mxu1 %vm6337_vm5, %v6350_v46  ;;  %5126 = vmatprep.subr.bf16.mxu0 %v5565_v22 }
  0xaf   : > { %4868 = vmatprep.mubr.msk.bf16.mxu1 %vm6337_vm5, %v6359_v35 }
  0xb1   : > { %5127 = vmatpush3.bf16.msra.mxu0 %v5565_v22  ;;  %v5576_v22 = vld [vmem:[%s6814_s3 + $0x230] sm:$0xff]  }
  0xb2   : > { %5160 = vmatprep.subr.bf16.mxu0 %v5567_v58 }
  0xb4   : > { %5097 = vmatmul.mubr.msk.bf16.gmra.mrb[16].mxu0 %vm6337_vm5, %v6335_v30 }
  0xb5   : > { %5100 = vmatprep.mubr.msk.bf16.mxu0 %vm6337_vm5, %v6346_v21 }
  0xb6   : > { %4869 = vmatmul.mubr.msk.bf16.gmra.mrb[28].mxu1 %vm6337_vm5, %v6361_v26 }
  0xb7   : > { %4888 = vmatprep.mubr.bf16.mxu1 %v6542_v59 }
  0xbc   : > { %5101 = vmatmul.mubr.msk.bf16.gmra.mrb[20].mxu0 %vm6337_vm5, %v6350_v46 }
  0xbd   : > { %5104 = vmatprep.mubr.msk.bf16.mxu0 %vm6337_vm5, %v6359_v35 }
  0xbe   : > { %4889 = vmatmul.mubr.bf16.vlgmr.msra.gmra.mrb[0].mxu1 %v6875_v38  ;;  %v5584_v38 = vld [vmem:[%s6814_s3 + $0x120] sm:$0xff]  }
  0xbf   : > { %4921 = vmatpush3.bf16.msra.mxu1 %v5558_v40  ;;  %4892 = vmatprep.mubr.bf16.mxu1 %v6876_v3  ;;  %v6886_v40 = vld [vmem:[#allocation9_spill] sm:$0xff] }
  0xc0   : > { %4922 = vmatprep.subr.bf16.mxu1 %v5560_v33 }
  0xc3   : > { %4923 = vmatpush3.bf16.msra.mxu1 %v5560_v33  ;;  %v5581_v33 = vld [vmem:[%s6814_s3 + $0x108] sm:$0xff]  }
  0xc4   : > { %4924 = vmatprep.subr.bf16.mxu1 %v5562_v43  ;;  %5105 = vmatmul.mubr.msk.bf16.gmra.mrb[24].mxu0 %vm6337_vm5, %v6361_v26 }
  0xc5   : > { %5108 = vmatprep.mubr.msk.bf16.mxu0 %vm6337_vm5, %v6570_v24 }
  0xc6   : > { %4893 = vmatmul.mubr.bf16.gmra.mrb[4].mxu1 %v6877_v10 }
  0xc7   : > { %4896 = vmatprep.mubr.bf16.mxu1 %v6878_v15  ;;  %4925 = vmatpush3.bf16.msra.mxu1 %v5562_v43 }
  0xc8   : > { %4926 = vmatprep.subr.bf16.mxu1 %v5564_v54 }
  0xcb   : > { %4927 = vmatpush3.bf16.msra.mxu1 %v5564_v54 }
  0xcc   : > { %5109 = vmatmul.mubr.msk.bf16.gmra.mrb[28].mxu0 %vm6337_vm5, %v6302_v8  ;;  %4928 = vmatprep.subr.bf16.mxu1 %v5566_v50  ;;  %v5569_v8 = vld [vmem:[%s6814_s3 + $0x208] sm:$0xff]  }
  0xcd   : > { %5128 = vmatprep.mubr.bf16.mxu0 %v6879_v23 }
  0xce   : > { %4897 = vmatmul.mubr.bf16.gmra.mrb[8].mxu1 %v6880_v56 }
  0xcf   : > { %4900 = vmatprep.mubr.bf16.mxu1 %v6881_v42  ;;  %4929 = vmatpush3.bf16.msra.mxu1 %v5566_v50 }
  0xd0   : > { %4930 = vmatprep.subr.bf16.mxu1 %v5568_v9 }
  0xd3   : > { %4931 = vmatpush3.bf16.msra.mxu1 %v5568_v9 }
  0xd4   : > { %5129 = vmatmul.mubr.bf16.vlgmr.msra.gmra.mrb[0].mxu0 %v6882_v13  ;;  %4932 = vmatprep.subr.bf16.mxu1 %v5570_v19 }
  0xd5   : > { %5161 = vmatpush3.bf16.msra.mxu0 %v5567_v58  ;;  %5132 = vmatprep.mubr.bf16.mxu0 %v6883_v29  ;;  %v5577_v58 = vld [vmem:[%s6814_s3 + $0x238] sm:$0xff]  }
  0xd6   : > { %4901 = vmatmul.mubr.bf16.gmra.mrb[12].mxu1 %v6884_v16  ;;  %5162 = vmatprep.subr.bf16.mxu0 %v5569_v8 }
  0xd7   : > { %4904 = vmatprep.mubr.bf16.mxu1 %v6262_v60  ;;  %4933 = vmatpush3.bf16.msra.mxu1 %v5570_v19 }
  0xd8   : > { %4934 = vmatprep.subr.bf16.mxu1 %v5572_v32 }
  0xd9   : > { %5163 = vmatpush3.bf16.msra.mxu0 %v5569_v8 }
  0xda   : > { %5164 = vmatprep.subr.bf16.mxu0 %v5571_v6 }
  0xdb   : > { %4935 = vmatpush3.bf16.msra.mxu1 %v5572_v32 }
  0xdc   : > { %5133 = vmatmul.mubr.bf16.gmra.mrb[4].mxu0 %v6885_v53  ;;  %5208 = vmatprep.subr.bf16.mxu1 %v5580_v39 }
  0xdd   : > { %5136 = vmatprep.mubr.bf16.mxu0 %v6886_v40  ;;  %5165 = vmatpush3.bf16.msra.mxu0 %v5571_v6 }
  0xde   : > { %4905 = vmatmul.mubr.bf16.gmra.mrb[16].mxu1 %v6266_v37  ;;  %5166 = vmatprep.subr.bf16.mxu0 %v5573_v55 }
  0xdf   : > { %4908 = vmatprep.mubr.bf16.mxu1 %v6305_v27 }
  0xe1   : > { %5167 = vmatpush3.bf16.msra.mxu0 %v5573_v55 }
  0xe2   : > { %5168 = vmatprep.subr.bf16.mxu0 %v5574_v48 }
  0xe4   : > { %5137 = vmatmul.mubr.bf16.gmra.mrb[8].mxu0 %v6887_v20 }
  0xe5   : > { %5140 = vmatprep.mubr.bf16.mxu0 %v6888_v49  ;;  %5169 = vmatpush3.bf16.msra.mxu0 %v5574_v48 }
  0xe6   : > { %4909 = vmatmul.mubr.bf16.gmra.mrb[20].mxu1 %v6318_v4  ;;  %5170 = vmatprep.subr.bf16.mxu0 %v5575_v2 }
  0xe7   : > { %4912 = vmatprep.mubr.bf16.mxu1 %v6372_v63 }
  0xe9   : > { %5171 = vmatpush3.bf16.msra.mxu0 %v5575_v2 }
  0xea   : > { %5172 = vmatprep.subr.bf16.mxu0 %v5576_v22 }
  0xec   : > { %5141 = vmatmul.mubr.bf16.gmra.mrb[12].mxu0 %v6889_v34 }
  0xed   : > { %5144 = vmatprep.mubr.bf16.mxu0 %v6890_v7  ;;  %5173 = vmatpush3.bf16.msra.mxu0 %v5576_v22 }
  0xee   : > { %4913 = vmatmul.mubr.bf16.gmra.mrb[24].mxu1 %v6375_v51  ;;  %5174 = vmatprep.subr.bf16.mxu0 %v5577_v58 }
  0xef   : > { %4916 = vmatprep.mubr.bf16.mxu1 %v6410_v57 }
  0xf1   : > { %5175 = vmatpush3.bf16.msra.mxu0 %v5577_v58 }
  0xf4   : > { %5145 = vmatmul.mubr.bf16.gmra.mrb[16].mxu0 %v6891_v45 }
  0xf5   : > { %5148 = vmatprep.mubr.bf16.mxu0 %v6892_v28 }
  0xf6   : > { %4917 = vmatmul.mubr.bf16.gmra.mrb[28].mxu1 %v6418_v14 }
  0xf7   : > { %4936 = vmatprep.mubr.msk.bf16.mxu1 %vm6337_vm5, %v5786_v62  ;;  %v5582_v62 = vld [vmem:[%s6814_s3 + $0x110] sm:$0xff]  }
  0xfc   : > { %5149 = vmatmul.mubr.bf16.gmra.mrb[20].mxu0 %v6256_v52 }
  0xfd   : > { %5152 = vmatprep.mubr.bf16.mxu0 %v6272_v31 }
  0xfe   : > { %4937 = vmatmul.mubr.msk.bf16.vlgmr.msra.gmra.mrb[0].mxu1 %vm6337_vm5, %v6381_v12  ;;  %v5583_v12 = vld [vmem:[%s6814_s3 + $0x118] sm:$0xff]  }
  0xff   : > { %5216 = vmatpush3.bf16.msra.mxu1 %v5580_v39  ;;  %4940 = vmatprep.mubr.msk.bf16.mxu1 %vm6337_vm5, %v6415_v0  ;;  %v6893_v0 = vld [vmem:[#allocation4_spill] sm:$0xff] }
 0x100   : > { %5209 = vmatprep.subr.bf16.mxu1 %v5581_v33 }
 0x103   : > { %5217 = vmatpush3.bf16.msra.mxu1 %v5581_v33 }
 0x104   : > { %5210 = vmatprep.subr.bf16.mxu1 %v5582_v62  ;;  %5153 = vmatmul.mubr.bf16.gmra.mrb[24].mxu0 %v6353_v17 }
 0x105   : > { %5156 = vmatprep.mubr.bf16.mxu0 %v6467_v5 }
 0x106   : > { %4941 = vmatmul.mubr.msk.bf16.gmra.mrb[4].mxu1 %vm6337_vm5, %v6422_v25  ;;  %v5586_v25 = vld [vmem:[%s6814_s3 + $0x130] sm:$0xff]  }
 0x107   : > { %4944 = vmatprep.mubr.msk.bf16.mxu1 %vm6337_vm5, %v6289_v11  ;;  %5218 = vmatpush3.bf16.msra.mxu1 %v5582_v62  ;;  %v5585_v11 = vld [vmem:[%s6814_s3 + $0x128] sm:$0xff]  }
 0x108   : > { %5211 = vmatprep.subr.bf16.mxu1 %v5583_v12 }
 0x10b   : > { %5219 = vmatpush3.bf16.msra.mxu1 %v5583_v12 }
 0x10c   : > { %5157 = vmatmul.mubr.bf16.gmra.mrb[28].mxu0 %v6893_v0  ;;  %5212 = vmatprep.subr.bf16.mxu1 %v5584_v38 }
 0x10d   : > { %5176 = vmatprep.mubr.bf16.mxu0 %v6876_v3 }
 0x10e   : > { %4945 = vmatmul.mubr.msk.bf16.gmra.mrb[8].mxu1 %vm6337_vm5, %v6309_v44  ;;  %v5587_v44 = vld [vmem:[%s6814_s3 + $0x138] sm:$0xff]  }
 0x10f   : > { %4948 = vmatprep.mubr.msk.bf16.mxu1 %vm6337_vm5, %v6315_v47  ;;  %5220 = vmatpush3.bf16.msra.mxu1 %v5584_v38 }
 0x110   : > { %5213 = vmatprep.subr.bf16.mxu1 %v5585_v11 }
 0x113   : > { %5221 = vmatpush3.bf16.msra.mxu1 %v5585_v11 }
 0x114   : > { %5177 = vmatmul.mubr.bf16.vlgmr.msra.gmra.mrb[0].mxu0 %v6877_v10  ;;  %5214 = vmatprep.subr.bf16.mxu1 %v5586_v25 }
 0x115   : > { %5180 = vmatprep.mubr.bf16.mxu0 %v6878_v15 }
 0x116   : > { %4949 = vmatmul.mubr.msk.bf16.gmra.mrb[12].mxu1 %vm6337_vm5, %v6322_v41 }
 0x117   : > { %4952 = vmatprep.mubr.msk.bf16.mxu1 %vm6337_vm5, %v6327_v18  ;;  %5222 = vmatpush3.bf16.msra.mxu1 %v5586_v25 }
 0x118   : > { %5215 = vmatprep.subr.bf16.mxu1 %v5587_v44 }
 0x11b   : > { %5223 = vmatpush3.bf16.msra.mxu1 %v5587_v44 }
 0x11c   : > { %5181 = vmatmul.mubr.bf16.gmra.mrb[4].mxu0 %v6880_v56 }
 0x11d   : > { %5184 = vmatprep.mubr.bf16.mxu0 %v6881_v42 }
 0x11e   : > { %4953 = vmatmul.mubr.msk.bf16.gmra.mrb[16].mxu1 %vm6337_vm5, %v6331_v1 }
 0x11f   : > { %4956 = vmatprep.mubr.msk.bf16.mxu1 %vm6337_vm5, %v6335_v30 }
 0x124   : > { %5185 = vmatmul.mubr.bf16.gmra.mrb[8].mxu0 %v6884_v16 }
 0x125   : > { %5188 = vmatprep.mubr.bf16.mxu0 %v6262_v60 }
 0x126   : > { %4957 = vmatmul.mubr.msk.bf16.gmra.mrb[20].mxu1 %vm6337_vm5, %v6346_v21 }
 0x127   : > { %4960 = vmatprep.mubr.msk.bf16.mxu1 %vm6337_vm5, %v6350_v46 }
 0x12c   : > { %5189 = vmatmul.mubr.bf16.gmra.mrb[12].mxu0 %v6266_v37 }
 0x12d   : > { %5192 = vmatprep.mubr.bf16.mxu0 %v6305_v27 }
 0x12e   : > { %4961 = vmatmul.mubr.msk.bf16.gmra.mrb[24].mxu1 %vm6337_vm5, %v6359_v35 }
 0x12f   : > { %4964 = vmatprep.mubr.msk.bf16.mxu1 %vm6337_vm5, %v6361_v26 }
 0x134   : > { %5193 = vmatmul.mubr.bf16.gmra.mrb[16].mxu0 %v6318_v4 }
 0x135   : > { %5196 = vmatprep.mubr.bf16.mxu0 %v6372_v63 }
 0x136   : > { %4965 = vmatmul.mubr.msk.bf16.gmra.mrb[28].mxu1 %vm6337_vm5, %v6570_v24 }
 0x137   : > { %5000 = vmatprep.mubr.bf16.mxu1 %v6889_v34 }
 0x13c   : > { %5197 = vmatmul.mubr.bf16.gmra.mrb[20].mxu0 %v6375_v51 }
 0x13d   : > { %5200 = vmatprep.mubr.bf16.mxu0 %v6410_v57 }
 0x13e   : > { %5001 = vmatmul.mubr.bf16.vlgmr.msra.gmra.mrb[16].mxu1 %v6890_v7 }
 0x13f   : > { %5004 = vmatprep.mubr.bf16.mxu1 %v6891_v45 }
 0x144   : > { %5201 = vmatmul.mubr.bf16.gmra.mrb[24].mxu0 %v6418_v14 }
 0x145   : > { %5204 = vmatprep.mubr.bf16.mxu0 %v6439_v36 }
 0x146   : > { %5005 = vmatmul.mubr.bf16.gmra.mrb[20].mxu1 %v6892_v28 }
 0x147   : > { %5008 = vmatprep.mubr.bf16.mxu1 %v6256_v52 }
 0x14c   : > { %5205 = vmatmul.mubr.bf16.gmra.mrb[28].mxu0 %v6542_v59 }
 0x14e   : > { %5009 = vmatmul.mubr.bf16.gmra.mrb[24].mxu1 %v6272_v31 }
 0x14f   : > { %5012 = vmatprep.mubr.bf16.mxu1 %v6353_v17  ;;  %v6745_v17 = vld [vmem:[%s6815_s4] ss:$0 sm:$0xff] }
 0x156   : > { %5013 = vmatmul.mubr.bf16.gmra.mrb[28].mxu1 %v6467_v5 }
 0x1d1   : > { %v4938_v60 = vpop.f32.mrb[0].mxu1 }
 0x1d2   : > { %v2083_v37 = vpop.f32.mrb[1].mxu1 }
 0x1d3   : > { %v4939_v27 = vpop.f32.mrb[2].mxu1 }
 0x1d4   : > { %v2086_v47 = vpop.f32.mrb[3].mxu1 }
 0x1d9   : > { %v4942_v4 = vpop.f32.mrb[4].mxu1 }
 0x1da   : > { %v2099_v41 = vpop.f32.mrb[5].mxu1 }
 0x1db   : > { %v4943_v18 = vpop.f32.mrb[6].mxu1 }
 0x1dc   : > { %v2102_v1 = vpop.f32.mrb[7].mxu1 }
 0x1e1   : > { %v4946_v30 = vpop.f32.mrb[8].mxu1 }
 0x1e2   : > { %v2115_v61 = vpop.f32.mrb[9].mxu1 }
 0x1e3   : > { %v4947_v21 = vpop.f32.mrb[10].mxu1 }
 0x1e4   : > { %v2118_v52 = vpop.f32.mrb[11].mxu1 }
 0x1e7   : > { %v5178_v46 = vpop.f32.mrb[0].mxu0 }
 0x1e8   : > { %v5224_v35 = vadd.f32 %v5178_v46, %v4938_v60  ;;  %v3411_v31 = vpop.f32.mrb[1].mxu0 }
 0x1e9   : > { %v4950_v26 = vpop.f32.mrb[12].mxu1  ;;  %v5225_v63 = vadd.f32 %v3411_v31, %v2083_v37  ;;  %v5179_v51 = vpop.f32.mrb[2].mxu0 }
 0x1ea   : > { %v2131_v57 = vpop.f32.mrb[13].mxu1  ;;  %v5226_v14 = vadd.f32 %v5179_v51, %v4939_v27  ;;  %v3414_v36 = vpop.f32.mrb[3].mxu0  ;;  %v3579_v43 = vadd.f32 %v5224_v35, %v6745_v17 }
 0x1eb   : > { %v4951_v5 = vpop.f32.mrb[14].mxu1  ;;  %v5227_v59 = vadd.f32 %v3414_v36, %v2086_v47  ;;  %v3577_v54 = vadd.f32 %v5225_v63, %v6745_v17 }
 0x1ec   : > { %v2134_v3 = vpop.f32.mrb[15].mxu1  ;;  %v3580_v24 = vadd.f32 %v5226_v14, %v6745_v17 }
 0x1ed   : > { %v3578_v10 = vadd.f32 %v5227_v59, %v6745_v17 }
 0x1ee   : > { %v4458_v15 = vpack.c.bf16 %v3580_v24, %v3579_v43 }
 0x1ef   : > { %v4453_v50 = vpack.c.bf16 %v3578_v10, %v3577_v54  ;;  %v5182_v9 = vpop.f32.mrb[4].mxu0 }
 0x1f0   : > { %4545 = vst [vmem:[%s6755_s28 + $0x8] sm:$0xff] %v4458_v15   ;;  %v5228_v23 = vadd.f32 %v5182_v9, %v4942_v4  ;;  %v3427_v56 = vpop.f32.mrb[5].mxu0 }
 0x1f1   : > { %4454 = vst [vmem:[%s6755_s28] sm:$0xff] %v4453_v50   ;;  %v5229_v42 = vadd.f32 %v3427_v56, %v2099_v41  ;;  %v5183_v19 = vpop.f32.mrb[6].mxu0 }
 0x1f2   : > { %v5230_v8 = vadd.f32 %v5183_v19, %v4943_v18  ;;  %v3430_v13 = vpop.f32.mrb[7].mxu0  ;;  %v3583_v29 = vadd.f32 %v5228_v23, %v6745_v17 }
 0x1f3   : > { %v5231_v32 = vadd.f32 %v3430_v13, %v2102_v1  ;;  %v3581_v6 = vadd.f32 %v5229_v42, %v6745_v17 }
 0x1f4   : > { %v3584_v16 = vadd.f32 %v5230_v8, %v6745_v17 }
 0x1f5   : > { %v3582_v55 = vadd.f32 %v5231_v32, %v6745_v17 }
 0x1f6   : > { %v4468_v53 = vpack.c.bf16 %v3584_v16, %v3583_v29 }
 0x1f7   : > { %v4463_v39 = vpack.c.bf16 %v3582_v55, %v3581_v6  ;;  %v5186_v40 = vpop.f32.mrb[8].mxu0 }
 0x1f8   : > { %4547 = vst [vmem:[%s6755_s28 + $0x18] sm:$0xff] %v4468_v53   ;;  %v5232_v48 = vadd.f32 %v5186_v40, %v4946_v30  ;;  %v3443_v2 = vpop.f32.mrb[9].mxu0 }
 0x1f9   : > { %4546 = vst [vmem:[%s6755_s28 + $0x10] sm:$0xff] %v4463_v39   ;;  %v5233_v20 = vadd.f32 %v3443_v2, %v2115_v61  ;;  %v5187_v49 = vpop.f32.mrb[10].mxu0 }
 0x1fa   : > { %v5234_v22 = vadd.f32 %v5187_v49, %v4947_v21  ;;  %v3446_v58 = vpop.f32.mrb[11].mxu0  ;;  %v3587_v7 = vadd.f32 %v5232_v48, %v6745_v17 }
 0x1fb   : > { %v5235_v34 = vadd.f32 %v3446_v58, %v2118_v52  ;;  %v3585_v28 = vadd.f32 %v5233_v20, %v6745_v17 }
 0x1fc   : > { %v3588_v45 = vadd.f32 %v5234_v22, %v6745_v17 }
 0x1fd   : > { %v3586_v33 = vadd.f32 %v5235_v34, %v6745_v17 }
 0x1fe   : > { %v4478_v62 = vpack.c.bf16 %v3588_v45, %v3587_v7 }
 0x1ff   : > { %v4473_v12 = vpack.c.bf16 %v3586_v33, %v3585_v28  ;;  %v5190_v0 = vpop.f32.mrb[12].mxu0 }
 0x200   : > { %4549 = vst [vmem:[%s6755_s28 + $0x28] sm:$0xff] %v4478_v62   ;;  %v5236_v38 = vadd.f32 %v5190_v0, %v4950_v26  ;;  %v3459_v11 = vpop.f32.mrb[13].mxu0 }
 0x201   : > { %4548 = vst [vmem:[%s6755_s28 + $0x20] sm:$0xff] %v4473_v12   ;;  %v5237_v25 = vadd.f32 %v3459_v11, %v2131_v57  ;;  %v5191_v44 = vpop.f32.mrb[14].mxu0 }
 0x202   : > { %v5238_v60 = vadd.f32 %v5191_v44, %v4951_v5  ;;  %v3462_v37 = vpop.f32.mrb[15].mxu0  ;;  %v3591_v47 = vadd.f32 %v5236_v38, %v6745_v17 }
 0x203   : > { %v5239_v27 = vadd.f32 %v3462_v37, %v2134_v3  ;;  %v3589_v41 = vadd.f32 %v5237_v25, %v6745_v17 }
 0x204   : > { %v3592_v4 = vadd.f32 %v5238_v60, %v6745_v17 }
 0x205   : > { %v3590_v18 = vadd.f32 %v5239_v27, %v6745_v17 }
 0x206   : > { %v4488_v1 = vpack.c.bf16 %v3592_v4, %v3591_v47 }
 0x207   : > { %v4483_v30 = vpack.c.bf16 %v3590_v18, %v3589_v41  ;;  %v5194_v61 = vpop.f32.mrb[16].mxu0 }
 0x208   : > { %4551 = vst [vmem:[%s6755_s28 + $0x38] sm:$0xff] %v4488_v1   ;;  %v3475_v21 = vpop.f32.mrb[17].mxu0 }
 0x209   : > { %4550 = vst [vmem:[%s6755_s28 + $0x30] sm:$0xff] %v4483_v30   ;;  %v5195_v52 = vpop.f32.mrb[18].mxu0 }
 0x20a   : > { %v3478_v46 = vpop.f32.mrb[19].mxu0 }
 0x20f   : > { %v5198_v35 = vpop.f32.mrb[20].mxu0 }
 0x210   : > { %v3491_v31 = vpop.f32.mrb[21].mxu0 }
 0x211   : > { %v5002_v26 = vpop.f32.mrb[16].mxu1  ;;  %v5199_v63 = vpop.f32.mrb[22].mxu0 }
 0x212   : > { %v5240_v51 = vadd.f32 %v5194_v61, %v5002_v26  ;;  %v2418_v57 = vpop.f32.mrb[17].mxu1  ;;  %v3494_v14 = vpop.f32.mrb[23].mxu0 }
 0x213   : > { %v5241_v36 = vadd.f32 %v3475_v21, %v2418_v57  ;;  %v5003_v5 = vpop.f32.mrb[18].mxu1 }
 0x214   : > { %v5242_v59 = vadd.f32 %v5195_v52, %v5003_v5  ;;  %v2421_v3 = vpop.f32.mrb[19].mxu1  ;;  %v3595_v24 = vadd.f32 %v5240_v51, %v6745_v17 }
 0x215   : > { %v5243_v43 = vadd.f32 %v3478_v46, %v2421_v3  ;;  %v3593_v10 = vadd.f32 %v5241_v36, %v6745_v17 }
 0x216   : > { %v3596_v54 = vadd.f32 %v5242_v59, %v6745_v17 }
 0x217   : > { %v3594_v15 = vadd.f32 %v5243_v43, %v6745_v17  ;;  %v5202_v50 = vpop.f32.mrb[24].mxu0 }
 0x218   : > { %v4498_v9 = vpack.c.bf16 %v3596_v54, %v3595_v24  ;;  %v3507_v23 = vpop.f32.mrb[25].mxu0 }
 0x219   : > { %v4493_v56 = vpack.c.bf16 %v3594_v15, %v3593_v10  ;;  %v5006_v42 = vpop.f32.mrb[20].mxu1  ;;  %v5203_v19 = vpop.f32.mrb[26].mxu0 }
 0x21a   : > { %4553 = vst [vmem:[%s6755_s28 + $0x48] sm:$0xff] %v4498_v9   ;;  %v5244_v8 = vadd.f32 %v5198_v35, %v5006_v42  ;;  %v2434_v13 = vpop.f32.mrb[21].mxu1  ;;  %v3510_v32 = vpop.f32.mrb[27].mxu0 }
 0x21b   : > { %4552 = vst [vmem:[%s6755_s28 + $0x40] sm:$0xff] %v4493_v56   ;;  %v5245_v29 = vadd.f32 %v3491_v31, %v2434_v13  ;;  %v5007_v16 = vpop.f32.mrb[22].mxu1 }
 0x21c   : > { %v5246_v6 = vadd.f32 %v5199_v63, %v5007_v16  ;;  %v2437_v55 = vpop.f32.mrb[23].mxu1  ;;  %v3599_v39 = vadd.f32 %v5244_v8, %v6745_v17 }
 0x21d   : > { %v5247_v53 = vadd.f32 %v3494_v14, %v2437_v55  ;;  %v3597_v48 = vadd.f32 %v5245_v29, %v6745_v17 }
 0x21e   : > { %v3600_v40 = vadd.f32 %v5246_v6, %v6745_v17 }
 0x21f   : > { %v3598_v2 = vadd.f32 %v5247_v53, %v6745_v17  ;;  %v5206_v20 = vpop.f32.mrb[28].mxu0 }
 0x220   : > { %v4508_v49 = vpack.c.bf16 %v3600_v40, %v3599_v39  ;;  %v3523_v22 = vpop.f32.mrb[29].mxu0 }
 0x221   : > { %v4503_v58 = vpack.c.bf16 %v3598_v2, %v3597_v48  ;;  %v5010_v34 = vpop.f32.mrb[24].mxu1  ;;  %v5207_v7 = vpop.f32.mrb[30].mxu0 }
 0x222   : > { %4555 = vst [vmem:[%s6755_s28 + $0x58] sm:$0xff] %v4508_v49   ;;  %v5248_v45 = vadd.f32 %v5202_v50, %v5010_v34  ;;  %v2450_v28 = vpop.f32.mrb[25].mxu1  ;;  %v3526_v33 = vpop.f32.mrb[31].mxu0 }
 0x223   : > { %4554 = vst [vmem:[%s6755_s28 + $0x50] sm:$0xff] %v4503_v58   ;;  %v5249_v62 = vadd.f32 %v3507_v23, %v2450_v28  ;;  %v5011_v12 = vpop.f32.mrb[26].mxu1 }
 0x224   : > { %v5250_v0 = vadd.f32 %v5203_v19, %v5011_v12  ;;  %v2453_v38 = vpop.f32.mrb[27].mxu1  ;;  %v3603_v25 = vadd.f32 %v5248_v45, %v6745_v17 }
 0x225   : > { %v5251_v11 = vadd.f32 %v3510_v32, %v2453_v38  ;;  %v3601_v60 = vadd.f32 %v5249_v62, %v6745_v17 }
 0x226   : > { %v3604_v44 = vadd.f32 %v5250_v0, %v6745_v17 }
 0x227   : > { %v3602_v37 = vadd.f32 %v5251_v11, %v6745_v17 }
 0x228   : > { %v4518_v27 = vpack.c.bf16 %v3604_v44, %v3603_v25 }
 0x229   : > { %v4513_v47 = vpack.c.bf16 %v3602_v37, %v3601_v60  ;;  %v5014_v4 = vpop.f32.mrb[28].mxu1 }
 0x22a   : > { %4557 = vst [vmem:[%s6755_s28 + $0x68] sm:$0xff] %v4518_v27   ;;  %v5252_v41 = vadd.f32 %v5206_v20, %v5014_v4  ;;  %v2466_v18 = vpop.f32.mrb[29].mxu1 }
 0x22b   : > { %4556 = vst [vmem:[%s6755_s28 + $0x60] sm:$0xff] %v4513_v47   ;;  %v5253_v1 = vadd.f32 %v3523_v22, %v2466_v18  ;;  %v5015_v30 = vpop.f32.mrb[30].mxu1 }
 0x22c   : > { %v5254_v61 = vadd.f32 %v5207_v7, %v5015_v30  ;;  %v2469_v21 = vpop.f32.mrb[31].mxu1  ;;  %v3607_v46 = vadd.f32 %v5252_v41, %v6745_v17 }
 0x22d   : > { %v5255_v52 = vadd.f32 %v3526_v33, %v2469_v21  ;;  %v3605_v31 = vadd.f32 %v5253_v1, %v6745_v17 }
 0x22e   : > { %v3608_v35 = vadd.f32 %v5254_v61, %v6745_v17 }
 0x22f   : > { %v3606_v26 = vadd.f32 %v5255_v52, %v6745_v17 }
 0x230   : > { %v4528_v63 = vpack.c.bf16 %v3608_v35, %v3607_v46 }
 0x231   : > { %v4523_v51 = vpack.c.bf16 %v3606_v26, %v3605_v31 }
 0x232   : > { %4559 = vst [vmem:[%s6755_s28 + $0x78] sm:$0xff] %v4528_v63  }
 0x233   : > { %4558 = vst [vmem:[%s6755_s28 + $0x70] sm:$0xff] %v4523_v51  }
 0x234 PF: > { %s17_s2 = sadd.s32 1, %s5610_s2   ;;  %s6894_s23 = smov %s5606_s24 }
 0x235   : > { %p14_p5 = scmp.ge.s32.totalorder %s17_s2, 4   ;;  %s6895_s24 = smov %s6897_s25 }
 0x237   :  { %16 = sbr.rel (!%p14_p5) target bundleno = 2 (0x2), region = 92 }

// kernel: _lambda_.11
= control target key start
LH: loop header
LB: loop body
LE: loop exit
PB: predicated region body
PF: predicated region fallthrough
CT: control target
= control target key end

     0   :  { %s5963_s26 = smov 0   ;;  %s5965_s2 = smov 0   ;;  %s7153_s0 = inlined_call_operand.vmem [shape: bf16[2,16,16,128], index: 0, kind: input, shape index: {}, may-alias: {0,1,2}]   ;;  %s7154_s1 = inlined_call_operand.vmem [shape: bf16[2,16,16,128], index: 1, kind: input, shape index: {}, may-alias: {0,1,2}]   ;;  %s7155_s2 = inlined_call_operand.vmem [shape: bf16[2,16,16,128], index: 2, kind: input, shape index: {}, may-alias: {0,1,2}]   ;;  %s7156_s3 = inlined_call_operand.vmem [shape: bf16[9,128,128], index: 3, kind: input, shape index: {}]   ;;  %s7157_s4 = inlined_call_operand.vmem [shape: f32[1,128], index: 4, kind: input, shape index: {}]   ;;  %s7158_s5 = inlined_call_operand.vmem [shape: f32[1,128], index: 5, kind: input, shape index: {}]   ;;  %s7159_s6 = inlined_call_operand.vmem [shape: f32[1,128], index: 6, kind: input, shape index: {}]   ;;  %s7160_s7 = inlined_call_operand.vmem [shape: bf16[2,16,16,128], index: 7, kind: output, shape index: {0}]   ;;  %s7161_s8 = inlined_call_operand.vmem [shape: f32[2,1,2,128], index: 8, kind: output, shape index: {1}]  }
   0x1   :  { %s5967_s27 = smov 0  }
   0x2 LB: > { %s31_s28 = sadd.s32 1, %s5910_s2  ;;  %p4214_p0 = scmp.ge.s32.totalorder %s5914_s27, 1  ;;  %s5914_s27 = sphi %s5967_s27, %s19_s27   ;;  %s5910_s2 = sphi %s5965_s2, %s7236_s2   ;;  %s5906_s26 = sphi %s5963_s26, %s7235_s26  }
   0x3   : > { %p33_p1 = scmp.ge.s32.totalorder %s31_s28, 2  ;;  %p353_p2 = scmp.lt.s32.totalorder %s5914_s27, 3 }
   0x5   : > { %s7238_s28 = smov (%p33_p1, %s31_s28), 0  ;;  %p354_p3 = pnand %p4214_p0, %p353_p2 }
   0x7   : > { %357 = sbr.rel (%p354_p3) target bundleno = 600 (0x258), region = 48 }
   0xe   : > { %v5810_v0 = vld [vmem:[%s7156_s3 + $0x40] sm:$0xff]   ;;  %vm942_vm0 = vcmask 1040384   ;;  %v5812_v2 = vld [vmem:[%s7156_s3 + $0x48] sm:$0xff]   ;;  %v5916_v3 = vmov 0.0   ;;  %p448_p4 = scmp.lt.s32.totalorder %s5906_s26, 1  ;;  %v5814_v6 = vld [vmem:[%s7156_s3 + $0x50] sm:$0xff]  }
   0xf   : > { %v5811_v1 = vld [vmem:[%s7156_s3 + $0x100] sm:$0xff]   ;;  %5080 = vmatprep.subr.bf16.mxu1 %v5810_v0  ;;  %v5992_v4 = vrot.slane %v5916_v3, 7  ;;  %v5813_v5 = vld [vmem:[%s7156_s3 + $0x108] sm:$0xff]   ;;  %v5815_v8 = vld [vmem:[%s7156_s3 + $0x110] sm:$0xff]   ;;  %vm1139_vm1 = vsmask.f32 7424 }
  0x10   : > { %5272 = vmatprep.subr.bf16.mxu0 %v5811_v1  ;;  %5081 = vmatpush3.bf16.msra.mxu1 %v5810_v0  ;;  %v5816_v12 = vld [vmem:[%s7156_s3 + $0x58] sm:$0xff]   ;;  %s7240_s26 = smov (!%p448_p4, %s5906_s26), 1  ;;  %v5818_v18 = vld [vmem:[%s7156_s3 + $0x60] sm:$0xff]   ;;  %v5820_v22 = vld [vmem:[%s7156_s3 + $0x68] sm:$0xff]   ;;  %vm1815_vm14 = vcmask 1046528  }
  0x11   : > { %5273 = vmatpush3.bf16.msra.mxu0 %v5811_v1  ;;  %5082 = vmatprep.subr.bf16.mxu1 %v5812_v2  ;;  %v1051_v7 = vsel %vm942_vm0, 0.0, %v5992_v4  ;;  %v1069_v9 = vsel %vm942_vm0, %v5992_v4, 0.0  ;;  %v5817_v13 = vld [vmem:[%s7156_s3 + $0x118] sm:$0xff]   ;;  %s4654_s24 = sshll.u32 %s7240_s26, 7  ;;  %v5819_v19 = vld [vmem:[%s7156_s3 + $0x120] sm:$0xff]   ;;  %v5821_v23 = vld [vmem:[%s7156_s3 + $0x128] sm:$0xff]  }
  0x12   : > { %5274 = vmatprep.subr.bf16.mxu0 %v5813_v5  ;;  %v6009_v10 = vpack.c.bf16 %v5992_v4, %v1051_v7  ;;  %v6011_v11 = vpack.c.bf16 %v1069_v9, %v1069_v9  ;;  %s6037_s10 = scalar_lea.vmem %s7154_s1, %s4654_s24  ;;  %v6049_v25 = vld [vmem:[%s7158_s5] ss:$0 sm:$0xff]  ;;  %v5822_v35 = vld [vmem:[%s7156_s3 + $0x70] sm:$0xff]   ;;  %v5824_v48 = vld [vmem:[%s7156_s3 + $0x78] sm:$0xff]   ;;  %s7077_s14 = scalar_lea.vmem %s7160_s7, %s4654_s24 }
  0x13   : > { %v4691_v24 = vld [vmem:[%s6037_s10] sm:$0xff]   ;;  %v4834_v30 = vld [vmem:[%s6037_s10 + $0x8] sm:$0xff]   ;;  %v4835_v36 = vld [vmem:[%s6037_s10 + $0x10] sm:$0xff]   ;;  %s4223_s24 = sshll.u32 %s7240_s26, 1 }
  0x14   : > { %5083 = vmatpush3.bf16.msra.mxu1 %v5812_v2  ;;  %v1143_v14 = vshll.u32 %v6009_v10, 16  ;;  %v1141_v15 = vshrl.u32 %v6009_v10, 16  ;;  %v1148_v16 = vshll.u32 %v6011_v11, 16  ;;  %v4692_v27 = vunpack.c.l.bf16 %v4691_v24  ;;  %v6057_v29 = vld [vmem:[%s7159_s6] ss:$0 sm:$0xff]  ;;  %v5823_v37 = vld [vmem:[%s7156_s3 + $0x130] sm:$0xff]   ;;  %s492_s17 = scalar_lea.vmem %s7161_s8, %s4223_s24 }
  0x15   : > { %5275 = vmatpush3.bf16.msra.mxu0 %v5813_v5  ;;  %5084 = vmatprep.subr.bf16.mxu1 %v5814_v6  ;;  %v4693_v28 = vunpack.c.h.bf16 %v4691_v24  ;;  %v4696_v33 = vunpack.c.l.bf16 %v4834_v30  ;;  %v4697_v34 = vunpack.c.h.bf16 %v4834_v30  ;;  %v4836_v42 = vld [vmem:[%s6037_s10 + $0x18] sm:$0xff]   ;;  %v4700_v43 = vunpack.c.l.bf16 %v4835_v36  ;;  %v5826_v3 = vld [vmem:[%s7156_s3] sm:$0xff]  }
  0x16   : > { %5276 = vmatprep.subr.bf16.mxu0 %v5815_v8  ;;  %v1145_v17 = vrot.slane %v1143_v14, 1  ;;  %v1150_v21 = vrot.slane %v1148_v16, 1  ;;  %v575_v31 = vmul.f32 %v4692_v27, %v6049_v25  ;;  %v4701_v44 = vunpack.c.h.bf16 %v4835_v36  ;;  %v5825_v53 = vld [vmem:[%s7156_s3 + $0x138] sm:$0xff]  }
  0x17   : > { %v576_v32 = vmul.f32 %v4693_v28, %v6049_v25  ;;  %v577_v40 = vmul.f32 %v4696_v33, %v6049_v25  ;;  %v578_v41 = vmul.f32 %v4697_v34, %v6049_v25  ;;  %v4704_v45 = vunpack.c.l.bf16 %v4836_v42 }
  0x18   : > { %5085 = vmatpush3.bf16.msra.mxu1 %v5814_v6  ;;  %v1146_v20 = vor.u32 %v1145_v17, %v1141_v15  ;;  %v618_v38 = vadd.f32 %v6057_v29, %v575_v31  ;;  %v579_v51 = vmul.f32 %v4700_v43, %v6049_v25  ;;  %v4705_v52 = vunpack.c.h.bf16 %v4836_v42 }
  0x19   : > { %5277 = vmatpush3.bf16.msra.mxu0 %v5815_v8  ;;  %5086 = vmatprep.subr.bf16.mxu1 %v5816_v12  ;;  %v619_v39 = vadd.f32 %v6057_v29, %v576_v32  ;;  %v620_v49 = vadd.f32 %v6057_v29, %v577_v40  ;;  %v621_v50 = vadd.f32 %v6057_v29, %v578_v41 }
  0x1a   : > { %5278 = vmatprep.subr.bf16.mxu0 %v5817_v13  ;;  %v6052_v26 = vsel %vm1139_vm1, %v1146_v20, %v1150_v21  ;;  %vm654_vm2 = vcmp.ge.f32.partialorder %v618_v38, 0.0  ;;  %v690_v46 = vmul.f32 0.2, %v618_v38  ;;  %v580_v56 = vmul.f32 %v4701_v44, %v6049_v25 }
  0x1b   : > { %7193 = vst [vmem:[#allocation2_spill] sm:$0xff] %v6052_v26  ;;  %5096 = vmatprep.mubr.bf16.mxu1 %v6052_v26  ;;  %vm655_vm3 = vcmp.ge.f32.partialorder %v619_v39, 0.0  ;;  %v691_v47 = vmul.f32 0.2, %v619_v39  ;;  %v581_v57 = vmul.f32 %v4704_v45, %v6049_v25  ;;  %vm656_vm4 = vcmp.ge.f32.partialorder %v620_v49, 0.0  ;;  %v4843_v26 = vld [vmem:[%s6037_s10 + $0x50] sm:$0xff]  }
  0x1c   : > { %5087 = vmatpush3.bf16.msra.mxu1 %v5816_v12  ;;  %v726_v54 = vsel %vm654_vm2, %v618_v38, %v690_v46  ;;  %vm657_vm5 = vcmp.ge.f32.partialorder %v621_v50, 0.0  ;;  %v692_v60 = vmul.f32 0.2, %v620_v49  ;;  %v693_v61 = vmul.f32 0.2, %v621_v50  ;;  %v6105_v12 = vld [vmem:[%s7156_s3 + $0x140] sm:$0xff]  }
  0x1d   : > { %5279 = vmatpush3.bf16.msra.mxu0 %v5817_v13  ;;  %5088 = vmatprep.subr.bf16.mxu1 %v5818_v18  ;;  %v727_v55 = vsel %vm655_vm3, %v619_v39, %v691_v47  ;;  %v946_v58 = vrot.slane %v726_v54, 7  ;;  %v622_v62 = vadd.f32 %v6057_v29, %v579_v51  ;;  %v623_v63 = vadd.f32 %v6057_v29, %v580_v56  ;;  %v4837_v39 = vld [vmem:[%s6037_s10 + $0x20] sm:$0xff]   ;;  %v5828_v51 = vld [vmem:[%s7156_s3 + $0x148] sm:$0xff]  }
  0x1e   : > { %5280 = vmatprep.subr.bf16.mxu0 %v5819_v19  ;;  %v947_v59 = vrot.slane %v727_v55, 7  ;;  %v582_v5 = vmul.f32 %v4705_v52, %v6049_v25  ;;  %v728_v9 = vsel %vm656_vm4, %v620_v49, %v692_v60  ;;  %v729_v13 = vsel %vm657_vm5, %v621_v50, %v693_v61  ;;  %v5832_v55 = vld [vmem:[%s7156_s3 + $0x10] sm:$0xff]   ;;  %v4838_v56 = vld [vmem:[%s6037_s10 + $0x28] sm:$0xff]  }
  0x1f   : > { %v1052_v1 = vsel %vm942_vm0, 0.0, %v946_v58  ;;  %v6108_v14 = vrot.slane %v728_v9, 7  ;;  %vm658_vm6 = vcmp.ge.f32.partialorder %v622_v62, 0.0  ;;  %vm659_vm7 = vcmp.ge.f32.partialorder %v623_v63, 0.0  ;;  %v6163_v61 = vld [vmem:[%s6037_s10 + $0x30] sm:$0xff]  }
  0x20   : > { %5089 = vmatpush3.bf16.msra.mxu1 %v5818_v18  ;;  %v948_v0 = vsel %vm942_vm0, %v946_v58, %v947_v59  ;;  %v1070_v2 = vsel %vm942_vm0, %v947_v59, 0.0  ;;  %v950_v18 = vrot.slane %v729_v13, 7  ;;  %v694_v20 = vmul.f32 0.2, %v622_v62 }
  0x21   : > { %5281 = vmatpush3.bf16.msra.mxu0 %v5819_v19  ;;  %5090 = vmatprep.subr.bf16.mxu1 %v5820_v22  ;;  %v6095_v6 = vpack.c.bf16 %v948_v0, %v1052_v1  ;;  %v6097_v7 = vpack.c.bf16 %v1070_v2, %v1070_v2  ;;  %v6099_v8 = vpack.c.bf16 %v948_v0, %v946_v58  ;;  %v1053_v19 = vsel %vm942_vm0, 0.0, %v6108_v14 }
  0x22   : > { %5282 = vmatprep.subr.bf16.mxu0 %v5821_v23  ;;  %v695_v21 = vmul.f32 0.2, %v623_v63  ;;  %v6118_v27 = vsel %vm942_vm0, %v6108_v14, %v950_v18  ;;  %v1071_v28 = vsel %vm942_vm0, %v950_v18, 0.0  ;;  %v730_v32 = vsel %vm658_vm6, %v622_v62, %v694_v20 }
  0x23   : > { %v1153_v15 = vshrl.u32 %v6095_v6, 16  ;;  %v1155_v16 = vshll.u32 %v6095_v6, 16  ;;  %v1160_v17 = vshll.u32 %v6097_v7, 16  ;;  %v6123_v30 = vpack.c.bf16 %v6118_v27, %v1053_v19 }
  0x24   : > { %5091 = vmatpush3.bf16.msra.mxu1 %v5820_v22  ;;  %v624_v22 = vadd.f32 %v6057_v29, %v581_v57  ;;  %v6125_v31 = vpack.c.bf16 %v1071_v28, %v1071_v28  ;;  %v731_v33 = vsel %vm659_vm7, %v623_v63, %v695_v21  ;;  %v625_v38 = vadd.f32 %v6057_v29, %v582_v5  ;;  %v5835_v28 = vld [vmem:[%s7156_s3 + $0x18] sm:$0xff]  }
  0x25   : > { %5283 = vmatpush3.bf16.msra.mxu0 %v5821_v23  ;;  %5092 = vmatprep.subr.bf16.mxu1 %v5822_v35  ;;  %v1157_v23 = vrot.slane %v1155_v16, 1  ;;  %v1162_v24 = vrot.slane %v1160_v17, 1  ;;  %v953_v36 = vrot.slane %v731_v33, 7  ;;  %v1165_v40 = vshrl.u32 %v6123_v30, 16 }
  0x26   : > { %5284 = vmatprep.subr.bf16.mxu0 %v5823_v37  ;;  %v1167_v41 = vshll.u32 %v6123_v30, 16  ;;  %v1172_v42 = vshll.u32 %v6125_v31, 16  ;;  %vm660_vm8 = vcmp.ge.f32.partialorder %v624_v22, 0.0  ;;  %vm661_vm9 = vcmp.ge.f32.partialorder %v625_v38, 0.0 }
  0x27   : > { %v1158_v34 = vor.u32 %v1157_v23, %v1153_v15  ;;  %v1072_v46 = vsel %vm942_vm0, %v953_v36, 0.0  ;;  %v696_v52 = vmul.f32 0.2, %v624_v22  ;;  %v4708_v54 = vunpack.c.l.bf16 %v4837_v39 }
  0x28   : > { %5093 = vmatpush3.bf16.msra.mxu1 %v5822_v35  ;;  %v6129_v35 = vrot.slane %v730_v32, 7  ;;  %v1169_v47 = vrot.slane %v1167_v41, 1  ;;  %v6150_v50 = vpack.c.bf16 %v1072_v46, %v1072_v46  ;;  %v4709_v0 = vunpack.c.h.bf16 %v4837_v39 }
  0x29   : > { %5285 = vmatpush3.bf16.msra.mxu0 %v5823_v37  ;;  %5094 = vmatprep.subr.bf16.mxu1 %v5824_v48  ;;  %v5829_v37 = vld [vmem:[%s7156_s3 + $0x8] sm:$0xff]   ;;  %v1163_v43 = vsel %vm1139_vm1, %v1158_v34, %v1162_v24  ;;  %v732_v62 = vsel %vm660_vm8, %v624_v22, %v696_v52  ;;  %v583_v1 = vmul.f32 %v4708_v54, %v6049_v25  ;;  %v4712_v17 = vunpack.c.l.bf16 %v4838_v56  ;;  %v5830_v24 = vld [vmem:[%s7156_s3 + $0x150] sm:$0xff]  }
  0x2a   : > { %5286 = vmatprep.subr.bf16.mxu0 %v5825_v53  ;;  %v6142_v44 = vsel %vm942_vm0, %v6129_v35, %v953_v36  ;;  %v1054_v45 = vsel %vm942_vm0, 0.0, %v6129_v35  ;;  %5288 = vmatprep.mubr.bf16.mxu0 %v1163_v43  ;;  %v1170_v57 = vor.u32 %v1169_v47, %v1165_v40  ;;  %v1184_v60 = vshll.u32 %v6150_v50, 16 }
  0x2b   : > { %v6148_v49 = vpack.c.bf16 %v6142_v44, %v1054_v45  ;;  %v6170_v9 = vrot.slane %v732_v62, 7  ;;  %v584_v15 = vmul.f32 %v4709_v0, %v6049_v25  ;;  %v626_v16 = vadd.f32 %v6057_v29, %v583_v1  ;;  %v5831_v45 = vld [vmem:[%s7156_s3 + $0x158] sm:$0xff]   ;;  %v5840_v1 = vld [vmem:[%s7156_s3 + $0x28] sm:$0xff]  }
  0x2c   : > { %5095 = vmatpush3.bf16.msra.mxu1 %v5824_v48  ;;  %v1174_v48 = vrot.slane %v1172_v42, 1  ;;  %v1186_v5 = vrot.slane %v1184_v60, 1  ;;  %v4713_v20 = vunpack.c.h.bf16 %v4838_v56  ;;  %v4716_v21 = vunpack.c.l.bf16 %v6163_v61  ;;  %v4840_v60 = vld [vmem:[%s6037_s10 + $0x38] sm:$0xff]  }
  0x2d   : > { %5287 = vmatpush3.bf16.msra.mxu0 %v5825_v53  ;;  %5128 = vmatprep.subr.bf16.mxu1 %v5826_v3  ;;  %v697_v53 = vmul.f32 0.2, %v625_v38  ;;  %v1177_v58 = vshrl.u32 %v6148_v49, 16  ;;  %v1179_v59 = vshll.u32 %v6148_v49, 16  ;;  %v1055_v19 = vsel %vm942_vm0, 0.0, %v6170_v9 }
  0x2e   : > { %5320 = vmatprep.subr.bf16.mxu0 %v6105_v12  ;;  %v6168_v2 = vsel %vm1139_vm1, %v1170_v57, %v1174_v48  ;;  %vm662_vm10 = vcmp.ge.f32.partialorder %v626_v16, 0.0  ;;  %v698_v36 = vmul.f32 0.2, %v626_v16  ;;  %v586_v39 = vmul.f32 %v4713_v20, %v6049_v25 }
  0x2f   : > { %5097 = vmatmul.mubr.bf16.vlgmr.msra.gmra.mrb[0].mxu1 %v1163_v43  ;;  %v733_v63 = vsel %vm661_vm9, %v625_v38, %v697_v53  ;;  %7194 = vst [vmem:[#allocation3_spill] sm:$0xff] %v6168_v2  ;;  %v585_v38 = vmul.f32 %v4712_v17, %v6049_v25  ;;  %v4717_v56 = vunpack.c.h.bf16 %v6163_v61 }
  0x30   : > { %5129 = vmatpush3.bf16.msra.mxu1 %v5826_v3  ;;  %v1181_v3 = vrot.slane %v1179_v59, 1  ;;  %5289 = vmatmul.mubr.bf16.vlgmr.msra.gmra.mrb[0].mxu0 %v6168_v2  ;;  %v956_v13 = vrot.slane %v733_v63, 7  ;;  %v734_v43 = vsel %vm662_vm10, %v626_v16, %v698_v36  ;;  %v5833_v59 = vld [vmem:[%s7156_s3 + $0x160] sm:$0xff]  }
  0x31   : > { %5130 = vmatprep.subr.bf16.mxu1 %v5829_v37  ;;  %5100 = vmatprep.mubr.bf16.mxu1 %v6168_v2  ;;  %v6211_v47 = vrot.slane %v734_v43, 7  ;;  %v628_v48 = vadd.f32 %v6057_v29, %v585_v38 }
  0x32   : > { %5321 = vmatpush3.bf16.msra.mxu0 %v6105_v12  ;;  %v1182_v18 = vor.u32 %v1181_v3, %v1177_v58  ;;  %v6182_v22 = vsel %vm942_vm0, %v6170_v9, %v956_v13  ;;  %v1073_v23 = vsel %vm942_vm0, %v956_v13, 0.0  ;;  %v627_v12 = vadd.f32 %v6057_v29, %v584_v15 }
  0x33   : > { %5322 = vmatprep.subr.bf16.mxu0 %v5828_v51  ;;  %v6196_v33 = vpack.c.bf16 %v6182_v22, %v1055_v19  ;;  %v6198_v34 = vpack.c.bf16 %v1073_v23, %v1073_v23  ;;  %v1056_v57 = vsel %vm942_vm0, 0.0, %v6211_v47  ;;  %vm664_vm12 = vcmp.ge.f32.partialorder %v628_v48, 0.0 }
  0x34   : > { %5131 = vmatpush3.bf16.msra.mxu1 %v5829_v37  ;;  %v6193_v32 = vsel %vm1139_vm1, %v1182_v18, %v1186_v5  ;;  %vm663_vm11 = vcmp.ge.f32.partialorder %v627_v12, 0.0  ;;  %v699_v37 = vmul.f32 0.2, %v627_v12  ;;  %v700_v58 = vmul.f32 0.2, %v628_v48 }
  0x35   : > { %5132 = vmatprep.subr.bf16.mxu1 %v5832_v55  ;;  %7195 = vst [vmem:[#allocation4_spill] sm:$0xff] %v6193_v32  ;;  %5292 = vmatprep.mubr.bf16.mxu0 %v6193_v32  ;;  %v1189_v40 = vshrl.u32 %v6196_v33, 16  ;;  %v1191_v41 = vshll.u32 %v6196_v33, 16  ;;  %v1196_v42 = vshll.u32 %v6198_v34, 16  ;;  %v587_v15 = vmul.f32 %v4716_v21, %v6049_v25 }
  0x36   : > { %5323 = vmatpush3.bf16.msra.mxu0 %v5828_v51  ;;  %v735_v46 = vsel %vm663_vm11, %v627_v12, %v699_v37  ;;  %v629_v51 = vadd.f32 %v6057_v29, %v586_v39  ;;  %v736_v13 = vsel %vm664_vm12, %v628_v48, %v700_v58  ;;  %v588_v19 = vmul.f32 %v4717_v56, %v6049_v25 }
  0x37   : > { %5101 = vmatmul.mubr.bf16.gmra.mrb[4].mxu1 %v6193_v32  ;;  %5324 = vmatprep.subr.bf16.mxu0 %v5830_v24  ;;  %v1193_v52 = vrot.slane %v1191_v41, 1  ;;  %v1198_v53 = vrot.slane %v1196_v42, 1  ;;  %v959_v54 = vrot.slane %v735_v46, 7  ;;  %v6243_v18 = vrot.slane %v736_v13, 7  ;;  %v5834_v42 = vld [vmem:[%s7156_s3 + $0x168] sm:$0xff]  }
  0x38   : > { %5133 = vmatpush3.bf16.msra.mxu1 %v5832_v55  ;;  %v5838_v55 = vld [vmem:[%s7156_s3 + $0x20] sm:$0xff]   ;;  %vm665_vm13 = vcmp.ge.f32.partialorder %v629_v51, 0.0  ;;  %v701_v0 = vmul.f32 0.2, %v629_v51  ;;  %v631_v36 = vadd.f32 %v6057_v29, %v588_v19  ;;  %v4720_v37 = vunpack.c.l.bf16 %v4840_v60 }
  0x39   : > { %5134 = vmatprep.subr.bf16.mxu1 %v5835_v28  ;;  %v1194_v62 = vor.u32 %v1193_v52, %v1189_v40  ;;  %v6227_v61 = vsel %vm942_vm0, %v6211_v47, %v959_v54  ;;  %v1074_v63 = vsel %vm942_vm0, %v959_v54, 0.0  ;;  %v1057_v12 = vsel %vm942_vm0, 0.0, %v6243_v18  ;;  %v5842_v54 = vld [vmem:[%s7156_s3 + $0x30] sm:$0xff]  }
  0x3a   : > { %5325 = vmatpush3.bf16.msra.mxu0 %v5830_v24  ;;  %v6234_v3 = vpack.c.bf16 %v6227_v61, %v1056_v57  ;;  %v6236_v5 = vpack.c.bf16 %v1074_v63, %v1074_v63  ;;  %v737_v17 = vsel %vm665_vm13, %v629_v51, %v701_v0  ;;  %vm667_vm2 = vcmp.ge.f32.partialorder %v631_v36, 0.0 }
  0x3b   : > { %5326 = vmatprep.subr.bf16.mxu0 %v5831_v45  ;;  %v6240_v16 = vsel %vm1139_vm1, %v1194_v62, %v1198_v53  ;;  %v962_v24 = vrot.slane %v737_v17, 7  ;;  %v703_v51 = vmul.f32 0.2, %v631_v36  ;;  %v4721_v52 = vunpack.c.h.bf16 %v4840_v60  ;;  %v5836_v53 = vld [vmem:[%s7156_s3 + $0x170] sm:$0xff]   ;;  %v5844_v60 = vld [vmem:[%s7156_s3 + $0x38] sm:$0xff]  }
  0x3c   : > { %5135 = vmatpush3.bf16.msra.mxu1 %v5835_v28  ;;  %7196 = vst [vmem:[#allocation5_spill] sm:$0xff] %v6240_v16  ;;  %5293 = vmatmul.mubr.bf16.gmra.mrb[4].mxu0 %v6240_v16  ;;  %v1201_v20 = vshrl.u32 %v6234_v3, 16  ;;  %v1203_v23 = vshll.u32 %v6234_v3, 16  ;;  %v1208_v21 = vshll.u32 %v6236_v5, 16  ;;  %v630_v28 = vadd.f32 %v6057_v29, %v587_v15 }
  0x3d   : > { %5136 = vmatprep.subr.bf16.mxu1 %v5838_v55  ;;  %5104 = vmatprep.mubr.bf16.mxu1 %v6240_v16  ;;  %v6257_v40 = vsel %vm942_vm0, %v6243_v18, %v962_v24  ;;  %v1075_v41 = vsel %vm942_vm0, %v962_v24, 0.0  ;;  %v589_v58 = vmul.f32 %v4720_v37, %v6049_v25  ;;  %v739_v0 = vsel %vm667_vm2, %v631_v36, %v703_v51 }
  0x3e   : > { %5327 = vmatpush3.bf16.msra.mxu0 %v5831_v45  ;;  %v1205_v38 = vrot.slane %v1203_v23, 1  ;;  %v1210_v39 = vrot.slane %v1208_v21, 1  ;;  %v6264_v43 = vpack.c.bf16 %v6257_v40, %v1057_v12  ;;  %v6266_v45 = vpack.c.bf16 %v1075_v41, %v1075_v41  ;;  %v5837_v23 = vld [vmem:[%s7156_s3 + $0x178] sm:$0xff]   ;;  %v4841_v12 = vld [vmem:[%s6037_s10 + $0x40] sm:$0xff]  }
  0x3f   : > { %5328 = vmatprep.subr.bf16.mxu0 %v5833_v59  ;;  %vm666_vm15 = vcmp.ge.f32.partialorder %v630_v28, 0.0  ;;  %v702_v48 = vmul.f32 0.2, %v630_v28  ;;  %v590_v13 = vmul.f32 %v4721_v52, %v6049_v25  ;;  %v965_v17 = vrot.slane %v739_v0, 7 }
  0x40   : > { %5137 = vmatpush3.bf16.msra.mxu1 %v5838_v55  ;;  %v1206_v46 = vor.u32 %v1205_v38, %v1201_v20  ;;  %v1213_v56 = vshrl.u32 %v6264_v43, 16  ;;  %v1215_v55 = vshll.u32 %v6264_v43, 16  ;;  %v1220_v57 = vshll.u32 %v6266_v45, 16 }
  0x41   : > { %5138 = vmatprep.subr.bf16.mxu1 %v5840_v1  ;;  %v738_v63 = vsel %vm666_vm15, %v630_v28, %v702_v48  ;;  %v632_v19 = vadd.f32 %v6057_v29, %v589_v58  ;;  %v633_v20 = vadd.f32 %v6057_v29, %v590_v13  ;;  %v1819_v21 = vrot.slane %v6095_v6, 1  ;;  %v6302_v28 = vld [vmem:[%s7156_s3 + $0x80] sm:$0xff]  }
  0x42   : > { %5329 = vmatpush3.bf16.msra.mxu0 %v5833_v59  ;;  %v6282_v62 = vsel %vm1139_vm1, %v1206_v46, %v1210_v39  ;;  %v1217_v59 = vrot.slane %v1215_v55, 1  ;;  %v6289_v15 = vrot.slane %v738_v63, 7  ;;  %v1820_v24 = vrot.slane %v6097_v7, 1  ;;  %v4842_v55 = vld [vmem:[%s6037_s10 + $0x48] sm:$0xff]   ;;  %v6332_v13 = vld [vmem:[%s7156_s3 + $0x180] sm:$0xff]  }
  0x43   : > { %7197 = vst [vmem:[#allocation6_spill] sm:$0xff] %v6282_v62  ;;  %5330 = vmatprep.subr.bf16.mxu0 %v5834_v42  ;;  %5296 = vmatprep.mubr.bf16.mxu0 %v6282_v62  ;;  %v1076_v6 = vsel %vm942_vm0, %v965_v17, 0.0  ;;  %vm668_vm3 = vcmp.ge.f32.partialorder %v632_v19, 0.0  ;;  %vm669_vm4 = vcmp.ge.f32.partialorder %v633_v20, 0.0  ;;  %v705_v46 = vmul.f32 0.2, %v633_v20 }
  0x44   : > { %5139 = vmatpush3.bf16.msra.mxu1 %v5840_v1  ;;  %v1222_v1 = vrot.slane %v1220_v57, 1  ;;  %v1218_v36 = vor.u32 %v1217_v59, %v1213_v56  ;;  %v6306_v37 = vsel %vm942_vm0, %v6289_v15, %v965_v17  ;;  %v1058_v38 = vsel %vm942_vm0, 0.0, %v6289_v15 }
  0x45   : > { %5105 = vmatmul.mubr.bf16.gmra.mrb[8].mxu1 %v6282_v62  ;;  %5140 = vmatprep.subr.bf16.mxu1 %v5842_v54  ;;  %v6312_v7 = vpack.c.bf16 %v6306_v37, %v1058_v38  ;;  %v6314_v39 = vpack.c.bf16 %v1076_v6, %v1076_v6  ;;  %v6320_v48 = vsel %vm1815_vm14, %v1819_v21, %v1820_v24  ;;  %v4724_v56 = vunpack.c.l.bf16 %v4841_v12 }
  0x46   : > { %5331 = vmatpush3.bf16.msra.mxu0 %v5834_v42  ;;  %v6317_v41 = vsel %vm1139_vm1, %v1218_v36, %v1222_v1  ;;  %v704_v42 = vmul.f32 0.2, %v632_v19  ;;  %7199 = vst [vmem:[#allocation8_spill] sm:$0xff] %v6320_v48  ;;  %v741_v58 = vsel %vm669_vm4, %v633_v20, %v705_v46  ;;  %v4725_v63 = vunpack.c.h.bf16 %v4841_v12 }
  0x47   : > { %5332 = vmatprep.subr.bf16.mxu0 %v5836_v53  ;;  %7198 = vst [vmem:[#allocation7_spill] sm:$0xff] %v6317_v41  ;;  %5297 = vmatmul.mubr.bf16.gmra.mrb[8].mxu0 %v6317_v41  ;;  %v1225_v51 = vshrl.u32 %v6312_v7, 16  ;;  %v1227_v52 = vshll.u32 %v6312_v7, 16  ;;  %v1822_v0 = vrot.slane %v6123_v30, 1  ;;  %v968_v21 = vrot.slane %v741_v58, 7 }
  0x48   : > { %5141 = vmatpush3.bf16.msra.mxu1 %v5842_v54  ;;  %5108 = vmatprep.mubr.bf16.mxu1 %v6317_v41  ;;  %v1232_v54 = vshll.u32 %v6314_v39, 16  ;;  %v740_v57 = vsel %vm668_vm3, %v632_v19, %v704_v42  ;;  %v591_v19 = vmul.f32 %v4724_v56, %v6049_v25  ;;  %v1823_v30 = vrot.slane %v6125_v31, 1 }
  0x49   : > { %5142 = vmatprep.subr.bf16.mxu1 %v5844_v60  ;;  %v1229_v59 = vrot.slane %v1227_v52, 1  ;;  %v6334_v17 = vrot.slane %v740_v57, 7  ;;  %v4728_v20 = vunpack.c.l.bf16 %v4842_v55  ;;  %v1077_v36 = vsel %vm942_vm0, %v968_v21, 0.0 }
  0x4a   : > { %5333 = vmatpush3.bf16.msra.mxu0 %v5836_v53  ;;  %v1234_v1 = vrot.slane %v1232_v54, 1  ;;  %v592_v53 = vmul.f32 %v4725_v63, %v6049_v25  ;;  %v6350_v6 = vpack.c.bf16 %v1077_v36, %v1077_v36  ;;  %v634_v42 = vadd.f32 %v6057_v29, %v591_v19 }
  0x4b   : > { %5334 = vmatprep.subr.bf16.mxu0 %v5837_v23  ;;  %v1230_v24 = vor.u32 %v1229_v59, %v1225_v51  ;;  %v6342_v12 = vsel %vm942_vm0, %v6334_v17, %v968_v21  ;;  %v6358_v51 = vsel %vm1815_vm14, %v1822_v0, %v1823_v30  ;;  %v4729_v52 = vunpack.c.h.bf16 %v4842_v55 }
  0x4c   : > { %5143 = vmatpush3.bf16.msra.mxu1 %v5844_v60  ;;  %v1059_v60 = vsel %vm942_vm0, 0.0, %v6334_v17  ;;  %v635_v31 = vadd.f32 %v6057_v29, %v592_v53  ;;  %7201 = vst [vmem:[#allocation10_spill] sm:$0xff] %v6358_v51  ;;  %v593_v54 = vmul.f32 %v4728_v20, %v6049_v25  ;;  %v1244_v57 = vshll.u32 %v6350_v6, 16 }
  0x4d   : > { %5176 = vmatprep.subr.bf16.mxu1 %v6302_v28  ;;  %v6348_v38 = vpack.c.bf16 %v6342_v12, %v1059_v60  ;;  %v6355_v46 = vsel %vm1139_vm1, %v1230_v24, %v1234_v1  ;;  %vm670_vm5 = vcmp.ge.f32.partialorder %v634_v42, 0.0  ;;  %v706_v58 = vmul.f32 0.2, %v634_v42 }
  0x4e   : > { %5335 = vmatpush3.bf16.msra.mxu0 %v5837_v23  ;;  %7200 = vst [vmem:[#allocation9_spill] sm:$0xff] %v6355_v46  ;;  %5300 = vmatprep.mubr.bf16.mxu0 %v6355_v46  ;;  %vm671_vm6 = vcmp.ge.f32.partialorder %v635_v31, 0.0  ;;  %v707_v63 = vmul.f32 0.2, %v635_v31  ;;  %v594_v0 = vmul.f32 %v4729_v52, %v6049_v25  ;;  %v1246_v59 = vrot.slane %v1244_v57, 1 }
  0x4f   : > { %5368 = vmatprep.subr.bf16.mxu0 %v6332_v13  ;;  %5109 = vmatmul.mubr.bf16.gmra.mrb[12].mxu1 %v6355_v46  ;;  %v1237_v23 = vshrl.u32 %v6348_v38, 16  ;;  %v1239_v56 = vshll.u32 %v6348_v38, 16  ;;  %v636_v1 = vadd.f32 %v6057_v29, %v593_v54  ;;  %v1825_v21 = vrot.slane %v6148_v49, 1 }
  0x50   : > { %v742_v19 = vsel %vm670_vm5, %v634_v42, %v706_v58  ;;  %v743_v53 = vsel %vm671_vm6, %v635_v31, %v707_v63  ;;  %v637_v30 = vadd.f32 %v6057_v29, %v594_v0  ;;  %v1826_v20 = vrot.slane %v6150_v50, 1  ;;  %vm4258_vm6 = vmneg %vm942_vm0 }
  0x51   : > { %v1241_v55 = vrot.slane %v1239_v56, 1  ;;  %v6372_v60 = vrot.slane %v742_v19, 7  ;;  %v971_v36 = vrot.slane %v743_v53, 7  ;;  %vm672_vm7 = vcmp.ge.f32.partialorder %v636_v1, 0.0 }
  0x52   : > { %vm673_vm8 = vcmp.ge.f32.partialorder %v637_v30, 0.0  ;;  %v708_v52 = vmul.f32 0.2, %v636_v1  ;;  %v709_v56 = vmul.f32 0.2, %v637_v30  ;;  %v6376_v57 = vsel %vm1815_vm14, %v1825_v21, %v1826_v20 }
  0x53   : > { %v1242_v24 = vor.u32 %v1241_v55, %v1237_v23  ;;  %7202 = vst [vmem:[#allocation11_spill] sm:$0xff] %v6376_v57  ;;  %v6383_v42 = vsel %vm942_vm0, %v6372_v60, %v971_v36  ;;  %v1060_v50 = vsel %vm942_vm0, 0.0, %v6372_v60  ;;  %v1078_v31 = vsel %vm942_vm0, %v971_v36, 0.0  ;;  %v4844_v36 = vld [vmem:[%s6037_s10 + $0x58] sm:$0xff]  }
  0x54   : > { %v6391_v54 = vpack.c.bf16 %v6383_v42, %v1060_v50  ;;  %v6393_v23 = vpack.c.bf16 %v1078_v31, %v1078_v31  ;;  %v744_v58 = vsel %vm672_vm7, %v636_v1, %v708_v52  ;;  %v4732_v63 = vunpack.c.l.bf16 %v4843_v26 }
  0x55   : > { %v6379_v49 = vsel %vm1139_vm1, %v1242_v24, %v1246_v59  ;;  %v745_v0 = vsel %vm673_vm8, %v637_v30, %v709_v56  ;;  %v6396_v55 = vrot.slane %v744_v58, 7  ;;  %v4733_v59 = vunpack.c.h.bf16 %v4843_v26  ;;  %v5841_v58 = vld [vmem:[%s7156_s3 + $0x188] sm:$0xff]  }
  0x56   : > { %7203 = vst [vmem:[#allocation12_spill] sm:$0xff] %v6379_v49  ;;  %5301 = vmatmul.mubr.bf16.gmra.mrb[12].mxu0 %v6379_v49  ;;  %5112 = vmatprep.mubr.bf16.mxu1 %v6379_v49  ;;  %v1828_v21 = vrot.slane %v6196_v33, 1  ;;  %v1249_v19 = vshrl.u32 %v6391_v54, 16  ;;  %v1251_v53 = vshll.u32 %v6391_v54, 16  ;;  %v1256_v20 = vshll.u32 %v6393_v23, 16 }
  0x57   : > { %5336 = vmatprep.mubr.bf16.mxu0 %v6320_v48  ;;  %v974_v24 = vrot.slane %v745_v0, 7  ;;  %v1061_v1 = vsel %vm942_vm0, 0.0, %v6396_v55  ;;  %v595_v52 = vmul.f32 %v4732_v63, %v6049_v25  ;;  %v596_v30 = vmul.f32 %v4733_v59, %v6049_v25 }
  0x58   : > { %v1829_v56 = vrot.slane %v6198_v34, 1  ;;  %v1253_v26 = vrot.slane %v1251_v53, 1  ;;  %v1258_v50 = vrot.slane %v1256_v20, 1  ;;  %v4736_v49 = vunpack.c.l.bf16 %v4844_v36 }
  0x59   : > { %v6410_v33 = vsel %vm942_vm0, %v6396_v55, %v974_v24  ;;  %v1079_v31 = vsel %vm942_vm0, %v974_v24, 0.0  ;;  %v638_v34 = vadd.f32 %v6057_v29, %v595_v52  ;;  %v639_v59 = vadd.f32 %v6057_v29, %v596_v30  ;;  %v4845_v30 = vld [vmem:[%s6037_s10 + $0x60] sm:$0xff]  }
  0x5a   : > { %v6417_v0 = vpack.c.bf16 %v6410_v33, %v1061_v1  ;;  %v6419_v63 = vpack.c.bf16 %v1079_v31, %v1079_v31  ;;  %v1254_v53 = vor.u32 %v1253_v26, %v1249_v19  ;;  %v6424_v20 = vsel %vm1815_vm14, %v1828_v21, %v1829_v56 }
  0x5b   : > { %7204 = vst [vmem:[#allocation13_spill] sm:$0xff] %v6424_v20  ;;  %v4737_v24 = vunpack.c.h.bf16 %v4844_v36  ;;  %vm674_vm9 = vcmp.ge.f32.partialorder %v638_v34, 0.0  ;;  %vm675_vm10 = vcmp.ge.f32.partialorder %v639_v59, 0.0  ;;  %v710_v52 = vmul.f32 0.2, %v638_v34 }
  0x5c   : > { %v1261_v46 = vshrl.u32 %v6417_v0, 16  ;;  %v1263_v41 = vshll.u32 %v6417_v0, 16  ;;  %v1268_v1 = vshll.u32 %v6419_v63, 16  ;;  %v6430_v31 = vsel %vm1139_vm1, %v1254_v53, %v1258_v50 }
  0x5d   : > { %7205 = vst [vmem:[#allocation14_spill] sm:$0xff] %v6430_v31  ;;  %v711_v19 = vmul.f32 0.2, %v639_v59  ;;  %5113 = vmatmul.mubr.bf16.gmra.mrb[16].mxu1 %v6430_v31  ;;  %v597_v56 = vmul.f32 %v4736_v49, %v6049_v25  ;;  %v598_v26 = vmul.f32 %v4737_v24, %v6049_v25  ;;  %v746_v50 = vsel %vm674_vm9, %v638_v34, %v710_v52  ;;  %v5843_v31 = vld [vmem:[%s7156_s3 + $0x190] sm:$0xff]  }
  0x5e   : > { %5337 = vmatmul.mubr.bf16.vlgmr.msra.gmra.mrb[0].mxu0 %v6358_v51  ;;  %v1265_v21 = vrot.slane %v1263_v41, 1  ;;  %v1270_v36 = vrot.slane %v1268_v1, 1  ;;  %v1831_v62 = vrot.slane %v6234_v3, 1  ;;  %v1832_v16 = vrot.slane %v6236_v5, 1 }
  0x5f   : > { %5369 = vmatpush3.bf16.msra.mxu0 %v6332_v13  ;;  %5340 = vmatprep.mubr.bf16.mxu0 %v6376_v57  ;;  %v747_v53 = vsel %vm675_vm10, %v639_v59, %v711_v19  ;;  %v6444_v41 = vrot.slane %v746_v50, 7  ;;  %v640_v49 = vadd.f32 %v6057_v29, %v597_v56  ;;  %v641_v25 = vadd.f32 %v6057_v29, %v598_v26 }
  0x60   : > { %5370 = vmatprep.subr.bf16.mxu0 %v5841_v58  ;;  %v1266_v13 = vor.u32 %v1265_v21, %v1261_v46  ;;  %v977_v1 = vrot.slane %v747_v53, 7  ;;  %v6449_v34 = vsel %vm1815_vm14, %v1831_v62, %v1832_v16  ;;  %v4740_v59 = vunpack.c.l.bf16 %v4845_v30 }
  0x61   : > { %7206 = vst [vmem:[#allocation15_spill] sm:$0xff] %v6449_v34  ;;  %v4741_v24 = vunpack.c.h.bf16 %v4845_v30  ;;  %v1062_v46 = vsel %vm942_vm0, 0.0, %v6444_v41  ;;  %vm676_vm11 = vcmp.ge.f32.partialorder %v640_v49, 0.0  ;;  %vm677_vm12 = vcmp.ge.f32.partialorder %v641_v25, 0.0  ;;  %v6470_v30 = vld [vmem:[%s7158_s5] ss:$0 sm:$0xff] }
  0x62   : > { %v6452_v3 = vsel %vm1139_vm1, %v1266_v13, %v1270_v36  ;;  %v6456_v5 = vsel %vm942_vm0, %v6444_v41, %v977_v1  ;;  %v1080_v52 = vsel %vm942_vm0, %v977_v1, 0.0  ;;  %v712_v62 = vmul.f32 0.2, %v640_v49  ;;  %v5845_v36 = vld [vmem:[%s7156_s3 + $0x198] sm:$0xff]  }
  0x63   : > { %7207 = vst [vmem:[#allocation16_spill] sm:$0xff] %v6452_v3  ;;  %5371 = vmatpush3.bf16.msra.mxu0 %v5841_v58  ;;  %5116 = vmatprep.mubr.bf16.mxu1 %v6452_v3  ;;  %v6463_v29 = vpack.c.bf16 %v6456_v5, %v1062_v46  ;;  %v6465_v16 = vpack.c.bf16 %v1080_v52, %v1080_v52  ;;  %v713_v19 = vmul.f32 0.2, %v641_v25  ;;  %v1834_v53 = vrot.slane %v6264_v43, 1  ;;  %v5847_v43 = vld [vmem:[%s7156_s3 + $0x1a0] sm:$0xff]  }
  0x64   : > { %5372 = vmatprep.subr.bf16.mxu0 %v5843_v31  ;;  %v599_v21 = vmul.f32 %v6470_v30, %v4740_v59  ;;  %v600_v58 = vmul.f32 %v6470_v30, %v4741_v24  ;;  %v748_v13 = vsel %vm676_vm11, %v640_v49, %v712_v62  ;;  %v6486_v59 = vld [vmem:[%s7159_s6] ss:$0 sm:$0xff]  ;;  %v1837_v48 = vrot.slane %v6312_v7, 1 }
  0x65   : > { %v1273_v56 = vshrl.u32 %v6463_v29, 16  ;;  %v1275_v26 = vshll.u32 %v6463_v29, 16  ;;  %v1280_v50 = vshll.u32 %v6465_v16, 16  ;;  %v749_v1 = vsel %vm677_vm12, %v641_v25, %v713_v19 }
  0x66   : > { %5341 = vmatmul.mubr.bf16.gmra.mrb[4].mxu0 %v6424_v20  ;;  %v642_v24 = vadd.f32 %v6486_v59, %v599_v21  ;;  %v643_v46 = vadd.f32 %v6486_v59, %v600_v58  ;;  %v6490_v32 = vrot.slane %v748_v13, 7  ;;  %v980_v2 = vrot.slane %v749_v1, 7 }
  0x67   : > { %5344 = vmatprep.mubr.bf16.mxu0 %v6449_v34  ;;  %v1277_v52 = vrot.slane %v1275_v26, 1  ;;  %v1282_v3 = vrot.slane %v1280_v50, 1  ;;  %5373 = vmatpush3.bf16.msra.mxu0 %v5843_v31  ;;  %v4846_v31 = vld [vmem:[%s6037_s10 + $0x68] sm:$0xff]   ;;  %v1835_v20 = vrot.slane %v6266_v45, 1  ;;  %vm5917_vm7 = vmmov 1  }
  0x68   : > { %vm678_vm13 = vcmp.ge.f32.partialorder %v642_v24, 0.0  ;;  %vm679_vm15 = vcmp.ge.f32.partialorder %v643_v46, 0.0  ;;  %v714_v49 = vmul.f32 0.2, %v642_v24  ;;  %v715_v25 = vmul.f32 0.2, %v643_v46  ;;  %5374 = vmatprep.subr.bf16.mxu0 %v5845_v36  ;;  %vm6640_vm8 = vmpackc.low %vm5917_vm7, %vm4258_vm6 }
  0x69   : > { %v1278_v62 = vor.u32 %v1277_v52, %v1273_v56  ;;  %v6497_v19 = vsel %vm942_vm0, %v6490_v32, %v980_v2  ;;  %v1063_v21 = vsel %vm942_vm0, 0.0, %v6490_v32  ;;  %v1081_v58 = vsel %vm942_vm0, %v980_v2, 0.0 }
  0x6a   : > { %v6504_v26 = vpack.c.bf16 %v6497_v19, %v1063_v21  ;;  %v6506_v50 = vpack.c.bf16 %v1081_v58, %v1081_v58  ;;  %v750_v13 = vsel %vm678_vm13, %v642_v24, %v714_v49  ;;  %v751_v1 = vsel %vm679_vm15, %v643_v46, %v715_v25 }
  0x6b   : > { %v6509_v34 = vsel %vm1139_vm1, %v1278_v62, %v1282_v3  ;;  %v6511_v56 = vrot.slane %v750_v13, 7  ;;  %v983_v52 = vrot.slane %v751_v1, 7  ;;  %5375 = vmatpush3.bf16.msra.mxu0 %v5845_v36  ;;  %v4744_v24 = vunpack.c.l.bf16 %v4846_v31  ;;  %v5849_v3 = vld [vmem:[%s7156_s3 + $0x1a8] sm:$0xff]  }
  0x6c   : > { %7208 = vst [vmem:[#allocation17_spill] sm:$0xff] %v6509_v34  ;;  %5117 = vmatmul.mubr.bf16.gmra.mrb[20].mxu1 %v6509_v34  ;;  %v1285_v2 = vshrl.u32 %v6504_v26, 16  ;;  %v1287_v21 = vshll.u32 %v6504_v26, 16  ;;  %v1292_v58 = vshll.u32 %v6506_v50, 16  ;;  %5376 = vmatprep.subr.bf16.mxu0 %v5847_v43  ;;  %v6529_v49 = vsel %vm1815_vm14, %v1834_v53, %v1835_v20  ;;  %v4847_v34 = vld [vmem:[%s6037_s10 + $0x70] sm:$0xff]  }
  0x6d   : > { %v6523_v46 = vsel %vm942_vm0, %v6511_v56, %v983_v52  ;;  %v1064_v45 = vsel %vm942_vm0, 0.0, %v6511_v56  ;;  %v1082_v36 = vsel %vm942_vm0, %v983_v52, 0.0  ;;  %7209 = vst [vmem:[#allocation18_spill] sm:$0xff] %v6529_v49  ;;  %v4745_v57 = vunpack.c.h.bf16 %v4846_v31 }
  0x6e   : > { %v1289_v25 = vrot.slane %v1287_v21, 1  ;;  %v1294_v62 = vrot.slane %v1292_v58, 1  ;;  %v6532_v13 = vpack.c.bf16 %v6523_v46, %v1064_v45  ;;  %v6534_v1 = vpack.c.bf16 %v1082_v36, %v1082_v36  ;;  %5345 = vmatmul.mubr.bf16.gmra.mrb[8].mxu0 %v6529_v49  ;;  %v5851_v45 = vld [vmem:[%s7156_s3 + $0x1b0] sm:$0xff]  }
  0x6f   : > { %v601_v51 = vmul.f32 %v6470_v30, %v4744_v24  ;;  %v1838_v52 = vrot.slane %v6314_v39, 1  ;;  %5377 = vmatpush3.bf16.msra.mxu0 %v5847_v43  ;;  %v602_v31 = vmul.f32 %v6470_v30, %v4745_v57  ;;  %v4748_v39 = vunpack.c.l.bf16 %v4847_v34 }
  0x70   : > { %v1290_v20 = vor.u32 %v1289_v25, %v1285_v2  ;;  %v1297_v53 = vshrl.u32 %v6532_v13, 16  ;;  %v1299_v21 = vshll.u32 %v6532_v13, 16  ;;  %v1304_v58 = vshll.u32 %v6534_v1, 16  ;;  %5378 = vmatprep.subr.bf16.mxu0 %v5849_v3 }
  0x71   : > { %v644_v24 = vadd.f32 %v6486_v59, %v601_v51  ;;  %v6550_v7 = vsel %vm1815_vm14, %v1837_v48, %v1838_v52  ;;  %v4749_v25 = vunpack.c.h.bf16 %v4847_v34  ;;  %v645_v49 = vadd.f32 %v6486_v59, %v602_v31  ;;  %v5853_v31 = vld [vmem:[%s7156_s3 + $0x1b8] sm:$0xff]  }
  0x72   : > { %v6553_v43 = vsel %vm1139_vm1, %v1290_v20, %v1294_v62  ;;  %v1301_v2 = vrot.slane %v1299_v21, 1  ;;  %v1306_v36 = vrot.slane %v1304_v58, 1  ;;  %5348 = vmatprep.mubr.bf16.mxu0 %v6550_v7  ;;  %v603_v51 = vmul.f32 %v6470_v30, %v4748_v39 }
  0x73   : > { %7210 = vst [vmem:[#allocation19_spill] sm:$0xff] %v6553_v43  ;;  %5120 = vmatprep.mubr.bf16.mxu1 %v6553_v43  ;;  %vm680_vm2 = vcmp.ge.f32.partialorder %v644_v24, 0.0  ;;  %v716_v57 = vmul.f32 0.2, %v644_v24  ;;  %5379 = vmatpush3.bf16.msra.mxu0 %v5849_v3  ;;  %v604_v52 = vmul.f32 %v6470_v30, %v4749_v25  ;;  %v1840_v62 = vrot.slane %v6348_v38, 1 }
  0x74   : > { %v1302_v48 = vor.u32 %v1301_v2, %v1297_v53  ;;  %v1841_v20 = vrot.slane %v6350_v6, 1  ;;  %5380 = vmatprep.subr.bf16.mxu0 %v5851_v45  ;;  %vm681_vm3 = vcmp.ge.f32.partialorder %v645_v49, 0.0  ;;  %v717_v21 = vmul.f32 0.2, %v645_v49 }
  0x75   : > { %v752_v34 = vsel %vm680_vm2, %v644_v24, %v716_v57  ;;  %v646_v58 = vadd.f32 %v6486_v59, %v603_v51  ;;  %v647_v53 = vadd.f32 %v6486_v59, %v604_v52  ;;  %v1843_v2 = vrot.slane %v6391_v54, 1 }
  0x76   : > { %v6567_v39 = vsel %vm1139_vm1, %v1302_v48, %v1306_v36  ;;  %v6569_v3 = vrot.slane %v752_v34, 7  ;;  %v6573_v38 = vsel %vm1815_vm14, %v1840_v62, %v1841_v20  ;;  %v753_v6 = vsel %vm681_vm3, %v645_v49, %v717_v21  ;;  %v6586_v62 = vld [vmem:[%s7156_s3 + $0x1c0] sm:$0xff]  }
  0x77   : > { %7211 = vst [vmem:[#allocation20_spill] sm:$0xff] %v6567_v39  ;;  %5121 = vmatmul.mubr.bf16.gmra.mrb[24].mxu1 %v6567_v39  ;;  %vm682_vm4 = vcmp.ge.f32.partialorder %v646_v58, 0.0  ;;  %v718_v24 = vmul.f32 0.2, %v646_v58  ;;  %5349 = vmatmul.mubr.bf16.gmra.mrb[12].mxu0 %v6573_v38  ;;  %v986_v25 = vrot.slane %v753_v6, 7  ;;  %vm683_vm5 = vcmp.ge.f32.partialorder %v647_v53, 0.0 }
  0x78   : > { %v1065_v36 = vsel %vm942_vm0, 0.0, %v6569_v3  ;;  %v719_v57 = vmul.f32 0.2, %v647_v53  ;;  %5381 = vmatpush3.bf16.msra.mxu0 %v5851_v45  ;;  %v1844_v48 = vrot.slane %v6393_v23, 1  ;;  %v1846_v52 = vrot.slane %v6417_v0, 1 }
  0x79   : > { %v754_v51 = vsel %vm682_vm4, %v646_v58, %v718_v24  ;;  %v1847_v49 = vrot.slane %v6419_v63, 1  ;;  %5382 = vmatprep.subr.bf16.mxu0 %v5853_v31  ;;  %v6590_v54 = vsel %vm942_vm0, %v6569_v3, %v986_v25  ;;  %v1083_v20 = vsel %vm942_vm0, %v986_v25, 0.0 }
  0x7a   : > { %v755_v45 = vsel %vm683_vm5, %v647_v53, %v719_v57  ;;  %v6593_v21 = vrot.slane %v754_v51, 7  ;;  %v6596_v23 = vpack.c.bf16 %v6590_v54, %v1065_v36  ;;  %v6598_v0 = vpack.c.bf16 %v1083_v20, %v1083_v20 }
  0x7b   : > { %v989_v63 = vrot.slane %v755_v45, 7  ;;  %v6601_v34 = vsel %vm1815_vm14, %v1843_v2, %v1844_v48  ;;  %v6607_v6 = vsel %vm1815_vm14, %v1846_v52, %v1847_v49  ;;  %v1849_v53 = vrot.slane %v6463_v29, 1 }
  0x7c   : > { %7212 = vst [vmem:[#allocation21_spill] sm:$0xff] %v6601_v34  ;;  %v1066_v58 = vsel %vm942_vm0, 0.0, %v6593_v21  ;;  %5352 = vmatprep.mubr.bf16.mxu0 %v6601_v34  ;;  %5383 = vmatpush3.bf16.msra.mxu0 %v5853_v31  ;;  %v1309_v24 = vshrl.u32 %v6596_v23, 16  ;;  %v1311_v25 = vshll.u32 %v6596_v23, 16  ;;  %v1316_v36 = vshll.u32 %v6598_v0, 16 }
  0x7d   : > { %v990_v2 = vsel %vm942_vm0, %v6593_v21, %v989_v63  ;;  %5416 = vmatprep.subr.bf16.mxu0 %v6586_v62  ;;  %v1084_v57 = vsel %vm942_vm0, %v989_v63, 0.0  ;;  %v1850_v48 = vrot.slane %v6465_v16, 1  ;;  %v1852_v49 = vrot.slane %v6504_v26, 1 }
  0x7e   : > { %v1117_v51 = vpack.c.bf16 %v990_v2, %v1066_v58  ;;  %v1313_v52 = vrot.slane %v1311_v25, 1  ;;  %v1318_v29 = vrot.slane %v1316_v36, 1  ;;  %v1118_v31 = vpack.c.bf16 %v1084_v57, %v1084_v57  ;;  %v4848_v36 = vld [vmem:[%s6037_s10 + $0x78] sm:$0xff]  }
  0x7f   : > { %5353 = vmatmul.mubr.bf16.gmra.mrb[16].mxu0 %v6607_v6  ;;  %v6621_v39 = vsel %vm1815_vm14, %v1849_v53, %v1850_v48  ;;  %v1853_v43 = vrot.slane %v6506_v50, 1  ;;  %v1855_v16 = vrot.slane %v6532_v13, 1  ;;  %v1856_v25 = vrot.slane %v6534_v1, 1 }
  0x80   : > { %v1321_v20 = vshrl.u32 %v1117_v51, 16  ;;  %v1323_v45 = vshll.u32 %v1117_v51, 16  ;;  %v1314_v34 = vor.u32 %v1313_v52, %v1309_v24  ;;  %v1328_v63 = vshll.u32 %v1118_v31, 16  ;;  %5356 = vmatprep.mubr.bf16.mxu0 %v6621_v39 }
  0x81   : > { %v6635_v50 = vpack.c.bf16 %v5992_v4, %v5992_v4  ;;  %v6638_v24 = vsel %vm1815_vm14, %v1852_v49, %v1853_v43  ;;  %v6645_v1 = vsel %vm1815_vm14, %v1855_v16, %v1856_v25  ;;  %v4753_v52 = vunpack.c.h.bf16 %v4848_v36 }
  0x82   : > { %v1325_v58 = vrot.slane %v1323_v45, 1  ;;  %v6630_v26 = vsel %vm1139_vm1, %v1314_v34, %v1318_v29  ;;  %v1330_v57 = vrot.slane %v1328_v63, 1  ;;  %v4752_v34 = vunpack.c.l.bf16 %v4848_v36 }
  0x83   : > { %5124 = vmatprep.mubr.bf16.mxu1 %v6630_v26  ;;  %v6652_v4 = vpack.c.bf16 %v6342_v12, %v6334_v17  ;;  %v6656_v43 = vpack.c.bf16 %v6383_v42, %v6372_v60  ;;  %v1858_v29 = vrot.slane %v6596_v23, 1  ;;  %v1859_v17 = vrot.slane %v6598_v0, 1 }
  0x84   : > { %v1326_v53 = vor.u32 %v1325_v58, %v1321_v20  ;;  %v605_v49 = vmul.f32 %v6470_v30, %v4752_v34  ;;  %v6664_v20 = vpack.c.bf16 %v6410_v33, %v6396_v55  ;;  %v606_v12 = vmul.f32 %v6470_v30, %v4753_v52  ;;  %v5857_v34 = vld [vmem:[%s7156_s3 + $0x1c8] sm:$0xff]  }
  0x85   : > { %v6674_v60 = vpack.c.bf16 %v6456_v5, %v6444_v41  ;;  %v6678_v42 = vpack.c.bf16 %v6497_v19, %v6490_v32  ;;  %v6683_v33 = vpack.c.bf16 %v6523_v46, %v6511_v56  ;;  %v6687_v23 = vpack.c.bf16 %v6590_v54, %v6569_v3  ;;  %v5848_v3 = vld [vmem:[%s7156_s3 + $0x88] sm:$0xff]  }
  0x86   : > { %v6648_v48 = vsel %vm1139_vm1, %v1326_v53, %v1330_v57  ;;  %v648_v55 = vadd.f32 %v6486_v59, %v605_v49  ;;  %v6690_v30 = vpack.c.bf16 %v990_v2, %v6593_v21  ;;  %v1861_v0 = vrot.slane %v1117_v51, 1  ;;  %v5850_v51 = vld [vmem:[%s7156_s3 + $0x90] sm:$0xff]   ;;  %v5852_v57 = vld [vmem:[%s7156_s3 + $0x98] sm:$0xff]  }
  0x87   : > { %5125 = vmatmul.mubr.bf16.gmra.mrb[28].mxu1 %v6648_v48  ;;  %5357 = vmatmul.mubr.bf16.gmra.mrb[20].mxu0 %v6638_v24  ;;  %v1862_v41 = vrot.slane %v1118_v31, 1  ;;  %v649_v5 = vadd.f32 %v6486_v59, %v606_v12  ;;  %v6695_v19 = vpack.c.bf16 %v6118_v27, %v6108_v14  ;;  %v6698_v56 = vsel %vm1815_vm14, %v1858_v29, %v1859_v17  ;;  %v5859_v29 = vld [vmem:[%s7156_s3 + $0x1d0] sm:$0xff]  }
  0x88   : > { %5144 = vmatprep.mubr.msk.bf16.mxu1 %vm6640_vm8, %v6635_v50  ;;  %5360 = vmatprep.mubr.bf16.mxu0 %v6645_v1  ;;  %vm684_vm9 = vcmp.ge.f32.partialorder %v648_v55, 0.0  ;;  %v720_v32 = vmul.f32 0.2, %v648_v55  ;;  %v6730_v16 = vpack.c.bf16 %v6142_v44, %v6129_v35  ;;  %v6734_v58 = vpack.c.bf16 %v6182_v22, %v6170_v9  ;;  %v5854_v35 = vld [vmem:[%s7156_s3 + $0xa0] sm:$0xff]   ;;  %v5856_v22 = vld [vmem:[%s7156_s3 + $0xa8] sm:$0xff]  }
  0x89   : > { %vm685_vm10 = vcmp.ge.f32.partialorder %v649_v5, 0.0  ;;  %v721_v46 = vmul.f32 0.2, %v649_v5  ;;  %v6704_v21 = vsel %vm1815_vm14, %v1861_v0, %v1862_v41  ;;  %v6757_v44 = vpack.c.bf16 %v6227_v61, %v6211_v47  ;;  %v5861_v0 = vld [vmem:[%s7156_s3 + $0x1d8] sm:$0xff]   ;;  %v5865_v41 = vld [vmem:[%s7156_s3 + $0x1e8] sm:$0xff]  }
  0x8a   : > { %v756_v54 = vsel %vm684_vm9, %v648_v55, %v720_v32  ;;  %v6761_v9 = vpack.c.bf16 %v6257_v40, %v6243_v18  ;;  %v5858_v40 = vld [vmem:[%s7156_s3 + $0xb0] sm:$0xff]   ;;  %v6790_v17 = vpack.c.bf16 %v6306_v37, %v6289_v15  ;;  %v5860_v55 = vld [vmem:[%s7156_s3 + $0xb8] sm:$0xff]   ;;  %v5862_v15 = vld [vmem:[%s7156_s3 + $0xc0] sm:$0xff]  }
  0x8b   : > { %v757_v59 = vsel %vm685_vm10, %v649_v5, %v721_v46  ;;  %v6706_v2 = vrot.slane %v756_v54, 7  ;;  %v5863_v37 = vld [vmem:[%s7156_s3 + $0x1e0] sm:$0xff]   ;;  %v5867_v5 = vld [vmem:[%s7156_s3 + $0x1f0] sm:$0xff]   ;;  %v5869_v32 = vld [vmem:[%s7156_s3 + $0x1f8] sm:$0xff]   ;;  %v1817_v54 = vrot.slane %v6011_v11, 1 }
  0x8c   : > { %v992_v14 = vrot.slane %v757_v59, 7  ;;  %v5871_v46 = vld [vmem:[%s7156_s3 + $0x200] sm:$0xff]  }
  0x8d   : > { %v1067_v27 = vsel %vm942_vm0, 0.0, %v6706_v2 }
  0x8e   : > { %v6724_v31 = vsel %vm942_vm0, %v6706_v2, %v992_v14 }
  0x8f   : > { %5145 = vmatmul.mubr.msk.bf16.vlgmr.msra.gmra.mrb[0].mxu1 %vm6640_vm8, %v6099_v8  ;;  %5361 = vmatmul.mubr.bf16.gmra.mrb[24].mxu0 %v6698_v56  ;;  %v1119_v45 = vpack.c.bf16 %v6724_v31, %v1067_v27  ;;  %v6887_v11 = vpack.c.bf16 %v6724_v31, %v6706_v2  ;;  %v7216_v27 = vld [vmem:[#allocation10_spill] sm:$0xff]  ;;  %v5868_v2 = vld [vmem:[%s7156_s3 + $0xd8] sm:$0xff]   ;;  %v7217_v31 = vld [vmem:[#allocation11_spill] sm:$0xff] }
  0x90   : > { %5177 = vmatpush3.bf16.msra.mxu1 %v6302_v28  ;;  %5148 = vmatprep.mubr.msk.bf16.mxu1 %vm6640_vm8, %v6695_v19  ;;  %v1085_v28 = vsel %vm942_vm0, %v992_v14, 0.0  ;;  %v7215_v14 = vld [vmem:[#allocation8_spill] sm:$0xff] }
  0x91   : > { %5178 = vmatprep.subr.bf16.mxu1 %v5848_v3  ;;  %5364 = vmatprep.mubr.bf16.mxu0 %v6704_v21  ;;  %v1120_v63 = vpack.c.bf16 %v1085_v28, %v1085_v28  ;;  %v2669_v25 = vrot.slane %v1119_v45, 1  ;;  %v2399_v47 = vshll.u32 %v1119_v45, 16  ;;  %v2397_v61 = vshrl.u32 %v1119_v45, 16  ;;  %v7218_v28 = vld [vmem:[#allocation13_spill] sm:$0xff]  ;;  %v7219_v45 = vld [vmem:[#allocation3_spill] sm:$0xff] }
  0x93   : > { %v2670_v36 = vrot.slane %v1120_v63, 1  ;;  %v2404_v18 = vshll.u32 %v1120_v63, 16  ;;  %v2401_v52 = vrot.slane %v2399_v47, 1  ;;  %v5870_v63 = vld [vmem:[%s7156_s3 + $0xe0] sm:$0xff]   ;;  %v5875_v47 = vld [vmem:[%s7156_s3 + $0x210] sm:$0xff]  }
  0x94   : > { %5179 = vmatpush3.bf16.msra.mxu1 %v5848_v3  ;;  %v1816_v3 = vrot.slane %v6009_v10, 1  ;;  %v5864_v10 = vld [vmem:[%s7156_s3 + $0xc8] sm:$0xff]  }
  0x95   : > { %5180 = vmatprep.subr.bf16.mxu1 %v5850_v51  ;;  %v6740_v53 = vsel %vm1815_vm14, %v2669_v25, %v2670_v36  ;;  %v2406_v49 = vrot.slane %v2404_v18, 1  ;;  %v5872_v25 = vld [vmem:[%s7156_s3 + $0xe8] sm:$0xff]   ;;  %v5877_v18 = vld [vmem:[%s7156_s3 + $0x218] sm:$0xff]  }
  0x96   : > { %v6870_v59 = vsel %vm1815_vm14, %v1816_v3, %v1817_v54  ;;  %v7220_v36 = vld [vmem:[#allocation15_spill] sm:$0xff]  ;;  %v7233_v54 = vld [vmem:[#allocation20_spill] sm:$0xff] }
  0x97   : > { %5149 = vmatmul.mubr.msk.bf16.gmra.mrb[4].mxu1 %vm6640_vm8, %v6730_v16  ;;  %5365 = vmatmul.mubr.bf16.gmra.mrb[28].mxu0 %v6740_v53  ;;  %v7232_v3 = vld [vmem:[#allocation19_spill] sm:$0xff] }
  0x98   : > { %5152 = vmatprep.mubr.msk.bf16.mxu1 %vm6640_vm8, %v6734_v58  ;;  %5181 = vmatpush3.bf16.msra.mxu1 %v5850_v51  ;;  %v5866_v51 = vld [vmem:[%s7156_s3 + $0xd0] sm:$0xff]  }
  0x99   : > { %5182 = vmatprep.subr.bf16.mxu1 %v5852_v57  ;;  %5384 = vmatprep.mubr.msk.bf16.mxu0 %vm6640_vm8, %v6695_v19 }
  0x9c   : > { %5183 = vmatpush3.bf16.msra.mxu1 %v5852_v57  ;;  %v7221_v57 = vld [vmem:[#allocation4_spill] sm:$0xff] }
  0x9d   : > { %5184 = vmatprep.subr.bf16.mxu1 %v5854_v35 }
  0x9f   : > { %5153 = vmatmul.mubr.msk.bf16.gmra.mrb[8].mxu1 %vm6640_vm8, %v6757_v44  ;;  %5385 = vmatmul.mubr.msk.bf16.vlgmr.msra.gmra.mrb[0].mxu0 %vm6640_vm8, %v6730_v16 }
  0xa0   : > { %5156 = vmatprep.mubr.msk.bf16.mxu1 %vm6640_vm8, %v6761_v9  ;;  %5185 = vmatpush3.bf16.msra.mxu1 %v5854_v35  ;;  %v7222_v35 = vld [vmem:[#allocation18_spill] sm:$0xff] }
  0xa1   : > { %5417 = vmatpush3.bf16.msra.mxu0 %v6586_v62  ;;  %5388 = vmatprep.mubr.msk.bf16.mxu0 %vm6640_vm8, %v6734_v58  ;;  %v2402_v62 = vor.u32 %v2401_v52, %v2397_v61  ;;  %v5876_v61 = vld [vmem:[%s7156_s3 + $0xf8] sm:$0xff]   ;;  %v7225_v52 = vld [vmem:[#allocation7_spill] sm:$0xff] }
  0xa2   : > { %5186 = vmatprep.subr.bf16.mxu1 %v5856_v22  ;;  %5418 = vmatprep.subr.bf16.mxu0 %v5857_v34 }
  0xa3   : > { %v6793_v12 = vsel %vm1139_vm1, %v2402_v62, %v2406_v49  ;;  %v5884_v49 = vld [vmem:[%s7156_s3 + $0x100] sm:$0xff]   ;;  %v5879_v62 = vld [vmem:[%s7156_s3 + $0x228] sm:$0xff]  }
  0xa4   : > { %5187 = vmatpush3.bf16.msra.mxu1 %v5856_v22  ;;  %v7223_v22 = vld [vmem:[#allocation5_spill] sm:$0xff] }
  0xa5   : > { %5419 = vmatpush3.bf16.msra.mxu0 %v5857_v34  ;;  %5188 = vmatprep.subr.bf16.mxu1 %v5858_v40  ;;  %v5874_v34 = vld [vmem:[%s7156_s3 + $0xf0] sm:$0xff]  }
  0xa6   : > { %5420 = vmatprep.subr.bf16.mxu0 %v5859_v29 }
  0xa7   : > { %5157 = vmatmul.mubr.msk.bf16.gmra.mrb[12].mxu1 %vm6640_vm8, %v6790_v17  ;;  %5389 = vmatmul.mubr.msk.bf16.gmra.mrb[4].mxu0 %vm6640_vm8, %v6757_v44 }
  0xa8   : > { %5160 = vmatprep.mubr.msk.bf16.mxu1 %vm6640_vm8, %v6652_v4  ;;  %5392 = vmatprep.mubr.msk.bf16.mxu0 %vm6640_vm8, %v6761_v9 }
  0xa9   : > { %5189 = vmatpush3.bf16.msra.mxu1 %v5858_v40  ;;  %5421 = vmatpush3.bf16.msra.mxu0 %v5859_v29  ;;  %v7224_v40 = vld [vmem:[#allocation6_spill] sm:$0xff] }
  0xaa   : > { %5190 = vmatprep.subr.bf16.mxu1 %v5860_v55  ;;  %5422 = vmatprep.subr.bf16.mxu0 %v5861_v0  ;;  %v5878_v29 = vld [vmem:[%s7156_s3 + $0x220] sm:$0xff]  }
  0xad   : > { %5191 = vmatpush3.bf16.msra.mxu1 %v5860_v55  ;;  %5423 = vmatpush3.bf16.msra.mxu0 %v5861_v0  ;;  %v7226_v55 = vld [vmem:[#allocation21_spill] sm:$0xff] }
  0xae   : > { %5224 = vmatprep.subr.bf16.mxu1 %v5862_v15  ;;  %5424 = vmatprep.subr.bf16.mxu0 %v5863_v37  ;;  %v7227_v0 = vld [vmem:[#allocation9_spill] sm:$0xff] }
  0xaf   : > { %5161 = vmatmul.mubr.msk.bf16.gmra.mrb[16].mxu1 %vm6640_vm8, %v6656_v43  ;;  %5393 = vmatmul.mubr.msk.bf16.gmra.mrb[8].mxu0 %vm6640_vm8, %v6790_v17 }
  0xb0   : > { %5164 = vmatprep.mubr.msk.bf16.mxu1 %vm6640_vm8, %v6664_v20  ;;  %5396 = vmatprep.mubr.msk.bf16.mxu0 %vm6640_vm8, %v6652_v4 }
  0xb1   : > { %5425 = vmatpush3.bf16.msra.mxu0 %v5863_v37  ;;  %v5880_v37 = vld [vmem:[%s7156_s3 + $0x230] sm:$0xff]  }
  0xb2   : > { %5426 = vmatprep.subr.bf16.mxu0 %v5865_v41 }
  0xb5   : > { %5427 = vmatpush3.bf16.msra.mxu0 %v5865_v41  ;;  %v5881_v41 = vld [vmem:[%s7156_s3 + $0x238] sm:$0xff]  }
  0xb6   : > { %5428 = vmatprep.subr.bf16.mxu0 %v5867_v5 }
  0xb7   : > { %5165 = vmatmul.mubr.msk.bf16.gmra.mrb[20].mxu1 %vm6640_vm8, %v6674_v60  ;;  %5397 = vmatmul.mubr.msk.bf16.gmra.mrb[12].mxu0 %vm6640_vm8, %v6656_v43 }
  0xb8   : > { %5168 = vmatprep.mubr.msk.bf16.mxu1 %vm6640_vm8, %v6678_v42  ;;  %5400 = vmatprep.mubr.msk.bf16.mxu0 %vm6640_vm8, %v6664_v20 }
  0xb9   : > { %5429 = vmatpush3.bf16.msra.mxu0 %v5867_v5  ;;  %v7229_v5 = vld [vmem:[#allocation14_spill] sm:$0xff] }
  0xba   : > { %5430 = vmatprep.subr.bf16.mxu0 %v5869_v32 }
  0xbd   : > { %5431 = vmatpush3.bf16.msra.mxu0 %v5869_v32  ;;  %v7230_v32 = vld [vmem:[#allocation16_spill] sm:$0xff] }
  0xbe   : > { %5464 = vmatprep.subr.bf16.mxu0 %v5871_v46 }
  0xbf   : > { %5169 = vmatmul.mubr.msk.bf16.gmra.mrb[24].mxu1 %vm6640_vm8, %v6683_v33  ;;  %5401 = vmatmul.mubr.msk.bf16.gmra.mrb[16].mxu0 %vm6640_vm8, %v6674_v60 }
  0xc0   : > { %5172 = vmatprep.mubr.msk.bf16.mxu1 %vm6640_vm8, %v6687_v23  ;;  %5404 = vmatprep.mubr.msk.bf16.mxu0 %vm6640_vm8, %v6678_v42 }
  0xc7   : > { %5173 = vmatmul.mubr.msk.bf16.gmra.mrb[28].mxu1 %vm6640_vm8, %v6690_v30  ;;  %5405 = vmatmul.mubr.msk.bf16.gmra.mrb[20].mxu0 %vm6640_vm8, %v6683_v33 }
  0xc8   : > { %5192 = vmatprep.mubr.bf16.mxu1 %v6870_v59  ;;  %5408 = vmatprep.mubr.msk.bf16.mxu0 %vm6640_vm8, %v6687_v23 }
  0xcf   : > { %5193 = vmatmul.mubr.bf16.vlgmr.msra.gmra.mrb[0].mxu1 %v7215_v14  ;;  %5409 = vmatmul.mubr.msk.bf16.gmra.mrb[24].mxu0 %vm6640_vm8, %v6690_v30  ;;  %v5888_v14 = vld [vmem:[%s7156_s3 + $0x120] sm:$0xff]  }
  0xd0   : > { %5225 = vmatpush3.bf16.msra.mxu1 %v5862_v15  ;;  %5196 = vmatprep.mubr.bf16.mxu1 %v7216_v27  ;;  %v7228_v15 = vld [vmem:[#allocation12_spill] sm:$0xff] }
  0xd1   : > { %5226 = vmatprep.subr.bf16.mxu1 %v5864_v10  ;;  %5412 = vmatprep.mubr.msk.bf16.mxu0 %vm6640_vm8, %v6887_v11 }
  0xd4   : > { %5227 = vmatpush3.bf16.msra.mxu1 %v5864_v10  ;;  %v5885_v10 = vld [vmem:[%s7156_s3 + $0x108] sm:$0xff]  }
  0xd5   : > { %5228 = vmatprep.subr.bf16.mxu1 %v5866_v51 }
  0xd7   : > { %5197 = vmatmul.mubr.bf16.gmra.mrb[4].mxu1 %v7217_v31  ;;  %5413 = vmatmul.mubr.msk.bf16.gmra.mrb[28].mxu0 %vm6640_vm8, %v6635_v50  ;;  %v5873_v50 = vld [vmem:[%s7156_s3 + $0x208] sm:$0xff]  }
  0xd8   : > { %5200 = vmatprep.mubr.bf16.mxu1 %v7218_v28  ;;  %5229 = vmatpush3.bf16.msra.mxu1 %v5866_v51 }
  0xd9   : > { %5230 = vmatprep.subr.bf16.mxu1 %v5868_v2  ;;  %5432 = vmatprep.mubr.bf16.mxu0 %v7219_v45 }
  0xdc   : > { %5231 = vmatpush3.bf16.msra.mxu1 %v5868_v2 }
  0xdd   : > { %5232 = vmatprep.subr.bf16.mxu1 %v5870_v63 }
  0xdf   : > { %5201 = vmatmul.mubr.bf16.gmra.mrb[8].mxu1 %v7220_v36  ;;  %5433 = vmatmul.mubr.bf16.vlgmr.msra.gmra.mrb[0].mxu0 %v7221_v57 }
  0xe0   : > { %5204 = vmatprep.mubr.bf16.mxu1 %v7222_v35  ;;  %5233 = vmatpush3.bf16.msra.mxu1 %v5870_v63 }
  0xe1   : > { %5465 = vmatpush3.bf16.msra.mxu0 %v5871_v46  ;;  %5436 = vmatprep.mubr.bf16.mxu0 %v7223_v22  ;;  %v7231_v46 = vld [vmem:[#allocation17_spill] sm:$0xff] }
  0xe2   : > { %5234 = vmatprep.subr.bf16.mxu1 %v5872_v25  ;;  %5466 = vmatprep.subr.bf16.mxu0 %v5873_v50 }
  0xe4   : > { %5235 = vmatpush3.bf16.msra.mxu1 %v5872_v25 }
  0xe5   : > { %5467 = vmatpush3.bf16.msra.mxu0 %v5873_v50  ;;  %5236 = vmatprep.subr.bf16.mxu1 %v5874_v34 }
  0xe6   : > { %5468 = vmatprep.subr.bf16.mxu0 %v5875_v47 }
  0xe7   : > { %5205 = vmatmul.mubr.bf16.gmra.mrb[12].mxu1 %v6550_v7  ;;  %5437 = vmatmul.mubr.bf16.gmra.mrb[4].mxu0 %v7224_v40 }
  0xe8   : > { %5208 = vmatprep.mubr.bf16.mxu1 %v6573_v38  ;;  %5440 = vmatprep.mubr.bf16.mxu0 %v7225_v52 }
  0xe9   : > { %5237 = vmatpush3.bf16.msra.mxu1 %v5874_v34  ;;  %5469 = vmatpush3.bf16.msra.mxu0 %v5875_v47 }
  0xea   : > { %5238 = vmatprep.subr.bf16.mxu1 %v5876_v61  ;;  %5470 = vmatprep.subr.bf16.mxu0 %v5877_v18 }
  0xed   : > { %5239 = vmatpush3.bf16.msra.mxu1 %v5876_v61  ;;  %5471 = vmatpush3.bf16.msra.mxu0 %v5877_v18 }
  0xee   : > { %5512 = vmatprep.subr.bf16.mxu1 %v5884_v49  ;;  %5472 = vmatprep.subr.bf16.mxu0 %v5878_v29 }
  0xef   : > { %5209 = vmatmul.mubr.bf16.gmra.mrb[16].mxu1 %v7226_v55  ;;  %5441 = vmatmul.mubr.bf16.gmra.mrb[8].mxu0 %v7227_v0 }
  0xf0   : > { %5212 = vmatprep.mubr.bf16.mxu1 %v6607_v6  ;;  %5444 = vmatprep.mubr.bf16.mxu0 %v7228_v15 }
  0xf1   : > { %5473 = vmatpush3.bf16.msra.mxu0 %v5878_v29 }
  0xf2   : > { %5474 = vmatprep.subr.bf16.mxu0 %v5879_v62 }
  0xf5   : > { %5475 = vmatpush3.bf16.msra.mxu0 %v5879_v62 }
  0xf6   : > { %5476 = vmatprep.subr.bf16.mxu0 %v5880_v37 }
  0xf7   : > { %5213 = vmatmul.mubr.bf16.gmra.mrb[20].mxu1 %v6621_v39  ;;  %5445 = vmatmul.mubr.bf16.gmra.mrb[12].mxu0 %v7229_v5 }
  0xf8   : > { %5216 = vmatprep.mubr.bf16.mxu1 %v6638_v24  ;;  %5448 = vmatprep.mubr.bf16.mxu0 %v7230_v32 }
  0xf9   : > { %5477 = vmatpush3.bf16.msra.mxu0 %v5880_v37 }
  0xfa   : > { %5478 = vmatprep.subr.bf16.mxu0 %v5881_v41 }
  0xfd   : > { %5479 = vmatpush3.bf16.msra.mxu0 %v5881_v41 }
  0xff   : > { %5217 = vmatmul.mubr.bf16.gmra.mrb[24].mxu1 %v6645_v1  ;;  %5449 = vmatmul.mubr.bf16.gmra.mrb[16].mxu0 %v7231_v46 }
 0x100   : > { %5220 = vmatprep.mubr.bf16.mxu1 %v6698_v56  ;;  %5452 = vmatprep.mubr.bf16.mxu0 %v7232_v3 }
 0x107   : > { %5221 = vmatmul.mubr.bf16.gmra.mrb[28].mxu1 %v6704_v21  ;;  %5453 = vmatmul.mubr.bf16.gmra.mrb[20].mxu0 %v7233_v54 }
 0x108   : > { %5240 = vmatprep.mubr.msk.bf16.mxu1 %vm6640_vm8, %v6099_v8  ;;  %5456 = vmatprep.mubr.bf16.mxu0 %v6630_v26  ;;  %v5886_v8 = vld [vmem:[%s7156_s3 + $0x110] sm:$0xff]  }
 0x10f   : > { %5241 = vmatmul.mubr.msk.bf16.vlgmr.msra.gmra.mrb[0].mxu1 %vm6640_vm8, %v6695_v19  ;;  %5457 = vmatmul.mubr.bf16.gmra.mrb[24].mxu0 %v6648_v48  ;;  %v7234_v19 = vld [vmem:[#allocation2_spill] sm:$0xff] }
 0x110   : > { %5520 = vmatpush3.bf16.msra.mxu1 %v5884_v49  ;;  %5244 = vmatprep.mubr.msk.bf16.mxu1 %vm6640_vm8, %v6730_v16  ;;  %v5887_v16 = vld [vmem:[%s7156_s3 + $0x118] sm:$0xff]  }
 0x111   : > { %5513 = vmatprep.subr.bf16.mxu1 %v5885_v10  ;;  %5460 = vmatprep.mubr.bf16.mxu0 %v6793_v12 }
 0x114   : > { %5521 = vmatpush3.bf16.msra.mxu1 %v5885_v10 }
 0x115   : > { %5514 = vmatprep.subr.bf16.mxu1 %v5886_v8 }
 0x117   : > { %5245 = vmatmul.mubr.msk.bf16.gmra.mrb[4].mxu1 %vm6640_vm8, %v6734_v58  ;;  %5461 = vmatmul.mubr.bf16.gmra.mrb[28].mxu0 %v7234_v19  ;;  %v5889_v58 = vld [vmem:[%s7156_s3 + $0x128] sm:$0xff]  }
 0x118   : > { %5248 = vmatprep.mubr.msk.bf16.mxu1 %vm6640_vm8, %v6757_v44  ;;  %5522 = vmatpush3.bf16.msra.mxu1 %v5886_v8  ;;  %v5890_v44 = vld [vmem:[%s7156_s3 + $0x130] sm:$0xff]  }
 0x119   : > { %5515 = vmatprep.subr.bf16.mxu1 %v5887_v16  ;;  %5480 = vmatprep.mubr.bf16.mxu0 %v7216_v27 }
 0x11c   : > { %5523 = vmatpush3.bf16.msra.mxu1 %v5887_v16 }
 0x11d   : > { %5516 = vmatprep.subr.bf16.mxu1 %v5888_v14 }
 0x11f   : > { %5249 = vmatmul.mubr.msk.bf16.gmra.mrb[8].mxu1 %vm6640_vm8, %v6761_v9  ;;  %5481 = vmatmul.mubr.bf16.vlgmr.msra.gmra.mrb[0].mxu0 %v7217_v31  ;;  %v5891_v9 = vld [vmem:[%s7156_s3 + $0x138] sm:$0xff]  }
 0x120   : > { %5252 = vmatprep.mubr.msk.bf16.mxu1 %vm6640_vm8, %v6790_v17  ;;  %5524 = vmatpush3.bf16.msra.mxu1 %v5888_v14 }
 0x121   : > { %5484 = vmatprep.mubr.bf16.mxu0 %v7218_v28  ;;  %5517 = vmatprep.subr.bf16.mxu1 %v5889_v58 }
 0x124   : > { %5525 = vmatpush3.bf16.msra.mxu1 %v5889_v58 }
 0x125   : > { %5518 = vmatprep.subr.bf16.mxu1 %v5890_v44 }
 0x127   : > { %5253 = vmatmul.mubr.msk.bf16.gmra.mrb[12].mxu1 %vm6640_vm8, %v6652_v4  ;;  %5485 = vmatmul.mubr.bf16.gmra.mrb[4].mxu0 %v7220_v36 }
 0x128   : > { %5256 = vmatprep.mubr.msk.bf16.mxu1 %vm6640_vm8, %v6656_v43  ;;  %5488 = vmatprep.mubr.bf16.mxu0 %v7222_v35 }
 0x129   : > { %5526 = vmatpush3.bf16.msra.mxu1 %v5890_v44 }
 0x12a   : > { %5519 = vmatprep.subr.bf16.mxu1 %v5891_v9 }
 0x12d   : > { %5527 = vmatpush3.bf16.msra.mxu1 %v5891_v9 }
 0x12f   : > { %5257 = vmatmul.mubr.msk.bf16.gmra.mrb[16].mxu1 %vm6640_vm8, %v6664_v20  ;;  %5489 = vmatmul.mubr.bf16.gmra.mrb[8].mxu0 %v6550_v7 }
 0x130   : > { %5260 = vmatprep.mubr.msk.bf16.mxu1 %vm6640_vm8, %v6674_v60  ;;  %5492 = vmatprep.mubr.bf16.mxu0 %v6573_v38 }
 0x137   : > { %5261 = vmatmul.mubr.msk.bf16.gmra.mrb[20].mxu1 %vm6640_vm8, %v6678_v42  ;;  %5493 = vmatmul.mubr.bf16.gmra.mrb[12].mxu0 %v7226_v55 }
 0x138   : > { %5264 = vmatprep.mubr.msk.bf16.mxu1 %vm6640_vm8, %v6683_v33  ;;  %5496 = vmatprep.mubr.bf16.mxu0 %v6607_v6 }
 0x13f   : > { %5265 = vmatmul.mubr.msk.bf16.gmra.mrb[24].mxu1 %vm6640_vm8, %v6687_v23  ;;  %5497 = vmatmul.mubr.bf16.gmra.mrb[16].mxu0 %v6621_v39 }
 0x140   : > { %5268 = vmatprep.mubr.msk.bf16.mxu1 %vm6640_vm8, %v6690_v30  ;;  %5500 = vmatprep.mubr.bf16.mxu0 %v6638_v24 }
 0x147   : > { %5269 = vmatmul.mubr.msk.bf16.gmra.mrb[28].mxu1 %vm6640_vm8, %v6887_v11  ;;  %5501 = vmatmul.mubr.bf16.gmra.mrb[20].mxu0 %v6645_v1 }
 0x148   : > { %5304 = vmatprep.mubr.bf16.mxu1 %v7229_v5  ;;  %5504 = vmatprep.mubr.bf16.mxu0 %v6698_v56 }
 0x14f   : > { %5305 = vmatmul.mubr.bf16.vlgmr.msra.gmra.mrb[16].mxu1 %v7230_v32  ;;  %5505 = vmatmul.mubr.bf16.gmra.mrb[24].mxu0 %v6704_v21 }
 0x150   : > { %5308 = vmatprep.mubr.bf16.mxu1 %v7231_v46  ;;  %5508 = vmatprep.mubr.bf16.mxu0 %v6740_v53 }
 0x157   : > { %5309 = vmatmul.mubr.bf16.gmra.mrb[20].mxu1 %v7232_v3  ;;  %5509 = vmatmul.mubr.bf16.gmra.mrb[28].mxu0 %v6870_v59 }
 0x158   : > { %5312 = vmatprep.mubr.bf16.mxu1 %v7233_v54 }
 0x15f   : > { %5313 = vmatmul.mubr.bf16.gmra.mrb[24].mxu1 %v6630_v26  ;;  %v7067_v26 = vld [vmem:[%s7157_s4] ss:$0 sm:$0xff] }
 0x160   : > { %5316 = vmatprep.mubr.bf16.mxu1 %v6648_v48 }
 0x167   : > { %5317 = vmatmul.mubr.bf16.gmra.mrb[28].mxu1 %v6793_v12 }
 0x1e2   : > { %v5242_v7 = vpop.f32.mrb[0].mxu1 }
 0x1e3   : > { %v2237_v39 = vpop.f32.mrb[1].mxu1 }
 0x1e4   : > { %v5243_v38 = vpop.f32.mrb[2].mxu1 }
 0x1e5   : > { %v2240_v6 = vpop.f32.mrb[3].mxu1 }
 0x1ea   : > { %v5246_v24 = vpop.f32.mrb[4].mxu1 }
 0x1eb   : > { %v2253_v13 = vpop.f32.mrb[5].mxu1 }
 0x1ec   : > { %v5247_v1 = vpop.f32.mrb[6].mxu1 }
 0x1ed   : > { %v2256_v4 = vpop.f32.mrb[7].mxu1 }
 0x1f2   : > { %v5250_v43 = vpop.f32.mrb[8].mxu1  ;;  %v5482_v20 = vpop.f32.mrb[0].mxu0 }
 0x1f3   : > { %v2269_v60 = vpop.f32.mrb[9].mxu1  ;;  %v5528_v42 = vadd.f32 %v5482_v20, %v5242_v7  ;;  %v3565_v48 = vpop.f32.mrb[1].mxu0 }
 0x1f4   : > { %v5251_v33 = vpop.f32.mrb[10].mxu1  ;;  %v5529_v23 = vadd.f32 %v3565_v48, %v2237_v39  ;;  %v5483_v30 = vpop.f32.mrb[2].mxu0 }
 0x1f5   : > { %v2272_v56 = vpop.f32.mrb[11].mxu1  ;;  %v5530_v21 = vadd.f32 %v5483_v30, %v5243_v38  ;;  %v3568_v53 = vpop.f32.mrb[3].mxu0  ;;  %v3733_v59 = vadd.f32 %v5528_v42, %v7067_v26 }
 0x1f6   : > { %v3731_v17 = vadd.f32 %v5529_v23, %v7067_v26  ;;  %v5531_v12 = vadd.f32 %v3568_v53, %v2240_v6 }
 0x1f7   : > { %v3734_v11 = vadd.f32 %v5530_v21, %v7067_v26  ;;  %v3802_v22 = vmul.f32 %v3733_v59, %v3733_v59 }
 0x1f8   : > { %v3732_v27 = vadd.f32 %v5531_v12, %v7067_v26  ;;  %v3800_v31 = vmul.f32 %v3731_v17, %v3731_v17 }
 0x1f9   : > { %v4762_v51 = vpack.c.bf16 %v3734_v11, %v3733_v59  ;;  %v3803_v52 = vmul.f32 %v3734_v11, %v3734_v11 }
 0x1fa   : > { %v7080_v2 = vpop.f32.mrb[12].mxu1  ;;  %v3763_v28 = vadd.f32 %v3732_v27, %v3731_v17  ;;  %v3801_v45 = vmul.f32 %v3732_v27, %v3732_v27  ;;  %v4757_v63 = vpack.c.bf16 %v3732_v27, %v3731_v17  ;;  %v5486_v25 = vpop.f32.mrb[4].mxu0 }
 0x1fb   : > { %v7082_v50 = vpop.f32.mrb[13].mxu1  ;;  %4849 = vst [vmem:[%s7077_s14 + $0x8] sm:$0xff] %v4762_v51   ;;  %v5532_v36 = vadd.f32 %v5486_v25, %v5246_v24  ;;  %v3581_v57 = vpop.f32.mrb[5].mxu0 }
 0x1fc   : > { %v7085_v35 = vpop.f32.mrb[14].mxu1  ;;  %v3764_v34 = vadd.f32 %v3763_v28, %v3733_v59  ;;  %v3832_v47 = vadd.f32 %v3801_v45, %v3800_v31  ;;  %4758 = vst [vmem:[%s7077_s14] sm:$0xff] %v4757_v63   ;;  %v5533_v61 = vadd.f32 %v3581_v57, %v2253_v13  ;;  %v5487_v18 = vpop.f32.mrb[6].mxu0 }
 0x1fd   : > { %v7088_v40 = vpop.f32.mrb[15].mxu1  ;;  %v5534_v29 = vadd.f32 %v5487_v18, %v5247_v1  ;;  %v3584_v49 = vpop.f32.mrb[7].mxu0  ;;  %v3737_v37 = vadd.f32 %v5532_v36, %v7067_v26 }
 0x1fe   : > { %v3833_v62 = vadd.f32 %v3832_v47, %v3802_v22  ;;  %v3735_v55 = vadd.f32 %v5533_v61, %v7067_v26  ;;  %v3765_v0 = vadd.f32 %v3764_v34, %v3734_v11  ;;  %v5535_v15 = vadd.f32 %v3584_v49, %v2256_v4 }
 0x1ff   : > { %v3738_v41 = vadd.f32 %v5534_v29, %v7067_v26  ;;  %v3806_v9 = vmul.f32 %v3737_v37, %v3737_v37 }
 0x200   : > { %v3766_v5 = vadd.f32 %v3765_v0, %v3735_v55  ;;  %v3804_v32 = vmul.f32 %v3735_v55, %v3735_v55  ;;  %v3834_v46 = vadd.f32 %v3833_v62, %v3803_v52  ;;  %v3736_v3 = vadd.f32 %v5535_v15, %v7067_v26 }
 0x201   : > { %v4772_v54 = vpack.c.bf16 %v3738_v41, %v3737_v37  ;;  %v3807_v24 = vmul.f32 %v3738_v41, %v3738_v41 }
 0x202   : > { %v3835_v10 = vadd.f32 %v3834_v46, %v3804_v32  ;;  %v3767_v8 = vadd.f32 %v3766_v5, %v3736_v3  ;;  %v3805_v19 = vmul.f32 %v3736_v3, %v3736_v3  ;;  %v4767_v16 = vpack.c.bf16 %v3736_v3, %v3735_v55  ;;  %v5490_v14 = vpop.f32.mrb[8].mxu0 }
 0x203   : > { %4851 = vst [vmem:[%s7077_s14 + $0x18] sm:$0xff] %v4772_v54   ;;  %v5536_v58 = vadd.f32 %v5490_v14, %v5250_v43  ;;  %v3597_v44 = vpop.f32.mrb[9].mxu0 }
 0x204   : > { %v3768_v7 = vadd.f32 %v3767_v8, %v3737_v37  ;;  %v3836_v39 = vadd.f32 %v3835_v10, %v3805_v19  ;;  %4850 = vst [vmem:[%s7077_s14 + $0x10] sm:$0xff] %v4767_v16   ;;  %v5537_v38 = vadd.f32 %v3597_v44, %v2269_v60  ;;  %v5491_v6 = vpop.f32.mrb[10].mxu0 }
 0x205   : > { %v5538_v13 = vadd.f32 %v5491_v6, %v5251_v33  ;;  %v3600_v1 = vpop.f32.mrb[11].mxu0  ;;  %v3741_v23 = vadd.f32 %v5536_v58, %v7067_v26 }
 0x206   : > { %v3837_v4 = vadd.f32 %v3836_v39, %v3806_v9  ;;  %v3739_v20 = vadd.f32 %v5537_v38, %v7067_v26  ;;  %v3769_v42 = vadd.f32 %v3768_v7, %v3738_v41  ;;  %v5539_v48 = vadd.f32 %v3600_v1, %v2272_v56 }
 0x207   : > { %v3742_v43 = vadd.f32 %v5538_v13, %v7067_v26  ;;  %v3810_v31 = vmul.f32 %v3741_v23, %v3741_v23 }
 0x208   : > { %v3770_v30 = vadd.f32 %v3769_v42, %v3739_v20  ;;  %v3808_v21 = vmul.f32 %v3739_v20, %v3739_v20  ;;  %v3838_v53 = vadd.f32 %v3837_v4, %v3807_v24  ;;  %v3740_v60 = vadd.f32 %v5539_v48, %v7067_v26 }
 0x209   : > { %v4782_v17 = vpack.c.bf16 %v3742_v43, %v3741_v23  ;;  %v3811_v36 = vmul.f32 %v3742_v43, %v3742_v43 }
 0x20a   : > { %v3839_v12 = vadd.f32 %v3838_v53, %v3808_v21  ;;  %v3771_v33 = vadd.f32 %v3770_v30, %v3740_v60  ;;  %v3809_v59 = vmul.f32 %v3740_v60, %v3740_v60  ;;  %v4777_v11 = vpack.c.bf16 %v3740_v60, %v3739_v20  ;;  %v5494_v27 = vpop.f32.mrb[12].mxu0 }
 0x20b   : > { %4853 = vst [vmem:[%s7077_s14 + $0x28] sm:$0xff] %v4782_v17   ;;  %v5540_v51 = vadd.f32 %v5494_v27, %v7080_v2  ;;  %v3613_v56 = vpop.f32.mrb[13].mxu0 }
 0x20c   : > { %v3772_v28 = vadd.f32 %v3771_v33, %v3741_v23  ;;  %v3840_v45 = vadd.f32 %v3839_v12, %v3809_v59  ;;  %4852 = vst [vmem:[%s7077_s14 + $0x20] sm:$0xff] %v4777_v11   ;;  %v5541_v63 = vadd.f32 %v3613_v56, %v7082_v50  ;;  %v5495_v25 = vpop.f32.mrb[14].mxu0 }
 0x20d   : > { %v5542_v57 = vadd.f32 %v5495_v25, %v7085_v35  ;;  %v3616_v22 = vpop.f32.mrb[15].mxu0  ;;  %v3745_v2 = vadd.f32 %v5540_v51, %v7067_v26 }
 0x20e   : > { %v3841_v34 = vadd.f32 %v3840_v45, %v3810_v31  ;;  %v3743_v47 = vadd.f32 %v5541_v63, %v7067_v26  ;;  %v3773_v61 = vadd.f32 %v3772_v28, %v3742_v43  ;;  %v5543_v18 = vadd.f32 %v3616_v22, %v7088_v40 }
 0x20f   : > { %v3746_v52 = vadd.f32 %v5542_v57, %v7067_v26  ;;  %v3814_v32 = vmul.f32 %v3745_v2, %v3745_v2 }
 0x210   : > { %v3774_v29 = vadd.f32 %v3773_v61, %v3743_v47  ;;  %v3812_v49 = vmul.f32 %v3743_v47, %v3743_v47  ;;  %v3842_v50 = vadd.f32 %v3841_v34, %v3811_v36  ;;  %v3744_v62 = vadd.f32 %v5543_v18, %v7067_v26 }
 0x211   : > { %v4792_v55 = vpack.c.bf16 %v3746_v52, %v3745_v2  ;;  %v3815_v10 = vmul.f32 %v3746_v52, %v3746_v52 }
 0x212   : > { %v3843_v35 = vadd.f32 %v3842_v50, %v3812_v49  ;;  %v3775_v0 = vadd.f32 %v3774_v29, %v3744_v62  ;;  %v3813_v15 = vmul.f32 %v3744_v62, %v3744_v62  ;;  %v4787_v37 = vpack.c.bf16 %v3744_v62, %v3743_v47  ;;  %v5498_v41 = vpop.f32.mrb[16].mxu0 }
 0x213   : > { %4855 = vst [vmem:[%s7077_s14 + $0x38] sm:$0xff] %v4792_v55   ;;  %v3629_v5 = vpop.f32.mrb[17].mxu0 }
 0x214   : > { %v3776_v40 = vadd.f32 %v3775_v0, %v3745_v2  ;;  %v3844_v46 = vadd.f32 %v3843_v35, %v3813_v15  ;;  %4854 = vst [vmem:[%s7077_s14 + $0x30] sm:$0xff] %v4787_v37   ;;  %v5499_v3 = vpop.f32.mrb[18].mxu0 }
 0x215   : > { %v3632_v54 = vpop.f32.mrb[19].mxu0 }
 0x216   : > { %v3845_v8 = vadd.f32 %v3844_v46, %v3814_v32  ;;  %v3777_v19 = vadd.f32 %v3776_v40, %v3746_v52 }
 0x218   : > { %v3846_v16 = vadd.f32 %v3845_v8, %v3815_v10 }
 0x21a   : > { %v5502_v14 = vpop.f32.mrb[20].mxu0 }
 0x21b   : > { %v3645_v58 = vpop.f32.mrb[21].mxu0 }
 0x21c   : > { %v5503_v44 = vpop.f32.mrb[22].mxu0 }
 0x21d   : > { %v3648_v9 = vpop.f32.mrb[23].mxu0 }
 0x222   : > { %v5306_v7 = vpop.f32.mrb[16].mxu1  ;;  %v5506_v39 = vpop.f32.mrb[24].mxu0 }
 0x223   : > { %v5544_v38 = vadd.f32 %v5498_v41, %v5306_v7  ;;  %v2572_v6 = vpop.f32.mrb[17].mxu1  ;;  %v3661_v24 = vpop.f32.mrb[25].mxu0 }
 0x224   : > { %v5545_v13 = vadd.f32 %v3629_v5, %v2572_v6  ;;  %v5307_v1 = vpop.f32.mrb[18].mxu1  ;;  %v5507_v4 = vpop.f32.mrb[26].mxu0 }
 0x225   : > { %v5546_v20 = vadd.f32 %v5499_v3, %v5307_v1  ;;  %v2575_v42 = vpop.f32.mrb[19].mxu1  ;;  %v3664_v48 = vpop.f32.mrb[27].mxu0  ;;  %v3749_v30 = vadd.f32 %v5544_v38, %v7067_v26 }
 0x226   : > { %v3747_v23 = vadd.f32 %v5545_v13, %v7067_v26  ;;  %v5547_v43 = vadd.f32 %v3632_v54, %v2575_v42 }
 0x227   : > { %v3750_v21 = vadd.f32 %v5546_v20, %v7067_v26  ;;  %v3818_v63 = vmul.f32 %v3749_v30, %v3749_v30 }
 0x228   : > { %v3778_v53 = vadd.f32 %v3777_v19, %v3747_v23  ;;  %v3816_v60 = vmul.f32 %v3747_v23, %v3747_v23  ;;  %v3748_v17 = vadd.f32 %v5547_v43, %v7067_v26 }
 0x229   : > { %v4802_v12 = vpack.c.bf16 %v3750_v21, %v3749_v30  ;;  %v3819_v47 = vmul.f32 %v3750_v21, %v3750_v21 }
 0x22a   : > { %v3847_v33 = vadd.f32 %v3846_v16, %v3816_v60  ;;  %v3779_v59 = vadd.f32 %v3778_v53, %v3748_v17  ;;  %v3817_v11 = vmul.f32 %v3748_v17, %v3748_v17  ;;  %v4797_v27 = vpack.c.bf16 %v3748_v17, %v3747_v23  ;;  %v5310_v51 = vpop.f32.mrb[20].mxu1  ;;  %v5510_v56 = vpop.f32.mrb[28].mxu0 }
 0x22b   : > { %4857 = vst [vmem:[%s7077_s14 + $0x48] sm:$0xff] %v4802_v12   ;;  %v5548_v31 = vadd.f32 %v5502_v14, %v5310_v51  ;;  %v2588_v28 = vpop.f32.mrb[21].mxu1  ;;  %v7117_v45 = vpop.f32.mrb[29].mxu0 }
 0x22c   : > { %v3780_v25 = vadd.f32 %v3779_v59, %v3749_v30  ;;  %v3848_v36 = vadd.f32 %v3847_v33, %v3817_v11  ;;  %4856 = vst [vmem:[%s7077_s14 + $0x40] sm:$0xff] %v4797_v27   ;;  %v5549_v57 = vadd.f32 %v3645_v58, %v2588_v28  ;;  %v5311_v22 = vpop.f32.mrb[22].mxu1  ;;  %v5511_v34 = vpop.f32.mrb[30].mxu0 }
 0x22d   : > { %v5550_v61 = vadd.f32 %v5503_v44, %v5311_v22  ;;  %v2591_v18 = vpop.f32.mrb[23].mxu1  ;;  %v3680_v2 = vpop.f32.mrb[31].mxu0  ;;  %v3753_v62 = vadd.f32 %v5548_v31, %v7067_v26 }
 0x22e   : > { %v3849_v52 = vadd.f32 %v3848_v36, %v3818_v63  ;;  %v3751_v29 = vadd.f32 %v5549_v57, %v7067_v26  ;;  %v3781_v49 = vadd.f32 %v3780_v25, %v3750_v21  ;;  %v5551_v50 = vadd.f32 %v3648_v9, %v2591_v18 }
 0x22f   : > { %v3754_v55 = vadd.f32 %v5550_v61, %v7067_v26  ;;  %v3822_v8 = vmul.f32 %v3753_v62, %v3753_v62 }
 0x230   : > { %v3782_v35 = vadd.f32 %v3781_v49, %v3751_v29  ;;  %v3820_v0 = vmul.f32 %v3751_v29, %v3751_v29  ;;  %v3850_v15 = vadd.f32 %v3849_v52, %v3819_v47  ;;  %v3752_v37 = vadd.f32 %v5551_v50, %v7067_v26 }
 0x231   : > { %v4812_v41 = vpack.c.bf16 %v3754_v55, %v3753_v62  ;;  %v3823_v44 = vmul.f32 %v3754_v55, %v3754_v55 }
 0x232   : > { %v3851_v5 = vadd.f32 %v3850_v15, %v3820_v0  ;;  %v3783_v32 = vadd.f32 %v3782_v35, %v3752_v37  ;;  %v3821_v40 = vmul.f32 %v3752_v37, %v3752_v37  ;;  %v4807_v46 = vpack.c.bf16 %v3752_v37, %v3751_v29  ;;  %v5314_v3 = vpop.f32.mrb[24].mxu1 }
 0x233   : > { %4859 = vst [vmem:[%s7077_s14 + $0x58] sm:$0xff] %v4812_v41   ;;  %v5552_v54 = vadd.f32 %v5506_v39, %v5314_v3  ;;  %v2604_v10 = vpop.f32.mrb[25].mxu1 }
 0x234   : > { %v3784_v19 = vadd.f32 %v3783_v32, %v3753_v62  ;;  %v3852_v16 = vadd.f32 %v3851_v5, %v3821_v40  ;;  %4858 = vst [vmem:[%s7077_s14 + $0x50] sm:$0xff] %v4807_v46   ;;  %v5553_v14 = vadd.f32 %v3661_v24, %v2604_v10  ;;  %v5315_v58 = vpop.f32.mrb[26].mxu1 }
 0x235   : > { %v5554_v9 = vadd.f32 %v5507_v4, %v5315_v58  ;;  %v2607_v7 = vpop.f32.mrb[27].mxu1  ;;  %v3757_v20 = vadd.f32 %v5552_v54, %v7067_v26 }
 0x236   : > { %v3853_v38 = vadd.f32 %v3852_v16, %v3822_v8  ;;  %v3755_v6 = vadd.f32 %v5553_v14, %v7067_v26  ;;  %v3785_v13 = vadd.f32 %v3784_v19, %v3754_v55  ;;  %v5555_v1 = vadd.f32 %v3664_v48, %v2607_v7 }
 0x237   : > { %v3758_v39 = vadd.f32 %v5554_v9, %v7067_v26  ;;  %v3826_v48 = vmul.f32 %v3757_v20, %v3757_v20 }
 0x238   : > { %v3786_v42 = vadd.f32 %v3785_v13, %v3755_v6  ;;  %v3824_v23 = vmul.f32 %v3755_v6, %v3755_v6  ;;  %v3854_v43 = vadd.f32 %v3853_v38, %v3823_v44  ;;  %v3756_v24 = vadd.f32 %v5555_v1, %v7067_v26 }
 0x239   : > { %v4822_v30 = vpack.c.bf16 %v3758_v39, %v3757_v20  ;;  %v3827_v31 = vmul.f32 %v3758_v39, %v3758_v39 }
 0x23a   : > { %v3855_v21 = vadd.f32 %v3854_v43, %v3824_v23  ;;  %v3787_v4 = vadd.f32 %v3786_v42, %v3756_v24  ;;  %v3825_v53 = vmul.f32 %v3756_v24, %v3756_v24  ;;  %v4817_v60 = vpack.c.bf16 %v3756_v24, %v3755_v6  ;;  %v5318_v17 = vpop.f32.mrb[28].mxu1 }
 0x23b   : > { %4861 = vst [vmem:[%s7077_s14 + $0x68] sm:$0xff] %v4822_v30   ;;  %v5556_v12 = vadd.f32 %v5510_v56, %v5318_v17  ;;  %v2620_v33 = vpop.f32.mrb[29].mxu1 }
 0x23c   : > { %v3788_v59 = vadd.f32 %v3787_v4, %v3757_v20  ;;  %v3856_v11 = vadd.f32 %v3855_v21, %v3825_v53  ;;  %4860 = vst [vmem:[%s7077_s14 + $0x60] sm:$0xff] %v4817_v60   ;;  %v5557_v27 = vadd.f32 %v7117_v45, %v2620_v33  ;;  %v5319_v51 = vpop.f32.mrb[30].mxu1 }
 0x23d   : > { %v5558_v28 = vadd.f32 %v5511_v34, %v5319_v51  ;;  %v2623_v63 = vpop.f32.mrb[31].mxu1  ;;  %v3761_v56 = vadd.f32 %v5556_v12, %v7067_v26 }
 0x23e   : > { %v3857_v25 = vadd.f32 %v3856_v11, %v3826_v48  ;;  %v3759_v36 = vadd.f32 %v5557_v27, %v7067_v26  ;;  %v3789_v57 = vadd.f32 %v3788_v59, %v3758_v39  ;;  %v5559_v22 = vadd.f32 %v3680_v2, %v2623_v63 }
 0x23f   : > { %v3762_v47 = vadd.f32 %v5558_v28, %v7067_v26  ;;  %v3830_v55 = vmul.f32 %v3761_v56, %v3761_v56 }
 0x240   : > { %v3790_v61 = vadd.f32 %v3789_v57, %v3759_v36  ;;  %v3828_v18 = vmul.f32 %v3759_v36, %v3759_v36  ;;  %v3858_v52 = vadd.f32 %v3857_v25, %v3827_v31  ;;  %v3760_v45 = vadd.f32 %v5559_v22, %v7067_v26 }
 0x241   : > { %v4832_v29 = vpack.c.bf16 %v3762_v47, %v3761_v56  ;;  %v3831_v0 = vmul.f32 %v3762_v47, %v3762_v47 }
 0x242   : > { %v3859_v49 = vadd.f32 %v3858_v52, %v3828_v18  ;;  %v3791_v34 = vadd.f32 %v3790_v61, %v3760_v45  ;;  %v3829_v50 = vmul.f32 %v3760_v45, %v3760_v45  ;;  %v4827_v62 = vpack.c.bf16 %v3760_v45, %v3759_v36 }
 0x243   : > { %4863 = vst [vmem:[%s7077_s14 + $0x78] sm:$0xff] %v4832_v29  }
 0x244   : > { %v3792_v35 = vadd.f32 %v3791_v34, %v3761_v56  ;;  %v3860_v2 = vadd.f32 %v3859_v49, %v3829_v50  ;;  %4862 = vst [vmem:[%s7077_s14 + $0x70] sm:$0xff] %v4827_v62  }
 0x246   : > { %v3793_v15 = vadd.f32 %v3792_v35, %v3762_v47  ;;  %v3861_v37 = vadd.f32 %v3860_v2, %v3830_v55 }
 0x248   : > { %v3794_v41 = vrot.slane %v3793_v15, 4  ;;  %v3862_v5 = vadd.f32 %v3861_v37, %v3831_v0 }
 0x24a   : > { %v3795_v32 = vadd.f32 %v3794_v41, %v3793_v15  ;;  %v3863_v40 = vrot.slane %v3862_v5, 4 }
 0x24c   : > { %v3796_v46 = vrot.slane %v3795_v32, 2  ;;  %v3864_v26 = vadd.f32 %v3863_v40, %v3862_v5 }
 0x24e   : > { %v3797_v3 = vadd.f32 %v3796_v46, %v3795_v32  ;;  %v3865_v54 = vrot.slane %v3864_v26, 2 }
 0x250   : > { %v3798_v10 = vrot.slane %v3797_v3, 1  ;;  %v3866_v8 = vadd.f32 %v3865_v54, %v3864_v26 }
 0x252   : > { %v3867_v19 = vrot.slane %v3866_v8, 1  ;;  %v3799_v16 = vadd.f32 %v3798_v10, %v3797_v3 }
 0x254   : > { %v3868_v14 = vadd.f32 %v3867_v19, %v3866_v8 }
 0x256   : > { %v3869_v58 = vsel %vm942_vm0, %v3799_v16, %v3868_v14 }
 0x257   : > { %3870 = vst [vmem:[%s492_s17] sm:$0x3] %v3869_v58 }
 0x258 PF: > { %s19_s27 = sadd.s32 1, %s5914_s27   ;;  %s7235_s26 = smov %s5910_s2 }
 0x259   : > { %p16_p5 = scmp.ge.s32.totalorder %s19_s27, 4   ;;  %s7236_s2 = smov %s7238_s28 }
 0x25b   :  { %18 = sbr.rel (!%p16_p5) target bundleno = 2 (0x2), region = 104 }

</bundles_post_ra>
